<compile_context>
chip_gen: v7x
topology: tpu7x:2x2x1
jax: 0.10.0
libtpu: 0.0.40
codegen_flags: <defaults>
</compile_context>

<pallas_src>
import numpy as np
import jax
import jax.numpy as jnp
from jax import lax
from jax.experimental import pallas as pl
from jax.experimental.pallas import tpu as pltpu

# ---- static config (mirrors the args of PlmConvKnrm, small synthetic sizes) ----
QUERY_MAX_LEN = 8
DOC_MAX_LEN = 16
DIM_SIZE = 32            # args.dim_size (PLM hidden size)
FILTER_SIZE = 32         # args.filter_size
WINDOW_SIZE_LIST = (1, 2, 3)
MEAN_LIST = (1.0, 0.9, 0.5, 0.0, -0.5)
STDDEV_LIST = (1e-3, 0.1, 0.1, 0.1, 0.1)
NUM_KERNELS = len(MEAN_LIST)
NUM_WINDOWS = len(WINDOW_SIZE_LIST)
FEATURE_SIZE = NUM_KERNELS * NUM_WINDOWS ** 2     # 5 * 3^2 = 45
PMAX = max(w // 2 for w in WINDOW_SIZE_LIST)      # shared zero-padding on the seq axis
NTAPS = 2 * PMAX + 1                              # distinct im2col tap offsets (=3)
LN_EPS = 1e-5
COS_EPS = 1e-12                                   # guards rsqrt against all-zero conv rows
MAX_BATCH_TILE = 128                              # hard cap on batch rows per grid step
# conservative lane-padded f32 intermediate footprint per batch row (sim/sim_wide/rbf/
# conv outputs, lanes padded to 128/256) used for the VMEM-aware tile choice.
_VMEM_PER_ELEM = 224 * 1024


def conv_knrm_kernel(q_lens_ref, d_lens_ref, q_emb_ref, d_emb_ref,
                     wc_ref, bc_ref, rbf_ref, group_ref, head_ref, pb_ref,
                     out_ref):
    TB = q_lens_ref.shape[0]
    Q, D, F = QUERY_MAX_LEN, DOC_MAX_LEN, FILTER_SIZE
    NW, NK = NUM_WINDOWS, NUM_KERNELS

    wc = wc_ref[...]                                    # (NTAPS*DIM, NW*F) bf16 combined taps
    bc = bc_ref[...]                                    # (1, NW*F) f32 combined bias

    # ---- in-kernel im2col + fused Conv1d(3 windows) + ReLU: one bf16 matmul per side ----
    def conv_stack(x_ref, L):
        # relayout (pad / shifted slices / lane concat) is done in f32 (well-supported
        # layout path); the values are exact bf16 so casting back for the MXU is lossless.
        x = x_ref[...].astype(jnp.float32)              # (TB, L, DIM)
        xp = jnp.pad(x, ((0, 0), (PMAX, PMAX), (0, 0)))
        x2d = jnp.concatenate([xp[:, o:o + L, :] for o in range(NTAPS)], axis=-1)
        x2d = x2d.reshape(TB * L, NTAPS * DIM_SIZE).astype(jnp.bfloat16)
        c = jnp.dot(x2d, wc, preferred_element_type=jnp.float32) + bc
        c = jnp.maximum(c, 0.0).reshape(TB, L, NW * F)  # f32 conv output
        # window-major stacking along the position axis -> (TB, NW*L, F)
        return jnp.concatenate([c[:, :, i * F:(i + 1) * F] for i in range(NW)], axis=1)

    qc = conv_stack(q_emb_ref, Q)                       # (TB, NW*Q, F)
    dc = conv_stack(d_emb_ref, D)                       # (TB, NW*D, F)

    # ---- cosine similarity (f32): pre-normalize rows (rsqrt on EUP), one batched matmul ----
    qc_n = qc * lax.rsqrt(jnp.sum(qc * qc, axis=-1, keepdims=True) + COS_EPS)
    dc_n = dc * lax.rsqrt(jnp.sum(dc * dc, axis=-1, keepdims=True) + COS_EPS)
    sim = jnp.einsum('bqf,bdf->bqd', qc_n, dc_n,
                     preferred_element_type=jnp.float32)        # (TB, NW*Q, NW*D)

    # ---- length masking (replicates the torch <= / >= masks exactly) ----
    ql = q_lens_ref[...].reshape(TB, 1, 1)
    dl = d_lens_ref[...].reshape(TB, 1, 1)
    q_pos1 = lax.broadcasted_iota(jnp.int32, (1, Q, 1), 1)
    d_pos1 = lax.broadcasted_iota(jnp.int32, (1, 1, D), 2)
    q_pos = jnp.concatenate([q_pos1] * NW, axis=1)      # (1, NW*Q, 1)
    d_pos = jnp.concatenate([d_pos1] * NW, axis=2)      # (1, 1, NW*D)
    keep = (q_pos <= ql) & (d_pos <= dl)                # (TB, NW*Q, NW*D)
    sim = jnp.where(keep, sim, 0.0)

    # ---- RBF kernel pooling: all 5 kernels x 9 window pairs vectorized (f32) ----
    sim_wide = jnp.concatenate([sim] * NK, axis=-1)     # (TB, NW*Q, NK*NW*D) = (TB, 24, 240)
    rc = rbf_ref[...]                                   # (2, NK*NW*D)
    rbf = jnp.exp(-(sim_wide - rc[0:1, :]) ** 2 * rc[1:2, :])
    # grouped doc-axis sums as one MXU matmul; output lanes ordered (window_d, kernel)
    ds = jnp.dot(rbf.reshape(TB * NW * Q, NK * NW * D), group_ref[...],
                 preferred_element_type=jnp.float32)    # (TB*NW*Q, NW*NK)
    kde = jnp.log(jnp.maximum(ds, 1e-10)) * 0.01
    kde = kde.reshape(TB, NW * Q, NW * NK)
    pad_mask = q_pos >= ql                              # (TB, NW*Q, 1) query padding rows
    kde = jnp.where(pad_mask, 0.0, kde)
    # query-axis sums per query-window block -> (TB, NW, NW*NK), torch feature ordering
    feats = jnp.concatenate(
        [jnp.sum(kde[:, wq * Q:(wq + 1) * Q, :], axis=1, keepdims=True)
         for wq in range(NW)], axis=1)

    # ---- LayerNorm(feature_size) + Linear(score_dim, 1) + tanh ----
    n_feat = float(FEATURE_SIZE)
    mu = jnp.sum(jnp.sum(feats, axis=2, keepdims=True), axis=1, keepdims=True) / n_feat
    diff = feats - mu
    var = jnp.sum(jnp.sum(diff * diff, axis=2, keepdims=True),
                  axis=1, keepdims=True) / n_feat
    normed = diff * lax.rsqrt(var + LN_EPS)
    normed = normed * head_ref[0] + head_ref[1]         # gamma, beta : (NW, NW*NK)
    proj = jnp.sum(jnp.sum(normed * head_ref[2], axis=2, keepdims=True),
                   axis=1, keepdims=True)               # (TB, 1, 1)
    score = jnp.tanh(proj + pb_ref[...])                # (TB, 1, 1)
    out_ref[...] = score.reshape(1, 1, TB)              # lane-dense score row


# ---------------- host-side (trace-time) parameter / constant preparation ----------------

def _build_combined_conv_params(convs):
    """Combined im2col conv weight (NTAPS*DIM, NW*F) in bf16 and bias (1, NW*F) in f32.

    conv weights are stored as (kernel_width, dim_in, filter) == torch weight.permute(2,1,0).
    """
    wc = jnp.zeros((NTAPS * DIM_SIZE, NUM_WINDOWS * FILTER_SIZE), jnp.float32)
    bcs = []
    for i, w in enumerate(WINDOW_SIZE_LIST):
        cw, cb = convs[i]
        pad = w // 2
        t0 = 1 if w % 2 == 0 else 0   # even windows: torch trims the first output position
        for k in range(w):
            o = t0 + k - pad + PMAX   # tap offset into the im2col view (0..NTAPS-1)
            wc = wc.at[o * DIM_SIZE:(o + 1) * DIM_SIZE,
                       i * FILTER_SIZE:(i + 1) * FILTER_SIZE].set(cw[k])
        bcs.append(jnp.reshape(cb, (1, FILTER_SIZE)))
    bc = jnp.concatenate(bcs, axis=1).astype(jnp.float32)
    return wc.astype(jnp.bfloat16), bc


def _rbf_constants():
    width = NUM_WINDOWS * DOC_MAX_LEN
    mean_row = np.repeat(np.asarray(MEAN_LIST, np.float32), width)
    inv2ss_row = np.repeat(
        (1.0 / (2.0 * np.asarray(STDDEV_LIST, np.float32) ** 2)).astype(np.float32), width)
    rbf_const = jnp.asarray(np.stack([mean_row, inv2ss_row], axis=0))   # (2, NK*NW*D)
    # grouping matrix: sums each (kernel, window_d) block of D doc lanes;
    # output column order = window_d major, kernel minor (torch feature order).
    gm = np.zeros((NUM_KERNELS * width, NUM_WINDOWS * NUM_KERNELS), np.float32)
    for k in range(NUM_KERNELS):
        for wd in range(NUM_WINDOWS):
            r0 = k * width + wd * DOC_MAX_LEN
            gm[r0:r0 + DOC_MAX_LEN, wd * NUM_KERNELS + k] = 1.0
    return rbf_const, jnp.asarray(gm)


def _pick_tiling(B):
    """VMEM-aware batch tile: single grid step for small B, up to 128 rows/step otherwise."""
    try:
        info = pltpu.get_tpu_info()
        vmem_cap = int(getattr(info, "vmem_capacity_bytes", 64 << 20))
    except Exception:
        vmem_cap = 64 << 20                       # conservative (v7x per-core) fallback
    budget = vmem_cap // 2                        # headroom for double-buffered inputs etc.
    tb_cap = max(8, min(MAX_BATCH_TILE, (budget // _VMEM_PER_ELEM) // 8 * 8))
    b8 = ((B + 7) // 8) * 8                       # sublane constraint
    tb = min(b8, tb_cap)
    b_pad = ((B + tb - 1) // tb) * tb
    vmem_limit = int(min(max(vmem_cap * 3 // 4, 32 << 20), 128 << 20))
    return tb, b_pad, vmem_limit


def plm_conv_knrm_forward(contextualized_embed, query_lens, doc_lens, params,
                          batch_tile=None):
    B = contextualized_embed.shape[0]
    # slicing of the joint PLM output, exactly as in forward()
    query_embed = contextualized_embed[:, 1:QUERY_MAX_LEN + 1]
    doc_start = QUERY_MAX_LEN + 2
    doc_embed = contextualized_embed[:, doc_start:doc_start + DOC_MAX_LEN]
    # context_vector = contextualized_embed[:, 0]   # unused (use_context_vector=False)

    TB, B_pad, vmem_limit = _pick_tiling(B)
    if batch_tile is not None:
        TB = batch_tile
        assert TB % 8 == 0, "batch tile must be a multiple of 8 (sublane constraint)"
        B_pad = ((B + TB - 1) // TB) * TB
    NB = B_pad // TB
    pad_b = B_pad - B

    # raw bf16 embeddings are DMA'd; im2col happens inside the kernel (6x less input DMA
    # than the previous f32 im2col inputs).
    q_emb = query_embed.astype(jnp.bfloat16)
    d_emb = doc_embed.astype(jnp.bfloat16)
    ql = query_lens.astype(jnp.int32)
    dl = doc_lens.astype(jnp.int32)
    if pad_b:
        q_emb = jnp.pad(q_emb, ((0, pad_b), (0, 0), (0, 0)))
        d_emb = jnp.pad(d_emb, ((0, pad_b), (0, 0), (0, 0)))
        ql = jnp.pad(ql, (0, pad_b), constant_values=1)
        dl = jnp.pad(dl, (0, pad_b), constant_values=1)
    ql2 = ql.reshape(B_pad, 1)
    dl2 = dl.reshape(B_pad, 1)

    wc, bc = _build_combined_conv_params(params['convs'])
    rbf_const, group_mat = _rbf_constants()
    head = jnp.stack([
        jnp.reshape(params['ln_gamma'], (NUM_WINDOWS, NUM_WINDOWS * NUM_KERNELS)),
        jnp.reshape(params['ln_beta'], (NUM_WINDOWS, NUM_WINDOWS * NUM_KERNELS)),
        jnp.reshape(params['proj_w'], (NUM_WINDOWS, NUM_WINDOWS * NUM_KERNELS)),
    ], axis=0).astype(jnp.float32)                      # (3, NW, NW*NK)
    pb = jnp.reshape(jnp.asarray(params['proj_b'], jnp.float32), (1, 1))

    def im_batched2(i): return (i, 0)
    def im_batched3(i): return (i, 0, 0)
    def im_fixed2(i): return (0, 0)
    def im_fixed3(i): return (0, 0, 0)

    in_specs = [
        pl.BlockSpec((TB, 1), im_batched2),                               # query lens
        pl.BlockSpec((TB, 1), im_batched2),                               # doc lens
        pl.BlockSpec((TB, QUERY_MAX_LEN, DIM_SIZE), im_batched3),         # query embed (bf16)
        pl.BlockSpec((TB, DOC_MAX_LEN, DIM_SIZE), im_batched3),           # doc embed (bf16)
        pl.BlockSpec(wc.shape, im_fixed2),
        pl.BlockSpec(bc.shape, im_fixed2),
        pl.BlockSpec(rbf_const.shape, im_fixed2),
        pl.BlockSpec(group_mat.shape, im_fixed2),
        pl.BlockSpec(head.shape, im_fixed3),
        pl.BlockSpec(pb.shape, im_fixed2),
    ]

    out = pl.pallas_call(
        conv_knrm_kernel,
        out_shape=jax.ShapeDtypeStruct((NB, 1, TB), jnp.float32),
        grid=(NB,),
        in_specs=in_specs,
        out_specs=pl.BlockSpec((1, 1, TB), im_batched3),
        compiler_params=pltpu.CompilerParams(
            dimension_semantics=("parallel",),          # lets v7x shard batch over 2 TCs
            vmem_limit_bytes=vmem_limit),
    )(ql2, dl2, q_emb, d_emb, wc, bc, rbf_const, group_mat, head, pb)
    return out.reshape(B_pad, 1)[:B]


if __name__ == "__main__":
    key = jax.random.PRNGKey(0)
    keys = jax.random.split(key, 10)

    B = 16
    # joint sequence: [CLS] query(Q) [SEP] doc(D) [SEP]
    total_len = 1 + QUERY_MAX_LEN + 1 + DOC_MAX_LEN + 1   # = 27

    # TODO(synk): the pretrained PLM (BERT) encoder has no clean Pallas equivalent here;
    # its contextualized output embedding is substituted by a deterministic random tensor.
    contextualized_embed = jax.random.normal(
        keys[0], (B, total_len, DIM_SIZE), dtype=jnp.float32)
    query_lens = jax.random.randint(keys[1], (B,), 1, QUERY_MAX_LEN + 1).astype(jnp.int32)
    doc_lens = jax.random.randint(keys[2], (B,), 1, DOC_MAX_LEN + 1).astype(jnp.int32)

    # deterministic parameter init (Conv1d weights as (w, dim_in, filter), LN defaults)
    convs = []
    for i, w in enumerate(WINDOW_SIZE_LIST):
        cw = 0.1 * jax.random.normal(keys[3 + i], (w, DIM_SIZE, FILTER_SIZE), jnp.float32)
        cb = 0.1 * jax.random.normal(keys[6 + i], (FILTER_SIZE,), jnp.float32)
        convs.append((cw, cb))
    params = dict(
        convs=convs,
        ln_gamma=jnp.ones((FEATURE_SIZE,), jnp.float32),
        ln_beta=jnp.zeros((FEATURE_SIZE,), jnp.float32),
        proj_w=0.1 * jax.random.normal(keys[9], (FEATURE_SIZE,), jnp.float32),
        proj_b=jnp.zeros((1,), jnp.float32),
    )

    score = plm_conv_knrm_forward(contextualized_embed, query_lens, doc_lens, params)
    jax.block_until_ready(score)
    assert score.shape == (B, 1)
    assert bool(jnp.all(jnp.isfinite(score)))
    print("KERNEL_OK")
</pallas_src>

<mosaic_0001>
module attributes {stable_mosaic.version = 11 : i64} {
  func.func @conv_knrm_kernel(%arg0: i32, %arg1: memref<16x1xi32, #tpu.memory_space<vmem>>, %arg2: memref<16x1xi32, #tpu.memory_space<vmem>>, %arg3: memref<16x8x32xbf16, #tpu.memory_space<vmem>>, %arg4: memref<16x16x32xbf16, #tpu.memory_space<vmem>>, %arg5: memref<96x96xbf16, #tpu.memory_space<vmem>>, %arg6: memref<1x96xf32, #tpu.memory_space<vmem>>, %arg7: memref<2x240xf32, #tpu.memory_space<vmem>>, %arg8: memref<240x15xf32, #tpu.memory_space<vmem>>, %arg9: memref<3x3x15xf32, #tpu.memory_space<vmem>>, %arg10: memref<1x1xf32, #tpu.memory_space<vmem>>, %arg11: memref<1x1x16xf32, #tpu.memory_space<vmem>>) attributes {dimension_semantics = [#tpu.dimension_semantics<parallel>], iteration_bounds = array<i64: 1>, scalar_prefetch = 0 : i64, scratch_operands = 0 : i64, tpu.core_type = #tpu.core_type<tc>, window_params = [{transform_indices = @transform_0, window_bounds = array<i64: 16, 1>}, {transform_indices = @transform_1, window_bounds = array<i64: 16, 1>}, {transform_indices = @transform_2, window_bounds = array<i64: 16, 8, 32>}, {transform_indices = @transform_3, window_bounds = array<i64: 16, 16, 32>}, {pipeline_mode = #tpu.pipeline_mode<synchronous>, transform_indices = @transform_4, window_bounds = array<i64: 96, 96>}, {pipeline_mode = #tpu.pipeline_mode<synchronous>, transform_indices = @transform_5, window_bounds = array<i64: 1, 96>}, {pipeline_mode = #tpu.pipeline_mode<synchronous>, transform_indices = @transform_6, window_bounds = array<i64: 2, 240>}, {pipeline_mode = #tpu.pipeline_mode<synchronous>, transform_indices = @transform_7, window_bounds = array<i64: 240, 15>}, {pipeline_mode = #tpu.pipeline_mode<synchronous>, transform_indices = @transform_8, window_bounds = array<i64: 3, 3, 15>}, {pipeline_mode = #tpu.pipeline_mode<synchronous>, transform_indices = @transform_9, window_bounds = array<i64: 1, 1>}, {transform_indices = @transform_10, window_bounds = array<i64: 1, 1, 16>}]} {
    %c0 = arith.constant 0 : index
    %c0_0 = arith.constant 0 : index
    %0 = vector.load %arg5[%c0, %c0_0] : memref<96x96xbf16, #tpu.memory_space<vmem>>, vector<96x96xbf16>
    %c0_1 = arith.constant 0 : index
    %c0_2 = arith.constant 0 : index
    %1 = vector.load %arg6[%c0_1, %c0_2] : memref<1x96xf32, #tpu.memory_space<vmem>>, vector<1x96xf32>
    %c0_3 = arith.constant 0 : index
    %c0_4 = arith.constant 0 : index
    %c0_5 = arith.constant 0 : index
    %2 = vector.load %arg3[%c0_3, %c0_4, %c0_5] : memref<16x8x32xbf16, #tpu.memory_space<vmem>>, vector<16x8x32xbf16>
    %3 = arith.extf %2 : vector<16x8x32xbf16> to vector<16x8x32xf32>
    %c0_i32 = arith.constant 0 : i32
    %4 = arith.sitofp %c0_i32 : i32 to f32
    %5 = vector.broadcast %4 : f32 to vector<16x1x32xf32>
    %6 = tpu.concatenate %5, %3 in 1 : vector<16x1x32xf32>, vector<16x8x32xf32> -> vector<16x9x32xf32>
    %7 = vector.broadcast %4 : f32 to vector<16x1x32xf32>
    %8 = tpu.concatenate %6, %7 in 1 : vector<16x9x32xf32>, vector<16x1x32xf32> -> vector<16x10x32xf32>
    %9 = vector.extract_strided_slice %8 {offsets = [0, 0, 0], sizes = [16, 8, 32], strides = [1, 1, 1]} : vector<16x10x32xf32> to vector<16x8x32xf32>
    %10 = vector.extract_strided_slice %8 {offsets = [0, 1, 0], sizes = [16, 8, 32], strides = [1, 1, 1]} : vector<16x10x32xf32> to vector<16x8x32xf32>
    %11 = vector.extract_strided_slice %8 {offsets = [0, 2, 0], sizes = [16, 8, 32], strides = [1, 1, 1]} : vector<16x10x32xf32> to vector<16x8x32xf32>
    %12 = tpu.concatenate %9, %10, %11 in 2 : vector<16x8x32xf32>, vector<16x8x32xf32>, vector<16x8x32xf32> -> vector<16x8x96xf32>
    %13 = vector.shape_cast %12 : vector<16x8x96xf32> to vector<128x96xf32>
    %14 = arith.truncf %13 : vector<128x96xf32> to vector<128x96xbf16>
    %cst = arith.constant dense<0.000000e+00> : vector<128x96xf32>
    %15 = tpu.matmul %14, %0, %cst {dimension_numbers = #tpu.dot_dimension_numbers<[1], [0], [0], [1], [0, 0, 1, 1], [], []>} : vector<128x96xbf16>, vector<96x96xbf16>, vector<128x96xf32> -> vector<128x96xf32>
    %16 = vector.broadcast %1 : vector<1x96xf32> to vector<128x96xf32>
    %17 = arith.addf %15, %16 : vector<128x96xf32>
    %cst_6 = arith.constant 0.000000e+00 : f32
    %18 = vector.broadcast %cst_6 : f32 to vector<128x96xf32>
    %19 = arith.maximumf %17, %18 : vector<128x96xf32>
    %20 = vector.shape_cast %19 : vector<128x96xf32> to vector<16x8x96xf32>
    %21 = vector.extract_strided_slice %20 {offsets = [0, 0, 0], sizes = [16, 8, 32], strides = [1, 1, 1]} : vector<16x8x96xf32> to vector<16x8x32xf32>
    %22 = vector.extract_strided_slice %20 {offsets = [0, 0, 32], sizes = [16, 8, 32], strides = [1, 1, 1]} : vector<16x8x96xf32> to vector<16x8x32xf32>
    %23 = vector.extract_strided_slice %20 {offsets = [0, 0, 64], sizes = [16, 8, 32], strides = [1, 1, 1]} : vector<16x8x96xf32> to vector<16x8x32xf32>
    %24 = tpu.concatenate %21, %22, %23 in 1 : vector<16x8x32xf32>, vector<16x8x32xf32>, vector<16x8x32xf32> -> vector<16x24x32xf32>
    %c0_7 = arith.constant 0 : index
    %c0_8 = arith.constant 0 : index
    %c0_9 = arith.constant 0 : index
    %25 = vector.load %arg4[%c0_7, %c0_8, %c0_9] : memref<16x16x32xbf16, #tpu.memory_space<vmem>>, vector<16x16x32xbf16>
    %26 = arith.extf %25 : vector<16x16x32xbf16> to vector<16x16x32xf32>
    %c0_i32_10 = arith.constant 0 : i32
    %27 = arith.sitofp %c0_i32_10 : i32 to f32
    %28 = vector.broadcast %27 : f32 to vector<16x1x32xf32>
    %29 = tpu.concatenate %28, %26 in 1 : vector<16x1x32xf32>, vector<16x16x32xf32> -> vector<16x17x32xf32>
    %30 = vector.broadcast %27 : f32 to vector<16x1x32xf32>
    %31 = tpu.concatenate %29, %30 in 1 : vector<16x17x32xf32>, vector<16x1x32xf32> -> vector<16x18x32xf32>
    %32 = vector.extract_strided_slice %31 {offsets = [0, 0, 0], sizes = [16, 16, 32], strides = [1, 1, 1]} : vector<16x18x32xf32> to vector<16x16x32xf32>
    %33 = vector.extract_strided_slice %31 {offsets = [0, 1, 0], sizes = [16, 16, 32], strides = [1, 1, 1]} : vector<16x18x32xf32> to vector<16x16x32xf32>
    %34 = vector.extract_strided_slice %31 {offsets = [0, 2, 0], sizes = [16, 16, 32], strides = [1, 1, 1]} : vector<16x18x32xf32> to vector<16x16x32xf32>
    %35 = tpu.concatenate %32, %33, %34 in 2 : vector<16x16x32xf32>, vector<16x16x32xf32>, vector<16x16x32xf32> -> vector<16x16x96xf32>
    %36 = vector.shape_cast %35 : vector<16x16x96xf32> to vector<256x96xf32>
    %37 = arith.truncf %36 : vector<256x96xf32> to vector<256x96xbf16>
    %cst_11 = arith.constant dense<0.000000e+00> : vector<256x96xf32>
    %38 = tpu.matmul %37, %0, %cst_11 {dimension_numbers = #tpu.dot_dimension_numbers<[1], [0], [0], [1], [0, 0, 1, 1], [], []>} : vector<256x96xbf16>, vector<96x96xbf16>, vector<256x96xf32> -> vector<256x96xf32>
    %39 = vector.broadcast %1 : vector<1x96xf32> to vector<256x96xf32>
    %40 = arith.addf %38, %39 : vector<256x96xf32>
    %cst_12 = arith.constant 0.000000e+00 : f32
    %41 = vector.broadcast %cst_12 : f32 to vector<256x96xf32>
    %42 = arith.maximumf %40, %41 : vector<256x96xf32>
    %43 = vector.shape_cast %42 : vector<256x96xf32> to vector<16x16x96xf32>
    %44 = vector.extract_strided_slice %43 {offsets = [0, 0, 0], sizes = [16, 16, 32], strides = [1, 1, 1]} : vector<16x16x96xf32> to vector<16x16x32xf32>
    %45 = vector.extract_strided_slice %43 {offsets = [0, 0, 32], sizes = [16, 16, 32], strides = [1, 1, 1]} : vector<16x16x96xf32> to vector<16x16x32xf32>
    %46 = vector.extract_strided_slice %43 {offsets = [0, 0, 64], sizes = [16, 16, 32], strides = [1, 1, 1]} : vector<16x16x96xf32> to vector<16x16x32xf32>
    %47 = tpu.concatenate %44, %45, %46 in 1 : vector<16x16x32xf32>, vector<16x16x32xf32>, vector<16x16x32xf32> -> vector<16x48x32xf32>
    %48 = arith.mulf %24, %24 : vector<16x24x32xf32>
    %cst_13 = arith.constant dense<0.000000e+00> : vector<16x24xf32>
    %49 = vector.multi_reduction <add>, %48, %cst_13 [2] : vector<16x24x32xf32> to vector<16x24xf32>
    %50 = vector.shape_cast %49 : vector<16x24xf32> to vector<16x24x1xf32>
    %cst_14 = arith.constant 9.99999996E-13 : f32
    %51 = vector.broadcast %cst_14 : f32 to vector<16x24x1xf32>
    %52 = arith.addf %50, %51 : vector<16x24x1xf32>
    %53 = math.rsqrt %52 : vector<16x24x1xf32>
    %54 = vector.broadcast %53 : vector<16x24x1xf32> to vector<16x24x32xf32>
    %55 = arith.mulf %24, %54 : vector<16x24x32xf32>
    %56 = arith.mulf %47, %47 : vector<16x48x32xf32>
    %cst_15 = arith.constant dense<0.000000e+00> : vector<16x48xf32>
    %57 = vector.multi_reduction <add>, %56, %cst_15 [2] : vector<16x48x32xf32> to vector<16x48xf32>
    %58 = vector.shape_cast %57 : vector<16x48xf32> to vector<16x48x1xf32>
    %cst_16 = arith.constant 9.99999996E-13 : f32
    %59 = vector.broadcast %cst_16 : f32 to vector<16x48x1xf32>
    %60 = arith.addf %58, %59 : vector<16x48x1xf32>
    %61 = math.rsqrt %60 : vector<16x48x1xf32>
    %62 = vector.broadcast %61 : vector<16x48x1xf32> to vector<16x48x32xf32>
    %63 = arith.mulf %47, %62 : vector<16x48x32xf32>
    "tpu.trace_start"() <{level = 10 : i32, message = "bqf,bdf->bqd"}> : () -> ()
    %cst_17 = arith.constant dense<0.000000e+00> : vector<16x24x48xf32>
    %64 = tpu.matmul %55, %63, %cst_17 {dimension_numbers = #tpu.dot_dimension_numbers<[2], [2], [1], [1], [0, 0, 0, 1, 1, 1], [0], [0]>} : vector<16x24x32xf32>, vector<16x48x32xf32>, vector<16x24x48xf32> -> vector<16x24x48xf32>
    "tpu.trace_stop"() : () -> ()
    %c0_18 = arith.constant 0 : index
    %c0_19 = arith.constant 0 : index
    %65 = vector.load %arg1[%c0_18, %c0_19] : memref<16x1xi32, #tpu.memory_space<vmem>>, vector<16x1xi32>
    %66 = vector.shape_cast %65 : vector<16x1xi32> to vector<16x1x1xi32>
    %c0_20 = arith.constant 0 : index
    %c0_21 = arith.constant 0 : index
    %67 = vector.load %arg2[%c0_20, %c0_21] : memref<16x1xi32, #tpu.memory_space<vmem>>, vector<16x1xi32>
    %68 = vector.shape_cast %67 : vector<16x1xi32> to vector<16x1x1xi32>
    %69 = tpu.iota {dimensions = array<i32: 1>} : vector<1x8x1xi32>
    %70 = tpu.iota {dimensions = array<i32: 2>} : vector<1x1x16xi32>
    %71 = tpu.concatenate %69, %69, %69 in 1 : vector<1x8x1xi32>, vector<1x8x1xi32>, vector<1x8x1xi32> -> vector<1x24x1xi32>
    %72 = tpu.concatenate %70, %70, %70 in 2 : vector<1x1x16xi32>, vector<1x1x16xi32>, vector<1x1x16xi32> -> vector<1x1x48xi32>
    %73 = vector.broadcast %71 : vector<1x24x1xi32> to vector<16x24x1xi32>
    %74 = vector.broadcast %66 : vector<16x1x1xi32> to vector<16x24x1xi32>
    %75 = arith.cmpi sle, %73, %74 : vector<16x24x1xi32>
    %76 = vector.broadcast %72 : vector<1x1x48xi32> to vector<16x1x48xi32>
    %77 = vector.broadcast %68 : vector<16x1x1xi32> to vector<16x1x48xi32>
    %78 = arith.cmpi sle, %76, %77 : vector<16x1x48xi32>
    %79 = vector.broadcast %75 : vector<16x24x1xi1> to vector<16x24x48xi1>
    %80 = vector.broadcast %78 : vector<16x1x48xi1> to vector<16x24x48xi1>
    %81 = arith.andi %79, %80 : vector<16x24x48xi1>
    %cst_22 = arith.constant 0.000000e+00 : f32
    %82 = vector.broadcast %cst_22 : f32 to vector<16x24x48xf32>
    %83 = arith.select %81, %64, %82 : vector<16x24x48xi1>, vector<16x24x48xf32>
    %84 = tpu.concatenate %83, %83, %83, %83, %83 in 2 : vector<16x24x48xf32>, vector<16x24x48xf32>, vector<16x24x48xf32>, vector<16x24x48xf32>, vector<16x24x48xf32> -> vector<16x24x240xf32>
    %c0_23 = arith.constant 0 : index
    %c0_24 = arith.constant 0 : index
    %85 = vector.load %arg7[%c0_23, %c0_24] : memref<2x240xf32, #tpu.memory_space<vmem>>, vector<2x240xf32>
    %86 = vector.extract_strided_slice %85 {offsets = [0, 0], sizes = [1, 240], strides = [1, 1]} : vector<2x240xf32> to vector<1x240xf32>
    %87 = vector.shape_cast %86 : vector<1x240xf32> to vector<1x1x240xf32>
    %88 = vector.broadcast %87 : vector<1x1x240xf32> to vector<16x24x240xf32>
    %89 = arith.subf %84, %88 : vector<16x24x240xf32>
    %90 = arith.mulf %89, %89 : vector<16x24x240xf32>
    %cst_25 = arith.constant 0.000000e+00 : f32
    %91 = vector.broadcast %cst_25 : f32 to vector<16x24x240xf32>
    %92 = arith.subf %91, %90 : vector<16x24x240xf32>
    %93 = vector.extract_strided_slice %85 {offsets = [1, 0], sizes = [1, 240], strides = [1, 1]} : vector<2x240xf32> to vector<1x240xf32>
    %94 = vector.shape_cast %93 : vector<1x240xf32> to vector<1x1x240xf32>
    %95 = vector.broadcast %94 : vector<1x1x240xf32> to vector<16x24x240xf32>
    %96 = arith.mulf %92, %95 : vector<16x24x240xf32>
    %97 = math.exp %96 : vector<16x24x240xf32>
    %98 = vector.shape_cast %97 : vector<16x24x240xf32> to vector<384x240xf32>
    %c0_26 = arith.constant 0 : index
    %c0_27 = arith.constant 0 : index
    %99 = vector.load %arg8[%c0_26, %c0_27] : memref<240x15xf32, #tpu.memory_space<vmem>>, vector<240x15xf32>
    %cst_28 = arith.constant dense<0.000000e+00> : vector<384x15xf32>
    %100 = tpu.matmul %98, %99, %cst_28 {dimension_numbers = #tpu.dot_dimension_numbers<[1], [0], [0], [1], [0, 0, 1, 1], [], []>} : vector<384x240xf32>, vector<240x15xf32>, vector<384x15xf32> -> vector<384x15xf32>
    %cst_29 = arith.constant 1.000000e-10 : f32
    %101 = vector.broadcast %cst_29 : f32 to vector<384x15xf32>
    %102 = arith.maximumf %100, %101 : vector<384x15xf32>
    %103 = math.log %102 : vector<384x15xf32>
    %cst_30 = arith.constant 0.00999999977 : f32
    %104 = vector.broadcast %cst_30 : f32 to vector<384x15xf32>
    %105 = arith.mulf %103, %104 : vector<384x15xf32>
    %106 = vector.shape_cast %105 : vector<384x15xf32> to vector<16x24x15xf32>
    %107 = vector.broadcast %71 : vector<1x24x1xi32> to vector<16x24x1xi32>
    %108 = vector.broadcast %66 : vector<16x1x1xi32> to vector<16x24x1xi32>
    %109 = arith.cmpi sge, %107, %108 : vector<16x24x1xi32>
    %cst_31 = arith.constant 0.000000e+00 : f32
    %110 = vector.shape_cast %109 : vector<16x24x1xi1> to vector<16x24x1xi1>
    %111 = vector.broadcast %110 : vector<16x24x1xi1> to vector<16x24x15xi1>
    %112 = vector.broadcast %cst_31 : f32 to vector<16x24x15xf32>
    %113 = arith.select %111, %112, %106 : vector<16x24x15xi1>, vector<16x24x15xf32>
    %114 = vector.extract_strided_slice %113 {offsets = [0, 0, 0], sizes = [16, 8, 15], strides = [1, 1, 1]} : vector<16x24x15xf32> to vector<16x8x15xf32>
    %cst_32 = arith.constant dense<0.000000e+00> : vector<16x15xf32>
    %115 = vector.multi_reduction <add>, %114, %cst_32 [1] : vector<16x8x15xf32> to vector<16x15xf32>
    %116 = vector.shape_cast %115 : vector<16x15xf32> to vector<16x1x15xf32>
    %117 = vector.extract_strided_slice %113 {offsets = [0, 8, 0], sizes = [16, 8, 15], strides = [1, 1, 1]} : vector<16x24x15xf32> to vector<16x8x15xf32>
    %cst_33 = arith.constant dense<0.000000e+00> : vector<16x15xf32>
    %118 = vector.multi_reduction <add>, %117, %cst_33 [1] : vector<16x8x15xf32> to vector<16x15xf32>
    %119 = vector.shape_cast %118 : vector<16x15xf32> to vector<16x1x15xf32>
    %120 = vector.extract_strided_slice %113 {offsets = [0, 16, 0], sizes = [16, 8, 15], strides = [1, 1, 1]} : vector<16x24x15xf32> to vector<16x8x15xf32>
    %cst_34 = arith.constant dense<0.000000e+00> : vector<16x15xf32>
    %121 = vector.multi_reduction <add>, %120, %cst_34 [1] : vector<16x8x15xf32> to vector<16x15xf32>
    %122 = vector.shape_cast %121 : vector<16x15xf32> to vector<16x1x15xf32>
    %123 = tpu.concatenate %116, %119, %122 in 1 : vector<16x1x15xf32>, vector<16x1x15xf32>, vector<16x1x15xf32> -> vector<16x3x15xf32>
    %cst_35 = arith.constant dense<0.000000e+00> : vector<16x3xf32>
    %124 = vector.multi_reduction <add>, %123, %cst_35 [2] : vector<16x3x15xf32> to vector<16x3xf32>
    %125 = vector.shape_cast %124 : vector<16x3xf32> to vector<16x3x1xf32>
    %cst_36 = arith.constant dense<0.000000e+00> : vector<16x1xf32>
    %126 = vector.multi_reduction <add>, %125, %cst_36 [1] : vector<16x3x1xf32> to vector<16x1xf32>
    %127 = vector.shape_cast %126 : vector<16x1xf32> to vector<16x1x1xf32>
    %cst_37 = arith.constant 4.500000e+01 : f32
    %128 = vector.broadcast %cst_37 : f32 to vector<16x1x1xf32>
    %129 = arith.divf %127, %128 : vector<16x1x1xf32>
    %130 = vector.broadcast %129 : vector<16x1x1xf32> to vector<16x3x15xf32>
    %131 = arith.subf %123, %130 : vector<16x3x15xf32>
    %132 = arith.mulf %131, %131 : vector<16x3x15xf32>
    %cst_38 = arith.constant dense<0.000000e+00> : vector<16x3xf32>
    %133 = vector.multi_reduction <add>, %132, %cst_38 [2] : vector<16x3x15xf32> to vector<16x3xf32>
    %134 = vector.shape_cast %133 : vector<16x3xf32> to vector<16x3x1xf32>
    %cst_39 = arith.constant dense<0.000000e+00> : vector<16x1xf32>
    %135 = vector.multi_reduction <add>, %134, %cst_39 [1] : vector<16x3x1xf32> to vector<16x1xf32>
    %136 = vector.shape_cast %135 : vector<16x1xf32> to vector<16x1x1xf32>
    %cst_40 = arith.constant 4.500000e+01 : f32
    %137 = vector.broadcast %cst_40 : f32 to vector<16x1x1xf32>
    %138 = arith.divf %136, %137 : vector<16x1x1xf32>
    %cst_41 = arith.constant 9.99999974E-6 : f32
    %139 = vector.broadcast %cst_41 : f32 to vector<16x1x1xf32>
    %140 = arith.addf %138, %139 : vector<16x1x1xf32>
    %141 = math.rsqrt %140 : vector<16x1x1xf32>
    %142 = vector.broadcast %141 : vector<16x1x1xf32> to vector<16x3x15xf32>
    %143 = arith.mulf %131, %142 : vector<16x3x15xf32>
    %c0_42 = arith.constant 0 : index
    %c0_43 = arith.constant 0 : index
    %c0_44 = arith.constant 0 : index
    %144 = vector.load %arg9[%c0_42, %c0_43, %c0_44] : memref<3x3x15xf32, #tpu.memory_space<vmem>>, vector<1x3x15xf32>
    %145 = vector.shape_cast %144 : vector<1x3x15xf32> to vector<3x15xf32>
    %146 = vector.shape_cast %145 : vector<3x15xf32> to vector<1x3x15xf32>
    %147 = vector.broadcast %146 : vector<1x3x15xf32> to vector<16x3x15xf32>
    %148 = arith.mulf %143, %147 : vector<16x3x15xf32>
    %c1 = arith.constant 1 : index
    %c0_45 = arith.constant 0 : index
    %c0_46 = arith.constant 0 : index
    %149 = vector.load %arg9[%c1, %c0_45, %c0_46] : memref<3x3x15xf32, #tpu.memory_space<vmem>>, vector<1x3x15xf32>
    %150 = vector.shape_cast %149 : vector<1x3x15xf32> to vector<3x15xf32>
    %151 = vector.shape_cast %150 : vector<3x15xf32> to vector<1x3x15xf32>
    %152 = vector.broadcast %151 : vector<1x3x15xf32> to vector<16x3x15xf32>
    %153 = arith.addf %148, %152 : vector<16x3x15xf32>
    %c2 = arith.constant 2 : index
    %c0_47 = arith.constant 0 : index
    %c0_48 = arith.constant 0 : index
    %154 = vector.load %arg9[%c2, %c0_47, %c0_48] : memref<3x3x15xf32, #tpu.memory_space<vmem>>, vector<1x3x15xf32>
    %155 = vector.shape_cast %154 : vector<1x3x15xf32> to vector<3x15xf32>
    %156 = vector.shape_cast %155 : vector<3x15xf32> to vector<1x3x15xf32>
    %157 = vector.broadcast %156 : vector<1x3x15xf32> to vector<16x3x15xf32>
    %158 = arith.mulf %153, %157 : vector<16x3x15xf32>
    %cst_49 = arith.constant dense<0.000000e+00> : vector<16x3xf32>
    %159 = vector.multi_reduction <add>, %158, %cst_49 [2] : vector<16x3x15xf32> to vector<16x3xf32>
    %160 = vector.shape_cast %159 : vector<16x3xf32> to vector<16x3x1xf32>
    %cst_50 = arith.constant dense<0.000000e+00> : vector<16x1xf32>
    %161 = vector.multi_reduction <add>, %160, %cst_50 [1] : vector<16x3x1xf32> to vector<16x1xf32>
    %162 = vector.shape_cast %161 : vector<16x1xf32> to vector<16x1x1xf32>
    %c0_51 = arith.constant 0 : index
    %c0_52 = arith.constant 0 : index
    %163 = vector.load %arg10[%c0_51, %c0_52] : memref<1x1xf32, #tpu.memory_space<vmem>>, vector<1x1xf32>
    %164 = vector.shape_cast %163 : vector<1x1xf32> to vector<1x1x1xf32>
    %165 = vector.broadcast %164 : vector<1x1x1xf32> to vector<16x1x1xf32>
    %166 = arith.addf %162, %165 : vector<16x1x1xf32>
    %167 = math.tanh %166 : vector<16x1x1xf32>
    %168 = vector.shape_cast %167 : vector<16x1x1xf32> to vector<1x1x16xf32>
    %c0_53 = arith.constant 0 : index
    %c0_54 = arith.constant 0 : index
    %c0_55 = arith.constant 0 : index
    %169 = vector.load %arg11[%c0_53, %c0_54, %c0_55] : memref<1x1x16xf32, #tpu.memory_space<vmem>>, vector<1x1x16xf32>
    tpu.vector_store %arg11[%c0_53, %c0_54, %c0_55], %168 {strides = array<i32>} : memref<1x1x16xf32, #tpu.memory_space<vmem>>, vector<1x1x16xf32>,
    return
  }
  func.func @transform_0(%arg0: i32) -> (i32, i32) {
    %c0_i32 = arith.constant 0 : i32
    %c0_i32_0 = arith.constant 0 : i32
    return %arg0, %c0_i32 : i32, i32
  }
  func.func @transform_1(%arg0: i32) -> (i32, i32) {
    %c0_i32 = arith.constant 0 : i32
    %c0_i32_0 = arith.constant 0 : i32
    return %arg0, %c0_i32 : i32, i32
  }
  func.func @transform_2(%arg0: i32) -> (i32, i32, i32) {
    %c0_i32 = arith.constant 0 : i32
    %c0_i32_0 = arith.constant 0 : i32
    %c0_i32_1 = arith.constant 0 : i32
    return %arg0, %c0_i32, %c0_i32_0 : i32, i32, i32
  }
  func.func @transform_3(%arg0: i32) -> (i32, i32, i32) {
    %c0_i32 = arith.constant 0 : i32
    %c0_i32_0 = arith.constant 0 : i32
    %c0_i32_1 = arith.constant 0 : i32
    return %arg0, %c0_i32, %c0_i32_0 : i32, i32, i32
  }
  func.func @transform_4(%arg0: i32) -> (i32, i32) {
    %c0_i32 = arith.constant 0 : i32
    %c0_i32_0 = arith.constant 0 : i32
    %c0_i32_1 = arith.constant 0 : i32
    return %c0_i32, %c0_i32_0 : i32, i32
  }
  func.func @transform_5(%arg0: i32) -> (i32, i32) {
    %c0_i32 = arith.constant 0 : i32
    %c0_i32_0 = arith.constant 0 : i32
    %c0_i32_1 = arith.constant 0 : i32
    return %c0_i32, %c0_i32_0 : i32, i32
  }
  func.func @transform_6(%arg0: i32) -> (i32, i32) {
    %c0_i32 = arith.constant 0 : i32
    %c0_i32_0 = arith.constant 0 : i32
    %c0_i32_1 = arith.constant 0 : i32
    return %c0_i32, %c0_i32_0 : i32, i32
  }
  func.func @transform_7(%arg0: i32) -> (i32, i32) {
    %c0_i32 = arith.constant 0 : i32
    %c0_i32_0 = arith.constant 0 : i32
    %c0_i32_1 = arith.constant 0 : i32
    return %c0_i32, %c0_i32_0 : i32, i32
  }
  func.func @transform_8(%arg0: i32) -> (i32, i32, i32) {
    %c0_i32 = arith.constant 0 : i32
    %c0_i32_0 = arith.constant 0 : i32
    %c0_i32_1 = arith.constant 0 : i32
    %c0_i32_2 = arith.constant 0 : i32
    return %c0_i32, %c0_i32_0, %c0_i32_1 : i32, i32, i32
  }
  func.func @transform_9(%arg0: i32) -> (i32, i32) {
    %c0_i32 = arith.constant 0 : i32
    %c0_i32_0 = arith.constant 0 : i32
    %c0_i32_1 = arith.constant 0 : i32
    return %c0_i32, %c0_i32_0 : i32, i32
  }
  func.func @transform_10(%arg0: i32) -> (i32, i32, i32) {
    %c0_i32 = arith.constant 0 : i32
    %c0_i32_0 = arith.constant 0 : i32
    %c0_i32_1 = arith.constant 0 : i32
    return %arg0, %c0_i32, %c0_i32_0 : i32, i32, i32
  }
}

</mosaic_0001>

<bundles_post_ra>
// kernel: tpu_custom_call.1
= control target key start
LH: loop header
LB: loop body
LE: loop exit
PB: predicated region body
PF: predicated region fallthrough
CT: control target
= control target key end

     0   :  { %s15613_s0 = inlined_call_operand.vmem [shape: s32[16,1], index: 0, kind: input, shape index: {}]   ;;  %s15614_s1 = inlined_call_operand.vmem [shape: s32[16,1], index: 1, kind: input, shape index: {}]   ;;  %s15615_s2 = inlined_call_operand.vmem [shape: bf16[16,8,32], index: 2, kind: input, shape index: {}]   ;;  %s15616_s3 = inlined_call_operand.vmem [shape: bf16[16,16,32], index: 3, kind: input, shape index: {}]   ;;  %s15617_s4 = inlined_call_operand.vmem [shape: bf16[96,96], index: 4, kind: input, shape index: {}]   ;;  %s15618_s5 = inlined_call_operand.vmem [shape: f32[1,96], index: 5, kind: input, shape index: {}]   ;;  %s15619_s6 = inlined_call_operand.vmem [shape: f32[2,240], index: 6, kind: input, shape index: {}]   ;;  %s15620_s7 = inlined_call_operand.vmem [shape: f32[240,15], index: 7, kind: input, shape index: {}]   ;;  %s15621_s8 = inlined_call_operand.vmem [shape: f32[3,3,15], index: 8, kind: input, shape index: {}]   ;;  %s15622_s9 = inlined_call_operand.<no memory space> [shape: f32[1,1], index: 9, kind: input, shape index: {}]   ;;  %s15623_s10 = inlined_call_operand.hbm [shape: f32[1,1,16], index: 10, kind: output, shape index: {}]  }
   0x1   :  { %v15_v0 = vstv %s15622_s9 }
   0x2   :  { %16 = vst [vmem:[#allocation2] sm:$0x1] %v15_v0 }
   0x3   :  { %vm132_vm0 = vcmask 1040384   ;;  %v8948_v1 = vld [vmem:[%s15616_s3] sm:$0xff]   ;;  %vm294_vm1 = vcmask 1045504   ;;  %vm197_vm2 = vcmask 1046528   ;;  %v9018_v4 = vld [vmem:[%s15616_s3 + $0x8] sm:$0xff]   ;;  %v9019_v5 = vld [vmem:[%s15616_s3 + $0x10] sm:$0xff]  }
   0x4   :  { %v8949_v2 = vunpack.c.l.bf16 %v8948_v1  ;;  %v8950_v3 = vunpack.c.h.bf16 %v8948_v1  ;;  %v10898_v6 = vld [vmem:[%s15615_s2] sm:$0xff]   ;;  %v8953_v7 = vunpack.c.l.bf16 %v9018_v4  ;;  %v8954_v8 = vunpack.c.h.bf16 %v9018_v4  ;;  %v10142_v24 = vld [vmem:[%s15617_s4 + $0x8] sm:$0xff]   ;;  %v10143_v33 = vld [vmem:[%s15617_s4 + $0x10] sm:$0xff]   ;;  %s10817_s30 = smov 64   ;;  %s10818_s11 = smov 32  }
   0x5   :  { %v8957_v9 = vunpack.c.l.bf16 %v9019_v5  ;;  %v8958_v10 = vunpack.c.h.bf16 %v9019_v5  ;;  %v8917_v13 = vunpack.c.l.bf16 %v10898_v6  ;;  %v8918_v14 = vunpack.c.h.bf16 %v10898_v6  ;;  %v10141_v15 = vld [vmem:[%s15617_s4] sm:$0xff]   ;;  %v10144_v46 = vld [vmem:[%s15617_s4 + $0x18] sm:$0xff]  }
   0x6   :  { %v821_v11 = vrot.slane %v8949_v2, 7  ;;  %v822_v12 = vrot.slane %v8950_v3, 7  ;;  %v824_v16 = vrot.slane %v8953_v7, 7  ;;  %v825_v17 = vrot.slane %v8954_v8, 7  ;;  %9241 = vmatprep.subr.bf16.mxu1 %v10141_v15  ;;  %9213 = vmatprep.subr.bf16.mxu0 %v10141_v15 }
   0x7   :  { %v827_v18 = vrot.slane %v8957_v9, 7  ;;  %v828_v19 = vrot.slane %v8958_v10, 7  ;;  %v100_v23 = vrot.slane %v8917_v13, 7  ;;  %9242 = vmatpush3.bf16.msra.mxu1 %v10141_v15  ;;  %9214 = vmatpush3.bf16.msra.mxu0 %v10141_v15 }
   0x8   :  { %v10906_v20 = vsel %vm132_vm0, %v821_v11, %v822_v12  ;;  %v10909_v21 = vsel %vm132_vm0, 0.0, %v821_v11  ;;  %v933_v22 = vsel %vm132_vm0, %v822_v12, 0.0  ;;  %v10920_v31 = vsel %vm132_vm0, %v824_v16, %v825_v17  ;;  %9243 = vmatprep.subr.bf16.mxu1 %v10142_v24  ;;  %9215 = vmatprep.subr.bf16.mxu0 %v10142_v24 }
   0x9   :  { %v1157_v25 = vrot.slane %v10909_v21, 2  ;;  %v1158_v26 = vrot.slane %v10906_v20, 2  ;;  %v1160_v27 = vrot.slane %v933_v22, 2  ;;  %v981_v28 = vrot.slane %v10909_v21, 1 }
   0xa   :  { %v982_v29 = vrot.slane %v10906_v20, 1  ;;  %v984_v30 = vrot.slane %v933_v22, 1  ;;  %v10923_v32 = vsel %vm132_vm0, 0.0, %v824_v16  ;;  %v934_v36 = vsel %vm132_vm0, %v825_v17, 0.0 }
   0xb   :  { %v1159_v34 = vsel %vm294_vm1, %v1157_v25, %v1158_v26  ;;  %v1161_v35 = vsel %vm294_vm1, %v1158_v26, %v1160_v27  ;;  %v1162_v37 = vrot.slane %v10923_v32, 2  ;;  %v1163_v41 = vrot.slane %v10920_v31, 2  ;;  %9244 = vmatpush3.bf16.msra.mxu1 %v10142_v24  ;;  %9216 = vmatpush3.bf16.msra.mxu0 %v10142_v24 }
   0xc   :  { %v9909_v38 = vpack.i.bf16 %v1161_v35, %v1159_v34  ;;  %v983_v39 = vsel %vm197_vm2, %v981_v28, %v982_v29  ;;  %v985_v40 = vsel %vm197_vm2, %v982_v29, %v984_v30  ;;  %v1165_v43 = vrot.slane %v934_v36, 2  ;;  %9245 = vmatprep.subr.bf16.mxu1 %v10143_v33  ;;  %9217 = vmatprep.subr.bf16.mxu0 %v10143_v33 }
   0xd   :  { %v9899_v42 = vpack.i.bf16 %v985_v40, %v983_v39  ;;  %v986_v44 = vrot.slane %v10923_v32, 1  ;;  %v987_v45 = vrot.slane %v10920_v31, 1  ;;  %v1164_v47 = vsel %vm294_vm1, %v1162_v37, %v1163_v41 }
   0xe   :  { %9910 = vrot.lane.b32.xlu1 %v9909_v38, %s10817_s30  ;;  %v989_v48 = vrot.slane %v934_v36, 1  ;;  %v10943_v49 = vsel %vm132_vm0, %v827_v18, %v828_v19  ;;  %v10946_v50 = vsel %vm132_vm0, 0.0, %v827_v18  ;;  %v1166_v51 = vsel %vm294_vm1, %v1163_v41, %v1165_v43 }
   0xf   :  { %9900 = vrot.lane.b32.xlu0 %v9899_v42, %s10818_s11  ;;  %v988_v52 = vsel %vm197_vm2, %v986_v44, %v987_v45  ;;  %v10952_v53 = vsel %vm132_vm0, %v828_v19, 0.0  ;;  %v991_v54 = vrot.slane %v10946_v50, 1  ;;  %v9914_v55 = vpack.i.bf16 %v1166_v51, %v1164_v47 }
  0x10   :  { %v990_v56 = vsel %vm197_vm2, %v987_v45, %v989_v48  ;;  %v992_v57 = vrot.slane %v10943_v49, 1  ;;  %v994_v58 = vrot.slane %v10952_v53, 1 }
  0x11   :  { %17 = vsyncpa [#allocation4], 0  ;;  %v9904_v59 = vpack.i.bf16 %v990_v56, %v988_v52  ;;  %v101_v60 = vrot.slane %v8918_v14, 7  ;;  %v10959_v61 = vsel %vm132_vm0, 0.0, %v100_v23  ;;  %v149_v62 = vsel %vm132_vm0, %v100_v23, 0.0  ;;  %9246 = vmatpush3.bf16.msra.mxu1 %v10143_v33  ;;  %9218 = vmatpush3.bf16.msra.mxu0 %v10143_v33  ;;  %v9011_v3 = vld [vmem:[%s15615_s2 + $0x8] sm:$0xff]  }
  0x12   :  { %9915 = vrot.lane.b32.xlu1 %v9914_v55, %s10817_s30  ;;  %v993_v63 = vsel %vm197_vm2, %v991_v54, %v992_v57  ;;  %v995_v0 = vsel %vm197_vm2, %v992_v57, %v994_v58  ;;  %v198_v1 = vrot.slane %v10959_v61, 1  ;;  %v199_v2 = vrot.slane %v149_v62, 1  ;;  %9247 = vmatprep.subr.bf16.mxu1 %v10144_v46  ;;  %v10145_v4 = vld [vmem:[%s15617_s4 + $0x20] sm:$0xff]   ;;  %v9020_v17 = vld [vmem:[%s15616_s3 + $0x18] sm:$0xff]   ;;  %v10146_v24 = vld [vmem:[%s15617_s4 + $0x28] sm:$0xff]   ;;  %s10819_s16 = smov 96  }
  0x13   :  { %9905 = vrot.lane.b32.xlu0 %v9904_v59, %s10818_s11  ;;  %v9924_v5 = vpack.i.bf16 %v995_v0, %v993_v63  ;;  %v10974_v6 = vsel %vm132_vm0, 0.0, %v101_v60  ;;  %v150_v7 = vsel %vm132_vm0, %v101_v60, 0.0  ;;  %v295_v8 = vrot.slane %v10959_v61, 2  ;;  %9219 = vmatprep.subr.bf16.mxu0 %v10144_v46  ;;  %v9022_v63 = vld [vmem:[%s15616_s3 + $0x28] sm:$0xff]   ;;  %s10826_s13 = smov 48  }
  0x14   :  { %v200_v9 = vsel %vm197_vm2, %v198_v1, %v199_v2  ;;  %v201_v10 = vrot.slane %v10974_v6, 1  ;;  %v202_v11 = vrot.slane %v150_v7, 1  ;;  %v296_v12 = vrot.slane %v149_v62, 2 }
  0x15   :  { %v298_v13 = vrot.slane %v10974_v6, 2  ;;  %v299_v14 = vrot.slane %v150_v7, 2  ;;  %v8921_v15 = vunpack.c.l.bf16 %v9011_v3  ;;  %v8922_v16 = vunpack.c.h.bf16 %v9011_v3  ;;  %9248 = vmatpush3.bf16.msra.mxu1 %v10144_v46  ;;  %9220 = vmatpush3.bf16.msra.mxu0 %v10144_v46 }
  0x16   :  { %9925 = vrot.lane.b32.xlu1 %v9924_v5, %s10818_s11  ;;  %v203_v18 = vsel %vm197_vm2, %v201_v10, %v202_v11  ;;  %v297_v19 = vsel %vm294_vm1, %v295_v8, %v296_v12  ;;  %v1167_v22 = vrot.slane %v10946_v50, 2  ;;  %v1168_v23 = vrot.slane %v10943_v49, 2  ;;  %9249 = vmatprep.subr.bf16.mxu1 %v10145_v4 }
  0x17   :  { %v9919_v25 = vpack.i.bf16 %v203_v18, %v200_v9  ;;  %v300_v26 = vsel %vm294_vm1, %v298_v13, %v299_v14  ;;  %v102_v27 = vrot.slane %v8921_v15, 7  ;;  %v103_v28 = vrot.slane %v8922_v16, 7  ;;  %9221 = vmatprep.subr.bf16.mxu0 %v10145_v4 }
  0x18   :  { %v9934_v29 = vpack.i.bf16 %v300_v26, %v297_v19  ;;  %v1169_v30 = vsel %vm294_vm1, %v1167_v22, %v1168_v23  ;;  %v1170_v33 = vrot.slane %v10952_v53, 2  ;;  %v8961_v34 = vunpack.c.l.bf16 %v9020_v17  ;;  %v9021_v53 = vld [vmem:[%s15616_s3 + $0x20] sm:$0xff]  }
  0x19   :  { %9920 = vrot.lane.b32.xlu0 %v9919_v25, %s10818_s11  ;;  %v10997_v35 = vsel %vm132_vm0, 0.0, %v102_v27  ;;  %v11000_v36 = vsel %vm132_vm0, 0.0, %v103_v28  ;;  %v151_v37 = vsel %vm132_vm0, %v102_v27, 0.0  ;;  %v152_v38 = vsel %vm132_vm0, %v103_v28, 0.0  ;;  %9250 = vmatpush3.bf16.msra.mxu1 %v10145_v4 }
  0x1a   :  { %9935 = vrot.lane.b32.xlu1 %v9934_v29, %s10817_s30  ;;  %v204_v39 = vrot.slane %v10997_v35, 1  ;;  %v205_v40 = vrot.slane %v151_v37, 1  ;;  %v207_v41 = vrot.slane %v11000_v36, 1  ;;  %v208_v42 = vrot.slane %v152_v38, 1  ;;  %9251 = vmatprep.subr.bf16.mxu1 %v10146_v24 }
  0x1b   :  { %v1171_v43 = vsel %vm294_vm1, %v1168_v23, %v1170_v33  ;;  %v8962_v44 = vunpack.c.h.bf16 %v9020_v17  ;;  %v830_v45 = vrot.slane %v8961_v34, 7  ;;  %v301_v46 = vrot.slane %v10997_v35, 2  ;;  %9222 = vmatpush3.bf16.msra.mxu0 %v10145_v4  ;;  %v9023_v23 = vld [vmem:[%s15616_s3 + $0x30] sm:$0xff]  }
  0x1c   :  { %v206_v47 = vsel %vm197_vm2, %v204_v39, %v205_v40  ;;  %v209_v48 = vsel %vm197_vm2, %v207_v41, %v208_v42  ;;  %v9944_v51 = vpack.i.bf16 %v1171_v43, %v1169_v30  ;;  %v302_v52 = vrot.slane %v151_v37, 2  ;;  %9223 = vmatprep.subr.bf16.mxu0 %v10146_v24 }
  0x1d   :  { %v9929_v54 = vpack.i.bf16 %v209_v48, %v206_v47  ;;  %v831_v55 = vrot.slane %v8962_v44, 7  ;;  %v11015_v56 = vsel %vm132_vm0, 0.0, %v830_v45  ;;  %v304_v57 = vrot.slane %v11000_v36, 2  ;;  %9252 = vmatpush3.bf16.msra.mxu1 %v10146_v24 }
  0x1e   :  { %9945 = vrot.lane.b32.xlu1 %v9944_v51, %s10817_s30  ;;  %v996_v58 = vrot.slane %v11015_v56, 1  ;;  %v1172_v59 = vrot.slane %v11015_v56, 2  ;;  %v303_v60 = vsel %vm294_vm1, %v301_v46, %v302_v52  ;;  %v305_v62 = vrot.slane %v152_v38, 2 }
  0x1f   :  { %9930 = vrot.lane.b32.xlu0 %v9929_v54, %s10818_s11  ;;  %v11027_v0 = vsel %vm132_vm0, %v830_v45, %v831_v55  ;;  %v936_v1 = vsel %vm132_vm0, %v831_v55, 0.0  ;;  %v8965_v2 = vunpack.c.l.bf16 %v9021_v53  ;;  %v8966_v3 = vunpack.c.h.bf16 %v9021_v53  ;;  %9224 = vmatpush3.bf16.msra.mxu0 %v10146_v24  ;;  %v9024_v54 = vld [vmem:[%s15616_s3 + $0x38] sm:$0xff]  }
  0x20   :  { %v997_v4 = vrot.slane %v11027_v0, 1  ;;  %v999_v5 = vrot.slane %v936_v1, 1  ;;  %v1173_v7 = vrot.slane %v11027_v0, 2  ;;  %v1175_v8 = vrot.slane %v936_v1, 2 }
  0x21   :  { %v306_v9 = vsel %vm294_vm1, %v304_v57, %v305_v62  ;;  %v833_v10 = vrot.slane %v8965_v2, 7  ;;  %v834_v11 = vrot.slane %v8966_v3, 7  ;;  %v8969_v12 = vunpack.c.l.bf16 %v9022_v63 }
  0x22   :  { %v998_v13 = vsel %vm197_vm2, %v996_v58, %v997_v4  ;;  %v1000_v14 = vsel %vm197_vm2, %v997_v4, %v999_v5  ;;  %v1174_v15 = vsel %vm294_vm1, %v1172_v59, %v1173_v7  ;;  %v1176_v16 = vsel %vm294_vm1, %v1173_v7, %v1175_v8 }
  0x23   :  { %v9939_v17 = vpack.i.bf16 %v1000_v14, %v998_v13  ;;  %v9954_v18 = vpack.i.bf16 %v1176_v16, %v1174_v15  ;;  %v9949_v19 = vpack.i.bf16 %v306_v9, %v303_v60  ;;  %v11038_v22 = vsel %vm132_vm0, %v833_v10, %v834_v11 }
  0x24   :  { %v11044_v24 = vsel %vm132_vm0, 0.0, %v833_v10  ;;  %v937_v25 = vsel %vm132_vm0, %v834_v11, 0.0  ;;  %v1002_v26 = vrot.slane %v11038_v22, 1  ;;  %v8970_v27 = vunpack.c.h.bf16 %v9022_v63  ;;  %v9012_v11 = vld [vmem:[%s15615_s2 + $0x10] sm:$0xff]  }
  0x25   :  { %9940 = vrot.lane.b32.xlu0 %v9939_v17, %s10818_s11  ;;  %9955 = vrot.lane.b32.xlu1 %v9954_v18, %s10817_s30  ;;  %v1001_v28 = vrot.slane %v11044_v24, 1  ;;  %v1004_v29 = vrot.slane %v937_v25, 1  ;;  %v836_v30 = vrot.slane %v8969_v12, 7  ;;  %v1177_v33 = vrot.slane %v11044_v24, 2 }
  0x26   :  { %v837_v34 = vrot.slane %v8970_v27, 7  ;;  %v1178_v37 = vrot.slane %v11038_v22, 2  ;;  %v1180_v38 = vrot.slane %v937_v25, 2  ;;  %v8973_v39 = vunpack.c.l.bf16 %v9023_v23 }
  0x27   :  { %v1003_v40 = vsel %vm197_vm2, %v1001_v28, %v1002_v26  ;;  %v1005_v41 = vsel %vm197_vm2, %v1002_v26, %v1004_v29  ;;  %v11056_v42 = vsel %vm132_vm0, 0.0, %v836_v30  ;;  %v8974_v43 = vunpack.c.h.bf16 %v9023_v23 }
  0x28   :  { %v9959_v44 = vpack.i.bf16 %v1005_v41, %v1003_v40  ;;  %v11059_v45 = vsel %vm132_vm0, %v836_v30, %v837_v34  ;;  %v938_v46 = vsel %vm132_vm0, %v837_v34, 0.0  ;;  %v1006_v47 = vrot.slane %v11056_v42, 1  ;;  %v9013_v34 = vld [vmem:[%s15615_s2 + $0x18] sm:$0xff]  }
  0x29   :  { %9950 = vrot.lane.b32.xlu0 %v9949_v19, %s10817_s30  ;;  %v1007_v48 = vrot.slane %v11059_v45, 1  ;;  %v1009_v51 = vrot.slane %v938_v46, 1  ;;  %v1179_v52 = vsel %vm294_vm1, %v1177_v33, %v1178_v37  ;;  %v1181_v53 = vsel %vm294_vm1, %v1178_v37, %v1180_v38 }
  0x2a   :  { %v9969_v55 = vpack.i.bf16 %v1181_v53, %v1179_v52  ;;  %v1182_v57 = vrot.slane %v11056_v42, 2  ;;  %v1183_v58 = vrot.slane %v11059_v45, 2  ;;  %v1185_v59 = vrot.slane %v938_v46, 2 }
  0x2b   :  { %v1008_v60 = vsel %vm197_vm2, %v1006_v47, %v1007_v48  ;;  %v1010_v62 = vsel %vm197_vm2, %v1007_v48, %v1009_v51  ;;  %v839_v63 = vrot.slane %v8973_v39, 7  ;;  %v840_v1 = vrot.slane %v8974_v43, 7 }
  0x2c   :  { %v9964_v2 = vpack.i.bf16 %v1010_v62, %v1008_v60  ;;  %v1184_v3 = vsel %vm294_vm1, %v1182_v57, %v1183_v58  ;;  %v1186_v4 = vsel %vm294_vm1, %v1183_v58, %v1185_v59  ;;  %v8977_v5 = vunpack.c.l.bf16 %v9024_v54 }
  0x2d   :  { %9960 = vrot.lane.b32.xlu0 %v9959_v44, %s10818_s11  ;;  %v9974_v7 = vpack.i.bf16 %v1186_v4, %v1184_v3  ;;  %v11078_v8 = vsel %vm132_vm0, %v839_v63, %v840_v1  ;;  %v11081_v9 = vsel %vm132_vm0, 0.0, %v839_v63  ;;  %v939_v10 = vsel %vm132_vm0, %v840_v1, 0.0 }
  0x2e   :  { %9965 = vrot.lane.b32.xlu1 %v9964_v2, %s10818_s11  ;;  %v1011_v12 = vrot.slane %v11081_v9, 1  ;;  %v1012_v13 = vrot.slane %v11078_v8, 1  ;;  %v1014_v14 = vrot.slane %v939_v10, 1  ;;  %v8978_v15 = vunpack.c.h.bf16 %v9024_v54 }
  0x2f   :  { %v842_v16 = vrot.slane %v8977_v5, 7  ;;  %v1187_v17 = vrot.slane %v11081_v9, 2  ;;  %v1188_v18 = vrot.slane %v11078_v8, 2  ;;  %v1190_v19 = vrot.slane %v939_v10, 2 }
  0x30   :  { %v1013_v23 = vsel %vm197_vm2, %v1011_v12, %v1012_v13  ;;  %v1015_v25 = vsel %vm197_vm2, %v1012_v13, %v1014_v14  ;;  %v843_v26 = vrot.slane %v8978_v15, 7  ;;  %v8925_v27 = vunpack.c.l.bf16 %v9012_v11 }
  0x31   :  { %9970 = vrot.lane.b32.xlu0 %v9969_v55, %s10817_s30  ;;  %v9979_v28 = vpack.i.bf16 %v1015_v25, %v1013_v23  ;;  %v11096_v29 = vsel %vm132_vm0, 0.0, %v842_v16  ;;  %v1189_v30 = vsel %vm294_vm1, %v1187_v17, %v1188_v18  ;;  %v1191_v33 = vsel %vm294_vm1, %v1188_v18, %v1190_v19 }
  0x32   :  { %9975 = vrot.lane.b32.xlu1 %v9974_v7, %s10817_s30  ;;  %v11105_v37 = vsel %vm132_vm0, %v842_v16, %v843_v26  ;;  %v940_v38 = vsel %vm132_vm0, %v843_v26, 0.0  ;;  %v1016_v39 = vrot.slane %v11096_v29, 1  ;;  %v9989_v40 = vpack.i.bf16 %v1191_v33, %v1189_v30 }
  0x33   :  { %v1017_v41 = vrot.slane %v11105_v37, 1  ;;  %v1019_v43 = vrot.slane %v940_v38, 1  ;;  %v1192_v44 = vrot.slane %v11096_v29, 2  ;;  %v1193_v46 = vrot.slane %v11105_v37, 2 }
  0x34   :  { %v1195_v47 = vrot.slane %v940_v38, 2  ;;  %v8926_v48 = vunpack.c.h.bf16 %v9012_v11  ;;  %v104_v51 = vrot.slane %v8925_v27, 7  ;;  %v8929_v52 = vunpack.c.l.bf16 %v9013_v34 }
  0x35   :  { %9980 = vrot.lane.b32.xlu0 %v9979_v28, %s10818_s11  ;;  %v1018_v53 = vsel %vm197_vm2, %v1016_v39, %v1017_v41  ;;  %v1020_v54 = vsel %vm197_vm2, %v1017_v41, %v1019_v43  ;;  %v1194_v55 = vsel %vm294_vm1, %v1192_v44, %v1193_v46  ;;  %v8930_v57 = vunpack.c.h.bf16 %v9013_v34  ;;  %v9025_v41 = vld [vmem:[%s15616_s3 + $0x40] sm:$0xff]  }
  0x36   :  { %v9984_v58 = vpack.i.bf16 %v1020_v54, %v1018_v53  ;;  %v1196_v59 = vsel %vm294_vm1, %v1193_v46, %v1195_v47  ;;  %v105_v60 = vrot.slane %v8926_v48, 7  ;;  %v11118_v62 = vsel %vm132_vm0, 0.0, %v104_v51  ;;  %v9014_v48 = vld [vmem:[%s15615_s2 + $0x20] sm:$0xff]   ;;  %v9026_v53 = vld [vmem:[%s15616_s3 + $0x48] sm:$0xff]  }
  0x37   :  { %v9994_v63 = vpack.i.bf16 %v1196_v59, %v1194_v55  ;;  %v153_v1 = vsel %vm132_vm0, %v104_v51, 0.0  ;;  %v210_v2 = vrot.slane %v11118_v62, 1  ;;  %v106_v3 = vrot.slane %v8929_v52, 7 }
  0x38   :  { %9985 = vrot.lane.b32.xlu1 %v9984_v58, %s10818_s11  ;;  %v11124_v4 = vsel %vm132_vm0, 0.0, %v105_v60  ;;  %v154_v5 = vsel %vm132_vm0, %v105_v60, 0.0  ;;  %v211_v7 = vrot.slane %v153_v1, 1  ;;  %v107_v10 = vrot.slane %v8930_v57, 7  ;;  %v11165_v58 = vld [vmem:[%s15615_s2 + $0x28] sm:$0xff]  }
  0x39   :  { %9990 = vrot.lane.b32.xlu0 %v9989_v40, %s10817_s30  ;;  %v213_v11 = vrot.slane %v11124_v4, 1  ;;  %v214_v12 = vrot.slane %v154_v5, 1  ;;  %v11130_v13 = vsel %vm132_vm0, 0.0, %v106_v3  ;;  %v155_v14 = vsel %vm132_vm0, %v106_v3, 0.0 }
  0x3a   :  { %v212_v15 = vsel %vm197_vm2, %v210_v2, %v211_v7  ;;  %v11135_v16 = vsel %vm132_vm0, 0.0, %v107_v10  ;;  %v156_v17 = vsel %vm132_vm0, %v107_v10, 0.0  ;;  %v216_v18 = vrot.slane %v11130_v13, 1 }
  0x3b   :  { %v215_v19 = vsel %vm197_vm2, %v213_v11, %v214_v12  ;;  %v217_v23 = vrot.slane %v155_v14, 1  ;;  %v219_v25 = vrot.slane %v11135_v16, 1  ;;  %v220_v26 = vrot.slane %v156_v17, 1 }
  0x3c   :  { %9995 = vrot.lane.b32.xlu1 %v9994_v63, %s10817_s30  ;;  %v9999_v27 = vpack.i.bf16 %v215_v19, %v212_v15  ;;  %v307_v28 = vrot.slane %v11118_v62, 2  ;;  %v308_v30 = vrot.slane %v153_v1, 2  ;;  %v310_v33 = vrot.slane %v11124_v4, 2 }
  0x3d   :  { %v218_v34 = vsel %vm197_vm2, %v216_v18, %v217_v23  ;;  %v221_v38 = vsel %vm197_vm2, %v219_v25, %v220_v26  ;;  %v311_v39 = vrot.slane %v154_v5, 2  ;;  %v313_v40 = vrot.slane %v11130_v13, 2 }
  0x3e   :  { %10000 = vrot.lane.b32.xlu0 %v9999_v27, %s10818_s11  ;;  %v10004_v43 = vpack.i.bf16 %v221_v38, %v218_v34  ;;  %v309_v44 = vsel %vm294_vm1, %v307_v28, %v308_v30  ;;  %v314_v46 = vrot.slane %v155_v14, 2  ;;  %v316_v47 = vrot.slane %v11135_v16, 2 }
  0x3f   :  { %v312_v51 = vsel %vm294_vm1, %v310_v33, %v311_v39  ;;  %v317_v52 = vrot.slane %v156_v17, 2  ;;  %v8981_v57 = vunpack.c.l.bf16 %v9025_v41  ;;  %v8982_v60 = vunpack.c.h.bf16 %v9025_v41 }
  0x40   :  { %10005 = vrot.lane.b32.xlu1 %v10004_v43, %s10818_s11  ;;  %v10009_v54 = vpack.i.bf16 %v312_v51, %v309_v44  ;;  %v315_v55 = vsel %vm294_vm1, %v313_v40, %v314_v46  ;;  %v8933_v63 = vunpack.c.l.bf16 %v9014_v48  ;;  %v8934_v1 = vunpack.c.h.bf16 %v9014_v48 }
  0x41   :  { %v318_v59 = vsel %vm294_vm1, %v316_v47, %v317_v52  ;;  %v845_v3 = vrot.slane %v8981_v57, 7  ;;  %v8985_v5 = vunpack.c.l.bf16 %v9026_v53  ;;  %v8986_v7 = vunpack.c.h.bf16 %v9026_v53 }
  0x42   :  { %10010 = vrot.lane.b32.xlu0 %v10009_v54, %s10817_s30  ;;  %v10014_v2 = vpack.i.bf16 %v318_v59, %v315_v55  ;;  %v846_v10 = vrot.slane %v8982_v60, 7  ;;  %v108_v11 = vrot.slane %v8933_v63, 7  ;;  %v109_v12 = vrot.slane %v8934_v1, 7 }
  0x43   :  { %v8937_v14 = vunpack.c.l.bf16 %v11165_v58  ;;  %v11172_v15 = vsel %vm132_vm0, 0.0, %v845_v3  ;;  %v848_v17 = vrot.slane %v8985_v5, 7  ;;  %v849_v18 = vrot.slane %v8986_v7, 7 }
  0x44   :  { %10015 = vrot.lane.b32.xlu1 %v10014_v2, %s10817_s30  ;;  %v8938_v19 = vunpack.c.h.bf16 %v11165_v58  ;;  %v11176_v23 = vsel %vm132_vm0, %v845_v3, %v846_v10  ;;  %v941_v25 = vsel %vm132_vm0, %v846_v10, 0.0  ;;  %v1021_v26 = vrot.slane %v11172_v15, 1 }
  0x45   :  { %v1197_v27 = vrot.slane %v11172_v15, 2  ;;  %v1022_v28 = vrot.slane %v11176_v23, 1  ;;  %v1024_v30 = vrot.slane %v941_v25, 1  ;;  %v1198_v33 = vrot.slane %v11176_v23, 2 }
  0x46   :  { %v1200_v34 = vrot.slane %v941_v25, 2  ;;  %v11184_v38 = vsel %vm132_vm0, 0.0, %v108_v11  ;;  %v11187_v39 = vsel %vm132_vm0, 0.0, %v109_v12  ;;  %v157_v40 = vsel %vm132_vm0, %v108_v11, 0.0 }
  0x47   :  { %v158_v41 = vsel %vm132_vm0, %v109_v12, 0.0  ;;  %v1023_v43 = vsel %vm197_vm2, %v1021_v26, %v1022_v28  ;;  %v1025_v44 = vsel %vm197_vm2, %v1022_v28, %v1024_v30  ;;  %v1199_v46 = vsel %vm294_vm1, %v1197_v27, %v1198_v33 }
  0x48   :  { %v1201_v47 = vsel %vm294_vm1, %v1198_v33, %v1200_v34  ;;  %v10019_v48 = vpack.i.bf16 %v1025_v44, %v1023_v43  ;;  %v222_v52 = vrot.slane %v11184_v38, 1  ;;  %v223_v53 = vrot.slane %v157_v40, 1 }
  0x49   :  { %v10029_v51 = vpack.i.bf16 %v1201_v47, %v1199_v46  ;;  %v225_v54 = vrot.slane %v11187_v39, 1  ;;  %v226_v55 = vrot.slane %v158_v41, 1  ;;  %v11198_v57 = vsel %vm132_vm0, %v848_v17, %v849_v18 }
  0x4a   :  { %v11201_v58 = vsel %vm132_vm0, 0.0, %v848_v17  ;;  %10020 = vrot.lane.b32.xlu0 %v10019_v48, %s10818_s11  ;;  %v224_v59 = vsel %vm197_vm2, %v222_v52, %v223_v53  ;;  %v942_v60 = vsel %vm132_vm0, %v849_v18, 0.0  ;;  %v1027_v1 = vrot.slane %v11198_v57, 1  ;;  %v9027_v18 = vld [vmem:[%s15616_s3 + $0x50] sm:$0xff]  }
  0x4b   :  { %v1026_v63 = vrot.slane %v11201_v58, 1  ;;  %v227_v2 = vsel %vm197_vm2, %v225_v54, %v226_v55  ;;  %v1029_v3 = vrot.slane %v942_v60, 1  ;;  %v319_v5 = vrot.slane %v11184_v38, 2 }
  0x4c   :  { %v320_v7 = vrot.slane %v157_v40, 2  ;;  %v10039_v10 = vpack.i.bf16 %v227_v2, %v224_v59  ;;  %v322_v12 = vrot.slane %v11187_v39, 2  ;;  %v323_v17 = vrot.slane %v158_v41, 2 }
  0x4d   :  { %v1028_v11 = vsel %vm197_vm2, %v1026_v63, %v1027_v1  ;;  %v1030_v25 = vsel %vm197_vm2, %v1027_v1, %v1029_v3  ;;  %v1202_v27 = vrot.slane %v11201_v58, 2  ;;  %v1203_v28 = vrot.slane %v11198_v57, 2 }
  0x4e   :  { %v321_v26 = vsel %vm294_vm1, %v319_v5, %v320_v7  ;;  %10030 = vrot.lane.b32.xlu0 %v10029_v51, %s10817_s30  ;;  %v10024_v30 = vpack.i.bf16 %v1030_v25, %v1028_v11  ;;  %v324_v33 = vsel %vm294_vm1, %v322_v12, %v323_v17  ;;  %v1205_v34 = vrot.slane %v942_v60, 2 }
  0x4f   :  { %v110_v40 = vrot.slane %v8937_v14, 7  ;;  %v10049_v41 = vpack.i.bf16 %v324_v33, %v321_v26  ;;  %v1204_v43 = vsel %vm294_vm1, %v1202_v27, %v1203_v28  ;;  %v111_v44 = vrot.slane %v8938_v19, 7  ;;  %v9029_v19 = vld [vmem:[%s15616_s3 + $0x60] sm:$0xff]  }
  0x50   :  { %v8989_v46 = vunpack.c.l.bf16 %v9027_v18  ;;  %10025 = vrot.lane.b32.xlu1 %v10024_v30, %s10818_s11  ;;  %v1206_v47 = vsel %vm294_vm1, %v1203_v28, %v1205_v34  ;;  %v8990_v51 = vunpack.c.h.bf16 %v9027_v18  ;;  %v8997_v18 = vunpack.c.l.bf16 %v9029_v19  ;;  %v9028_v28 = vld [vmem:[%s15616_s3 + $0x58] sm:$0xff]  }
  0x51   :  { %v11225_v48 = vsel %vm132_vm0, 0.0, %v110_v40  ;;  %v159_v52 = vsel %vm132_vm0, %v110_v40, 0.0  ;;  %v10034_v53 = vpack.i.bf16 %v1206_v47, %v1204_v43  ;;  %v11229_v54 = vsel %vm132_vm0, 0.0, %v111_v44 }
  0x52   :  { %v160_v14 = vsel %vm132_vm0, %v111_v44, 0.0  ;;  %v325_v55 = vrot.slane %v11225_v48, 2  ;;  %10040 = vrot.lane.b32.xlu0 %v10039_v10, %s10818_s11  ;;  %v326_v59 = vrot.slane %v159_v52, 2  ;;  %v328_v60 = vrot.slane %v11229_v54, 2 }
  0x53   :  { %v329_v63 = vrot.slane %v160_v14, 2  ;;  %v228_v1 = vrot.slane %v11225_v48, 1  ;;  %v229_v2 = vrot.slane %v159_v52, 1  ;;  %v231_v3 = vrot.slane %v11229_v54, 1 }
  0x54   :  { %v232_v5 = vrot.slane %v160_v14, 1  ;;  %v851_v7 = vrot.slane %v8989_v46, 7  ;;  %10035 = vrot.lane.b32.xlu1 %v10034_v53, %s10817_s30  ;;  %v327_v11 = vsel %vm294_vm1, %v325_v55, %v326_v59  ;;  %v852_v17 = vrot.slane %v8990_v51, 7 }
  0x55   :  { %v330_v12 = vsel %vm294_vm1, %v328_v60, %v329_v63  ;;  %v230_v25 = vsel %vm197_vm2, %v228_v1, %v229_v2  ;;  %v8998_v51 = vunpack.c.h.bf16 %v9029_v19  ;;  %v8993_v53 = vunpack.c.l.bf16 %v9028_v28  ;;  %v9016_v63 = vld [vmem:[%s15615_s2 + $0x30] sm:$0xff]  }
  0x56   :  { %v10059_v10 = vpack.i.bf16 %v330_v12, %v327_v11  ;;  %v233_v26 = vsel %vm197_vm2, %v231_v3, %v232_v5  ;;  %v11246_v27 = vsel %vm132_vm0, 0.0, %v851_v7  ;;  %10050 = vrot.lane.b32.xlu0 %v10049_v41, %s10817_s30  ;;  %v11253_v33 = vsel %vm132_vm0, %v851_v7, %v852_v17 }
  0x57   :  { %v10044_v30 = vpack.i.bf16 %v233_v26, %v230_v25  ;;  %v943_v34 = vsel %vm132_vm0, %v852_v17, 0.0  ;;  %v1207_v40 = vrot.slane %v11246_v27, 2  ;;  %v1208_v43 = vrot.slane %v11253_v33, 2 }
  0x58   :  { %v1210_v44 = vrot.slane %v943_v34, 2  ;;  %v1031_v46 = vrot.slane %v11246_v27, 1  ;;  %v1032_v47 = vrot.slane %v11253_v33, 1  ;;  %v1034_v52 = vrot.slane %v943_v34, 1 }
  0x59   :  { %10045 = vrot.lane.b32.xlu1 %v10044_v30, %s10818_s11  ;;  %v857_v41 = vrot.slane %v8997_v18, 7  ;;  %v1209_v14 = vsel %vm294_vm1, %v1207_v40, %v1208_v43  ;;  %v8994_v60 = vunpack.c.h.bf16 %v9028_v28  ;;  %v858_v3 = vrot.slane %v8998_v51, 7 }
  0x5a   :  { %v1211_v55 = vsel %vm294_vm1, %v1208_v43, %v1210_v44  ;;  %v1033_v59 = vsel %vm197_vm2, %v1031_v46, %v1032_v47  ;;  %10060 = vrot.lane.b32.xlu0 %v10059_v10, %s10817_s30  ;;  %v1035_v2 = vsel %vm197_vm2, %v1032_v47, %v1034_v52  ;;  %v854_v11 = vrot.slane %v8993_v53, 7 }
  0x5b   :  { %v10069_v1 = vpack.i.bf16 %v1211_v55, %v1209_v14  ;;  %v11270_v19 = vsel %vm132_vm0, 0.0, %v857_v41  ;;  %v10054_v5 = vpack.i.bf16 %v1035_v2, %v1033_v59  ;;  %v855_v12 = vrot.slane %v8994_v60, 7  ;;  %v9030_v60 = vld [vmem:[%s15616_s3 + $0x68] sm:$0xff]  }
  0x5c   :  { %v1041_v7 = vrot.slane %v11270_v19, 1  ;;  %v11274_v17 = vsel %vm132_vm0, %v857_v41, %v858_v3  ;;  %v945_v18 = vsel %vm132_vm0, %v858_v3, 0.0  ;;  %v1217_v25 = vrot.slane %v11270_v19, 2 }
  0x5d   :  { %v8941_v10 = vunpack.c.l.bf16 %v9016_v63  ;;  %10055 = vrot.lane.b32.xlu1 %v10054_v5, %s10818_s11  ;;  %v1042_v26 = vrot.slane %v11274_v17, 1  ;;  %v1044_v28 = vrot.slane %v945_v18, 1  ;;  %v11281_v30 = vsel %vm132_vm0, %v854_v11, %v855_v12 }
  0x5e   :  { %v11284_v34 = vsel %vm132_vm0, 0.0, %v854_v11  ;;  %10070 = vrot.lane.b32.xlu0 %v10069_v1, %s10817_s30  ;;  %v944_v40 = vsel %vm132_vm0, %v855_v12, 0.0  ;;  %v1037_v44 = vrot.slane %v11281_v30, 1  ;;  %v1218_v46 = vrot.slane %v11274_v17, 2 }
  0x5f   :  { %v1036_v43 = vrot.slane %v11284_v34, 1  ;;  %v1043_v47 = vsel %vm197_vm2, %v1041_v7, %v1042_v26  ;;  %v1045_v52 = vsel %vm197_vm2, %v1042_v26, %v1044_v28  ;;  %v1039_v51 = vrot.slane %v944_v40, 1 }
  0x60   :  { %v1220_v41 = vrot.slane %v945_v18, 2  ;;  %v10079_v53 = vpack.i.bf16 %v1045_v52, %v1043_v47  ;;  %v1219_v55 = vsel %vm294_vm1, %v1217_v25, %v1218_v46  ;;  %v1212_v59 = vrot.slane %v11284_v34, 2 }
  0x61   :  { %v1038_v14 = vsel %vm197_vm2, %v1036_v43, %v1037_v44  ;;  %v1040_v1 = vsel %vm197_vm2, %v1037_v44, %v1039_v51  ;;  %v1213_v3 = vrot.slane %v11281_v30, 2  ;;  %v1215_v5 = vrot.slane %v944_v40, 2 }
  0x62   :  { %v1221_v2 = vsel %vm294_vm1, %v1218_v46, %v1220_v41  ;;  %10080 = vrot.lane.b32.xlu0 %v10079_v53, %s10818_s11  ;;  %v10064_v7 = vpack.i.bf16 %v1040_v1, %v1038_v14  ;;  %v8942_v12 = vunpack.c.h.bf16 %v9016_v63  ;;  %v112_v18 = vrot.slane %v8941_v10, 7 }
  0x63   :  { %v10089_v11 = vpack.i.bf16 %v1221_v2, %v1219_v55  ;;  %v1214_v25 = vsel %vm294_vm1, %v1212_v59, %v1213_v3  ;;  %v1216_v26 = vsel %vm294_vm1, %v1213_v3, %v1215_v5  ;;  %v9001_v28 = vunpack.c.l.bf16 %v9030_v60 }
  0x64   :  { %v9002_v43 = vunpack.c.h.bf16 %v9030_v60  ;;  %10065 = vrot.lane.b32.xlu1 %v10064_v7, %s10818_s11  ;;  %v10074_v44 = vpack.i.bf16 %v1216_v26, %v1214_v25  ;;  %v113_v47 = vrot.slane %v8942_v12, 7  ;;  %v11307_v46 = vsel %vm132_vm0, 0.0, %v112_v18  ;;  %v9017_v12 = vld [vmem:[%s15615_s2 + $0x38] sm:$0xff]  }
  0x65   :  { %15721 = vst [vmem:[#allocation6_spill] sm:$0xff] %v11307_v46  ;;  %v161_v40 = vsel %vm132_vm0, %v112_v18, 0.0  ;;  %v234_v52 = vrot.slane %v11307_v46, 1  ;;  %v860_v63 = vrot.slane %v9001_v28, 7  ;;  %v331_v14 = vrot.slane %v11307_v46, 2 }
  0x66   :  { %v235_v51 = vrot.slane %v161_v40, 1  ;;  %v861_v10 = vrot.slane %v9002_v43, 7  ;;  %10090 = vrot.lane.b32.xlu0 %v10089_v11, %s10817_s30  ;;  %v11313_v41 = vsel %vm132_vm0, 0.0, %v113_v47  ;;  %v162_v53 = vsel %vm132_vm0, %v113_v47, 0.0 }
  0x67   :  { %v332_v55 = vrot.slane %v161_v40, 2  ;;  %v237_v60 = vrot.slane %v11313_v41, 1  ;;  %v238_v1 = vrot.slane %v162_v53, 1  ;;  %v11324_v3 = vsel %vm132_vm0, 0.0, %v860_v63 }
  0x68   :  { %v236_v59 = vsel %vm197_vm2, %v234_v52, %v235_v51  ;;  %v11320_v2 = vsel %vm132_vm0, %v860_v63, %v861_v10  ;;  %10075 = vrot.lane.b32.xlu1 %v10074_v44, %s10817_s30  ;;  %v946_v5 = vsel %vm132_vm0, %v861_v10, 0.0  ;;  %v1046_v25 = vrot.slane %v11324_v3, 1 }
  0x69   :  { %v1047_v7 = vrot.slane %v11320_v2, 1  ;;  %v333_v11 = vsel %vm294_vm1, %v331_v14, %v332_v55  ;;  %v239_v18 = vsel %vm197_vm2, %v237_v60, %v238_v1  ;;  %v1049_v26 = vrot.slane %v946_v5, 1 }
  0x6a   :  { %v334_v28 = vrot.slane %v11313_v41, 2  ;;  %v10099_v43 = vpack.i.bf16 %v239_v18, %v236_v59  ;;  %v335_v44 = vrot.slane %v162_v53, 2  ;;  %v1222_v47 = vrot.slane %v11324_v3, 2 }
  0x6b   :  { %v1223_v40 = vrot.slane %v11320_v2, 2  ;;  %v1048_v52 = vsel %vm197_vm2, %v1046_v25, %v1047_v7  ;;  %v1050_v51 = vsel %vm197_vm2, %v1047_v7, %v1049_v26  ;;  %v1225_v63 = vrot.slane %v946_v5, 2 }
  0x6c   :  { %v8945_v10 = vunpack.c.l.bf16 %v9017_v12  ;;  %10100 = vrot.lane.b32.xlu0 %v10099_v43, %s10818_s11  ;;  %v10084_v14 = vpack.i.bf16 %v1050_v51, %v1048_v52  ;;  %v336_v55 = vsel %vm294_vm1, %v334_v28, %v335_v44  ;;  %v8946_v1 = vunpack.c.h.bf16 %v9017_v12 }
  0x6d   :  { %v1224_v60 = vsel %vm294_vm1, %v1222_v47, %v1223_v40  ;;  %v10109_v59 = vpack.i.bf16 %v336_v55, %v333_v11  ;;  %v1226_v53 = vsel %vm294_vm1, %v1223_v40, %v1225_v63  ;;  %vm391_vm3 = vcmask 261120  }
  0x6e   :  { %v114_v18 = vrot.slane %v8945_v10, 7  ;;  %10085 = vrot.lane.b32.xlu1 %v10084_v14, %s10818_s11  ;;  %v10094_v46 = vpack.i.bf16 %v1226_v53, %v1224_v60  ;;  %v115_v25 = vrot.slane %v8946_v1, 7  ;;  %vm408_vm4 = vcmask 523264   ;;  %vm11884_vm6 = vmpackc.low %vm391_vm3, %vm391_vm3 }
  0x6f   :  { %vm475_vm5 = vcmask 785408   ;;  %vm10821_vm7 = vmmov 0  }
  0x70   :  { %v11345_v7 = vsel %vm132_vm0, 0.0, %v114_v18  ;;  %v163_v5 = vsel %vm132_vm0, %v114_v18, 0.0  ;;  %10110 = vrot.lane.b32.xlu0 %v10109_v59, %s10817_s30  ;;  %v11350_v26 = vsel %vm132_vm0, 0.0, %v115_v25  ;;  %v164_v12 = vsel %vm132_vm0, %v115_v25, 0.0 }
  0x71   :  { %v337_v11 = vrot.slane %v11345_v7, 2  ;;  %v338_v28 = vrot.slane %v163_v5, 2  ;;  %v340_v43 = vrot.slane %v11350_v26, 2  ;;  %v341_v44 = vrot.slane %v164_v12, 2 }
  0x72   :  { %v240_v47 = vrot.slane %v11345_v7, 1  ;;  %v241_v40 = vrot.slane %v163_v5, 1  ;;  %10095 = vrot.lane.b32.xlu1 %v10094_v46, %s10817_s30  ;;  %v243_v51 = vrot.slane %v11350_v26, 1  ;;  %v244_v63 = vrot.slane %v164_v12, 1 }
  0x73   :  { %v339_v52 = vsel %vm294_vm1, %v337_v11, %v338_v28  ;;  %v342_v10 = vsel %vm294_vm1, %v340_v43, %v341_v44 }
  0x74   :  { %v242_v14 = vsel %vm197_vm2, %v240_v47, %v241_v40  ;;  %v10119_v55 = vpack.i.bf16 %v342_v10, %v339_v52  ;;  %v245_v60 = vsel %vm197_vm2, %v243_v51, %v244_v63 }
  0x75   :  { %v10104_v1 = vpack.i.bf16 %v245_v60, %v242_v14 }
  0x76   :  { %10120 = vrot.lane.b32.xlu0 %v10119_v55, %s10817_s30 }
  0x77   :  { %10105 = vrot.lane.b32.xlu1 %v10104_v1, %s10818_s11 }
  0x80   :  { %v9911_v59 = vpop.permute.xlu1 %9910 }
  0x81   :  { %v9913_v53 = vunpack.i.h.bf16 %v9911_v59  ;;  %v9912_v46 = vunpack.i.l.bf16 %v9911_v59  ;;  %v9901_v18 = vpop.permute.xlu0 %9900 }
  0x82   :  { %v9903_v25 = vunpack.i.h.bf16 %v9901_v18  ;;  %v9902_v5 = vunpack.i.l.bf16 %v9901_v18 }
  0x84   :  { %v9916_v12 = vpop.permute.xlu1 %9915  ;;  %v1333_v11 = vsel %vm391_vm3, %v10909_v21, %v9902_v5  ;;  %v1334_v28 = vsel %vm391_vm3, %v10906_v20, %v9903_v25 }
  0x85   :  { %v9918_v43 = vunpack.i.h.bf16 %v9916_v12  ;;  %v9917_v44 = vunpack.i.l.bf16 %v9916_v12  ;;  %v9906_v47 = vpop.permute.xlu0 %9905  ;;  %v1365_v40 = vsel %vm408_vm4, %v1333_v11, %v9912_v46  ;;  %v1366_v52 = vsel %vm408_vm4, %v1334_v28, %v9913_v53 }
  0x86   :  { %v9908_v51 = vunpack.i.h.bf16 %v9906_v47  ;;  %v9907_v63 = vunpack.i.l.bf16 %v9906_v47  ;;  %v1397_v10 = vpack.c.bf16 %v1366_v52, %v1365_v40 }
  0x88   :  { %v1336_v14 = vsel %vm391_vm3, %v10920_v31, %v9908_v51  ;;  %v1335_v55 = vsel %vm391_vm3, %v10923_v32, %v9907_v63  ;;  %9253 = vmatprep.mubr.msk.bf16.mxu1 %vm475_vm5, %v1397_v10  ;;  %v9926_v21 = vpop.permute.xlu1 %9925 }
  0x89   :  { %v1367_v20 = vsel %vm408_vm4, %v1335_v55, %v9917_v44  ;;  %v1368_v60 = vsel %vm408_vm4, %v1336_v14, %v9918_v43  ;;  %v9928_v46 = vunpack.i.h.bf16 %v9926_v21  ;;  %v9927_v53 = vunpack.i.l.bf16 %v9926_v21 }
  0x8a   :  { %v1398_v1 = vpack.c.bf16 %v1368_v60, %v1367_v20 }
  0x8b   :  { %v9921_v59 = vpop.permute.xlu0 %9920  ;;  %v1338_v44 = vsel %vm391_vm3, %v10943_v49, %v9928_v46  ;;  %v1337_v47 = vsel %vm391_vm3, %v10946_v50, %v9927_v53 }
  0x8c   :  { %v9923_v18 = vunpack.i.h.bf16 %v9921_v59  ;;  %v9922_v25 = vunpack.i.l.bf16 %v9921_v59  ;;  %9254 = vmatmul.mubr.msk.bf16.vlgmr.msra.gmra.mrb[0].mxu1 %vm475_vm5, %v1398_v1  ;;  %v9936_v5 = vpop.permute.xlu1 %9935 }
  0x8d   :  { %v9938_v31 = vunpack.i.h.bf16 %v9936_v5  ;;  %v9937_v12 = vunpack.i.l.bf16 %v9936_v5 }
  0x8e   :  { %v392_v32 = vsel %vm391_vm3, %v10959_v61, %v9922_v25  ;;  %v393_v11 = vsel %vm391_vm3, %v10974_v6, %v9923_v18 }
  0x8f   :  { %v409_v28 = vsel %vm408_vm4, %v392_v32, %v9937_v12  ;;  %v410_v43 = vsel %vm408_vm4, %v393_v11, %v9938_v31 }
  0x90   :  { %v9946_v40 = vpop.permute.xlu1 %9945  ;;  %v425_v52 = vpack.c.bf16 %v410_v43, %v409_v28 }
  0x91   :  { %v9931_v51 = vpop.permute.xlu0 %9930  ;;  %v9948_v63 = vunpack.i.h.bf16 %v9946_v40  ;;  %v9947_v10 = vunpack.i.l.bf16 %v9946_v40 }
  0x92   :  { %9225 = vmatprep.mubr.msk.bf16.mxu0 %vm475_vm5, %v425_v52  ;;  %v9933_v1 = vunpack.i.h.bf16 %v9931_v51  ;;  %v9932_v59 = vunpack.i.l.bf16 %v9931_v51 }
  0x93   :  { %v1370_v61 = vsel %vm408_vm4, %v1338_v44, %v9948_v63  ;;  %v1369_v6 = vsel %vm408_vm4, %v1337_v47, %v9947_v10 }
  0x94   :  { %v1399_v14 = vpack.c.bf16 %v1370_v61, %v1369_v6  ;;  %v395_v11 = vsel %vm391_vm3, %v11000_v36, %v9933_v1  ;;  %v394_v28 = vsel %vm391_vm3, %v10997_v35, %v9932_v59 }
  0x96   :  { %9257 = vmatprep.mubr.msk.bf16.mxu1 %vm475_vm5, %v1399_v14 }
  0x97   :  { %v9941_v55 = vpop.permute.xlu0 %9940  ;;  %v9956_v21 = vpop.permute.xlu1 %9955 }
  0x98   :  { %v9943_v49 = vunpack.i.h.bf16 %v9941_v55  ;;  %v9942_v20 = vunpack.i.l.bf16 %v9941_v55  ;;  %v9958_v60 = vunpack.i.h.bf16 %v9956_v21  ;;  %v9957_v50 = vunpack.i.l.bf16 %v9956_v21 }
  0x9a   :  { %v1340_v46 = vsel %vm391_vm3, %v11027_v0, %v9943_v49  ;;  %v1339_v53 = vsel %vm391_vm3, %v11015_v56, %v9942_v20 }
  0x9b   :  { %v1371_v18 = vsel %vm408_vm4, %v1339_v53, %v9957_v50  ;;  %v1372_v25 = vsel %vm408_vm4, %v1340_v46, %v9958_v60  ;;  %v9951_v5 = vpop.permute.xlu0 %9950 }
  0x9c   :  { %v9953_v31 = vunpack.i.h.bf16 %v9951_v5  ;;  %v9952_v12 = vunpack.i.l.bf16 %v9951_v5  ;;  %v1400_v32 = vpack.c.bf16 %v1372_v25, %v1371_v18 }
  0x9e   :  { %v411_v43 = vsel %vm408_vm4, %v394_v28, %v9952_v12  ;;  %v412_v0 = vsel %vm408_vm4, %v395_v11, %v9953_v31  ;;  %9258 = vmatmul.mubr.msk.bf16.gmra.mrb[4].mxu1 %vm475_vm5, %v1400_v32 }
  0x9f   :  { %v426_v56 = vpack.c.bf16 %v412_v0, %v411_v43  ;;  %v9961_v44 = vpop.permute.xlu0 %9960 }
  0xa0   :  { %v9963_v47 = vunpack.i.h.bf16 %v9961_v44  ;;  %v9962_v40 = vunpack.i.l.bf16 %v9961_v44  ;;  %v9966_v52 = vpop.permute.xlu1 %9965 }
  0xa1   :  { %9226 = vmatmul.mubr.msk.bf16.vlgmr.msra.gmra.mrb[0].mxu0 %vm475_vm5, %v426_v56  ;;  %v9968_v51 = vunpack.i.h.bf16 %v9966_v52  ;;  %v9967_v63 = vunpack.i.l.bf16 %v9966_v52 }
  0xa2   :  { %v1342_v36 = vsel %vm391_vm3, %v11038_v22, %v9963_v47  ;;  %v1341_v35 = vsel %vm391_vm3, %v11044_v24, %v9962_v40 }
  0xa3   :  { %v9971_v10 = vpop.permute.xlu0 %9970  ;;  %v1344_v61 = vsel %vm391_vm3, %v11059_v45, %v9968_v51  ;;  %v1343_v6 = vsel %vm391_vm3, %v11056_v42, %v9967_v63 }
  0xa4   :  { %v9973_v14 = vunpack.i.h.bf16 %v9971_v10  ;;  %v9972_v55 = vunpack.i.l.bf16 %v9971_v10  ;;  %v9976_v21 = vpop.permute.xlu1 %9975 }
  0xa5   :  { %v9978_v49 = vunpack.i.h.bf16 %v9976_v21  ;;  %v9977_v20 = vunpack.i.l.bf16 %v9976_v21 }
  0xa6   :  { %v1373_v60 = vsel %vm408_vm4, %v1341_v35, %v9972_v55  ;;  %v1374_v50 = vsel %vm408_vm4, %v1342_v36, %v9973_v14 }
  0xa7   :  { %v1375_v22 = vsel %vm408_vm4, %v1343_v6, %v9977_v20  ;;  %v1376_v24 = vsel %vm408_vm4, %v1344_v61, %v9978_v49  ;;  %v9981_v1 = vpop.permute.xlu0 %9980  ;;  %v1401_v59 = vpack.c.bf16 %v1374_v50, %v1373_v60 }
  0xa8   :  { %v9983_v46 = vunpack.i.h.bf16 %v9981_v1  ;;  %v9982_v45 = vunpack.i.l.bf16 %v9981_v1  ;;  %v1402_v53 = vpack.c.bf16 %v1376_v24, %v1375_v22 }
  0xa9   :  { %9261 = vmatprep.mubr.msk.bf16.mxu1 %vm475_vm5, %v1401_v59 }
  0xaa   :  { %v9986_v42 = vpop.permute.xlu1 %9985  ;;  %9262 = vmatmul.mubr.msk.bf16.gmra.mrb[8].mxu1 %vm475_vm5, %v1402_v53  ;;  %v1346_v18 = vsel %vm391_vm3, %v11078_v8, %v9983_v46  ;;  %v1345_v25 = vsel %vm391_vm3, %v11081_v9, %v9982_v45 }
  0xab   :  { %v9988_v5 = vunpack.i.h.bf16 %v9986_v42  ;;  %v9987_v31 = vunpack.i.l.bf16 %v9986_v42  ;;  %v9991_v12 = vpop.permute.xlu0 %9990 }
  0xac   :  { %v9993_v32 = vunpack.i.h.bf16 %v9991_v12  ;;  %v9992_v11 = vunpack.i.l.bf16 %v9991_v12 }
  0xad   :  { %v1348_v28 = vsel %vm391_vm3, %v11105_v37, %v9988_v5  ;;  %v1347_v43 = vsel %vm391_vm3, %v11096_v29, %v9987_v31  ;;  %v9032_v31 = vld [vmem:[%s15616_s3 + $0x78] sm:$0xff]  }
  0xae   :  { %v1377_v0 = vsel %vm408_vm4, %v1345_v25, %v9992_v11  ;;  %v1378_v56 = vsel %vm408_vm4, %v1346_v18, %v9993_v32  ;;  %v9996_v44 = vpop.permute.xlu1 %9995 }
  0xaf   :  { %v9998_v8 = vunpack.i.h.bf16 %v9996_v44  ;;  %v9997_v47 = vunpack.i.l.bf16 %v9996_v44  ;;  %v1403_v40 = vpack.c.bf16 %v1378_v56, %v1377_v0  ;;  %v9010_v44 = vunpack.c.h.bf16 %v9032_v31 }
  0xb0   :  { %v10001_v9 = vpop.permute.xlu0 %10000 }
  0xb1   :  { %v1379_v52 = vsel %vm408_vm4, %v1347_v43, %v9997_v47  ;;  %v1380_v51 = vsel %vm408_vm4, %v1348_v28, %v9998_v8  ;;  %v10003_v63 = vunpack.i.h.bf16 %v10001_v9  ;;  %v10002_v36 = vunpack.i.l.bf16 %v10001_v9  ;;  %9265 = vmatprep.mubr.msk.bf16.mxu1 %vm475_vm5, %v1403_v40 }
  0xb2   :  { %v10006_v37 = vpop.permute.xlu1 %10005  ;;  %v1404_v35 = vpack.c.bf16 %v1380_v51, %v1379_v52  ;;  %v9009_v28 = vunpack.c.l.bf16 %v9032_v31 }
  0xb3   :  { %v10008_v29 = vunpack.i.h.bf16 %v10006_v37  ;;  %v10007_v10 = vunpack.i.l.bf16 %v10006_v37  ;;  %v397_v61 = vsel %vm391_vm3, %v11124_v4, %v10003_v63  ;;  %v396_v6 = vsel %vm391_vm3, %v11118_v62, %v10002_v36 }
  0xb4   :  { %v10011_v14 = vpop.permute.xlu0 %10010  ;;  %9266 = vmatmul.mubr.msk.bf16.gmra.mrb[12].mxu1 %vm475_vm5, %v1404_v35  ;;  %v866_v40 = vrot.slane %v9009_v28, 7  ;;  %v867_v63 = vrot.slane %v9010_v44, 7 }
  0xb5   :  { %v10013_v55 = vunpack.i.h.bf16 %v10011_v14  ;;  %v10012_v21 = vunpack.i.l.bf16 %v10011_v14  ;;  %v399_v49 = vsel %vm391_vm3, %v11135_v16, %v10008_v29  ;;  %v398_v20 = vsel %vm391_vm3, %v11130_v13, %v10007_v10  ;;  %v9031_v13 = vld [vmem:[%s15616_s3 + $0x70] sm:$0xff]  }
  0xb6   :  { %v10016_v60 = vpop.permute.xlu1 %10015  ;;  %v9005_v16 = vunpack.c.l.bf16 %v9031_v13  ;;  %v9006_v45 = vunpack.c.h.bf16 %v9031_v13  ;;  %v11470_v37 = vsel %vm132_vm0, 0.0, %v866_v40  ;;  %v11474_v35 = vsel %vm132_vm0, %v866_v40, %v867_v63 }
  0xb7   :  { %v413_v50 = vsel %vm408_vm4, %v396_v6, %v10012_v21  ;;  %v414_v22 = vsel %vm408_vm4, %v397_v61, %v10013_v55  ;;  %v10018_v4 = vunpack.i.h.bf16 %v10016_v60  ;;  %v10017_v24 = vunpack.i.l.bf16 %v10016_v60 }
  0xb8   :  { %v427_v1 = vpack.c.bf16 %v414_v22, %v413_v50  ;;  %v863_v53 = vrot.slane %v9005_v16, 7  ;;  %v864_v42 = vrot.slane %v9006_v45, 7  ;;  %v948_v29 = vsel %vm132_vm0, %v867_v63, 0.0 }
  0xb9   :  { %v415_v62 = vsel %vm408_vm4, %v398_v20, %v10017_v24  ;;  %v416_v59 = vsel %vm408_vm4, %v399_v49, %v10018_v4  ;;  %v1056_v10 = vrot.slane %v11470_v37, 1  ;;  %v1057_v61 = vrot.slane %v11474_v35, 1 }
  0xba   :  { %9229 = vmatprep.mubr.msk.bf16.mxu0 %vm475_vm5, %v427_v1  ;;  %v428_v46 = vpack.c.bf16 %v416_v59, %v415_v62  ;;  %v11452_v18 = vsel %vm132_vm0, %v863_v53, %v864_v42  ;;  %v11455_v25 = vsel %vm132_vm0, 0.0, %v863_v53  ;;  %v947_v5 = vsel %vm132_vm0, %v864_v42, 0.0 }
  0xbb   :  { %v1227_v12 = vrot.slane %v11455_v25, 2  ;;  %v1228_v32 = vrot.slane %v11452_v18, 2  ;;  %v1230_v11 = vrot.slane %v947_v5, 2  ;;  %v1051_v43 = vrot.slane %v11455_v25, 1 }
  0xbc   :  { %9230 = vmatmul.mubr.msk.bf16.gmra.mrb[4].mxu0 %vm475_vm5, %v428_v46  ;;  %v1052_v0 = vrot.slane %v11452_v18, 1  ;;  %v1054_v56 = vrot.slane %v947_v5, 1  ;;  %v1059_v6 = vrot.slane %v948_v29, 1  ;;  %v1232_v14 = vrot.slane %v11470_v37, 2  ;;  %v10021_v24 = vpop.permute.xlu0 %10020 }
  0xbd   :  { %v1229_v8 = vsel %vm294_vm1, %v1227_v12, %v1228_v32  ;;  %v1231_v47 = vsel %vm294_vm1, %v1228_v32, %v1230_v11  ;;  %v1233_v55 = vrot.slane %v11474_v35, 2  ;;  %v1235_v21 = vrot.slane %v948_v29, 2 }
  0xbe   :  { %v10129_v9 = vpack.i.bf16 %v1231_v47, %v1229_v8  ;;  %v1053_v52 = vsel %vm197_vm2, %v1051_v43, %v1052_v0  ;;  %v1055_v51 = vsel %vm197_vm2, %v1052_v0, %v1054_v56  ;;  %v1058_v49 = vsel %vm197_vm2, %v1056_v10, %v1057_v61 }
  0xbf   :  { %v10114_v36 = vpack.i.bf16 %v1055_v51, %v1053_v52  ;;  %v1060_v20 = vsel %vm197_vm2, %v1057_v61, %v1059_v6  ;;  %v1234_v50 = vsel %vm294_vm1, %v1232_v14, %v1233_v55  ;;  %v1236_v22 = vsel %vm294_vm1, %v1233_v55, %v1235_v21 }
  0xc0   :  { %10130 = vrot.lane.b32.xlu0 %v10129_v9, %s10817_s30  ;;  %v10124_v60 = vpack.i.bf16 %v1060_v20, %v1058_v49  ;;  %v10134_v4 = vpack.i.bf16 %v1236_v22, %v1234_v50  ;;  %v10031_v1 = vpop.permute.xlu0 %10030  ;;  %v10023_v62 = vunpack.i.h.bf16 %v10021_v24  ;;  %v10022_v59 = vunpack.i.l.bf16 %v10021_v24 }
  0xc1   :  { %10115 = vrot.lane.b32.xlu1 %v10114_v36, %s10818_s11  ;;  %v10033_v45 = vunpack.i.h.bf16 %v10031_v1  ;;  %v10032_v53 = vunpack.i.l.bf16 %v10031_v1 }
  0xc2   :  { %v1350_v42 = vsel %vm391_vm3, %v11176_v23, %v10023_v62  ;;  %v1349_v5 = vsel %vm391_vm3, %v11172_v15, %v10022_v59  ;;  %v10026_v31 = vpop.permute.xlu1 %10025 }
  0xc3   :  { %v10028_v11 = vunpack.i.h.bf16 %v10026_v31  ;;  %v10027_v28 = vunpack.i.l.bf16 %v10026_v31  ;;  %v1381_v0 = vsel %vm408_vm4, %v1349_v5, %v10032_v53  ;;  %v1382_v56 = vsel %vm408_vm4, %v1350_v42, %v10033_v45 }
  0xc4   :  { %v10041_v46 = vpop.permute.xlu0 %10040  ;;  %v1405_v51 = vpack.c.bf16 %v1382_v56, %v1381_v0 }
  0xc5   :  { %10125 = vrot.lane.b32.xlu1 %v10124_v60, %s10818_s11  ;;  %v10043_v13 = vunpack.i.h.bf16 %v10041_v46  ;;  %v10042_v16 = vunpack.i.l.bf16 %v10041_v46  ;;  %v1352_v23 = vsel %vm391_vm3, %v11198_v57, %v10028_v11  ;;  %v1351_v15 = vsel %vm391_vm3, %v11201_v58, %v10027_v28 }
  0xc6   :  { %9269 = vmatprep.mubr.msk.bf16.mxu1 %vm475_vm5, %v1405_v51 }
  0xc7   :  { %v401_v12 = vsel %vm391_vm3, %v11187_v39, %v10043_v13  ;;  %v400_v32 = vsel %vm391_vm3, %v11184_v38, %v10042_v16  ;;  %v10036_v38 = vpop.permute.xlu1 %10035 }
  0xc8   :  { %v10051_v43 = vpop.permute.xlu0 %10050  ;;  %v10038_v40 = vunpack.i.h.bf16 %v10036_v38  ;;  %v10037_v9 = vunpack.i.l.bf16 %v10036_v38 }
  0xc9   :  { %10135 = vrot.lane.b32.xlu1 %v10134_v4, %s10817_s30  ;;  %v10053_v44 = vunpack.i.h.bf16 %v10051_v43  ;;  %v10052_v8 = vunpack.i.l.bf16 %v10051_v43 }
  0xca   :  { %v1383_v36 = vsel %vm408_vm4, %v1351_v15, %v10037_v9  ;;  %v1384_v29 = vsel %vm408_vm4, %v1352_v23, %v10038_v40 }
  0xcb   :  { %v417_v39 = vsel %vm408_vm4, %v400_v32, %v10052_v8  ;;  %v418_v47 = vsel %vm408_vm4, %v401_v12, %v10053_v44  ;;  %v10046_v10 = vpop.permute.xlu1 %10045  ;;  %v1406_v61 = vpack.c.bf16 %v1384_v29, %v1383_v36 }
  0xcc   :  { %v10061_v52 = vpop.permute.xlu0 %10060  ;;  %v429_v63 = vpack.c.bf16 %v418_v47, %v417_v39  ;;  %v10048_v6 = vunpack.i.h.bf16 %v10046_v10  ;;  %v10047_v14 = vunpack.i.l.bf16 %v10046_v10 }
  0xcd   :  { %v10063_v57 = vunpack.i.h.bf16 %v10061_v52  ;;  %v10062_v58 = vunpack.i.l.bf16 %v10061_v52  ;;  %9270 = vmatmul.mubr.msk.bf16.gmra.mrb[16].mxu1 %vm475_vm5, %v1406_v61 }
  0xce   :  { %9233 = vmatprep.mubr.msk.bf16.mxu0 %vm475_vm5, %v429_v63  ;;  %v403_v21 = vsel %vm391_vm3, %v11229_v54, %v10048_v6  ;;  %v402_v49 = vsel %vm391_vm3, %v11225_v48, %v10047_v14 }
  0xcf   :  { %v10056_v20 = vpop.permute.xlu1 %10055  ;;  %v419_v60 = vsel %vm408_vm4, %v402_v49, %v10062_v58  ;;  %v420_v50 = vsel %vm408_vm4, %v403_v21, %v10063_v57 }
  0xd0   :  { %v10071_v55 = vpop.permute.xlu0 %10070  ;;  %v430_v4 = vpack.c.bf16 %v420_v50, %v419_v60  ;;  %v10058_v24 = vunpack.i.h.bf16 %v10056_v20  ;;  %v10057_v1 = vunpack.i.l.bf16 %v10056_v20 }
  0xd1   :  { %v10073_v16 = vunpack.i.h.bf16 %v10071_v55  ;;  %v10072_v54 = vunpack.i.l.bf16 %v10071_v55 }
  0xd2   :  { %9234 = vmatmul.mubr.msk.bf16.gmra.mrb[8].mxu0 %vm475_vm5, %v430_v4  ;;  %v1354_v48 = vsel %vm391_vm3, %v11253_v33, %v10058_v24  ;;  %v1353_v45 = vsel %vm391_vm3, %v11246_v27, %v10057_v1 }
  0xd3   :  { %v1385_v28 = vsel %vm408_vm4, %v1353_v45, %v10072_v54  ;;  %v1386_v43 = vsel %vm408_vm4, %v1354_v48, %v10073_v16  ;;  %v11560_v48 = vld [vmem:[%s15618_s5] ss:$0 sm:$0xff] }
  0xd4   :  { %v10081_v22 = vpop.permute.xlu0 %10080  ;;  %v1407_v23 = vpack.c.bf16 %v1386_v43, %v1385_v28 }
  0xd5   :  { %v10083_v53 = vunpack.i.h.bf16 %v10081_v22  ;;  %v10082_v42 = vunpack.i.l.bf16 %v10081_v22 }
  0xd6   :  { %v10066_v62 = vpop.permute.xlu1 %10065  ;;  %9273 = vmatprep.mubr.msk.bf16.mxu1 %vm475_vm5, %v1407_v23 }
  0xd7   :  { %v10068_v59 = vunpack.i.h.bf16 %v10066_v62  ;;  %v10067_v46 = vunpack.i.l.bf16 %v10066_v62 }
  0xd8   :  { %v10091_v13 = vpop.permute.xlu0 %10090 }
  0xd9   :  { %v1356_v5 = vsel %vm391_vm3, %v11281_v30, %v10068_v59  ;;  %v1355_v31 = vsel %vm391_vm3, %v11284_v34, %v10067_v46  ;;  %v10093_v0 = vunpack.i.h.bf16 %v10091_v13  ;;  %v10092_v33 = vunpack.i.l.bf16 %v10091_v13 }
  0xda   :  { %v10076_v12 = vpop.permute.xlu1 %10075  ;;  %v1358_v30 = vsel %vm391_vm3, %v11274_v17, %v10083_v53  ;;  %v1357_v34 = vsel %vm391_vm3, %v11270_v19, %v10082_v42 }
  0xdb   :  { %v10078_v32 = vunpack.i.h.bf16 %v10076_v12  ;;  %v10077_v11 = vunpack.i.l.bf16 %v10076_v12  ;;  %v1389_v38 = vsel %vm408_vm4, %v1357_v34, %v10092_v33  ;;  %v1390_v40 = vsel %vm408_vm4, %v1358_v30, %v10093_v0 }
  0xdc   :  { %v1409_v57 = vpack.c.bf16 %v1390_v40, %v1389_v38 }
  0xdd   :  { %v1387_v56 = vsel %vm408_vm4, %v1355_v31, %v10077_v11  ;;  %v1388_v27 = vsel %vm408_vm4, %v1356_v5, %v10078_v32 }
  0xde   :  { %v10101_v44 = vpop.permute.xlu0 %10100  ;;  %v1408_v47 = vpack.c.bf16 %v1388_v27, %v1387_v56 }
  0xdf   :  { %v10103_v9 = vunpack.i.h.bf16 %v10101_v44  ;;  %v10102_v52 = vunpack.i.l.bf16 %v10101_v44 }
  0xe0   :  { %v10086_v8 = vpop.permute.xlu1 %10085  ;;  %9274 = vmatmul.mubr.msk.bf16.gmra.mrb[20].mxu1 %vm475_vm5, %v1408_v47 }
  0xe1   :  { %v10088_v15 = vunpack.i.h.bf16 %v10086_v8  ;;  %v10087_v39 = vunpack.i.l.bf16 %v10086_v8  ;;  %v405_v14 = vsel %vm391_vm3, %v11313_v41, %v10103_v9  ;;  %9277 = vmatprep.mubr.msk.bf16.mxu1 %vm475_vm5, %v1409_v57 }
  0xe2   :  { %v10111_v63 = vpop.permute.xlu0 %10110 }
  0xe3   :  { %v1360_v51 = vsel %vm391_vm3, %v11320_v2, %v10088_v15  ;;  %v1359_v17 = vsel %vm391_vm3, %v11324_v3, %v10087_v39  ;;  %v10113_v58 = vunpack.i.h.bf16 %v10111_v63  ;;  %v10112_v10 = vunpack.i.l.bf16 %v10111_v63  ;;  %v15722_v2 = vld [vmem:[#allocation6_spill] sm:$0xff] }
  0xe4   :  { %v10096_v19 = vpop.permute.xlu1 %10095  ;;  %v404_v55 = vsel %vm391_vm3, %v15722_v2, %v10102_v52 }
  0xe5   :  { %v10098_v36 = vunpack.i.h.bf16 %v10096_v19  ;;  %v10097_v29 = vunpack.i.l.bf16 %v10096_v19  ;;  %v421_v60 = vsel %vm408_vm4, %v404_v55, %v10112_v10  ;;  %v422_v50 = vsel %vm408_vm4, %v405_v14, %v10113_v58 }
  0xe6   :  { %v431_v59 = vpack.c.bf16 %v422_v50, %v421_v60 }
  0xe7   :  { %v1391_v61 = vsel %vm408_vm4, %v1359_v17, %v10097_v29  ;;  %v1392_v6 = vsel %vm408_vm4, %v1360_v51, %v10098_v36 }
  0xe8   :  { %v1410_v20 = vpack.c.bf16 %v1392_v6, %v1391_v61  ;;  %v10121_v22 = vpop.permute.xlu0 %10120  ;;  %9237 = vmatprep.mubr.msk.bf16.mxu0 %vm475_vm5, %v431_v59 }
  0xe9   :  { %v10106_v3 = vpop.permute.xlu1 %10105  ;;  %v10123_v4 = vunpack.i.h.bf16 %v10121_v22  ;;  %v10122_v24 = vunpack.i.l.bf16 %v10121_v22 }
  0xea   :  { %v10108_v21 = vunpack.i.h.bf16 %v10106_v3  ;;  %v10107_v49 = vunpack.i.l.bf16 %v10106_v3  ;;  %9278 = vmatmul.mubr.msk.bf16.gmra.mrb[24].mxu1 %vm475_vm5, %v1410_v20 }
  0xec   :  { %v407_v41 = vsel %vm391_vm3, %v11350_v26, %v10108_v21  ;;  %v406_v1 = vsel %vm391_vm3, %v11345_v7, %v10107_v49 }
  0xed   :  { %v423_v16 = vsel %vm408_vm4, %v406_v1, %v10122_v24  ;;  %v424_v54 = vsel %vm408_vm4, %v407_v41, %v10123_v4 }
  0xee   :  { %v432_v26 = vpack.c.bf16 %v424_v54, %v423_v16 }
  0xf0   :  { %9238 = vmatmul.mubr.msk.bf16.gmra.mrb[12].mxu0 %vm475_vm5, %v432_v26 }
 0x132   :  { %v10131_v45 = vpop.permute.xlu0 %10130 }
 0x133   :  { %v10116_v62 = vpop.permute.xlu1 %10115  ;;  %v10133_v53 = vunpack.i.h.bf16 %v10131_v45  ;;  %v10132_v42 = vunpack.i.l.bf16 %v10131_v45 }
 0x134   :  { %v10118_v46 = vunpack.i.h.bf16 %v10116_v62  ;;  %v10117_v13 = vunpack.i.l.bf16 %v10116_v62 }
 0x136   :  { %v1362_v31 = vsel %vm391_vm3, %v11452_v18, %v10118_v46  ;;  %v1361_v12 = vsel %vm391_vm3, %v11455_v25, %v10117_v13 }
 0x137   :  { %v10126_v7 = vpop.permute.xlu1 %10125  ;;  %v1393_v25 = vsel %vm408_vm4, %v1361_v12, %v10132_v42  ;;  %v1394_v30 = vsel %vm408_vm4, %v1362_v31, %v10133_v53 }
 0x138   :  { %v10128_v32 = vunpack.i.h.bf16 %v10126_v7  ;;  %v10127_v11 = vunpack.i.l.bf16 %v10126_v7  ;;  %v1411_v23 = vpack.c.bf16 %v1394_v30, %v1393_v25  ;;  %v15625_v25 = vmov 0.0|0.0  }
 0x139   :  { %9621 = vmatprep.subr.bf16.mxu0 %v15625_v25  ;;  %9645 = vmatprep.subr.bf16.mxu1 %v15625_v25 }
 0x13a   :  { %v1364_v33 = vsel %vm391_vm3, %v11474_v35, %v10128_v32  ;;  %v1363_v18 = vsel %vm391_vm3, %v11470_v37, %v10127_v11  ;;  %9281 = vmatprep.mubr.msk.bf16.mxu1 %vm475_vm5, %v1411_v23 }
 0x13b   :  { %v10136_v44 = vpop.permute.xlu1 %10135 }
 0x13c   :  { %v10138_v34 = vunpack.i.h.bf16 %v10136_v44  ;;  %v10137_v8 = vunpack.i.l.bf16 %v10136_v44 }
 0x13e   :  { %v1395_v35 = vsel %vm408_vm4, %v1363_v18, %v10137_v8  ;;  %v1396_v15 = vsel %vm408_vm4, %v1364_v33, %v10138_v34 }
 0x13f   :  { %v1412_v39 = vpack.c.bf16 %v1396_v15, %v1395_v35 }
 0x141   :  { %9282 = vmatmul.mubr.msk.bf16.gmra.mrb[28].mxu1 %vm475_vm5, %v1412_v39 }
 0x15f   :  { %v9255_v5 = vpop.f32.mrb[0].mxu1 }
 0x160   :  { %v1504_v28 = vadd.f32 %v9255_v5, %v11560_v48  ;;  %v1495_v43 = vpop.f32.mrb[1].mxu1 }
 0x161   :  { %v9256_v0 = vpop.f32.mrb[2].mxu1  ;;  %v1496_v19 = vadd.f32 %v11560_v48, %v1495_v43 }
 0x162   :  { %v11570_v56 = vmax.f32 %v1504_v28, 0.0  ;;  %v1498_v27 = vpop.f32.mrb[3].mxu1  ;;  %v1507_v58 = vadd.f32 %v9256_v0, %v11560_v48 }
 0x163   :  { %v11599_v57 = vmax.f32 %v1496_v19, 0.0  ;;  %v1499_v21 = vadd.f32 %v11560_v48, %v1498_v27 }
 0x164   :  { %1690 = vrot.lane.b32.xlu0 %v11570_v56, %s10819_s16  ;;  %v11612_v14 = vmax.f32 %v1507_v58, 0.0  ;;  %v2220_v13 = vmul.f32 %v11570_v56, %v11570_v56 }
 0x165   :  { %v11639_v24 = vmax.f32 %v1499_v21, 0.0  ;;  %v2214_v54 = vmul.f32 %v11599_v57, %v11599_v57 }
 0x166   :  { %v2328_v16 = vsel %vm391_vm3, %v2220_v13, 0.0  ;;  %v2221_v45 = vmul.f32 %v11612_v14, %v11612_v14 }
 0x167   :  { %v2310_v26 = vsel %vm391_vm3, %v2214_v54, 0.0  ;;  %v2215_v7 = vmul.f32 %v11639_v24, %v11639_v24 }
 0x168   :  { %1786 = vrot.lane.b32.xlu0 %v11570_v56, %s10817_s30  ;;  %v2331_v42 = vsel %vm391_vm3, %v2221_v45, 0.0 }
 0x169   :  { %v2313_v31 = vsel %vm391_vm3, %v2215_v7, 0.0 }
 0x171   :  { %v11584_v37 = vpop.f32.mrb[4].mxu1 }
 0x172   :  { %v1511_v47 = vpop.f32.mrb[5].mxu1  ;;  %v1520_v32 = vadd.f32 %v11584_v37, %v11560_v48 }
 0x173   :  { %v11586_v38 = vpop.f32.mrb[6].mxu1  ;;  %v1512_v12 = vadd.f32 %v11560_v48, %v1511_v47 }
 0x174   :  { %v9227_v40 = vpop.f32.mrb[0].mxu0  ;;  %v11588_v9 = vpop.f32.mrb[7].mxu1  ;;  %v1523_v28 = vadd.f32 %v11586_v38, %v11560_v48  ;;  %v11681_v43 = vmax.f32 %v1520_v32, 0.0 }
 0x175   :  { %v543_v52 = vadd.f32 %v9227_v40, %v11560_v48  ;;  %v534_v51 = vpop.f32.mrb[1].mxu0  ;;  %v11675_v11 = vmax.f32 %v1512_v12, 0.0  ;;  %v1515_v33 = vadd.f32 %v11560_v48, %v11588_v9 }
 0x176   :  { %v9228_v17 = vpop.f32.mrb[2].mxu0  ;;  %v535_v36 = vadd.f32 %v11560_v48, %v534_v51  ;;  %v11683_v0 = vmax.f32 %v1523_v28, 0.0 }
 0x177   :  { %v11592_v63 = vmax.f32 %v543_v52, 0.0  ;;  %v537_v29 = vpop.f32.mrb[3].mxu0  ;;  %v546_v3 = vadd.f32 %v9228_v17, %v11560_v48  ;;  %v11696_v18 = vmax.f32 %v1515_v33, 0.0  ;;  %v2226_v40 = vmul.f32 %v11675_v11, %v11675_v11 }
 0x178   :  { %v11602_v10 = vmax.f32 %v535_v36, 0.0  ;;  %v538_v20 = vadd.f32 %v11560_v48, %v537_v29 }
 0x179   :  { %681 = vrot.lane.b32.xlu1 %v11592_v63, %s10817_s30  ;;  %633 = vrot.lane.b32.xlu0 %v11592_v63, %s10819_s16  ;;  %v11628_v49 = vmax.f32 %v546_v3, 0.0  ;;  %v2346_v52 = vsel %vm391_vm3, %v2226_v40, 0.0  ;;  %v2227_v51 = vmul.f32 %v11696_v18, %v11696_v18 }
 0x17a   :  { %v11641_v41 = vmax.f32 %v538_v20, 0.0  ;;  %v1878_v53 = vmul.f32 %v11602_v10, %v11602_v10 }
 0x17b   :  { %v2349_v36 = vsel %vm391_vm3, %v2227_v51, 0.0 }
 0x17c   :  { %v1926_v5 = vsel %vm391_vm3, %v1878_v53, 0.0 }
 0x17d   :  { %1686 = vrot.lane.b32.xlu0 %v11599_v57, %s10819_s16  ;;  %677 = vrot.lane.b32.xlu1 %v11602_v10, %s10817_s30  ;;  %v11608_v61 = vpop.f32.mrb[8].mxu1 }
 0x17e   :  { %v11610_v6 = vpop.f32.mrb[9].mxu1  ;;  %v1536_v30 = vadd.f32 %v11608_v61, %v11560_v48 }
 0x17f   :  { %v11614_v2 = vpop.f32.mrb[10].mxu1  ;;  %v1528_v21 = vadd.f32 %v11560_v48, %v11610_v6 }
 0x180   :  { %v11616_v55 = vpop.f32.mrb[11].mxu1  ;;  %v11710_v34 = vmax.f32 %v1536_v30, 0.0  ;;  %v1539_v8 = vadd.f32 %v11614_v2, %v11560_v48 }
 0x181   :  { %1782 = vrot.lane.b32.xlu0 %v11599_v57, %s10817_s30  ;;  %1692 = vrot.lane.b32.xlu1 %v11612_v14, %s10819_s16  ;;  %v1531_v35 = vadd.f32 %v11560_v48, %v11616_v55 }
 0x182   :  { %v11716_v23 = vmax.f32 %v1539_v8, 0.0 }
 0x183   :  { %v11722_v15 = vmax.f32 %v1531_v35, 0.0 }
 0x185   :  { %1788 = vrot.lane.b32.xlu1 %v11612_v14, %s10817_s30  ;;  %629 = vrot.lane.b32.xlu0 %v11602_v10, %s10819_s16 }
 0x187   :  { %v11631_v60 = vpop.f32.mrb[12].mxu1 }
 0x188   :  { %v1543_v50 = vpop.f32.mrb[13].mxu1 }
 0x189   :  { %635 = vrot.lane.b32.xlu1 %v11628_v49, %s10819_s16  ;;  %683 = vrot.lane.b32.xlu0 %v11628_v49, %s10817_s30  ;;  %v11637_v22 = vpop.f32.mrb[14].mxu1  ;;  %v1544_v39 = vadd.f32 %v11560_v48, %v1543_v50 }
 0x18a   :  { %v1546_v4 = vpop.f32.mrb[15].mxu1 }
 0x18b   :  { %v11727_v37 = vmax.f32 %v1544_v39, 0.0  ;;  %v1547_v47 = vadd.f32 %v11560_v48, %v1546_v4 }
 0x18d   :  { %1688 = vrot.lane.b32.xlu1 %v11639_v24, %s10819_s16  ;;  %631 = vrot.lane.b32.xlu0 %v11641_v41, %s10819_s16  ;;  %15724 = vst [vmem:[#allocation7_spill] sm:$0xff] %v11727_v37  ;;  %v11732_v38 = vmax.f32 %v1547_v47, 0.0 }
 0x18f   :  { %v11647_v1 = vpop.f32.mrb[4].mxu0  ;;  %15725 = vst [vmem:[#allocation8_spill] sm:$0xff] %v11732_v38 }
 0x190   :  { %v550_v62 = vpop.f32.mrb[5].mxu0 }
 0x191   :  { %1784 = vrot.lane.b32.xlu1 %v11639_v24, %s10817_s30  ;;  %679 = vrot.lane.b32.xlu0 %v11641_v41, %s10817_s30  ;;  %v11653_v59 = vpop.f32.mrb[6].mxu0  ;;  %v551_v27 = vadd.f32 %v11560_v48, %v550_v62  ;;  %v11771_v62 = vmax.f32 %v1528_v21, 0.0 }
 0x192   :  { %v11655_v46 = vpop.f32.mrb[7].mxu0 }
 0x193   :  { %v11698_v44 = vmax.f32 %v551_v27, 0.0 }
 0x195   :  { %15723 = vst [vmem:[#allocation6_spill] sm:$0xff] %v11698_v44 }
 0x1b0   :  { %2329 = vadd.xlane.f32.xlu0 %v2328_v16  ;;  %v11775_v16 = vpop.f32.mrb[16].mxu1 }
 0x1b1   :  { %v11779_v6 = vpop.f32.mrb[17].mxu1 }
 0x1b4   :  { %2311 = vadd.xlane.f32.xlu0 %v2310_v26  ;;  %v11784_v26 = vpop.f32.mrb[18].mxu1 }
 0x1b5   :  { %2332 = vadd.xlane.f32.xlu1 %v2331_v42  ;;  %v11788_v42 = vpop.f32.mrb[19].mxu1 }
 0x1b6   :  { %v11810_v27 = vpop.f32.mrb[20].mxu1 }
 0x1b7   :  { %15733 = vst [vmem:[#allocation16_spill] sm:$0xff] %v11810_v27  ;;  %v11812_v30 = vpop.f32.mrb[21].mxu1 }
 0x1b8   :  { %1927 = vadd.xlane.f32.xlu0 %v1926_v5  ;;  %15734 = vst [vmem:[#allocation17_spill] sm:$0xff] %v11812_v30  ;;  %v11814_v8 = vpop.f32.mrb[22].mxu1 }
 0x1b9   :  { %2314 = vadd.xlane.f32.xlu1 %v2313_v31  ;;  %v11795_v31 = vpop.f32.mrb[8].mxu0  ;;  %15735 = vst [vmem:[#allocation18_spill] sm:$0xff] %v11814_v8  ;;  %v11816_v35 = vpop.f32.mrb[23].mxu1 }
 0x1ba   :  { %15729 = vst [vmem:[#allocation12_spill] sm:$0xff] %v11795_v31  ;;  %v11797_v12 = vpop.f32.mrb[9].mxu0  ;;  %15736 = vst [vmem:[#allocation19_spill] sm:$0xff] %v11816_v35 }
 0x1bb   :  { %15730 = vst [vmem:[#allocation13_spill] sm:$0xff] %v11797_v12  ;;  %v11802_v28 = vpop.f32.mrb[10].mxu0 }
 0x1bc   :  { %15731 = vst [vmem:[#allocation14_spill] sm:$0xff] %v11802_v28  ;;  %v11804_v33 = vpop.f32.mrb[11].mxu0 }
 0x1bd   :  { %15732 = vst [vmem:[#allocation15_spill] sm:$0xff] %v11804_v33  ;;  %v11822_v47 = vpop.f32.mrb[24].mxu1 }
 0x1be   :  { %15737 = vst [vmem:[#allocation20_spill] sm:$0xff] %v11822_v47  ;;  %v11824_v40 = vpop.f32.mrb[25].mxu1 }
 0x1bf   :  { %15738 = vst [vmem:[#allocation21_spill] sm:$0xff] %v11824_v40 }
 0x1ca   :  { %1694 = vrot.lane.b32.xlu1 %v11675_v11, %s10819_s16 }
 0x1ce   :  { %1700 = vrot.lane.b32.xlu1 %v11683_v0, %s10819_s16  ;;  %1698 = vrot.lane.b32.xlu0 %v11681_v43, %s10819_s16 }
 0x1d2   :  { %1796 = vrot.lane.b32.xlu1 %v11683_v0, %s10817_s30  ;;  %1794 = vrot.lane.b32.xlu0 %v11681_v43, %s10817_s30 }
 0x1d6   :  { %1792 = vrot.lane.b32.xlu1 %v11696_v18, %s10817_s30  ;;  %1790 = vrot.lane.b32.xlu0 %v11675_v11, %s10817_s30  ;;  %v11745_v17 = vpop.permute.xlu0 %1690 }
 0x1d7   :  { %v2222_v3 = vmul.f32 %v11745_v17, %v11745_v17 }
 0x1d9   :  { %v2334_v50 = vsel %vm391_vm3, %v2222_v3, 0.0 }
 0x1da   :  { %637 = vrot.lane.b32.xlu0 %v11698_v44, %s10819_s16  ;;  %v11750_v29 = vpop.permute.xlu0 %1786 }
 0x1db   :  { %v2224_v4 = vmul.f32 %v11750_v29, %v11750_v29 }
 0x1dd   :  { %v2340_v54 = vsel %vm391_vm3, %v2224_v4, 0.0 }
 0x1de   :  { %1696 = vrot.lane.b32.xlu0 %v11696_v18, %s10819_s16 }
 0x1e2   :  { %1802 = vrot.lane.b32.xlu0 %v11710_v34, %s10817_s30 }
 0x1e6   :  { %1708 = vrot.lane.b32.xlu0 %v11716_v23, %s10819_s16 }
 0x1ea   :  { %1704 = vrot.lane.b32.xlu0 %v11722_v15, %s10819_s16 }
 0x1eb   :  { %v11740_v9 = vpop.permute.xlu1 %681  ;;  %v11754_v61 = vpop.permute.xlu0 %633 }
 0x1ec   :  { %15726 = vst [vmem:[#allocation9_spill] sm:$0xff] %v11740_v9  ;;  %15727 = vst [vmem:[#allocation10_spill] sm:$0xff] %v11754_v61 }
 0x1ee   :  { %1710 = vrot.lane.b32.xlu0 %v11727_v37, %s10819_s16 }
 0x1ef   :  { %v11747_v19 = vpop.permute.xlu1 %677  ;;  %v11758_v55 = vpop.permute.xlu0 %1686 }
 0x1f2   :  { %1808 = vrot.lane.b32.xlu0 %v11732_v38, %s10817_s30 }
 0x1f3   :  { %v11752_v58 = vpop.permute.xlu1 %1692  ;;  %v11773_v13 = vpop.permute.xlu0 %1782 }
 0x1f4   :  { %v2218_v45 = vmul.f32 %v11773_v13, %v11773_v13 }
 0x1f6   :  { %v2322_v5 = vsel %vm391_vm3, %v2218_v45, 0.0 }
 0x1f7   :  { %v11756_v2 = vpop.permute.xlu1 %1788  ;;  %v11818_v39 = vpop.permute.xlu0 %629 }
 0x1fa   :  { %2347 = vadd.xlane.f32.xlu1 %v2346_v52  ;;  %v1555_v52 = vadd.f32 %v11637_v22, %v11560_v48 }
 0x1fb   :  { %v11764_v20 = vpop.permute.xlu1 %635  ;;  %v11828_v51 = vpop.permute.xlu0 %683 }
 0x1fc   :  { %15728 = vst [vmem:[#allocation11_spill] sm:$0xff] %v11764_v20  ;;  %15739 = vst [vmem:[#allocation22_spill] sm:$0xff] %v11828_v51  ;;  %v11834_v21 = vmax.f32 %v1555_v52, 0.0 }
 0x1fe   :  { %2350 = vadd.xlane.f32.xlu1 %v2349_v36  ;;  %v11830_v36 = vpop.f32.mrb[26].mxu1  ;;  %15742 = vst [vmem:[#allocation25_spill] sm:$0xff] %v11834_v21 }
 0x1ff   :  { %v11786_v53 = vpop.permute.xlu1 %1688  ;;  %15740 = vst [vmem:[#allocation23_spill] sm:$0xff] %v11830_v36  ;;  %v11832_v3 = vpop.f32.mrb[27].mxu1 }
 0x200   :  { %v2217_v7 = vmul.f32 %v11786_v53, %v11786_v53  ;;  %15741 = vst [vmem:[#allocation24_spill] sm:$0xff] %v11832_v3  ;;  %v11838_v4 = vpop.permute.xlu0 %631  ;;  %v2223_v3 = vmul.f32 %v11752_v58, %v11752_v58 }
 0x202   :  { %v2319_v32 = vsel %vm391_vm3, %v2217_v7, 0.0 }
 0x204   :  { %v11848_v7 = vpop.permute.xlu0 %679 }
 0x20f   :  { %1706 = vrot.lane.b32.xlu1 %v11710_v34, %s10819_s16 }
 0x211   :  { %2335 = vadd.xlane.f32.xlu0 %v2334_v50  ;;  %v11836_v50 = vpop.f32.mrb[12].mxu0 }
 0x212   :  { %15743 = vst [vmem:[#allocation26_spill] sm:$0xff] %v11836_v50  ;;  %v11858_v50 = vpop.permute.xlu1 %1784 }
 0x213   :  { %1702 = vrot.lane.b32.xlu1 %v11771_v62, %s10819_s16 }
 0x215   :  { %2341 = vadd.xlane.f32.xlu0 %v2340_v54  ;;  %v11842_v54 = vpop.f32.mrb[13].mxu0 }
 0x216   :  { %15744 = vst [vmem:[#allocation27_spill] sm:$0xff] %v11842_v54  ;;  %v11844_v45 = vpop.f32.mrb[14].mxu0 }
 0x217   :  { %1798 = vrot.lane.b32.xlu1 %v11771_v62, %s10817_s30  ;;  %15745 = vst [vmem:[#allocation28_spill] sm:$0xff] %v11844_v45  ;;  %v11846_v22 = vpop.f32.mrb[15].mxu0 }
 0x218   :  { %15746 = vst [vmem:[#allocation29_spill] sm:$0xff] %v11846_v22  ;;  %v2216_v22 = vmul.f32 %v11758_v55, %v11758_v55 }
 0x219   :  { %2323 = vadd.xlane.f32.xlu0 %v2322_v5  ;;  %v11850_v5 = vpop.f32.mrb[28].mxu1 }
 0x21a   :  { %15747 = vst [vmem:[#allocation30_spill] sm:$0xff] %v11850_v5  ;;  %v2316_v40 = vsel %vm391_vm3, %v2216_v22, 0.0  ;;  %v2337_v22 = vsel %vm391_vm3, %v2223_v3, 0.0  ;;  %v15753_v3 = vmov 0.0|0.0  }
 0x21b   :  { %1804 = vrot.lane.b32.xlu1 %v11716_v23, %s10817_s30 }
 0x21d   :  { %2320 = vadd.xlane.f32.xlu0 %v2319_v32  ;;  %v11852_v32 = vpop.f32.mrb[29].mxu1 }
 0x21e   :  { %15748 = vst [vmem:[#allocation31_spill] sm:$0xff] %v11852_v32  ;;  %v11856_v25 = vpop.f32.mrb[30].mxu1 }
 0x21f   :  { %1800 = vrot.lane.b32.xlu1 %v11722_v15, %s10817_s30  ;;  %15749 = vst [vmem:[#allocation32_spill] sm:$0xff] %v11856_v25  ;;  %v11860_v36 = vpop.f32.mrb[31].mxu1  ;;  %v1879_v25 = vmul.f32 %v11818_v39, %v11818_v39 }
 0x220   :  { %15750 = vst [vmem:[#allocation33_spill] sm:$0xff] %v11860_v36 }
 0x223   :  { %1806 = vrot.lane.b32.xlu1 %v11727_v37, %s10817_s30  ;;  %v2232_v37 = vmul.f32 %v11681_v43, %v11681_v43 }
 0x227   :  { %1712 = vrot.lane.b32.xlu1 %v11732_v38, %s10819_s16 }
 0x233   :  { %1716 = vrot.lane.b32.xlu0 %v11834_v21, %s10819_s16 }
 0x23d   :  { %v11854_v52 = vpop.xlane.xlu0 %2329 }
 0x241   :  { %v2312_v47 = vpop.xlane.xlu0 %2311 }
 0x242   :  { %v11862_v54 = vpop.xlane.xlu1 %2332  ;;  %v2598_v45 = vadd.f32 1e-12, %v2312_v47  ;;  %v1929_v47 = vsel %vm391_vm3, %v1879_v25, 0.0 }
 0x244   :  { %10151 = vrsqrt.f32 %v2598_v45 }
 0x246   :  { %v2315_v28 = vpop.xlane.xlu1 %2314 }
 0x247   :  { %v2599_v5 = vadd.f32 1e-12, %v2315_v28 }
 0x249   :  { %10153 = vrsqrt.f32 %v2599_v5  ;;  %v2225_v5 = vmul.f32 %v11756_v2, %v11756_v2 }
 0x24a   :  { %v11866_v32 = vpop.permute.xlu1 %1694 }
 0x24b   :  { %2317 = vadd.xlane.f32.xlu1 %v2316_v40  ;;  %v2228_v36 = vmul.f32 %v11866_v32, %v11866_v32 }
 0x24d   :  { %v2352_v28 = vsel %vm391_vm3, %v2228_v36, 0.0  ;;  %v2219_v36 = vmul.f32 %v11858_v50, %v11858_v50 }
 0x24e   :  { %v10152_v45 = vpop.eup %10151 }
 0x24f   :  { %1930 = vadd.xlane.f32.xlu1 %v1929_v47  ;;  %v2790_v40 = vmul.f32 %v10152_v45, %v11599_v57  ;;  %v2343_v47 = vsel %vm391_vm3, %v2225_v5, 0.0  ;;  %v2325_v57 = vsel %vm391_vm3, %v2219_v36, 0.0  ;;  %v11903_v45 = vpop.xlane.xlu0 %1927 }
 0x252   :  { %2353 = vadd.xlane.f32.xlu0 %v2352_v28 }
 0x253   :  { %v10154_v31 = vpop.eup %10153  ;;  %2338 = vadd.xlane.f32.xlu1 %v2337_v22  ;;  %v11911_v22 = vpop.permute.xlu0 %1698 }
 0x254   :  { %v2791_v8 = vmul.f32 %v10154_v31, %v11639_v24  ;;  %v1552_v24 = vadd.f32 %v11631_v60, %v11560_v48  ;;  %15756 = vst [vmem:[#allocation36_spill] sm:$0xff] %v11911_v22 }
 0x256   :  { %v9622_v28 = vpack.c.bf16 %v2791_v8, %v2790_v40  ;;  %v11899_v31 = vmax.f32 %v1552_v24, 0.0  ;;  %v554_v8 = vadd.f32 %v11560_v48, %v11655_v46  ;;  %v11917_v40 = vpop.permute.xlu1 %1700  ;;  %v15630_v46 = vmov 0.0  }
 0x257   :  { %2344 = vadd.xlane.f32.xlu1 %v2343_v47  ;;  %v11915_v60 = vpop.permute.xlu0 %1794  ;;  %9297 = vmatprep.mubr.msk.f32.mxu0 %vm10821_vm7, %v15630_v46 }
 0x258   :  { %9624 = vmatpush3.bf16.xpose.msk.msra.mxu0 %vm11884_vm6, %v9622_v28  ;;  %15754 = vst [vmem:[#allocation34_spill] sm:$0xff] %v11899_v31  ;;  %v11909_v5 = vmax.f32 %v554_v8, 0.0  ;;  %9339 = vmatprep.mubr.msk.f32.mxu1 %vm10821_vm7, %v15630_v46 }
 0x259   :  { %9625 = vmatprep.subr.bf16.mxu0 %v15753_v3 }
 0x25a   :  { %15755 = vst [vmem:[#allocation35_spill] sm:$0xff] %v11909_v5  ;;  %v11925_v47 = vpop.permute.xlu1 %1796 }
 0x25b   :  { %2326 = vadd.xlane.f32.xlu1 %v2325_v57  ;;  %v11923_v36 = vpop.permute.xlu0 %1790 }
 0x25c   :  { %v2230_v51 = vmul.f32 %v11923_v36, %v11923_v36 }
 0x25e   :  { %v11929_v57 = vpop.permute.xlu1 %1792  ;;  %v2358_v20 = vsel %vm391_vm3, %v2230_v51, 0.0 }
 0x25f   :  { %v11927_v28 = vpop.permute.xlu0 %637  ;;  %v2231_v38 = vmul.f32 %v11929_v57, %v11929_v57 }
 0x260   :  { %15757 = vst [vmem:[#allocation37_spill] sm:$0xff] %v11927_v28  ;;  %v1880_v28 = vmul.f32 %v11747_v19, %v11747_v19 }
 0x263   :  { %v11931_v8 = vpop.permute.xlu0 %1696 }
 0x264   :  { %v2229_v27 = vmul.f32 %v11931_v8, %v11931_v8 }
 0x268   :  { %685 = vrot.lane.b32.xlu0 %v11698_v44, %s10817_s30  ;;  %v2355_v44 = vsel %vm391_vm3, %v2229_v27, 0.0 }
 0x26c   :  { %1714 = vrot.lane.b32.xlu1 %v11899_v31, %s10819_s16  ;;  %1810 = vrot.lane.b32.xlu0 %v11899_v31, %s10817_s30 }
 0x270   :  { %639 = vrot.lane.b32.xlu0 %v11909_v5, %s10819_s16 }
 0x287   :  { %v2348_v24 = vpop.xlane.xlu1 %2347 }
 0x288   :  { %v2610_v31 = vadd.f32 1e-12, %v2348_v24  ;;  %v1932_v24 = vsel %vm391_vm3, %v1880_v28, 0.0  ;;  %v1881_v28 = vmul.f32 %v11641_v41, %v11641_v41 }
 0x28a   :  { %10155 = vrsqrt.f32 %v2610_v31  ;;  %v2364_v31 = vsel %vm391_vm3, %v2232_v37, 0.0  ;;  %v1560_v37 = vadd.f32 %v11560_v48, %v11779_v6 }
 0x28b   :  { %v2351_v33 = vpop.xlane.xlu1 %2350 }
 0x28c   :  { %v2611_v46 = vadd.f32 1e-12, %v2351_v33  ;;  %v2233_v33 = vmul.f32 %v11683_v0, %v11683_v0 }
 0x28e   :  { %10157 = vrsqrt.f32 %v2611_v46 }
 0x28f   :  { %2359 = vadd.xlane.f32.xlu0 %v2358_v20 }
 0x290   :  { %2356 = vadd.xlane.f32.xlu1 %v2355_v44  ;;  %v2367_v44 = vsel %vm391_vm3, %v2233_v33, 0.0  ;;  %v11970_v33 = vpop.permute.xlu1 %1706 }
 0x291   :  { %15760 = vst [vmem:[#allocation40_spill] sm:$0xff] %v11970_v33 }
 0x294   :  { %1933 = vadd.xlane.f32.xlu1 %v1932_v24  ;;  %v10156_v30 = vpop.eup %10155  ;;  %v1935_v24 = vsel %vm391_vm3, %v1881_v28, 0.0  ;;  %v2234_v28 = vmul.f32 %v11911_v22, %v11911_v22  ;;  %v1563_v22 = vadd.f32 %v11560_v48, %v11788_v42 }
 0x295   :  { %v2802_v46 = vmul.f32 %v10156_v30, %v11675_v11  ;;  %v11958_v11 = vmax.f32 %v1560_v37, 0.0 }
 0x296   :  { %v12009_v12 = vmax.f32 %v1563_v22, 0.0 }
 0x298   :  { %v10158_v51 = vpop.eup %10157  ;;  %2365 = vadd.xlane.f32.xlu1 %v2364_v31 }
 0x299   :  { %v2803_v20 = vmul.f32 %v10158_v51, %v11696_v18  ;;  %v11960_v18 = vpop.permute.xlu0 %1802  ;;  %v11976_v51 = vpop.permute.xlu1 %1702 }
 0x29a   :  { %15758 = vst [vmem:[#allocation38_spill] sm:$0xff] %v11960_v18 }
 0x29b   :  { %v9646_v27 = vpack.c.bf16 %v2803_v20, %v2802_v46 }
 0x29c   :  { %2368 = vadd.xlane.f32.xlu1 %v2367_v44 }
 0x29d   :  { %9648 = vmatpush3.bf16.xpose.msk.msra.mxu1 %vm11884_vm6, %v9646_v27  ;;  %v11966_v30 = vpop.permute.xlu0 %1708  ;;  %v11980_v20 = vpop.permute.xlu1 %1798 }
 0x29e   :  { %9649 = vmatprep.subr.bf16.mxu1 %v15753_v3  ;;  %15759 = vst [vmem:[#allocation39_spill] sm:$0xff] %v11966_v30  ;;  %15763 = vst [vmem:[#allocation43_spill] sm:$0xff] %v11980_v20  ;;  %v2361_v30 = vsel %vm391_vm3, %v2231_v38, 0.0 }
 0x2a0   :  { %1936 = vadd.xlane.f32.xlu1 %v1935_v24  ;;  %v2370_v24 = vsel %vm391_vm3, %v2234_v28, 0.0  ;;  %v1884_v28 = vmul.f32 %v11592_v63, %v11592_v63 }
 0x2a1   :  { %v11968_v31 = vpop.permute.xlu0 %1704  ;;  %v11982_v27 = vpop.permute.xlu1 %1804 }
 0x2a2   :  { %15764 = vst [vmem:[#allocation44_spill] sm:$0xff] %v11982_v27 }
 0x2a5   :  { %1718 = vrot.lane.b32.xlu0 %v11958_v11, %s10819_s16  ;;  %v11974_v6 = vpop.permute.xlu0 %1710 }
 0x2a6   :  { %15761 = vst [vmem:[#allocation41_spill] sm:$0xff] %v11974_v6  ;;  %v2239_v6 = vmul.f32 %v11722_v15, %v11722_v15 }
 0x2a8   :  { %v2385_v33 = vsel %vm391_vm3, %v2239_v6, 0.0 }
 0x2a9   :  { %687 = vrot.lane.b32.xlu0 %v11909_v5, %s10817_s30  ;;  %v11978_v46 = vpop.permute.xlu0 %1808  ;;  %v11991_v5 = vpop.permute.xlu1 %1800 }
 0x2aa   :  { %15762 = vst [vmem:[#allocation42_spill] sm:$0xff] %v11978_v46 }
 0x2ad   :  { %v2336_v44 = vpop.xlane.xlu0 %2335  ;;  %v11996_v27 = vpop.permute.xlu1 %1806 }
 0x2ae   :  { %15765 = vst [vmem:[#allocation45_spill] sm:$0xff] %v11996_v27 }
 0x2b1   :  { %1812 = vrot.lane.b32.xlu1 %v11834_v21, %s10817_s30  ;;  %v11986_v37 = vpop.xlane.xlu0 %2341  ;;  %v2238_v21 = vmul.f32 %v11771_v62, %v11771_v62 }
 0x2b3   :  { %v2382_v46 = vsel %vm391_vm3, %v2238_v21, 0.0  ;;  %v12004_v21 = vpop.permute.xlu1 %1712 }
 0x2b4   :  { %15766 = vst [vmem:[#allocation46_spill] sm:$0xff] %v12004_v21 }
 0x2b5   :  { %v2324_v18 = vpop.xlane.xlu0 %2323 }
 0x2b6   :  { %v2602_v21 = vadd.f32 1e-12, %v2324_v18 }
 0x2b9   :  { %v2321_v9 = vpop.xlane.xlu0 %2320 }
 0x2c8   :  { %2371 = vadd.xlane.f32.xlu0 %v2370_v24  ;;  %v1944_v24 = vsel %vm391_vm3, %v1884_v28, 0.0 }
 0x2cc   :  { %2383 = vadd.xlane.f32.xlu0 %v2382_v46  ;;  %v2601_v46 = vadd.f32 1e-12, %v2321_v9  ;;  %v562_v9 = vadd.f32 %v11653_v59, %v11560_v48  ;;  %v2070_v59 = vadd.f32 1e-12, %v11903_v45 }
 0x2ce   :  { %10159 = vrsqrt.f32 %v2601_v46 }
 0x2d0   :  { %2386 = vadd.xlane.f32.xlu0 %v2385_v33 }
 0x2d4   :  { %1945 = vadd.xlane.f32.xlu0 %v1944_v24 }
 0x2d5   :  { %2362 = vadd.xlane.f32.xlu1 %v2361_v30 }
 0x2d8   :  { %v2318_v27 = vpop.xlane.xlu1 %2317  ;;  %v10160_v33 = vpop.eup %10159 }
 0x2d9   :  { %v2600_v6 = vadd.f32 1e-12, %v2318_v27  ;;  %v2793_v24 = vmul.f32 %v10160_v33, %v11786_v53  ;;  %v2605_v53 = vadd.f32 1e-12, %v11862_v54  ;;  %v2606_v54 = vadd.f32 1e-12, %v2336_v44 }
 0x2da   :  { %v2608_v44 = vadd.f32 1e-12, %v11986_v37 }
 0x2db   :  { %10161 = vrsqrt.f32 %v2600_v6 }
 0x2dc   :  { %v1931_v20 = vpop.xlane.xlu1 %1930  ;;  %10163 = vrsqrt.f32 %v2602_v21 }
 0x2dd   :  { %v2071_v22 = vadd.f32 1e-12, %v1931_v20 }
 0x2e0   :  { %v2339_v35 = vpop.xlane.xlu1 %2338 }
 0x2e1   :  { %v2607_v21 = vadd.f32 1e-12, %v2339_v35 }
 0x2e4   :  { %v2345_v28 = vpop.xlane.xlu1 %2344 }
 0x2e5   :  { %v10162_v61 = vpop.eup %10161 }
 0x2e6   :  { %v2792_v38 = vmul.f32 %v10162_v61, %v11758_v55  ;;  %1720 = vrot.lane.b32.xlu1 %v12009_v12, %s10819_s16  ;;  %v12023_v61 = vmax.f32 %v562_v9, 0.0  ;;  %v2604_v55 = vadd.f32 1e-12, %v11854_v52  ;;  %v10164_v18 = vpop.eup %10163 }
 0x2e7   :  { %v2794_v6 = vmul.f32 %v10164_v18, %v11773_v13 }
 0x2e8   :  { %v2327_v30 = vpop.xlane.xlu1 %2326  ;;  %v9626_v27 = vpack.c.bf16 %v2793_v24, %v2792_v38  ;;  %v2609_v38 = vadd.f32 1e-12, %v2345_v28  ;;  %v15767_v28 = vmov 0.0  }
 0x2e9   :  { %v2603_v42 = vadd.f32 1e-12, %v2327_v30 }
 0x2ea   :  { %1814 = vrot.lane.b32.xlu0 %v11958_v11, %s10817_s30  ;;  %9628 = vmatpush3.bf16.xpose.msk.msra.mxu0 %vm11884_vm6, %v9626_v27 }
 0x2eb   :  { %10165 = vrsqrt.f32 %v2603_v42  ;;  %9629 = vmatprep.subr.bf16.mxu0 %v15753_v3 }
 0x2ec   :  { %10167 = vrsqrt.f32 %v2605_v53  ;;  %v2237_v53 = vmul.f32 %v11925_v47, %v11925_v47 }
 0x2ed   :  { %10169 = vrsqrt.f32 %v2604_v55 }
 0x2ee   :  { %643 = vrot.lane.b32.xlu0 %v12023_v61, %s10819_s16  ;;  %10171 = vrsqrt.f32 %v2070_v59  ;;  %v2379_v18 = vsel %vm391_vm3, %v2237_v53, 0.0 }
 0x2ef   :  { %10173 = vrsqrt.f32 %v2071_v22 }
 0x2f0   :  { %10175 = vrsqrt.f32 %v2607_v21 }
 0x2f1   :  { %10177 = vrsqrt.f32 %v2606_v54 }
 0x2f2   :  { %10179 = vrsqrt.f32 %v2609_v38 }
 0x2f3   :  { %10181 = vrsqrt.f32 %v2608_v44 }
 0x2f5   :  { %v10166_v46 = vpop.eup %10165 }
 0x2f6   :  { %v2795_v33 = vmul.f32 %v10166_v46, %v11858_v50  ;;  %v10168_v24 = vpop.eup %10167 }
 0x2f7   :  { %v10170_v45 = vpop.eup %10169  ;;  %v2797_v35 = vmul.f32 %v10168_v24, %v11612_v14 }
 0x2f8   :  { %v9630_v52 = vpack.c.bf16 %v2795_v33, %v2794_v6  ;;  %v10172_v20 = vpop.eup %10171  ;;  %v2796_v13 = vmul.f32 %v10170_v45, %v11570_v56  ;;  %v12066_v6 = vpop.permute.xlu0 %1716 }
 0x2f9   :  { %v2166_v50 = vmul.f32 %v10172_v20, %v11602_v10  ;;  %v10174_v9 = vpop.eup %10173  ;;  %v2235_v10 = vmul.f32 %v11917_v40, %v11917_v40  ;;  %v1571_v20 = vadd.f32 %v11784_v26, %v11560_v48 }
 0x2fa   :  { %9632 = vmatpush3.bf16.xpose.msk.msra.mxu0 %vm11884_vm6, %v9630_v52  ;;  %v9634_v30 = vpack.c.bf16 %v2797_v35, %v2796_v13  ;;  %v10176_v27 = vpop.eup %10175  ;;  %v2167_v37 = vmul.f32 %v10174_v9, %v11818_v39  ;;  %v12071_v52 = vpop.permute.xlu1 %1714 }
 0x2fb   :  { %9633 = vmatprep.subr.bf16.mxu0 %v15753_v3  ;;  %v10178_v14 = vpop.eup %10177  ;;  %v2799_v56 = vmul.f32 %v10176_v27, %v11752_v58  ;;  %v2373_v39 = vsel %vm391_vm3, %v2235_v10, 0.0  ;;  %v12081_v44 = vmax.f32 %v1571_v20, 0.0  ;;  %v1887_v20 = vmul.f32 %v11628_v49, %v11628_v49 }
 0x2fc   :  { %v2798_v42 = vmul.f32 %v10178_v14, %v11745_v17  ;;  %v10180_v59 = vpop.eup %10179  ;;  %v1882_v17 = vmul.f32 %v11838_v4, %v11838_v4  ;;  %v2354_v33 = vpop.xlane.xlu0 %2353 }
 0x2fd   :  { %v10182_v58 = vpop.eup %10181  ;;  %v2801_v22 = vmul.f32 %v10180_v59, %v11756_v2  ;;  %v559_v2 = vadd.f32 %v11647_v1, %v11560_v48  ;;  %v2612_v24 = vadd.f32 1e-12, %v2354_v33 }
 0x2fe   :  { %v9638_v55 = vpack.c.bf16 %v2799_v56, %v2798_v42  ;;  %v2800_v21 = vmul.f32 %v10182_v58, %v11750_v29  ;;  %v1938_v46 = vsel %vm391_vm3, %v1882_v17, 0.0 }
 0x2ff   :  { %v12075_v29 = vmax.f32 %v559_v2, 0.0  ;;  %10183 = vrsqrt.f32 %v2612_v24  ;;  %v2244_v24 = vmul.f32 %v11710_v34, %v11710_v34 }
 0x300   :  { %v9642_v54 = vpack.c.bf16 %v2801_v22, %v2800_v21  ;;  %v2236_v21 = vmul.f32 %v11915_v60, %v11915_v60 }
 0x301   :  { %9298 = vmatmul.mubr.msk.f32.vlgmr.msra.gmra.mrb[16].mxu0 %vm391_vm3, %v2166_v50 }
 0x302   :  { %9636 = vmatpush3.bf16.xpose.msk.msra.mxu0 %vm11884_vm6, %v9634_v30  ;;  %9300 = vmatprep.mubr.msk.f32.mxu0 %vm10821_vm7, %v15767_v28 }
 0x303   :  { %9637 = vmatprep.subr.bf16.mxu0 %v15753_v3 }
 0x305   :  { %9301 = vmatmul.mubr.msk.f32.gmra.mrb[18].mxu0 %vm391_vm3, %v2167_v37 }
 0x306   :  { %9303 = vmatprep.mubr.msk.f32.mxu0 %vm10821_vm7, %v15767_v28 }
 0x309   :  { %v10184_v50 = vpop.eup %10183 }
 0x30a   :  { %2374 = vadd.xlane.f32.xlu1 %v2373_v39  ;;  %9640 = vmatpush3.bf16.xpose.msk.msra.mxu0 %vm11884_vm6, %v9638_v55  ;;  %v2804_v37 = vmul.f32 %v10184_v50, %v11866_v32  ;;  %v12094_v32 = vpop.permute.xlu0 %685 }
 0x30b   :  { %9641 = vmatprep.subr.bf16.mxu0 %v15753_v3 }
 0x30d   :  { %2380 = vadd.xlane.f32.xlu0 %v2379_v18 }
 0x30e   :  { %v12098_v22 = vpop.permute.xlu0 %1810 }
 0x311   :  { %1939 = vadd.xlane.f32.xlu0 %v1938_v46  ;;  %v1883_v46 = vmul.f32 %v11848_v7, %v11848_v7 }
 0x312   :  { %9644 = vmatpush3.bf16.xpose.msk.msra.mxu0 %vm11884_vm6, %v9642_v54 }
 0x313   :  { %9657 = vmatprep.subr.bf16.mxu0 %v15753_v3  ;;  %v1941_v2 = vsel %vm391_vm3, %v1883_v46, 0.0  ;;  %v15768_v46 = vld [vmem:[#allocation10_spill] sm:$0xff] }
 0x31b   :  { %1816 = vrot.lane.b32.xlu1 %v12009_v12, %s10817_s30 }
 0x31d   :  { %v2357_v45 = vpop.xlane.xlu1 %2356 }
 0x31e   :  { %v2613_v38 = vadd.f32 1e-12, %v2357_v45 }
 0x31f   :  { %641 = vrot.lane.b32.xlu1 %v12075_v29, %s10819_s16 }
 0x320   :  { %10185 = vrsqrt.f32 %v2613_v38  ;;  %v2400_v38 = vsel %vm391_vm3, %v2244_v24, 0.0 }
 0x321   :  { %v1934_v35 = vpop.xlane.xlu1 %1933 }
 0x322   :  { %v2072_v1 = vadd.f32 1e-12, %v1934_v35  ;;  %v1568_v35 = vadd.f32 %v11775_v16, %v11560_v48 }
 0x324   :  { %10187 = vrsqrt.f32 %v2072_v1  ;;  %v12130_v50 = vmax.f32 %v1568_v35, 0.0 }
 0x325   :  { %v2366_v13 = vpop.xlane.xlu1 %2365 }
 0x326   :  { %v2616_v9 = vadd.f32 1e-12, %v2366_v13  ;;  %v1953_v13 = vsel %vm391_vm3, %v1887_v20, 0.0  ;;  %v15769_v20 = vld [vmem:[#allocation13_spill] sm:$0xff] }
 0x327   :  { %1724 = vrot.lane.b32.xlu0 %v12081_v44, %s10819_s16 }
 0x329   :  { %v2369_v30 = vpop.xlane.xlu1 %2368 }
 0x32a   :  { %v10186_v27 = vpop.eup %10185  ;;  %v2617_v14 = vadd.f32 1e-12, %v2369_v30 }
 0x32b   :  { %v2805_v56 = vmul.f32 %v10186_v27, %v11931_v8 }
 0x32c   :  { %10189 = vrsqrt.f32 %v2617_v14 }
 0x32d   :  { %10191 = vrsqrt.f32 %v2616_v9  ;;  %v1937_v26 = vpop.xlane.xlu1 %1936  ;;  %v9650_v10 = vpack.c.bf16 %v2805_v56, %v2804_v37 }
 0x32e   :  { %v10188_v42 = vpop.eup %10187  ;;  %v2073_v53 = vadd.f32 1e-12, %v1937_v26 }
 0x32f   :  { %9652 = vmatpush3.bf16.xpose.msk.msra.mxu1 %vm11884_vm6, %v9650_v10  ;;  %v2168_v55 = vmul.f32 %v10188_v42, %v11747_v19 }
 0x330   :  { %10193 = vrsqrt.f32 %v2073_v53  ;;  %9653 = vmatprep.subr.bf16.mxu1 %v15753_v3 }
 0x331   :  { %9304 = vmatmul.mubr.msk.f32.gmra.mrb[20].mxu0 %vm391_vm3, %v2168_v55  ;;  %v12138_v48 = vpop.permute.xlu1 %1812 }
 0x332   :  { %9318 = vmatprep.mubr.msk.f32.mxu0 %vm10821_vm7, %v15767_v28 }
 0x336   :  { %v10190_v8 = vpop.eup %10189 }
 0x337   :  { %v10192_v59 = vpop.eup %10191  ;;  %v2809_v39 = vmul.f32 %v10190_v8, %v11683_v0  ;;  %v12111_v0 = vpop.permute.xlu0 %639 }
 0x338   :  { %v2808_v17 = vmul.f32 %v10192_v59, %v11681_v43  ;;  %v2240_v43 = vmul.f32 %v11976_v51, %v11976_v51 }
 0x33a   :  { %v10194_v58 = vpop.eup %10193  ;;  %v9658_v18 = vpack.c.bf16 %v2809_v39, %v2808_v17  ;;  %v2388_v33 = vsel %vm391_vm3, %v2240_v43, 0.0 }
 0x33b   :  { %v2169_v19 = vmul.f32 %v10194_v58, %v11641_v41  ;;  %v2376_v41 = vsel %vm391_vm3, %v2236_v21, 0.0  ;;  %v2360_v54 = vpop.xlane.xlu0 %2359 }
 0x33c   :  { %v2614_v16 = vadd.f32 1e-12, %v2360_v54  ;;  %v1885_v54 = vmul.f32 %v15768_v46, %v15768_v46 }
 0x33d   :  { %9319 = vmatmul.mubr.msk.f32.vlgmr.msra.gmra.mrb[22].mxu0 %vm391_vm3, %v2169_v19 }
 0x33e   :  { %9660 = vmatpush3.bf16.xpose.msk.msra.mxu0 %vm11884_vm6, %v9658_v18  ;;  %9321 = vmatprep.mubr.msk.f32.mxu0 %vm10821_vm7, %v15767_v28  ;;  %10195 = vrsqrt.f32 %v2614_v16 }
 0x33f   :  { %9661 = vmatprep.subr.bf16.mxu0 %v15753_v3  ;;  %v12120_v45 = vpop.permute.xlu0 %1718 }
 0x343   :  { %2377 = vadd.xlane.f32.xlu1 %v2376_v41  ;;  %v12127_v1 = vpop.permute.xlu0 %687 }
 0x346   :  { %2389 = vadd.xlane.f32.xlu0 %v2388_v33 }
 0x348   :  { %v10196_v53 = vpop.eup %10195 }
 0x349   :  { %v2806_v8 = vmul.f32 %v10196_v53, %v11923_v36  ;;  %v2241_v36 = vmul.f32 %v11968_v31, %v11968_v31 }
 0x34a   :  { %1942 = vadd.xlane.f32.xlu0 %v1941_v2  ;;  %v1947_v2 = vsel %vm391_vm3, %v1885_v54, 0.0 }
 0x34e   :  { %2401 = vadd.xlane.f32.xlu0 %v2400_v38  ;;  %v12173_v38 = vld [vmem:[%s15618_s5] ss:$0 sm:$0xff] }
 0x34f   :  { %v567_v35 = vadd.f32 %v12173_v38, %v15769_v20  ;;  %v15776_v20 = vld [vmem:[#allocation17_spill] sm:$0xff] }
 0x352   :  { %1954 = vadd.xlane.f32.xlu0 %v1953_v13 }
 0x354   :  { %1722 = vrot.lane.b32.xlu1 %v12130_v50, %s10819_s16 }
 0x355   :  { %v2372_v9 = vpop.xlane.xlu0 %2371 }
 0x358   :  { %689 = vrot.lane.b32.xlu1 %v12075_v29, %s10817_s30 }
 0x359   :  { %v2384_v30 = vpop.xlane.xlu0 %2383 }
 0x35a   :  { %v2622_v10 = vadd.f32 1e-12, %v2384_v30  ;;  %v2618_v30 = vadd.f32 1e-12, %v2372_v9 }
 0x35c   :  { %691 = vrot.lane.b32.xlu1 %v12023_v61, %s10817_s30 }
 0x35d   :  { %v2387_v27 = vpop.xlane.xlu0 %2386 }
 0x35e   :  { %v2623_v56 = vadd.f32 1e-12, %v2387_v27  ;;  %v12183_v27 = vmax.f32 %v567_v35, 0.0  ;;  %v1576_v35 = vadd.f32 %v12173_v38, %v15776_v20 }
 0x361   :  { %v1946_v26 = vpop.xlane.xlu0 %1945 }
 0x362   :  { %v2363_v14 = vpop.xlane.xlu1 %2362  ;;  %v2076_v42 = vadd.f32 1e-12, %v1946_v26  ;;  %v15770_v26 = vld [vmem:[#allocation19_spill] sm:$0xff] }
 0x363   :  { %v2615_v37 = vadd.f32 1e-12, %v2363_v14 }
 0x365   :  { %10197 = vrsqrt.f32 %v2615_v37  ;;  %v12168_v24 = vpop.permute.xlu0 %1814 }
 0x366   :  { %10199 = vrsqrt.f32 %v2623_v56  ;;  %v12177_v13 = vpop.permute.xlu1 %1720 }
 0x367   :  { %10201 = vrsqrt.f32 %v2622_v10  ;;  %v1579_v10 = vadd.f32 %v12173_v38, %v15770_v26 }
 0x368   :  { %1820 = vrot.lane.b32.xlu0 %v12081_v44, %s10817_s30  ;;  %10203 = vrsqrt.f32 %v2076_v42 }
 0x369   :  { %v12181_v16 = vpop.permute.xlu0 %643  ;;  %10205 = vrsqrt.f32 %v2618_v30  ;;  %v12189_v9 = vmax.f32 %v1579_v10, 0.0  ;;  %v12218_v30 = vmax.f32 %v1576_v35, 0.0 }
 0x36f   :  { %v10198_v55 = vpop.eup %10197 }
 0x370   :  { %v2807_v59 = vmul.f32 %v10198_v55, %v11929_v57  ;;  %v10200_v58 = vpop.eup %10199 }
 0x371   :  { %v10202_v17 = vpop.eup %10201  ;;  %v2815_v18 = vmul.f32 %v10200_v58, %v11722_v15  ;;  %v2391_v15 = vsel %vm391_vm3, %v2241_v36, 0.0 }
 0x372   :  { %v9654_v39 = vpack.c.bf16 %v2807_v59, %v2806_v8  ;;  %v10204_v19 = vpop.eup %10203  ;;  %v2814_v21 = vmul.f32 %v10202_v17, %v11771_v62  ;;  %v2245_v62 = vmul.f32 %v11716_v23, %v11716_v23  ;;  %v15771_v59 = vld [vmem:[#allocation36_spill] sm:$0xff] }
 0x373   :  { %v2172_v43 = vmul.f32 %v10204_v19, %v11592_v63  ;;  %v2243_v63 = vmul.f32 %v11991_v5, %v11991_v5  ;;  %v10206_v55 = vpop.eup %10205 }
 0x374   :  { %9656 = vmatpush3.bf16.xpose.msk.msra.mxu1 %vm11884_vm6, %v9654_v39  ;;  %v9670_v41 = vpack.c.bf16 %v2815_v18, %v2814_v21  ;;  %v2403_v57 = vsel %vm391_vm3, %v2245_v62, 0.0  ;;  %v2810_v39 = vmul.f32 %v10206_v55, %v15771_v59  ;;  %v15772_v21 = vld [vmem:[#allocation43_spill] sm:$0xff] }
 0x375   :  { %9669 = vmatprep.subr.bf16.mxu1 %v15753_v3  ;;  %v2397_v33 = vsel %vm391_vm3, %v2243_v63, 0.0 }
 0x37b   :  { %9340 = vmatmul.mubr.msk.f32.vlgmr.msra.gmra.mrb[32].mxu1 %vm391_vm3, %v2172_v43  ;;  %v2242_v43 = vmul.f32 %v15772_v21, %v15772_v21 }
 0x37c   :  { %9672 = vmatpush3.bf16.xpose.msk.msra.mxu1 %vm11884_vm6, %v9670_v41  ;;  %9342 = vmatprep.mubr.msk.f32.mxu1 %vm10821_vm7, %v15767_v28  ;;  %v15773_v41 = vld [vmem:[#allocation39_spill] sm:$0xff] }
 0x37d   :  { %9673 = vmatprep.subr.bf16.mxu1 %v15753_v3  ;;  %v2394_v36 = vsel %vm391_vm3, %v2242_v43, 0.0 }
 0x380   :  { %2392 = vadd.xlane.f32.xlu1 %v2391_v15  ;;  %v15774_v15 = vld [vmem:[#allocation9_spill] sm:$0xff] }
 0x381   :  { %v1886_v62 = vmul.f32 %v15774_v15, %v15774_v15 }
 0x384   :  { %2404 = vadd.xlane.f32.xlu1 %v2403_v57  ;;  %v15775_v57 = vld [vmem:[#allocation8_spill] sm:$0xff] }
 0x385   :  { %v2251_v54 = vmul.f32 %v15775_v57, %v15775_v57 }
 0x387   :  { %2398 = vadd.xlane.f32.xlu0 %v2397_v33 }
 0x38b   :  { %1948 = vadd.xlane.f32.xlu0 %v1947_v2  ;;  %v2421_v2 = vsel %vm391_vm3, %v2251_v54, 0.0 }
 0x395   :  { %1818 = vrot.lane.b32.xlu1 %v12130_v50, %s10817_s30 }
 0x397   :  { %v2375_v14 = vpop.xlane.xlu1 %2374 }
 0x398   :  { %v2619_v37 = vadd.f32 1e-12, %v2375_v14 }
 0x399   :  { %645 = vrot.lane.b32.xlu1 %v12183_v27, %s10819_s16 }
 0x39a   :  { %10207 = vrsqrt.f32 %v2619_v37  ;;  %v2381_v56 = vpop.xlane.xlu0 %2380 }
 0x39b   :  { %v12213_v33 = vpop.permute.xlu1 %1816  ;;  %v2621_v37 = vadd.f32 1e-12, %v2381_v56 }
 0x39e   :  { %v1940_v42 = vpop.xlane.xlu0 %1939 }
 0x39f   :  { %v2074_v53 = vadd.f32 1e-12, %v1940_v42  ;;  %v12220_v14 = vpop.permute.xlu1 %641 }
 0x3a1   :  { %10209 = vrsqrt.f32 %v2074_v53  ;;  %1728 = vrot.lane.b32.xlu0 %v12189_v9, %s10819_s16 }
 0x3a2   :  { %v12224_v26 = vpop.permute.xlu0 %1724  ;;  %10211 = vrsqrt.f32 %v2621_v37  ;;  %v15780_v37 = vld [vmem:[#allocation7_spill] sm:$0xff] }
 0x3a4   :  { %v10208_v8 = vpop.eup %10207 }
 0x3a5   :  { %v2811_v58 = vmul.f32 %v10208_v8, %v11917_v40  ;;  %v2247_v40 = vmul.f32 %v15773_v41, %v15773_v41 }
 0x3a7   :  { %v9662_v17 = vpack.c.bf16 %v2811_v58, %v2810_v39  ;;  %v2409_v63 = vsel %vm391_vm3, %v2247_v40, 0.0 }
 0x3a9   :  { %9664 = vmatpush3.bf16.xpose.msk.msra.mxu0 %vm11884_vm6, %v9662_v17 }
 0x3aa   :  { %9665 = vmatprep.subr.bf16.mxu0 %v15753_v3 }
 0x3ab   :  { %v10210_v19 = vpop.eup %10209 }
 0x3ac   :  { %v2170_v18 = vmul.f32 %v10210_v19, %v11838_v4  ;;  %v1950_v4 = vsel %vm391_vm3, %v1886_v62, 0.0  ;;  %v10212_v17 = vpop.eup %10211 }
 0x3ad   :  { %v2813_v43 = vmul.f32 %v10212_v17, %v11925_v47 }
 0x3ae   :  { %9322 = vmatmul.mubr.msk.f32.gmra.mrb[24].mxu0 %vm391_vm3, %v2170_v18 }
 0x3af   :  { %9324 = vmatprep.mubr.msk.f32.mxu0 %vm10821_vm7, %v15767_v28 }
 0x3bd   :  { %2395 = vadd.xlane.f32.xlu1 %v2394_v36 }
 0x3c0   :  { %2410 = vadd.xlane.f32.xlu0 %v2409_v63 }
 0x3c4   :  { %1951 = vadd.xlane.f32.xlu0 %v1950_v4 }
 0x3c8   :  { %2422 = vadd.xlane.f32.xlu0 %v2421_v2  ;;  %v15779_v2 = vld [vmem:[#allocation40_spill] sm:$0xff] }
 0x3c9   :  { %v2246_v20 = vmul.f32 %v15779_v2, %v15779_v2 }
 0x3cb   :  { %v2406_v35 = vsel %vm391_vm3, %v2246_v20, 0.0 }
 0x3ce   :  { %1726 = vrot.lane.b32.xlu1 %v12218_v30, %s10819_s16 }
 0x3d0   :  { %v2378_v10 = vpop.xlane.xlu1 %2377 }
 0x3d1   :  { %v2620_v42 = vadd.f32 1e-12, %v2378_v10  ;;  %v15781_v10 = vld [vmem:[#allocation38_spill] sm:$0xff] }
 0x3d2   :  { %693 = vrot.lane.b32.xlu1 %v12183_v27, %s10817_s30 }
 0x3d3   :  { %10213 = vrsqrt.f32 %v2620_v42  ;;  %v2390_v53 = vpop.xlane.xlu0 %2389  ;;  %v2248_v42 = vmul.f32 %v15781_v10, %v15781_v10 }
 0x3d4   :  { %v12228_v55 = vpop.f32.mrb[16].mxu0 }
 0x3d5   :  { %15777 = vst [vmem:[#allocation10_spill] sm:$0xff] %v12228_v55  ;;  %v9299_v8 = vpop.f32.mrb[17].mxu0  ;;  %v2412_v17 = vsel %vm391_vm3, %v2248_v42, 0.0 }
 0x3d7   :  { %v1943_v59 = vpop.xlane.xlu0 %1942 }
 0x3d8   :  { %v2075_v39 = vadd.f32 1e-12, %v1943_v59  ;;  %v12230_v58 = vpop.f32.mrb[18].mxu0 }
 0x3d9   :  { %15778 = vst [vmem:[#allocation13_spill] sm:$0xff] %v12230_v58  ;;  %v9302_v56 = vpop.f32.mrb[19].mxu0 }
 0x3da   :  { %10215 = vrsqrt.f32 %v2075_v39  ;;  %v15783_v39 = vld [vmem:[#allocation11_spill] sm:$0xff] }
 0x3db   :  { %v2402_v19 = vpop.xlane.xlu0 %2401  ;;  %v1888_v56 = vmul.f32 %v15783_v39, %v15783_v39 }
 0x3dd   :  { %v10214_v18 = vpop.eup %10213 }
 0x3de   :  { %v2812_v40 = vmul.f32 %v10214_v18, %v11915_v60  ;;  %1822 = vrot.lane.b32.xlu0 %v12218_v30, %s10817_s30  ;;  %v12260_v18 = vpop.permute.xlu1 %1722 }
 0x3df   :  { %v1955_v36 = vpop.xlane.xlu0 %1954 }
 0x3e0   :  { %v2079_v62 = vadd.f32 1e-12, %v1955_v36  ;;  %v9666_v63 = vpack.c.bf16 %v2813_v43, %v2812_v40  ;;  %v1956_v40 = vsel %vm391_vm3, %v1888_v56, 0.0  ;;  %v15789_v56 = vld [vmem:[#allocation16_spill] sm:$0xff] }
 0x3e2   :  { %10217 = vrsqrt.f32 %v2079_v62  ;;  %9668 = vmatpush3.bf16.xpose.msk.msra.mxu0 %vm11884_vm6, %v9666_v63  ;;  %v12264_v36 = vpop.permute.xlu1 %689 }
 0x3e3   :  { %9681 = vmatprep.subr.bf16.mxu0 %v15753_v3  ;;  %v12274_v42 = vpop.permute.xlu0 %1820 }
 0x3e4   :  { %v10216_v4 = vpop.eup %10215  ;;  %15786 = vst [vmem:[#allocation36_spill] sm:$0xff] %v12274_v42 }
 0x3e5   :  { %v2171_v54 = vmul.f32 %v10216_v4, %v11848_v7  ;;  %v2250_v7 = vmul.f32 %v15780_v37, %v15780_v37 }
 0x3e6   :  { %v12268_v4 = vpop.permute.xlu1 %691 }
 0x3e7   :  { %9325 = vmatmul.mubr.msk.f32.gmra.mrb[26].mxu0 %vm391_vm3, %v2171_v54  ;;  %v2418_v8 = vsel %vm391_vm3, %v2250_v7, 0.0  ;;  %v2624_v54 = vadd.f32 1e-12, %v2390_v53  ;;  %v1584_v53 = vadd.f32 %v12173_v38, %v15789_v56 }
 0x3e8   :  { %9360 = vmatprep.mubr.msk.f32.mxu0 %vm10821_vm7, %v15767_v28 }
 0x3e9   :  { %10219 = vrsqrt.f32 %v2624_v54 }
 0x3ec   :  { %v10218_v60 = vpop.eup %10217 }
 0x3ed   :  { %v2175_v47 = vmul.f32 %v10218_v60, %v11628_v49  ;;  %v15782_v49 = vld [vmem:[#allocation6_spill] sm:$0xff]  ;;  %v15785_v60 = vld [vmem:[#allocation15_spill] sm:$0xff] }
 0x3ee   :  { %v1890_v59 = vmul.f32 %v15782_v49, %v15782_v49 }
 0x3ef   :  { %9361 = vmatmul.mubr.msk.f32.vlgmr.msra.gmra.mrb[28].mxu0 %vm391_vm3, %v2175_v47  ;;  %v570_v47 = vadd.f32 %v12173_v38, %v15785_v60 }
 0x3f0   :  { %9363 = vmatprep.mubr.msk.f32.mxu0 %vm10821_vm7, %v15767_v28  ;;  %v1962_v43 = vsel %vm391_vm3, %v1890_v59, 0.0 }
 0x3f1   :  { %v12278_v59 = vmax.f32 %v570_v47, 0.0 }
 0x3f3   :  { %15788 = vst [vmem:[#allocation39_spill] sm:$0xff] %v12278_v59  ;;  %v10220_v54 = vpop.eup %10219 }
 0x3f6   :  { %2407 = vadd.xlane.f32.xlu1 %v2406_v35  ;;  %v2628_v35 = vadd.f32 1e-12, %v2402_v19 }
 0x3fa   :  { %2419 = vadd.xlane.f32.xlu1 %v2418_v8 }
 0x3fd   :  { %2413 = vadd.xlane.f32.xlu0 %v2412_v17 }
 0x3fe   :  { %1963 = vadd.xlane.f32.xlu1 %v1962_v43 }
 0x401   :  { %1957 = vadd.xlane.f32.xlu0 %v1956_v40 }
 0x404   :  { %v12266_v62 = vpop.f32.mrb[20].mxu0 }
 0x405   :  { %15784 = vst [vmem:[#allocation19_spill] sm:$0xff] %v12266_v62  ;;  %v9305_v63 = vpop.f32.mrb[21].mxu0 }
 0x406   :  { %v12284_v63 = vmax.f32 %v1584_v53, 0.0 }
 0x408   :  { %15790 = vst [vmem:[#allocation9_spill] sm:$0xff] %v12284_v63 }
 0x40d   :  { %v2393_v20 = vpop.xlane.xlu1 %2392 }
 0x40e   :  { %v2625_v7 = vadd.f32 1e-12, %v2393_v20 }
 0x40f   :  { %1824 = vrot.lane.b32.xlu1 %v12189_v9, %s10817_s30 }
 0x410   :  { %10221 = vrsqrt.f32 %v2625_v7  ;;  %v12276_v8 = vpop.f32.mrb[22].mxu0  ;;  %v2816_v7 = vmul.f32 %v10220_v54, %v11976_v51  ;;  %v15792_v54 = vld [vmem:[#allocation44_spill] sm:$0xff] }
 0x411   :  { %15787 = vst [vmem:[#allocation43_spill] sm:$0xff] %v12276_v8  ;;  %v2405_v17 = vpop.xlane.xlu1 %2404  ;;  %v9320_v43 = vpop.f32.mrb[23].mxu0  ;;  %10223 = vrsqrt.f32 %v2628_v35 }
 0x412   :  { %v2629_v40 = vadd.f32 1e-12, %v2405_v17 }
 0x413   :  { %647 = vrot.lane.b32.xlu1 %v12278_v59, %s10819_s16 }
 0x414   :  { %10225 = vrsqrt.f32 %v2629_v40  ;;  %v2399_v19 = vpop.xlane.xlu0 %2398 }
 0x417   :  { %1730 = vrot.lane.b32.xlu0 %v12284_v63, %s10819_s16 }
 0x418   :  { %v1949_v60 = vpop.xlane.xlu0 %1948 }
 0x419   :  { %v2077_v47 = vadd.f32 1e-12, %v1949_v60  ;;  %v2249_v60 = vmul.f32 %v15792_v54, %v15792_v54 }
 0x41a   :  { %v10222_v20 = vpop.eup %10221 }
 0x41b   :  { %v2817_v56 = vmul.f32 %v10222_v20, %v11968_v31  ;;  %10227 = vrsqrt.f32 %v2077_v47  ;;  %v10224_v35 = vpop.eup %10223  ;;  %v15793_v47 = vld [vmem:[#allocation22_spill] sm:$0xff] }
 0x41c   :  { %v2820_v40 = vmul.f32 %v10224_v35, %v11710_v34  ;;  %v15791_v34 = vld [vmem:[#allocation41_spill] sm:$0xff]  ;;  %v1889_v20 = vmul.f32 %v15793_v47, %v15793_v47 }
 0x41d   :  { %v9674_v17 = vpack.c.bf16 %v2817_v56, %v2816_v7  ;;  %v2415_v7 = vsel %vm391_vm3, %v2249_v60, 0.0  ;;  %v15794_v56 = vld [vmem:[#allocation34_spill] sm:$0xff] }
 0x41e   :  { %v10226_v43 = vpop.eup %10225  ;;  %v2256_v35 = vmul.f32 %v15794_v56, %v15794_v56 }
 0x41f   :  { %v2821_v53 = vmul.f32 %v10226_v43, %v11716_v23  ;;  %9676 = vmatpush3.bf16.xpose.msk.msra.mxu1 %vm11884_vm6, %v9674_v17  ;;  %v2252_v23 = vmul.f32 %v15791_v34, %v15791_v34  ;;  %v15795_v43 = vld [vmem:[#allocation35_spill] sm:$0xff] }
 0x420   :  { %9677 = vmatprep.subr.bf16.mxu1 %v15753_v3  ;;  %v2436_v17 = vsel %vm391_vm3, %v2256_v35, 0.0 }
 0x421   :  { %v9682_v8 = vpack.c.bf16 %v2821_v53, %v2820_v40  ;;  %v1893_v40 = vmul.f32 %v15795_v43, %v15795_v43  ;;  %v12316_v53 = vpop.permute.xlu1 %1818 }
 0x423   :  { %9684 = vmatpush3.bf16.xpose.msk.msra.mxu0 %vm11884_vm6, %v9682_v8  ;;  %v2424_v8 = vsel %vm391_vm3, %v2252_v23, 0.0 }
 0x424   :  { %9685 = vmatprep.subr.bf16.mxu0 %v15753_v3 }
 0x425   :  { %v10228_v31 = vpop.eup %10227 }
 0x426   :  { %v2173_v51 = vmul.f32 %v10228_v31, %v15768_v46  ;;  %v1959_v46 = vsel %vm391_vm3, %v1889_v20, 0.0  ;;  %v1971_v31 = vsel %vm391_vm3, %v1893_v40, 0.0  ;;  %v12323_v20 = vpop.permute.xlu1 %645 }
 0x428   :  { %9343 = vmatmul.mubr.msk.f32.gmra.mrb[34].mxu1 %vm391_vm3, %v2173_v51  ;;  %v15796_v51 = vld [vmem:[#allocation18_spill] sm:$0xff] }
 0x429   :  { %9345 = vmatprep.mubr.msk.f32.mxu1 %vm10821_vm7, %v15767_v28  ;;  %v1587_v23 = vadd.f32 %v12173_v38, %v15796_v51 }
 0x42b   :  { %v12321_v60 = vmax.f32 %v1587_v23, 0.0 }
 0x42d   :  { %15797 = vst [vmem:[#allocation8_spill] sm:$0xff] %v12321_v60 }
 0x436   :  { %2425 = vadd.xlane.f32.xlu0 %v2424_v8  ;;  %v2627_v8 = vadd.f32 1e-12, %v2399_v19 }
 0x437   :  { %2416 = vadd.xlane.f32.xlu1 %v2415_v7  ;;  %v12327_v7 = vpop.permute.xlu0 %1728 }
 0x438   :  { %15798 = vst [vmem:[#allocation17_spill] sm:$0xff] %v12327_v7  ;;  %10229 = vrsqrt.f32 %v2627_v8 }
 0x43a   :  { %1960 = vadd.xlane.f32.xlu0 %v1959_v46 }
 0x43e   :  { %2437 = vadd.xlane.f32.xlu0 %v2436_v17 }
 0x442   :  { %1972 = vadd.xlane.f32.xlu0 %v1971_v31  ;;  %v10230_v19 = vpop.eup %10229 }
 0x443   :  { %v2819_v58 = vmul.f32 %v10230_v19, %v11991_v5  ;;  %v15800_v5 = vld [vmem:[#allocation46_spill] sm:$0xff] }
 0x448   :  { %1732 = vrot.lane.b32.xlu1 %v12321_v60, %s10819_s16 }
 0x44a   :  { %v2396_v46 = vpop.xlane.xlu1 %2395 }
 0x44b   :  { %v2626_v35 = vadd.f32 1e-12, %v2396_v46 }
 0x44c   :  { %695 = vrot.lane.b32.xlu1 %v12278_v59, %s10817_s30 }
 0x44d   :  { %10231 = vrsqrt.f32 %v2626_v35  ;;  %v2411_v17 = vpop.xlane.xlu0 %2410 }
 0x44e   :  { %v12331_v40 = vpop.f32.mrb[32].mxu1 }
 0x44f   :  { %15799 = vst [vmem:[#allocation40_spill] sm:$0xff] %v12331_v40  ;;  %v9341_v31 = vpop.f32.mrb[33].mxu1 }
 0x450   :  { %v15801_v31 = vld [vmem:[#allocation25_spill] sm:$0xff] }
 0x451   :  { %v1952_v51 = vpop.xlane.xlu0 %1951 }
 0x452   :  { %v2078_v23 = vadd.f32 1e-12, %v1952_v51 }
 0x454   :  { %10233 = vrsqrt.f32 %v2078_v23 }
 0x455   :  { %v2423_v40 = vpop.xlane.xlu0 %2422 }
 0x457   :  { %v10232_v62 = vpop.eup %10231 }
 0x458   :  { %v2818_v55 = vmul.f32 %v10232_v62, %v15772_v21  ;;  %1828 = vrot.lane.b32.xlu0 %v12321_v60, %s10817_s30  ;;  %v2253_v21 = vmul.f32 %v15800_v5, %v15800_v5 }
 0x45a   :  { %v9678_v8 = vpack.c.bf16 %v2819_v58, %v2818_v55  ;;  %v2427_v62 = vsel %vm391_vm3, %v2253_v21, 0.0  ;;  %v2257_v55 = vmul.f32 %v15801_v31, %v15801_v31  ;;  %v15802_v58 = vld [vmem:[#allocation42_spill] sm:$0xff] }
 0x45b   :  { %v2255_v51 = vmul.f32 %v15802_v58, %v15802_v58 }
 0x45c   :  { %9680 = vmatpush3.bf16.xpose.msk.msra.mxu1 %vm11884_vm6, %v9678_v8  ;;  %v2439_v23 = vsel %vm391_vm3, %v2257_v55, 0.0  ;;  %v15806_v55 = vld [vmem:[#allocation12_spill] sm:$0xff] }
 0x45d   :  { %9693 = vmatprep.subr.bf16.mxu1 %v15753_v3  ;;  %v2433_v8 = vsel %vm391_vm3, %v2255_v51, 0.0  ;;  %v12366_v51 = vpop.permute.xlu0 %1822 }
 0x45e   :  { %v10234_v46 = vpop.eup %10233  ;;  %15807 = vst [vmem:[#allocation6_spill] sm:$0xff] %v12366_v51 }
 0x45f   :  { %v2174_v35 = vmul.f32 %v10234_v46, %v15774_v15  ;;  %v15803_v15 = vld [vmem:[#allocation37_spill] sm:$0xff]  ;;  %v12355_v46 = vpop.permute.xlu1 %1726 }
 0x460   :  { %v1891_v19 = vmul.f32 %v15803_v15, %v15803_v15 }
 0x461   :  { %9346 = vmatmul.mubr.msk.f32.gmra.mrb[36].mxu1 %vm391_vm3, %v2174_v35 }
 0x462   :  { %9381 = vmatprep.mubr.msk.f32.mxu1 %vm10821_vm7, %v15767_v28  ;;  %v1965_v35 = vsel %vm391_vm3, %v1891_v19, 0.0 }
 0x463   :  { %v12358_v21 = vpop.permute.xlu1 %693 }
 0x464   :  { %15804 = vst [vmem:[#allocation7_spill] sm:$0xff] %v12358_v21 }
 0x470   :  { %2428 = vadd.xlane.f32.xlu1 %v2427_v62  ;;  %v2631_v62 = vadd.f32 1e-12, %v2411_v17 }
 0x472   :  { %10235 = vrsqrt.f32 %v2631_v62 }
 0x474   :  { %2440 = vadd.xlane.f32.xlu1 %v2439_v23  ;;  %v575_v23 = vadd.f32 %v12173_v38, %v15806_v55  ;;  %v15809_v55 = vld [vmem:[#allocation24_spill] sm:$0xff] }
 0x475   :  { %v1595_v62 = vadd.f32 %v12173_v38, %v15809_v55 }
 0x476   :  { %v12368_v19 = vmax.f32 %v575_v23, 0.0 }
 0x477   :  { %2434 = vadd.xlane.f32.xlu0 %v2433_v8  ;;  %v2635_v8 = vadd.f32 1e-12, %v2423_v40 }
 0x478   :  { %15808 = vst [vmem:[#allocation11_spill] sm:$0xff] %v12368_v19 }
 0x47b   :  { %1966 = vadd.xlane.f32.xlu0 %v1965_v35 }
 0x481   :  { %v12360_v60 = vpop.f32.mrb[24].mxu0 }
 0x482   :  { %15805 = vst [vmem:[#allocation38_spill] sm:$0xff] %v12360_v60  ;;  %v9323_v7 = vpop.f32.mrb[25].mxu0 }
 0x483   :  { %v2408_v59 = vpop.xlane.xlu1 %2407 }
 0x484   :  { %v2630_v42 = vadd.f32 1e-12, %v2408_v59 }
 0x485   :  { %1826 = vrot.lane.b32.xlu1 %v12284_v63, %s10817_s30  ;;  %v10236_v63 = vpop.eup %10235 }
 0x486   :  { %10237 = vrsqrt.f32 %v2630_v42  ;;  %v12374_v42 = vmax.f32 %v1595_v62, 0.0 }
 0x487   :  { %v2420_v17 = vpop.xlane.xlu1 %2419 }
 0x488   :  { %v2634_v35 = vadd.f32 1e-12, %v2420_v17  ;;  %v2823_v17 = vmul.f32 %v10236_v63, %v15773_v41 }
 0x489   :  { %649 = vrot.lane.b32.xlu1 %v12368_v19, %s10819_s16 }
 0x48a   :  { %10239 = vrsqrt.f32 %v2634_v35  ;;  %v2414_v7 = vpop.xlane.xlu0 %2413 }
 0x48b   :  { %10241 = vrsqrt.f32 %v2635_v8  ;;  %v1964_v59 = vpop.xlane.xlu1 %1963 }
 0x48c   :  { %v2082_v60 = vadd.f32 1e-12, %v1964_v59 }
 0x48e   :  { %10243 = vrsqrt.f32 %v2082_v60  ;;  %v1958_v51 = vpop.xlane.xlu0 %1957 }
 0x48f   :  { %v2080_v23 = vadd.f32 1e-12, %v1958_v51 }
 0x490   :  { %v10238_v40 = vpop.eup %10237 }
 0x491   :  { %v2822_v21 = vmul.f32 %v10238_v40, %v15779_v2  ;;  %10245 = vrsqrt.f32 %v2080_v23  ;;  %1736 = vrot.lane.b32.xlu0 %v12374_v42, %s10819_s16 }
 0x493   :  { %v9686_v35 = vpack.c.bf16 %v2823_v17, %v2822_v21  ;;  %v2263_v17 = vmul.f32 %v12009_v12, %v12009_v12 }
 0x494   :  { %v10240_v55 = vpop.eup %10239 }
 0x495   :  { %v10242_v8 = vpop.eup %10241  ;;  %9688 = vmatpush3.bf16.xpose.msk.msra.mxu0 %vm11884_vm6, %v9686_v35  ;;  %v2826_v60 = vmul.f32 %v10240_v55, %v15780_v37  ;;  %v2457_v35 = vsel %vm391_vm3, %v2263_v17, 0.0  ;;  %v15811_v55 = vld [vmem:[#allocation21_spill] sm:$0xff] }
 0x496   :  { %9689 = vmatprep.subr.bf16.mxu0 %v15753_v3  ;;  %v2827_v62 = vmul.f32 %v10242_v8, %v15775_v57  ;;  %v15810_v57 = vld [vmem:[#allocation45_spill] sm:$0xff]  ;;  %v1592_v8 = vadd.f32 %v12173_v38, %v15811_v55 }
 0x497   :  { %v2254_v37 = vmul.f32 %v15810_v57, %v15810_v57 }
 0x498   :  { %v10244_v51 = vpop.eup %10243  ;;  %v9694_v2 = vpack.c.bf16 %v2827_v62, %v2826_v60  ;;  %v12410_v60 = vpop.permute.xlu1 %1824 }
 0x499   :  { %v2178_v41 = vmul.f32 %v10244_v51, %v15782_v49  ;;  %v2259_v49 = vmul.f32 %v12066_v6, %v12066_v6  ;;  %v2430_v59 = vsel %vm391_vm3, %v2254_v37, 0.0  ;;  %15812 = vst [vmem:[#allocation15_spill] sm:$0xff] %v12410_v60 }
 0x49b   :  { %v10246_v63 = vpop.eup %10245  ;;  %9382 = vmatmul.mubr.msk.f32.vlgmr.msra.gmra.mrb[38].mxu1 %vm391_vm3, %v2178_v41  ;;  %v2445_v23 = vsel %vm391_vm3, %v2259_v49, 0.0  ;;  %v12414_v41 = vmax.f32 %v1592_v8, 0.0 }
 0x49c   :  { %9696 = vmatpush3.bf16.xpose.msk.msra.mxu1 %vm11884_vm6, %v9694_v2  ;;  %v2176_v21 = vmul.f32 %v10246_v63, %v15783_v39  ;;  %9384 = vmatprep.mubr.msk.f32.mxu1 %vm10821_vm7, %v15767_v28  ;;  %v1892_v39 = vmul.f32 %v12094_v32, %v12094_v32  ;;  %v12418_v2 = vpop.permute.xlu0 %1730  ;;  %v12420_v63 = vpop.permute.xlu1 %647 }
 0x49d   :  { %9697 = vmatprep.subr.bf16.mxu1 %v15753_v3  ;;  %15814 = vst [vmem:[#allocation41_spill] sm:$0xff] %v12414_v41 }
 0x49e   :  { %9364 = vmatmul.mubr.msk.f32.gmra.mrb[30].mxu0 %vm391_vm3, %v2176_v21  ;;  %v1968_v40 = vsel %vm391_vm3, %v1892_v39, 0.0  ;;  %v2632_v21 = vadd.f32 1e-12, %v2414_v7 }
 0x49f   :  { %9366 = vmatprep.mubr.msk.f32.mxu0 %vm10821_vm7, %v15767_v28 }
 0x4a0   :  { %10247 = vrsqrt.f32 %v2632_v21 }
 0x4aa   :  { %v10248_v55 = vpop.eup %10247 }
 0x4ad   :  { %2431 = vadd.xlane.f32.xlu1 %v2430_v59 }
 0x4b0   :  { %2446 = vadd.xlane.f32.xlu0 %v2445_v23 }
 0x4b4   :  { %1969 = vadd.xlane.f32.xlu0 %v1968_v40 }
 0x4b8   :  { %2458 = vadd.xlane.f32.xlu0 %v2457_v35 }
 0x4ba   :  { %v12412_v51 = vpop.f32.mrb[26].mxu0 }
 0x4bb   :  { %15813 = vst [vmem:[#allocation16_spill] sm:$0xff] %v12412_v51  ;;  %v9326_v62 = vpop.f32.mrb[27].mxu0  ;;  %v2824_v51 = vmul.f32 %v10248_v55, %v15781_v10 }
 0x4be   :  { %1734 = vrot.lane.b32.xlu1 %v12414_v41, %s10819_s16 }
 0x4c2   :  { %697 = vrot.lane.b32.xlu1 %v12368_v19, %s10817_s30  ;;  %v12424_v37 = vpop.f32.mrb[28].mxu0 }
 0x4c3   :  { %15815 = vst [vmem:[#allocation44_spill] sm:$0xff] %v12424_v37  ;;  %v9362_v49 = vpop.f32.mrb[29].mxu0  ;;  %v2426_v59 = vpop.xlane.xlu0 %2425 }
 0x4c4   :  { %v2417_v39 = vpop.xlane.xlu1 %2416 }
 0x4c5   :  { %v2633_v23 = vadd.f32 1e-12, %v2417_v39 }
 0x4c7   :  { %10249 = vrsqrt.f32 %v2633_v23  ;;  %v1961_v40 = vpop.xlane.xlu0 %1960 }
 0x4c8   :  { %v2081_v17 = vadd.f32 1e-12, %v1961_v40 }
 0x4ca   :  { %10251 = vrsqrt.f32 %v2081_v17  ;;  %v1894_v17 = vmul.f32 %v12111_v0, %v12111_v0 }
 0x4cb   :  { %v2438_v35 = vpop.xlane.xlu0 %2437 }
 0x4ce   :  { %1830 = vrot.lane.b32.xlu0 %v12414_v41, %s10817_s30 }
 0x4cf   :  { %v1973_v7 = vpop.xlane.xlu0 %1972 }
 0x4d0   :  { %v2085_v8 = vadd.f32 1e-12, %v1973_v7 }
 0x4d1   :  { %v10250_v62 = vpop.eup %10249 }
 0x4d2   :  { %v2825_v49 = vmul.f32 %v10250_v62, %v15792_v54  ;;  %10253 = vrsqrt.f32 %v2085_v8  ;;  %v2258_v54 = vmul.f32 %v12071_v52, %v12071_v52  ;;  %v1974_v8 = vsel %vm391_vm3, %v1894_v17, 0.0  ;;  %v12456_v62 = vpop.permute.xlu1 %1732  ;;  %v15818_v17 = vld [vmem:[#allocation20_spill] sm:$0xff] }
 0x4d4   :  { %v10252_v37 = vpop.eup %10251  ;;  %v9690_v21 = vpack.c.bf16 %v2825_v49, %v2824_v51  ;;  %v2262_v51 = vmul.f32 %v11958_v11, %v11958_v11 }
 0x4d5   :  { %v2177_v39 = vmul.f32 %v10252_v37, %v15793_v47  ;;  %v2442_v47 = vsel %vm391_vm3, %v2258_v54, 0.0  ;;  %v2260_v37 = vmul.f32 %v12098_v22, %v12098_v22 }
 0x4d6   :  { %9692 = vmatpush3.bf16.xpose.msk.msra.mxu0 %vm11884_vm6, %v9690_v21  ;;  %v2454_v40 = vsel %vm391_vm3, %v2262_v51, 0.0  ;;  %v12458_v49 = vpop.permute.xlu1 %695  ;;  %v2636_v21 = vadd.f32 1e-12, %v2426_v59  ;;  %v2640_v51 = vadd.f32 1e-12, %v2438_v35  ;;  %v1600_v59 = vadd.f32 %v12173_v38, %v15818_v17 }
 0x4d7   :  { %9367 = vmatmul.mubr.msk.f32.gmra.mrb[32].mxu0 %vm391_vm3, %v2177_v39  ;;  %9705 = vmatprep.subr.bf16.mxu0 %v15753_v3  ;;  %v2448_v55 = vsel %vm391_vm3, %v2260_v37, 0.0 }
 0x4d8   :  { %9402 = vmatprep.mubr.msk.f32.mxu0 %vm10821_vm7, %v15767_v28  ;;  %10255 = vrsqrt.f32 %v2636_v21 }
 0x4dc   :  { %v10254_v23 = vpop.eup %10253 }
 0x4dd   :  { %v2181_v10 = vmul.f32 %v10254_v23, %v15795_v43  ;;  %v1896_v43 = vmul.f32 %v12075_v29, %v12075_v29 }
 0x4df   :  { %9403 = vmatmul.mubr.msk.f32.vlgmr.msra.gmra.mrb[34].mxu0 %vm391_vm3, %v2181_v10  ;;  %v1980_v7 = vsel %vm391_vm3, %v1896_v43, 0.0  ;;  %v15817_v10 = vld [vmem:[#allocation14_spill] sm:$0xff] }
 0x4e0   :  { %9405 = vmatprep.mubr.msk.f32.mxu0 %vm10821_vm7, %v15767_v28  ;;  %v578_v54 = vadd.f32 %v12173_v38, %v15817_v10 }
 0x4e2   :  { %v12468_v43 = vmax.f32 %v578_v54, 0.0  ;;  %v10256_v21 = vpop.eup %10255 }
 0x4e6   :  { %2443 = vadd.xlane.f32.xlu1 %v2442_v47 }
 0x4ea   :  { %2455 = vadd.xlane.f32.xlu1 %v2454_v40  ;;  %v12466_v40 = vpop.permute.xlu0 %1828 }
 0x4ed   :  { %2449 = vadd.xlane.f32.xlu0 %v2448_v55 }
 0x4ee   :  { %1981 = vadd.xlane.f32.xlu1 %v1980_v7 }
 0x4f1   :  { %1975 = vadd.xlane.f32.xlu0 %v1974_v8  ;;  %v12474_v8 = vmax.f32 %v1600_v59, 0.0 }
 0x4fb   :  { %v12460_v39 = vpop.f32.mrb[34].mxu1 }
 0x4fc   :  { %15816 = vst [vmem:[#allocation22_spill] sm:$0xff] %v12460_v39  ;;  %v9344_v23 = vpop.f32.mrb[35].mxu1 }
 0x4fd   :  { %v2429_v47 = vpop.xlane.xlu1 %2428 }
 0x4fe   :  { %v2637_v37 = vadd.f32 1e-12, %v2429_v47  ;;  %v2828_v47 = vmul.f32 %v10256_v21, %v15791_v34  ;;  %v1895_v21 = vmul.f32 %v12127_v1, %v12127_v1 }
 0x4ff   :  { %1832 = vrot.lane.b32.xlu1 %v12374_v42, %s10817_s30 }
 0x500   :  { %10257 = vrsqrt.f32 %v2637_v37 }
 0x501   :  { %v2441_v55 = vpop.xlane.xlu1 %2440  ;;  %10259 = vrsqrt.f32 %v2640_v51 }
 0x502   :  { %v2641_v7 = vadd.f32 1e-12, %v2441_v55 }
 0x503   :  { %651 = vrot.lane.b32.xlu1 %v12468_v43, %s10819_s16 }
 0x504   :  { %10261 = vrsqrt.f32 %v2641_v7  ;;  %v2435_v35 = vpop.xlane.xlu0 %2434 }
 0x507   :  { %1738 = vrot.lane.b32.xlu0 %v12474_v8, %s10819_s16 }
 0x508   :  { %v1967_v23 = vpop.xlane.xlu0 %1966 }
 0x509   :  { %v2083_v10 = vadd.f32 1e-12, %v1967_v23 }
 0x50a   :  { %v10258_v54 = vpop.eup %10257 }
 0x50b   :  { %v2829_v37 = vmul.f32 %v10258_v54, %v15800_v5  ;;  %10263 = vrsqrt.f32 %v2083_v10  ;;  %v10260_v51 = vpop.eup %10259  ;;  %v2268_v10 = vmul.f32 %v12130_v50, %v12130_v50 }
 0x50c   :  { %v2832_v7 = vmul.f32 %v10260_v51, %v15794_v56  ;;  %v2264_v56 = vmul.f32 %v12120_v45, %v12120_v45 }
 0x50d   :  { %v9698_v17 = vpack.c.bf16 %v2829_v37, %v2828_v47  ;;  %v2472_v54 = vsel %vm391_vm3, %v2268_v10, 0.0  ;;  %v1899_v47 = vmul.f32 %v12023_v61, %v12023_v61  ;;  %v12506_v37 = vpop.permute.xlu1 %1826 }
 0x50e   :  { %v10262_v55 = vpop.eup %10261 }
 0x50f   :  { %v2833_v59 = vmul.f32 %v10262_v55, %v15801_v31  ;;  %9700 = vmatpush3.bf16.xpose.msk.msra.mxu1 %vm11884_vm6, %v9698_v17  ;;  %v2261_v31 = vmul.f32 %v12138_v48, %v12138_v48  ;;  %v1989_v51 = vsel %vm391_vm3, %v1899_v47, 0.0  ;;  %v15819_v17 = vld [vmem:[#allocation23_spill] sm:$0xff] }
 0x510   :  { %9701 = vmatprep.subr.bf16.mxu1 %v15753_v3  ;;  %v1603_v55 = vadd.f32 %v12173_v38, %v15819_v17 }
 0x511   :  { %v9706_v39 = vpack.c.bf16 %v2833_v59, %v2832_v7  ;;  %v2451_v23 = vsel %vm391_vm3, %v2261_v31, 0.0  ;;  %v12519_v31 = vpop.permute.xlu0 %1736 }
 0x512   :  { %15821 = vst [vmem:[#allocation35_spill] sm:$0xff] %v12519_v31 }
 0x513   :  { %9708 = vmatpush3.bf16.xpose.msk.msra.mxu0 %vm11884_vm6, %v9706_v39  ;;  %v2460_v39 = vsel %vm391_vm3, %v2264_v56, 0.0  ;;  %v2639_v56 = vadd.f32 1e-12, %v2435_v35 }
 0x514   :  { %9709 = vmatprep.subr.bf16.mxu0 %v15753_v3 }
 0x515   :  { %v10264_v34 = vpop.eup %10263  ;;  %10265 = vrsqrt.f32 %v2639_v56  ;;  %v2269_v56 = vmul.f32 %v12081_v44, %v12081_v44 }
 0x516   :  { %v2179_v5 = vmul.f32 %v10264_v34, %v15803_v15  ;;  %v1977_v15 = vsel %vm391_vm3, %v1895_v21, 0.0  ;;  %v12513_v34 = vmax.f32 %v1603_v55, 0.0 }
 0x518   :  { %9385 = vmatmul.mubr.msk.f32.gmra.mrb[40].mxu1 %vm391_vm3, %v2179_v5  ;;  %v12515_v5 = vpop.permute.xlu1 %649 }
 0x519   :  { %9387 = vmatprep.mubr.msk.f32.mxu1 %vm10821_vm7, %v15767_v28 }
 0x526   :  { %2461 = vadd.xlane.f32.xlu0 %v2460_v39 }
 0x527   :  { %2452 = vadd.xlane.f32.xlu1 %v2451_v23 }
 0x52a   :  { %1978 = vadd.xlane.f32.xlu0 %v1977_v15 }
 0x52e   :  { %2473 = vadd.xlane.f32.xlu0 %v2472_v54  ;;  %v10266_v54 = vpop.eup %10265 }
 0x52f   :  { %v2831_v35 = vmul.f32 %v10266_v54, %v15802_v58  ;;  %v2265_v58 = vmul.f32 %v12177_v13, %v12177_v13 }
 0x532   :  { %1990 = vadd.xlane.f32.xlu0 %v1989_v51 }
 0x534   :  { %v12511_v7 = vpop.f32.mrb[36].mxu1 }
 0x535   :  { %15820 = vst [vmem:[#allocation34_spill] sm:$0xff] %v12511_v7  ;;  %v9347_v59 = vpop.f32.mrb[37].mxu1 }
 0x538   :  { %1740 = vrot.lane.b32.xlu1 %v12513_v34, %s10819_s16 }
 0x53a   :  { %v2432_v21 = vpop.xlane.xlu1 %2431 }
 0x53b   :  { %v2638_v39 = vadd.f32 1e-12, %v2432_v21  ;;  %v2267_v21 = vmul.f32 %v12213_v33, %v12213_v33 }
 0x53c   :  { %699 = vrot.lane.b32.xlu1 %v12468_v43, %s10817_s30 }
 0x53d   :  { %10267 = vrsqrt.f32 %v2638_v39  ;;  %v2447_v23 = vpop.xlane.xlu0 %2446  ;;  %v2475_v39 = vsel %vm391_vm3, %v2269_v56, 0.0 }
 0x541   :  { %v1970_v15 = vpop.xlane.xlu0 %1969 }
 0x542   :  { %v2084_v10 = vadd.f32 1e-12, %v1970_v15  ;;  %v2469_v15 = vsel %vm391_vm3, %v2267_v21, 0.0 }
 0x544   :  { %10269 = vrsqrt.f32 %v2084_v10  ;;  %v12545_v10 = vpop.permute.xlu1 %1734 }
 0x547   :  { %v10268_v47 = vpop.eup %10267 }
 0x548   :  { %v2830_v51 = vmul.f32 %v10268_v47, %v15810_v57  ;;  %1836 = vrot.lane.b32.xlu0 %v12513_v34, %s10817_s30  ;;  %v2463_v57 = vsel %vm391_vm3, %v2265_v58, 0.0 }
 0x54a   :  { %v9702_v17 = vpack.c.bf16 %v2831_v35, %v2830_v51  ;;  %v12550_v35 = vpop.permute.xlu1 %697 }
 0x54c   :  { %9704 = vmatpush3.bf16.xpose.msk.msra.mxu1 %vm11884_vm6, %v9702_v17  ;;  %v2643_v17 = vadd.f32 1e-12, %v2447_v23 }
 0x54d   :  { %9717 = vmatprep.subr.bf16.mxu1 %v15753_v3 }
 0x54e   :  { %v10270_v55 = vpop.eup %10269  ;;  %10271 = vrsqrt.f32 %v2643_v17 }
 0x54f   :  { %v2180_v59 = vmul.f32 %v10270_v55, %v12094_v32  ;;  %v1897_v32 = vmul.f32 %v12220_v14, %v12220_v14  ;;  %v2459_v55 = vpop.xlane.xlu0 %2458 }
 0x551   :  { %9388 = vmatmul.mubr.msk.f32.gmra.mrb[42].mxu1 %vm391_vm3, %v2180_v59  ;;  %v1983_v54 = vsel %vm391_vm3, %v1897_v32, 0.0 }
 0x552   :  { %9423 = vmatprep.mubr.msk.f32.mxu1 %vm10821_vm7, %v15767_v28 }
 0x553   :  { %v12558_v32 = vpop.permute.xlu0 %1830 }
 0x560   :  { %2464 = vadd.xlane.f32.xlu1 %v2463_v57  ;;  %v15824_v57 = vld [vmem:[#allocation27_spill] sm:$0xff] }
 0x561   :  { %v583_v56 = vadd.f32 %v12173_v38, %v15824_v57  ;;  %v15825_v57 = vld [vmem:[#allocation31_spill] sm:$0xff] }
 0x562   :  { %v1608_v17 = vadd.f32 %v12173_v38, %v15825_v57 }
 0x564   :  { %2476 = vadd.xlane.f32.xlu1 %v2475_v39 }
 0x567   :  { %2470 = vadd.xlane.f32.xlu0 %v2469_v15  ;;  %v12560_v15 = vmax.f32 %v583_v56, 0.0 }
 0x56b   :  { %1984 = vadd.xlane.f32.xlu0 %v1983_v54  ;;  %v2647_v54 = vadd.f32 1e-12, %v2459_v55 }
 0x56e   :  { %v12548_v47 = vpop.f32.mrb[38].mxu1 }
 0x56f   :  { %15822 = vst [vmem:[#allocation18_spill] sm:$0xff] %v12548_v47  ;;  %v9383_v51 = vpop.f32.mrb[39].mxu1 }
 0x571   :  { %v12552_v59 = vpop.f32.mrb[30].mxu0 }
 0x572   :  { %15823 = vst [vmem:[#allocation46_spill] sm:$0xff] %v12552_v59  ;;  %v9365_v58 = vpop.f32.mrb[31].mxu0  ;;  %v10272_v59 = vpop.eup %10271 }
 0x573   :  { %v2444_v21 = vpop.xlane.xlu1 %2443 }
 0x574   :  { %v2642_v39 = vadd.f32 1e-12, %v2444_v21 }
 0x575   :  { %1834 = vrot.lane.b32.xlu1 %v12474_v8, %s10817_s30 }
 0x576   :  { %10273 = vrsqrt.f32 %v2642_v39  ;;  %v12566_v39 = vmax.f32 %v1608_v17, 0.0 }
 0x577   :  { %v2456_v23 = vpop.xlane.xlu1 %2455 }
 0x578   :  { %v2646_v51 = vadd.f32 1e-12, %v2456_v23  ;;  %v2835_v23 = vmul.f32 %v10272_v59, %v12066_v6 }
 0x579   :  { %653 = vrot.lane.b32.xlu1 %v12560_v15, %s10819_s16 }
 0x57a   :  { %10275 = vrsqrt.f32 %v2646_v51  ;;  %v2450_v58 = vpop.xlane.xlu0 %2449 }
 0x57b   :  { %10277 = vrsqrt.f32 %v2647_v54  ;;  %v1982_v21 = vpop.xlane.xlu1 %1981 }
 0x57c   :  { %v2088_v47 = vadd.f32 1e-12, %v1982_v21  ;;  %v1898_v21 = vmul.f32 %v12264_v36, %v12264_v36 }
 0x57e   :  { %10279 = vrsqrt.f32 %v2088_v47  ;;  %v1976_v7 = vpop.xlane.xlu0 %1975 }
 0x57f   :  { %v2086_v56 = vadd.f32 1e-12, %v1976_v7 }
 0x580   :  { %v10274_v55 = vpop.eup %10273 }
 0x581   :  { %v2834_v31 = vmul.f32 %v10274_v55, %v12071_v52  ;;  %10281 = vrsqrt.f32 %v2086_v56  ;;  %1742 = vrot.lane.b32.xlu0 %v12566_v39, %s10819_s16 }
 0x583   :  { %v9710_v51 = vpack.c.bf16 %v2835_v23, %v2834_v31  ;;  %v1901_v23 = vmul.f32 %v12268_v4, %v12268_v4 }
 0x584   :  { %v10276_v57 = vpop.eup %10275 }
 0x585   :  { %v10278_v54 = vpop.eup %10277  ;;  %9712 = vmatpush3.bf16.xpose.msk.msra.mxu0 %vm11884_vm6, %v9710_v51  ;;  %v2838_v47 = vmul.f32 %v10276_v57, %v11958_v11  ;;  %v2270_v11 = vmul.f32 %v12260_v18, %v12260_v18  ;;  %v1986_v51 = vsel %vm391_vm3, %v1898_v21, 0.0  ;;  %v1995_v57 = vsel %vm391_vm3, %v1901_v23, 0.0 }
 0x586   :  { %9713 = vmatprep.subr.bf16.mxu0 %v15753_v3  ;;  %v2839_v17 = vmul.f32 %v10278_v54, %v12009_v12  ;;  %v2266_v12 = vmul.f32 %v12168_v24, %v12168_v24  ;;  %v2275_v54 = vmul.f32 %v12189_v9, %v12189_v9 }
 0x587   :  { %v2478_v56 = vsel %vm391_vm3, %v2270_v11, 0.0 }
 0x588   :  { %v10280_v7 = vpop.eup %10279  ;;  %v9718_v52 = vpack.c.bf16 %v2839_v17, %v2838_v47  ;;  %v12605_v47 = vpop.permute.xlu1 %1832 }
 0x589   :  { %v2184_v6 = vmul.f32 %v10280_v7, %v12075_v29  ;;  %v1900_v29 = vmul.f32 %v12181_v16, %v12181_v16 }
 0x58b   :  { %v10282_v59 = vpop.eup %10281  ;;  %9424 = vmatmul.mubr.msk.f32.vlgmr.msra.gmra.mrb[44].mxu1 %vm391_vm3, %v2184_v6  ;;  %v1992_v55 = vsel %vm391_vm3, %v1900_v29, 0.0  ;;  %v2493_v6 = vsel %vm391_vm3, %v2275_v54, 0.0  ;;  %v2644_v29 = vadd.f32 1e-12, %v2450_v58 }
 0x58c   :  { %9720 = vmatpush3.bf16.xpose.msk.msra.mxu1 %vm11884_vm6, %v9718_v52  ;;  %v2182_v31 = vmul.f32 %v10282_v59, %v12111_v0  ;;  %9426 = vmatprep.mubr.msk.f32.mxu1 %vm10821_vm7, %v15767_v28  ;;  %v2466_v0 = vsel %vm391_vm3, %v2266_v12, 0.0  ;;  %v15827_v52 = vld [vmem:[#allocation33_spill] sm:$0xff]  ;;  %v12616_v11 = vpop.permute.xlu1 %651 }
 0x58d   :  { %9721 = vmatprep.subr.bf16.mxu1 %v15753_v3  ;;  %v1611_v59 = vadd.f32 %v12173_v38, %v15827_v52  ;;  %10283 = vrsqrt.f32 %v2644_v29 }
 0x58e   :  { %9406 = vmatmul.mubr.msk.f32.gmra.mrb[36].mxu0 %vm391_vm3, %v2182_v31  ;;  %v12612_v31 = vpop.permute.xlu0 %1738 }
 0x58f   :  { %9408 = vmatprep.mubr.msk.f32.mxu0 %vm10821_vm7, %v15767_v28  ;;  %v12614_v12 = vmax.f32 %v1611_v59, 0.0 }
 0x597   :  { %v10284_v54 = vpop.eup %10283 }
 0x598   :  { %v2836_v52 = vmul.f32 %v10284_v54, %v12098_v22 }
 0x59d   :  { %2467 = vadd.xlane.f32.xlu1 %v2466_v0 }
 0x5a0   :  { %2479 = vadd.xlane.f32.xlu0 %v2478_v56 }
 0x5a1   :  { %1993 = vadd.xlane.f32.xlu1 %v1992_v55 }
 0x5a4   :  { %1987 = vadd.xlane.f32.xlu0 %v1986_v51 }
 0x5a8   :  { %1996 = vadd.xlane.f32.xlu0 %v1995_v57 }
 0x5aa   :  { %v12607_v7 = vpop.f32.mrb[32].mxu0 }
 0x5ab   :  { %15826 = vst [vmem:[#allocation25_spill] sm:$0xff] %v12607_v7  ;;  %v9368_v17 = vpop.f32.mrb[33].mxu0 }
 0x5ac   :  { %2494 = vadd.xlane.f32.xlu0 %v2493_v6 }
 0x5b2   :  { %1744 = vrot.lane.b32.xlu1 %v12614_v12, %s10819_s16  ;;  %v12620_v0 = vpop.f32.mrb[34].mxu0 }
 0x5b3   :  { %15828 = vst [vmem:[#allocation42_spill] sm:$0xff] %v12620_v0  ;;  %v9404_v21 = vpop.f32.mrb[35].mxu0  ;;  %v2462_v56 = vpop.xlane.xlu0 %2461 }
 0x5b4   :  { %v2453_v55 = vpop.xlane.xlu1 %2452 }
 0x5b5   :  { %v2645_v23 = vadd.f32 1e-12, %v2453_v55 }
 0x5b6   :  { %701 = vrot.lane.b32.xlu1 %v12560_v15, %s10817_s30 }
 0x5b7   :  { %10285 = vrsqrt.f32 %v2645_v23  ;;  %v1979_v38 = vpop.xlane.xlu0 %1978 }
 0x5b8   :  { %v2087_v51 = vadd.f32 1e-12, %v1979_v38  ;;  %v2274_v38 = vmul.f32 %v12218_v30, %v12218_v30 }
 0x5ba   :  { %10287 = vrsqrt.f32 %v2087_v51  ;;  %v2272_v51 = vmul.f32 %v12316_v53, %v12316_v53  ;;  %v2490_v54 = vsel %vm391_vm3, %v2274_v38, 0.0 }
 0x5bb   :  { %v2474_v57 = vpop.xlane.xlu0 %2473 }
 0x5bf   :  { %v1991_v58 = vpop.xlane.xlu0 %1990 }
 0x5c0   :  { %v2091_v17 = vadd.f32 1e-12, %v1991_v58  ;;  %v1903_v58 = vmul.f32 %v12323_v20, %v12323_v20 }
 0x5c1   :  { %v10286_v6 = vpop.eup %10285 }
 0x5c2   :  { %v2837_v59 = vmul.f32 %v10286_v6, %v12138_v48  ;;  %10289 = vrsqrt.f32 %v2091_v17  ;;  %1838 = vrot.lane.b32.xlu0 %v12566_v39, %s10817_s30  ;;  %v2484_v17 = vsel %vm391_vm3, %v2272_v51, 0.0  ;;  %v12665_v51 = vld [vmem:[%s15618_s5] ss:$0 sm:$0xff] }
 0x5c3   :  { %v12660_v38 = vpop.permute.xlu0 %1836 }
 0x5c4   :  { %v10288_v29 = vpop.eup %10287  ;;  %v9714_v21 = vpack.c.bf16 %v2837_v59, %v2836_v52  ;;  %v12653_v52 = vpop.permute.xlu1 %1740  ;;  %v2001_v59 = vsel %vm391_vm3, %v1903_v58, 0.0 }
 0x5c5   :  { %v2183_v55 = vmul.f32 %v10288_v29, %v12127_v1  ;;  %v2271_v1 = vmul.f32 %v12224_v26, %v12224_v26 }
 0x5c6   :  { %9716 = vmatpush3.bf16.xpose.msk.msra.mxu0 %vm11884_vm6, %v9714_v21  ;;  %v2648_v21 = vadd.f32 1e-12, %v2462_v56 }
 0x5c7   :  { %9409 = vmatmul.mubr.msk.f32.gmra.mrb[38].mxu0 %vm391_vm3, %v2183_v55  ;;  %9729 = vmatprep.subr.bf16.mxu0 %v15753_v3  ;;  %v2481_v23 = vsel %vm391_vm3, %v2271_v1, 0.0  ;;  %v2652_v1 = vadd.f32 1e-12, %v2474_v57 }
 0x5c8   :  { %9444 = vmatprep.mubr.msk.f32.mxu0 %vm10821_vm7, %v15767_v28  ;;  %v12656_v29 = vpop.permute.xlu1 %699  ;;  %10291 = vrsqrt.f32 %v2648_v21 }
 0x5cc   :  { %v10290_v22 = vpop.eup %10289 }
 0x5cd   :  { %v2187_v48 = vmul.f32 %v10290_v22, %v12023_v61  ;;  %v1902_v61 = vmul.f32 %v12183_v27, %v12183_v27 }
 0x5cf   :  { %9445 = vmatmul.mubr.msk.f32.vlgmr.msra.gmra.mrb[40].mxu0 %vm391_vm3, %v2187_v48  ;;  %v1998_v6 = vsel %vm391_vm3, %v1902_v61, 0.0 }
 0x5d0   :  { %9447 = vmatprep.mubr.msk.f32.mxu0 %vm10821_vm7, %v15767_v28 }
 0x5d2   :  { %v10292_v21 = vpop.eup %10291 }
 0x5da   :  { %2482 = vadd.xlane.f32.xlu1 %v2481_v23 }
 0x5de   :  { %2491 = vadd.xlane.f32.xlu1 %v2490_v54  ;;  %v15830_v54 = vld [vmem:[#allocation29_spill] sm:$0xff] }
 0x5df   :  { %v586_v61 = vadd.f32 %v12665_v51, %v15830_v54  ;;  %v2840_v54 = vmul.f32 %v10292_v21, %v12120_v45 }
 0x5e1   :  { %2485 = vadd.xlane.f32.xlu0 %v2484_v17  ;;  %v12671_v17 = vmax.f32 %v586_v61, 0.0 }
 0x5e2   :  { %1999 = vadd.xlane.f32.xlu1 %v1998_v6  ;;  %v15832_v6 = vld [vmem:[#allocation30_spill] sm:$0xff] }
 0x5e3   :  { %15831 = vst [vmem:[#allocation12_spill] sm:$0xff] %v12671_v17 }
 0x5e5   :  { %2002 = vadd.xlane.f32.xlu0 %v2001_v59  ;;  %v1616_v59 = vadd.f32 %v12665_v51, %v15832_v6 }
 0x5eb   :  { %v12658_v55 = vpop.f32.mrb[40].mxu1 }
 0x5ec   :  { %15829 = vst [vmem:[#allocation37_spill] sm:$0xff] %v12658_v55  ;;  %v9386_v22 = vpop.f32.mrb[41].mxu1 }
 0x5ed   :  { %v2465_v48 = vpop.xlane.xlu1 %2464 }
 0x5ee   :  { %v2649_v23 = vadd.f32 1e-12, %v2465_v48  ;;  %v12677_v48 = vmax.f32 %v1616_v59, 0.0 }
 0x5f0   :  { %10293 = vrsqrt.f32 %v2649_v23 }
 0x5f1   :  { %v2477_v58 = vpop.xlane.xlu1 %2476  ;;  %10295 = vrsqrt.f32 %v2652_v1 }
 0x5f2   :  { %v2653_v56 = vadd.f32 1e-12, %v2477_v58 }
 0x5f3   :  { %1840 = vrot.lane.b32.xlu1 %v12614_v12, %s10817_s30 }
 0x5f4   :  { %10297 = vrsqrt.f32 %v2653_v56  ;;  %v2471_v57 = vpop.xlane.xlu0 %2470 }
 0x5f7   :  { %655 = vrot.lane.b32.xlu1 %v12671_v17, %s10819_s16 }
 0x5f8   :  { %v1985_v22 = vpop.xlane.xlu0 %1984 }
 0x5f9   :  { %v2089_v23 = vadd.f32 1e-12, %v1985_v22 }
 0x5fa   :  { %v10294_v1 = vpop.eup %10293 }
 0x5fb   :  { %v2841_v58 = vmul.f32 %v10294_v1, %v12177_v13  ;;  %10299 = vrsqrt.f32 %v2089_v23  ;;  %1746 = vrot.lane.b32.xlu0 %v12677_v48, %s10819_s16  ;;  %v10296_v61 = vpop.eup %10295  ;;  %v15835_v1 = vld [vmem:[#allocation9_spill] sm:$0xff] }
 0x5fc   :  { %v2844_v0 = vmul.f32 %v10296_v61, %v12130_v50  ;;  %v15833_v50 = vld [vmem:[#allocation36_spill] sm:$0xff] }
 0x5fd   :  { %v9722_v56 = vpack.c.bf16 %v2841_v58, %v2840_v54  ;;  %v2273_v21 = vmul.f32 %v15833_v50, %v15833_v50  ;;  %v2280_v54 = vmul.f32 %v15835_v1, %v15835_v1  ;;  %v12706_v58 = vpop.permute.xlu1 %1834 }
 0x5fe   :  { %v10298_v6 = vpop.eup %10297  ;;  %15836 = vst [vmem:[#allocation24_spill] sm:$0xff] %v12706_v58 }
 0x5ff   :  { %v2845_v55 = vmul.f32 %v10298_v6, %v12081_v44  ;;  %9724 = vmatpush3.bf16.xpose.msk.msra.mxu1 %vm11884_vm6, %v9722_v56  ;;  %v2276_v44 = vmul.f32 %v12355_v46, %v12355_v46  ;;  %v2487_v23 = vsel %vm391_vm3, %v2273_v21, 0.0  ;;  %v2508_v61 = vsel %vm391_vm3, %v2280_v54, 0.0  ;;  %v15837_v56 = vld [vmem:[#allocation39_spill] sm:$0xff] }
 0x600   :  { %9725 = vmatprep.subr.bf16.mxu1 %v15753_v3  ;;  %v1905_v6 = vmul.f32 %v15837_v56, %v15837_v56 }
 0x601   :  { %v9730_v59 = vpack.c.bf16 %v2845_v55, %v2844_v0  ;;  %v15834_v0 = vld [vmem:[#allocation7_spill] sm:$0xff]  ;;  %v2496_v22 = vsel %vm391_vm3, %v2276_v44, 0.0  ;;  %v15839_v44 = vld [vmem:[#allocation32_spill] sm:$0xff] }
 0x602   :  { %v1904_v55 = vmul.f32 %v15834_v0, %v15834_v0  ;;  %v1619_v21 = vadd.f32 %v12665_v51, %v15839_v44 }
 0x603   :  { %9732 = vmatpush3.bf16.xpose.msk.msra.mxu0 %vm11884_vm6, %v9730_v59 }
 0x604   :  { %9733 = vmatprep.subr.bf16.mxu0 %v15753_v3 }
 0x605   :  { %v10300_v45 = vpop.eup %10299 }
 0x606   :  { %v2185_v13 = vmul.f32 %v10300_v45, %v12220_v14  ;;  %v2004_v14 = vsel %vm391_vm3, %v1904_v55, 0.0  ;;  %v12716_v55 = vpop.permute.xlu1 %653 }
 0x607   :  { %15840 = vst [vmem:[#allocation21_spill] sm:$0xff] %v12716_v55 }
 0x608   :  { %9427 = vmatmul.mubr.msk.f32.gmra.mrb[46].mxu1 %vm391_vm3, %v2185_v13  ;;  %v2007_v13 = vsel %vm391_vm3, %v1905_v6, 0.0 }
 0x609   :  { %9429 = vmatprep.mubr.msk.f32.mxu1 %vm10821_vm7, %v15767_v28 }
 0x61a   :  { %2497 = vadd.xlane.f32.xlu0 %v2496_v22  ;;  %v2651_v22 = vadd.f32 1e-12, %v2471_v57 }
 0x61b   :  { %2488 = vadd.xlane.f32.xlu1 %v2487_v23  ;;  %v12718_v23 = vpop.permute.xlu0 %1742 }
 0x61c   :  { %10301 = vrsqrt.f32 %v2651_v22 }
 0x61e   :  { %2005 = vadd.xlane.f32.xlu0 %v2004_v14  ;;  %v12720_v14 = vmax.f32 %v1619_v21, 0.0 }
 0x620   :  { %15841 = vst [vmem:[#allocation14_spill] sm:$0xff] %v12720_v14 }
 0x622   :  { %2509 = vadd.xlane.f32.xlu0 %v2508_v61 }
 0x624   :  { %v12711_v59 = vpop.f32.mrb[42].mxu1 }
 0x625   :  { %15838 = vst [vmem:[#allocation45_spill] sm:$0xff] %v12711_v59  ;;  %v9389_v45 = vpop.f32.mrb[43].mxu1 }
 0x626   :  { %2008 = vadd.xlane.f32.xlu0 %v2007_v13  ;;  %v10302_v44 = vpop.eup %10301 }
 0x627   :  { %v2843_v22 = vmul.f32 %v10302_v44, %v12213_v33 }
 0x62a   :  { %v2468_v54 = vpop.xlane.xlu1 %2467 }
 0x62b   :  { %v2650_v7 = vadd.f32 1e-12, %v2468_v54 }
 0x62c   :  { %1748 = vrot.lane.b32.xlu1 %v12720_v14, %s10819_s16 }
 0x62d   :  { %10303 = vrsqrt.f32 %v2650_v7  ;;  %v2480_v61 = vpop.xlane.xlu0 %2479 }
 0x62e   :  { %v1994_v6 = vpop.xlane.xlu1 %1993 }
 0x62f   :  { %v2092_v45 = vadd.f32 1e-12, %v1994_v6 }
 0x630   :  { %703 = vrot.lane.b32.xlu1 %v12671_v17, %s10817_s30 }
 0x631   :  { %10305 = vrsqrt.f32 %v2092_v45  ;;  %v1988_v13 = vpop.xlane.xlu0 %1987 }
 0x632   :  { %v2090_v57 = vadd.f32 1e-12, %v1988_v13 }
 0x634   :  { %10307 = vrsqrt.f32 %v2090_v57  ;;  %v2279_v57 = vmul.f32 %v12410_v60, %v12410_v60 }
 0x635   :  { %v1997_v21 = vpop.xlane.xlu0 %1996 }
 0x636   :  { %v2093_v59 = vadd.f32 1e-12, %v1997_v21  ;;  %v2505_v21 = vsel %vm391_vm3, %v2279_v57, 0.0 }
 0x637   :  { %v10304_v55 = vpop.eup %10303 }
 0x638   :  { %v2842_v54 = vmul.f32 %v10304_v55, %v12168_v24  ;;  %10309 = vrsqrt.f32 %v2093_v59  ;;  %v15843_v55 = vld [vmem:[#allocation8_spill] sm:$0xff] }
 0x639   :  { %v2281_v13 = vmul.f32 %v15843_v55, %v15843_v55  ;;  %v2495_v57 = vpop.xlane.xlu0 %2494 }
 0x63a   :  { %v9726_v7 = vpack.c.bf16 %v2843_v22, %v2842_v54  ;;  %v12756_v22 = vpop.permute.xlu1 %1744  ;;  %v2282_v54 = vmul.f32 %v12418_v2, %v12418_v2 }
 0x63b   :  { %v10306_v58 = vpop.eup %10305  ;;  %v2511_v44 = vsel %vm391_vm3, %v2281_v13, 0.0  ;;  %v2654_v13 = vadd.f32 1e-12, %v2480_v61 }
 0x63c   :  { %1844 = vrot.lane.b32.xlu0 %v12720_v14, %s10817_s30  ;;  %9728 = vmatpush3.bf16.xpose.msk.msra.mxu1 %vm11884_vm6, %v9726_v7  ;;  %v2188_v6 = vmul.f32 %v10306_v58, %v12181_v16  ;;  %v15842_v16 = vld [vmem:[#allocation17_spill] sm:$0xff] }
 0x63d   :  { %9741 = vmatprep.subr.bf16.mxu1 %v15753_v3  ;;  %v2277_v58 = vmul.f32 %v15842_v16, %v15842_v16  ;;  %10311 = vrsqrt.f32 %v2654_v13 }
 0x63e   :  { %v10308_v45 = vpop.eup %10307  ;;  %9448 = vmatmul.mubr.msk.f32.gmra.mrb[42].mxu0 %vm391_vm3, %v2188_v6 }
 0x63f   :  { %v2186_v33 = vmul.f32 %v10308_v45, %v12264_v36  ;;  %9450 = vmatprep.mubr.msk.f32.mxu0 %vm10821_vm7, %v15767_v28  ;;  %v2499_v36 = vsel %vm391_vm3, %v2277_v58, 0.0  ;;  %v2514_v58 = vsel %vm391_vm3, %v2282_v54, 0.0  ;;  %v12777_v54 = vpop.permute.xlu0 %1838 }
 0x640   :  { %15847 = vst [vmem:[#allocation27_spill] sm:$0xff] %v12777_v54 }
 0x641   :  { %9430 = vmatmul.mubr.msk.f32.gmra.mrb[48].mxu1 %vm391_vm3, %v2186_v33 }
 0x642   :  { %v10310_v24 = vpop.eup %10309  ;;  %9465 = vmatprep.mubr.msk.f32.mxu1 %vm10821_vm7, %v15767_v28 }
 0x643   :  { %v2189_v59 = vmul.f32 %v10310_v24, %v12268_v4  ;;  %v1906_v4 = vmul.f32 %v12420_v63, %v12420_v63  ;;  %v2283_v24 = vmul.f32 %v12456_v62, %v12456_v62 }
 0x645   :  { %9451 = vmatmul.mubr.msk.f32.gmra.mrb[44].mxu0 %vm391_vm3, %v2189_v59  ;;  %v2010_v6 = vsel %vm391_vm3, %v1906_v4, 0.0  ;;  %v2517_v4 = vsel %vm391_vm3, %v2283_v24, 0.0  ;;  %v2659_v24 = vadd.f32 1e-12, %v2495_v57 }
 0x646   :  { %9486 = vmatprep.mubr.msk.f32.mxu0 %vm10821_vm7, %v15767_v28 }
 0x654   :  { %2500 = vadd.xlane.f32.xlu1 %v2499_v36  ;;  %v12768_v36 = vpop.permute.xlu1 %701 }
 0x658   :  { %2512 = vadd.xlane.f32.xlu1 %v2511_v44  ;;  %v1907_v44 = vmul.f32 %v12458_v49, %v12458_v49 }
 0x65a   :  { %v2013_v61 = vsel %vm391_vm3, %v1907_v44, 0.0 }
 0x65b   :  { %2506 = vadd.xlane.f32.xlu0 %v2505_v21  ;;  %v15846_v21 = vld [vmem:[#allocation26_spill] sm:$0xff] }
 0x65e   :  { %v12760_v7 = vpop.f32.mrb[44].mxu1 }
 0x65f   :  { %15844 = vst [vmem:[#allocation20_spill] sm:$0xff] %v12760_v7  ;;  %2011 = vadd.xlane.f32.xlu0 %v2010_v6  ;;  %v9425_v45 = vpop.f32.mrb[45].mxu1  ;;  %v591_v6 = vadd.f32 %v12665_v51, %v15846_v21 }
 0x661   :  { %v12763_v33 = vpop.f32.mrb[36].mxu0 }
 0x662   :  { %15845 = vst [vmem:[#allocation23_spill] sm:$0xff] %v12763_v33  ;;  %v9407_v59 = vpop.f32.mrb[37].mxu0 }
 0x663   :  { %2515 = vadd.xlane.f32.xlu0 %v2514_v58  ;;  %v2286_v59 = vmul.f32 %v12414_v41, %v12414_v41  ;;  %v12782_v58 = vmax.f32 %v591_v6, 0.0  ;;  %v10312_v6 = vpop.eup %10311 }
 0x665   :  { %15848 = vst [vmem:[#allocation31_spill] sm:$0xff] %v12782_v58 }
 0x667   :  { %v2483_v45 = vpop.xlane.xlu1 %2482  ;;  %2518 = vadd.xlane.f32.xlu0 %v2517_v4  ;;  %v2526_v4 = vsel %vm391_vm3, %v2286_v59, 0.0 }
 0x668   :  { %v2655_v7 = vadd.f32 1e-12, %v2483_v45 }
 0x669   :  { %1842 = vrot.lane.b32.xlu1 %v12677_v48, %s10817_s30 }
 0x66a   :  { %10313 = vrsqrt.f32 %v2655_v7  ;;  %v1908_v7 = vmul.f32 %v12368_v19, %v12368_v19 }
 0x66b   :  { %v2492_v33 = vpop.xlane.xlu1 %2491  ;;  %2014 = vadd.xlane.f32.xlu0 %v2013_v61 }
 0x66c   :  { %v2658_v21 = vadd.f32 1e-12, %v2492_v33  ;;  %v2016_v61 = vsel %vm391_vm3, %v1908_v7, 0.0 }
 0x66d   :  { %657 = vrot.lane.b32.xlu1 %v12782_v58, %s10819_s16 }
 0x66e   :  { %10315 = vrsqrt.f32 %v2658_v21  ;;  %v2486_v13 = vpop.xlane.xlu0 %2485  ;;  %v2846_v21 = vmul.f32 %v10312_v6, %v12260_v18 }
 0x66f   :  { %10317 = vrsqrt.f32 %v2659_v24  ;;  %v2000_v44 = vpop.xlane.xlu1 %1999  ;;  %2527 = vadd.xlane.f32.xlu0 %v2526_v4 }
 0x670   :  { %v2094_v45 = vadd.f32 1e-12, %v2000_v44 }
 0x672   :  { %10319 = vrsqrt.f32 %v2094_v45  ;;  %v2003_v57 = vpop.xlane.xlu0 %2002 }
 0x673   :  { %v2095_v33 = vadd.f32 1e-12, %v2003_v57  ;;  %2017 = vadd.xlane.f32.xlu0 %v2016_v61  ;;  %v2284_v57 = vmul.f32 %v12506_v37, %v12506_v37 }
 0x674   :  { %v10314_v41 = vpop.eup %10313 }
 0x675   :  { %v2847_v60 = vmul.f32 %v10314_v41, %v12224_v26  ;;  %10321 = vrsqrt.f32 %v2095_v33 }
 0x676   :  { %v12827_v61 = vpop.permute.xlu0 %1746 }
 0x677   :  { %v9734_v59 = vpack.c.bf16 %v2847_v60, %v2846_v21  ;;  %15855 = vst [vmem:[#allocation7_spill] sm:$0xff] %v12827_v61 }
 0x678   :  { %v10316_v17 = vpop.eup %10315 }
 0x679   :  { %v10318_v19 = vpop.eup %10317  ;;  %9736 = vmatpush3.bf16.xpose.msk.msra.mxu0 %vm11884_vm6, %v9734_v59  ;;  %v2850_v24 = vmul.f32 %v10316_v17, %v12218_v30  ;;  %v15849_v30 = vld [vmem:[#allocation28_spill] sm:$0xff]  ;;  %v2656_v59 = vadd.f32 1e-12, %v2486_v13 }
 0x67a   :  { %9737 = vmatprep.subr.bf16.mxu0 %v15753_v3  ;;  %v2851_v7 = vmul.f32 %v10318_v19, %v12189_v9  ;;  %v594_v60 = vadd.f32 %v12665_v51, %v15849_v30  ;;  %v15851_v9 = vld [vmem:[#allocation6_spill] sm:$0xff]  ;;  %v12819_v51 = vpop.permute.xlu1 %1840 }
 0x67b   :  { %v2278_v19 = vmul.f32 %v15851_v9, %v15851_v9  ;;  %15853 = vst [vmem:[#allocation30_spill] sm:$0xff] %v12819_v51  ;;  %10323 = vrsqrt.f32 %v2656_v59  ;;  %v2293_v59 = vmul.f32 %v12513_v34, %v12513_v34 }
 0x67c   :  { %v10320_v4 = vpop.eup %10319  ;;  %v9742_v45 = vpack.c.bf16 %v2851_v7, %v2850_v24  ;;  %v2288_v24 = vmul.f32 %v12545_v10, %v12545_v10  ;;  %v2520_v7 = vsel %vm391_vm3, %v2284_v57, 0.0 }
 0x67d   :  { %v2190_v44 = vmul.f32 %v10320_v4, %v12183_v27  ;;  %v12810_v27 = vmax.f32 %v594_v60, 0.0 }
 0x67e   :  { %v12829_v21 = vpop.permute.xlu1 %655  ;;  %v2532_v30 = vsel %vm391_vm3, %v2288_v24, 0.0 }
 0x67f   :  { %v10322_v18 = vpop.eup %10321  ;;  %9466 = vmatmul.mubr.msk.f32.vlgmr.msra.gmra.mrb[50].mxu1 %vm391_vm3, %v2190_v44  ;;  %15850 = vst [vmem:[#allocation33_spill] sm:$0xff] %v12810_v27  ;;  %15856 = vst [vmem:[#allocation9_spill] sm:$0xff] %v12829_v21 }
 0x680   :  { %9744 = vmatpush3.bf16.xpose.msk.msra.mxu1 %vm11884_vm6, %v9742_v45  ;;  %9468 = vmatprep.mubr.msk.f32.mxu1 %vm10821_vm7, %v15767_v28  ;;  %v2191_v26 = vmul.f32 %v10322_v18, %v12323_v20  ;;  %v2502_v20 = vsel %vm391_vm3, %v2278_v19, 0.0  ;;  %v1910_v18 = vmul.f32 %v12550_v35, %v12550_v35 }
 0x681   :  { %9745 = vmatprep.subr.bf16.mxu1 %v15753_v3 }
 0x682   :  { %v2022_v19 = vsel %vm391_vm3, %v1910_v18, 0.0  ;;  %v2547_v18 = vsel %vm391_vm3, %v2293_v59, 0.0  ;;  %v1912_v59 = vmul.f32 %v12616_v11, %v12616_v11 }
 0x683   :  { %9469 = vmatmul.mubr.msk.f32.gmra.mrb[52].mxu1 %vm391_vm3, %v2191_v26 }
 0x684   :  { %9471 = vmatprep.mubr.msk.f32.mxu1 %vm10821_vm7, %v15767_v28 }
 0x689   :  { %659 = vrot.lane.b32.xlu0 %v12810_v27, %s10819_s16 }
 0x691   :  { %2503 = vadd.xlane.f32.xlu1 %v2502_v20  ;;  %v2292_v20 = vmul.f32 %v12474_v8, %v12474_v8 }
 0x69a   :  { %v12817_v41 = vpop.f32.mrb[38].mxu0 }
 0x69b   :  { %15852 = vst [vmem:[#allocation29_spill] sm:$0xff] %v12817_v41  ;;  %v9410_v17 = vpop.f32.mrb[39].mxu0 }
 0x69c   :  { %v10324_v17 = vpop.eup %10323 }
 0x6a2   :  { %705 = vrot.lane.b32.xlu1 %v12782_v58, %s10817_s30  ;;  %v12823_v6 = vpop.f32.mrb[40].mxu0 }
 0x6a3   :  { %15854 = vst [vmem:[#allocation36_spill] sm:$0xff] %v12823_v6  ;;  %v9446_v33 = vpop.f32.mrb[41].mxu0 }
 0x6a4   :  { %v2544_v33 = vsel %vm391_vm3, %v2292_v20, 0.0  ;;  %v2290_v20 = vmul.f32 %v12558_v32, %v12558_v32 }
 0x6a7   :  { %v12833_v4 = vpop.xlane.xlu0 %2497 }
 0x6a8   :  { %v2489_v44 = vpop.xlane.xlu1 %2488  ;;  %2521 = vadd.xlane.f32.xlu0 %v2520_v7 }
 0x6a9   :  { %v2657_v45 = vadd.f32 1e-12, %v2489_v44  ;;  %v2848_v44 = vmul.f32 %v10324_v17, %v12316_v53 }
 0x6ab   :  { %10325 = vrsqrt.f32 %v2657_v45  ;;  %v2006_v26 = vpop.xlane.xlu0 %2005 }
 0x6ac   :  { %v2096_v60 = vadd.f32 1e-12, %v2006_v26  ;;  %2533 = vadd.xlane.f32.xlu0 %v2532_v30  ;;  %v1911_v26 = vmul.f32 %v12468_v43, %v12468_v43 }
 0x6ae   :  { %10327 = vrsqrt.f32 %v2096_v60  ;;  %v2025_v53 = vsel %vm391_vm3, %v1911_v26, 0.0 }
 0x6af   :  { %v12839_v13 = vpop.xlane.xlu0 %2509 }
 0x6b0   :  { %2023 = vadd.xlane.f32.xlu0 %v2022_v19 }
 0x6b3   :  { %v2009_v57 = vpop.xlane.xlu0 %2008 }
 0x6b4   :  { %v2097_v7 = vadd.f32 1e-12, %v2009_v57  ;;  %2545 = vadd.xlane.f32.xlu0 %v2544_v33  ;;  %v2287_v33 = vmul.f32 %v12374_v42, %v12374_v42 }
 0x6b5   :  { %v10326_v24 = vpop.eup %10325 }
 0x6b6   :  { %v2849_v45 = vmul.f32 %v10326_v24, %v15833_v50  ;;  %10329 = vrsqrt.f32 %v2097_v7  ;;  %v2291_v50 = vmul.f32 %v12605_v47, %v12605_v47  ;;  %v2285_v24 = vmul.f32 %v12466_v40, %v12466_v40 }
 0x6b8   :  { %v10328_v30 = vpop.eup %10327  ;;  %2548 = vadd.xlane.f32.xlu0 %v2547_v18  ;;  %v9738_v60 = vpack.c.bf16 %v2849_v45, %v2848_v44  ;;  %v2541_v7 = vsel %vm391_vm3, %v2291_v50, 0.0  ;;  %v2529_v44 = vsel %vm391_vm3, %v2287_v33, 0.0  ;;  %v2028_v45 = vsel %vm391_vm3, %v1912_v59, 0.0 }
 0x6b9   :  { %v2192_v19 = vmul.f32 %v10328_v30, %v15834_v0  ;;  %v2538_v0 = vsel %vm391_vm3, %v2290_v20, 0.0  ;;  %v1909_v18 = vmul.f32 %v12515_v5, %v12515_v5  ;;  %v2523_v26 = vsel %vm391_vm3, %v2285_v24, 0.0 }
 0x6ba   :  { %9740 = vmatpush3.bf16.xpose.msk.msra.mxu0 %vm11884_vm6, %v9738_v60  ;;  %v2295_v30 = vmul.f32 %v12653_v52, %v12653_v52  ;;  %v15674_v59 = vmov 0  }
 0x6bb   :  { %9472 = vmatmul.mubr.msk.f32.gmra.mrb[54].mxu1 %vm391_vm3, %v2192_v19  ;;  %9753 = vmatprep.subr.bf16.mxu0 %v15753_v3  ;;  %v2019_v19 = vsel %vm391_vm3, %v1909_v18, 0.0  ;;  %v2660_v18 = vadd.f32 1e-12, %v12833_v4  ;;  %v12917_v4 = vpop.permute.xlu0 %1844 }
 0x6bc   :  { %2026 = vadd.xlane.f32.xlu0 %v2025_v53  ;;  %9507 = vmatprep.mubr.msk.f32.mxu1 %vm10821_vm7, %v15767_v28  ;;  %v2553_v20 = vsel %vm391_vm3, %v2295_v30, 0.0  ;;  %v2298_v53 = vmul.f32 %v12566_v39, %v12566_v39  ;;  %15860 = vst [vmem:[#allocation8_spill] sm:$0xff] %v12917_v4 }
 0x6bd   :  { %10140 = vset.pattern.permute.xlu1 %v15674_v59  ;;  %10139 = vset.pattern.permute.xlu0 %v15674_v59  ;;  %10331 = vrsqrt.f32 %v2660_v18 }
 0x6be   :  { %v2562_v50 = vsel %vm391_vm3, %v2298_v53, 0.0 }
 0x6c0   :  { %v10330_v17 = vpop.eup %10329  ;;  %2539 = vadd.xlane.f32.xlu0 %v2538_v0  ;;  %v1914_v0 = vmul.f32 %v12560_v15, %v12560_v15 }
 0x6c1   :  { %v2193_v57 = vmul.f32 %v10330_v17, %v15837_v56  ;;  %v2294_v56 = vmul.f32 %v12612_v31, %v12612_v31  ;;  %v2297_v17 = vmul.f32 %v12660_v38, %v12660_v38 }
 0x6c2   :  { %v2034_v33 = vsel %vm391_vm3, %v1914_v0, 0.0 }
 0x6c3   :  { %9487 = vmatmul.mubr.msk.f32.vlgmr.msra.gmra.mrb[46].mxu0 %vm391_vm3, %v2193_v57  ;;  %v2550_v60 = vsel %vm391_vm3, %v2294_v56, 0.0  ;;  %v12895_v57 = vpop.permute.xlu1 %1748 }
 0x6c4   :  { %2542 = vadd.xlane.f32.xlu0 %v2541_v7  ;;  %9489 = vmatprep.mubr.msk.f32.mxu0 %vm10821_vm7, %v15767_v28  ;;  %15857 = vst [vmem:[#allocation39_spill] sm:$0xff] %v12895_v57  ;;  %v2300_v7 = vmul.f32 %v12718_v23, %v12718_v23 }
 0x6c6   :  { %2530 = vadd.xlane.f32.xlu1 %v2529_v44  ;;  %v2559_v44 = vsel %vm391_vm3, %v2297_v17, 0.0  ;;  %v2568_v30 = vsel %vm391_vm3, %v2300_v7, 0.0 }
 0x6c7   :  { %v10332_v18 = vpop.eup %10331 }
 0x6c8   :  { %2029 = vadd.xlane.f32.xlu0 %v2028_v45  ;;  %v12905_v45 = vpop.permute.xlu1 %703 }
 0x6c9   :  { %15859 = vst [vmem:[#allocation17_spill] sm:$0xff] %v12905_v45 }
 0x6ca   :  { %2524 = vadd.xlane.f32.xlu1 %v2523_v26  ;;  %v1916_v26 = vmul.f32 %v12768_v36, %v12768_v36 }
 0x6cc   :  { %2551 = vadd.xlane.f32.xlu0 %v2550_v60  ;;  %v2040_v53 = vsel %vm391_vm3, %v1916_v26, 0.0 }
 0x6ce   :  { %2020 = vadd.xlane.f32.xlu1 %v2019_v19  ;;  %v2664_v19 = vadd.f32 1e-12, %v12839_v13 }
 0x6d0   :  { %2554 = vadd.xlane.f32.xlu0 %v2553_v20 }
 0x6d4   :  { %2563 = vadd.xlane.f32.xlu0 %v2562_v50  ;;  %v2305_v50 = vmul.f32 %v12720_v14, %v12720_v14 }
 0x6d6   :  { %v2583_v7 = vsel %vm391_vm3, %v2305_v50, 0.0 }
 0x6d8   :  { %2035 = vadd.xlane.f32.xlu0 %v2034_v33  ;;  %v2302_v33 = vmul.f32 %v12777_v54, %v12777_v54 }
 0x6db   :  { %v12902_v24 = vpop.f32.mrb[46].mxu1 }
 0x6dc   :  { %15858 = vst [vmem:[#allocation32_spill] sm:$0xff] %v12902_v24  ;;  %2560 = vadd.xlane.f32.xlu0 %v2559_v44  ;;  %v9428_v56 = vpop.f32.mrb[47].mxu1  ;;  %v1918_v44 = vmul.f32 %v12829_v21, %v12829_v21  ;;  %v13021_v24 = vld [vmem:[%s15614_s1] sm:$0xff] }
 0x6dd   :  { %v2574_v56 = vsel %vm391_vm3, %v2302_v33, 0.0  ;;  %v4700_v41 = vcombine.high %v13021_v24, %v13021_v24 }
 0x6df   :  { %707 = vrot.lane.b32.xlu1 %v12810_v27, %s10817_s30 }
 0x6e0   :  { %2569 = vadd.xlane.f32.xlu0 %v2568_v30 }
 0x6e1   :  { %v2501_v60 = vpop.xlane.xlu1 %2500 }
 0x6e2   :  { %v2661_v20 = vadd.f32 1e-12, %v2501_v60 }
 0x6e4   :  { %10333 = vrsqrt.f32 %v2661_v20  ;;  %2041 = vadd.xlane.f32.xlu0 %v2040_v53  ;;  %v2852_v20 = vmul.f32 %v10332_v18, %v12355_v46  ;;  %v2307_v53 = vmul.f32 %v12895_v57, %v12895_v57 }
 0x6e5   :  { %v2513_v0 = vpop.xlane.xlu1 %2512  ;;  %10335 = vrsqrt.f32 %v2664_v19  ;;  %v2046_v19 = vsel %vm391_vm3, %v1918_v44, 0.0  ;;  %v1920_v44 = vmul.f32 %v12782_v58, %v12782_v58 }
 0x6e6   :  { %v2665_v17 = vadd.f32 1e-12, %v2513_v0  ;;  %v2589_v46 = vsel %vm391_vm3, %v2307_v53, 0.0 }
 0x6e8   :  { %10337 = vrsqrt.f32 %v2665_v17  ;;  %2584 = vadd.xlane.f32.xlu0 %v2583_v7  ;;  %v12922_v13 = vpop.xlane.xlu0 %2506 }
 0x6ec   :  { %2575 = vadd.xlane.f32.xlu0 %v2574_v56  ;;  %v2012_v26 = vpop.xlane.xlu0 %2011 }
 0x6ed   :  { %v2098_v30 = vadd.f32 1e-12, %v2012_v26 }
 0x6ee   :  { %v10334_v60 = vpop.eup %10333 }
 0x6ef   :  { %v2853_v50 = vmul.f32 %v10334_v60, %v15842_v16  ;;  %10339 = vrsqrt.f32 %v2098_v30  ;;  %v10336_v0 = vpop.eup %10335 }
 0x6f0   :  { %2047 = vadd.xlane.f32.xlu0 %v2046_v19  ;;  %v2516_v17 = vpop.xlane.xlu0 %2515  ;;  %v2856_v56 = vmul.f32 %v10336_v0, %v15835_v1  ;;  %v2309_v1 = vmul.f32 %v12917_v4, %v12917_v4 }
 0x6f1   :  { %v2666_v7 = vadd.f32 1e-12, %v2516_v17  ;;  %v9746_v33 = vpack.c.bf16 %v2853_v50, %v2852_v20  ;;  %v15861_v50 = vld [vmem:[#allocation35_spill] sm:$0xff] }
 0x6f2   :  { %v10338_v59 = vpop.eup %10337  ;;  %v2595_v53 = vsel %vm391_vm3, %v2309_v1, 0.0  ;;  %v2289_v0 = vmul.f32 %v15861_v50, %v15861_v50 }
 0x6f3   :  { %v2857_v26 = vmul.f32 %v10338_v59, %v15843_v55  ;;  %9748 = vmatpush3.bf16.xpose.msk.msra.mxu1 %vm11884_vm6, %v9746_v33  ;;  %10341 = vrsqrt.f32 %v2666_v7  ;;  %v2052_v55 = vsel %vm391_vm3, %v1920_v44, 0.0  ;;  %v1913_v33 = vmul.f32 %v12656_v29, %v12656_v29 }
 0x6f4   :  { %2590 = vadd.xlane.f32.xlu0 %v2589_v46  ;;  %v2519_v16 = vpop.xlane.xlu0 %2518  ;;  %9749 = vmatprep.subr.bf16.mxu1 %v15753_v3 }
 0x6f5   :  { %v2667_v18 = vadd.f32 1e-12, %v2519_v16  ;;  %v9754_v30 = vpack.c.bf16 %v2857_v26, %v2856_v56  ;;  %v2535_v26 = vsel %vm391_vm3, %v2289_v0, 0.0  ;;  %v2031_v16 = vsel %vm391_vm3, %v1913_v33, 0.0  ;;  %v12979_v0 = vpop.permute.xlu1 %1842 }
 0x6f6   :  { %15865 = vst [vmem:[#allocation28_spill] sm:$0xff] %v12979_v0 }
 0x6f7   :  { %10343 = vrsqrt.f32 %v2667_v18  ;;  %9756 = vmatpush3.bf16.xpose.msk.msra.mxu0 %vm11884_vm6, %v9754_v30  ;;  %v2299_v30 = vmul.f32 %v12614_v12, %v12614_v12 }
 0x6f8   :  { %2053 = vadd.xlane.f32.xlu0 %v2052_v55  ;;  %v2015_v59 = vpop.xlane.xlu0 %2014  ;;  %9757 = vmatprep.subr.bf16.mxu0 %v15753_v3  ;;  %v15863_v55 = vld [vmem:[#allocation21_spill] sm:$0xff] }
 0x6f9   :  { %v10340_v60 = vpop.eup %10339  ;;  %v2099_v19 = vadd.f32 1e-12, %v2015_v59  ;;  %v2565_v1 = vsel %vm391_vm3, %v2299_v30, 0.0 }
 0x6fa   :  { %v2194_v20 = vmul.f32 %v10340_v60, %v12420_v63 }
 0x6fb   :  { %10345 = vrsqrt.f32 %v2099_v19  ;;  %v2301_v19 = vmul.f32 %v12756_v22, %v12756_v22 }
 0x6fc   :  { %2596 = vadd.xlane.f32.xlu0 %v2595_v53  ;;  %9490 = vmatmul.mubr.msk.f32.gmra.mrb[48].mxu0 %vm391_vm3, %v2194_v20  ;;  %v12983_v33 = vpop.xlane.xlu0 %2527 }
 0x6fd   :  { %9492 = vmatprep.mubr.msk.f32.mxu0 %vm10821_vm7, %v15767_v28  ;;  %v10342_v17 = vpop.eup %10341 }
 0x6fe   :  { %v2858_v56 = vmul.f32 %v10342_v17, %v12418_v2  ;;  %v15862_v2 = vld [vmem:[#allocation24_spill] sm:$0xff] }
 0x701   :  { %v10344_v7 = vpop.eup %10343 }
 0x702   :  { %v2859_v63 = vmul.f32 %v10344_v7, %v12456_v62  ;;  %v2296_v62 = vmul.f32 %v15862_v2, %v15862_v2 }
 0x703   :  { %2536 = vadd.xlane.f32.xlu1 %v2535_v26 }
 0x704   :  { %v9758_v46 = vpack.c.bf16 %v2859_v63, %v2858_v56  ;;  %v2556_v59 = vsel %vm391_vm3, %v2296_v62, 0.0  ;;  %v2571_v56 = vsel %vm391_vm3, %v2301_v19, 0.0  ;;  %v2304_v63 = vmul.f32 %v12677_v48, %v12677_v48 }
 0x705   :  { %v10346_v44 = vpop.eup %10345  ;;  %v2663_v62 = vadd.f32 1e-12, %v12922_v13 }
 0x706   :  { %9760 = vmatpush3.bf16.xpose.msk.msra.mxu0 %vm11884_vm6, %v9758_v46  ;;  %v2195_v18 = vmul.f32 %v10346_v44, %v12458_v49  ;;  %v1915_v49 = vmul.f32 %v15863_v55, %v15863_v55  ;;  %v12990_v44 = vpop.permute.xlu1 %657 }
 0x707   :  { %2032 = vadd.xlane.f32.xlu1 %v2031_v16  ;;  %9761 = vmatprep.subr.bf16.mxu0 %v15753_v3  ;;  %15868 = vst [vmem:[#allocation24_spill] sm:$0xff] %v12990_v44  ;;  %v2580_v16 = vsel %vm391_vm3, %v2304_v63, 0.0  ;;  %10347 = vrsqrt.f32 %v2663_v62  ;;  %v15676_v62 = vlaneseq }
 0x708   :  { %9493 = vmatmul.mubr.msk.f32.gmra.mrb[50].mxu0 %vm391_vm3, %v2195_v18  ;;  %v2037_v53 = vsel %vm391_vm3, %v1915_v49, 0.0  ;;  %v15869_v18 = vld [vmem:[#allocation12_spill] sm:$0xff]  ;;  %v2303_v49 = vmul.f32 %v12819_v51, %v12819_v51 }
 0x709   :  { %9528 = vmatprep.mubr.msk.f32.mxu0 %vm10821_vm7, %v15767_v28  ;;  %v1917_v30 = vmul.f32 %v15869_v18, %v15869_v18 }
 0x70a   :  { %v2577_v13 = vsel %vm391_vm3, %v2303_v49, 0.0 }
 0x70b   :  { %2566 = vadd.xlane.f32.xlu1 %v2565_v1  ;;  %v2018_v1 = vpop.xlane.xlu0 %2017  ;;  %v2043_v19 = vsel %vm391_vm3, %v1917_v30, 0.0 }
 0x70f   :  { %2557 = vadd.xlane.f32.xlu1 %v2556_v59 }
 0x711   :  { %v12974_v60 = vpop.f32.mrb[42].mxu0 }
 0x712   :  { %15864 = vst [vmem:[#allocation26_spill] sm:$0xff] %v12974_v60  ;;  %v9449_v20 = vpop.f32.mrb[43].mxu0 }
 0x713   :  { %2038 = vadd.xlane.f32.xlu1 %v2037_v53  ;;  %v2306_v53 = vmul.f32 %v12827_v61, %v12827_v61 }
 0x714   :  { %v12981_v17 = vpop.f32.mrb[48].mxu1 }
 0x715   :  { %15866 = vst [vmem:[#allocation6_spill] sm:$0xff] %v12981_v17  ;;  %v9431_v7 = vpop.f32.mrb[49].mxu1  ;;  %v2586_v17 = vsel %vm391_vm3, %v2306_v53, 0.0 }
 0x716   :  { %v13001_v7 = vpop.permute.xlu0 %659 }
 0x717   :  { %2572 = vadd.xlane.f32.xlu1 %v2571_v56  ;;  %15870 = vst [vmem:[#allocation21_spill] sm:$0xff] %v13001_v7 }
 0x718   :  { %v12988_v26 = vpop.f32.mrb[44].mxu0 }
 0x719   :  { %15867 = vst [vmem:[#allocation35_spill] sm:$0xff] %v12988_v26  ;;  %v9452_v46 = vpop.f32.mrb[45].mxu0 }
 0x71a   :  { %v2100_v46 = vadd.f32 1e-12, %v2018_v1  ;;  %v10348_v1 = vpop.eup %10347 }
 0x71b   :  { %2581 = vadd.xlane.f32.xlu1 %v2580_v16  ;;  %v10824_v16 = vmov 1966171168  }
 0x71c   :  { %v4602_v30 = vunpack.c.l.s4 %v10824_v16 }
 0x71e   :  { %v2504_v59 = vpop.xlane.xlu1 %2503  ;;  %v4603_v49 = vunpack.c.0.s8 %v4602_v30  ;;  %v15873_v30 = vld [vmem:[#allocation15_spill] sm:$0xff] }
 0x71f   :  { %v2662_v20 = vadd.f32 1e-12, %v2504_v59  ;;  %2044 = vadd.xlane.f32.xlu1 %v2043_v19  ;;  %v1924_v59 = vmul.f32 %v13001_v7, %v13001_v7 }
 0x721   :  { %10349 = vrsqrt.f32 %v2662_v20  ;;  %v1919_v20 = vmul.f32 %v12905_v45, %v12905_v45  ;;  %v2064_v16 = vsel %vm391_vm3, %v1924_v59, 0.0 }
 0x722   :  { %v13003_v56 = vpop.permute.xlu1 %705  ;;  %10351 = vrsqrt.f32 %v2100_v46  ;;  %v4599_v46 = vld [vmem:[%s15613_s0 + $0x8] sm:$0xff] }
 0x723   :  { %15871 = vst [vmem:[#allocation47_spill] sm:$0xff] %v13003_v56  ;;  %v1922_v63 = vmul.f32 %v13003_v56, %v13003_v56  ;;  %2578 = vadd.xlane.f32.xlu1 %v2577_v13  ;;  %v13015_v13 = vshrl.u32 %v15676_v62, 7  ;;  %v2049_v53 = vsel %vm391_vm3, %v1919_v20, 0.0  ;;  %v15877_v56 = vmov 0  }
 0x725   :  { %v2058_v19 = vsel %vm391_vm3, %v1922_v63, 0.0  ;;  %15872 = vst [vmem:[#allocation48_spill] sm:$0xff] %v13015_v13  ;;  %v2308_v63 = vmul.f32 %v12979_v0, %v12979_v0  ;;  %v13032_v62 = vsub.s32 %v4603_v49, %v13015_v13  ;;  %v13055_v6 = vsub.s32 0, %v13015_v13 }
 0x726   :  { %2059 = vadd.xlane.f32.xlu0 %v2058_v19  ;;  %v2855_v19 = vmul.f32 %v10348_v1, %v15873_v30 }
 0x727   :  { %2587 = vadd.xlane.f32.xlu1 %v2586_v17  ;;  %v2592_v20 = vsel %vm391_vm3, %v2308_v63, 0.0  ;;  %v4656_v26 = vrot.slane %v4599_v46, %v13032_v62 }
 0x729   :  { %v4664_v30 = vcombine.high %v4656_v26, %v4656_v26 }
 0x72a   :  { %2065 = vadd.xlane.f32.xlu0 %v2064_v16  ;;  %v1921_v16 = vmul.f32 %v12990_v44, %v12990_v44 }
 0x72b   :  { %v10350_v17 = vpop.eup %10349  ;;  %2050 = vadd.xlane.f32.xlu1 %v2049_v53 }
 0x72c   :  { %v2854_v59 = vmul.f32 %v10350_v17, %v15851_v9  ;;  %v13043_v9 = vrot.slane %v4700_v41, %v13032_v62  ;;  %v10352_v49 = vpop.eup %10351  ;;  %v2055_v1 = vsel %vm391_vm3, %v1921_v16, 0.0  ;;  %v1923_v17 = vmul.f32 %v12810_v27, %v12810_v27 }
 0x72d   :  { %v4686_v41 = vrot.slane %v4664_v30, %v13032_v62  ;;  %v13072_v30 = vrot.slane %v4656_v26, %v13032_v62 }
 0x72e   :  { %v9750_v53 = vpack.c.bf16 %v2855_v19, %v2854_v59  ;;  %v4716_v63 = vcombine.high %v13043_v9, %v13043_v9  ;;  %v15874_v19 = vld [vmem:[#allocation11_spill] sm:$0xff] }
 0x72f   :  { %2593 = vadd.xlane.f32.xlu1 %v2592_v20  ;;  %v2196_v59 = vmul.f32 %v10352_v49, %v15874_v19  ;;  %v4699_v49 = vld [vmem:[%s15614_s1 + $0x8] sm:$0xff] }
 0x730   :  { %9752 = vmatpush3.bf16.xpose.msk.msra.mxu1 %vm11884_vm6, %v9750_v53  ;;  %v2061_v53 = vsel %vm391_vm3, %v1923_v17, 0.0  ;;  %v13059_v16 = vrot.slane %v4716_v63, %v13032_v62  ;;  %v13069_v17 = vrot.slane %v4686_v41, %v13055_v6  ;;  %v4756_v63 = vrot.slane %v4699_v49, %v13032_v62 }
 0x731   :  { %9765 = vmatprep.subr.bf16.mxu1 %v15753_v3  ;;  %v4749_v61 = vcombine.high %v4699_v49, %v4699_v49 }
 0x732   :  { %15875 = vst [vmem:[#allocation15_spill] sm:$0xff] %v13059_v16  ;;  %15876 = vst [vmem:[#allocation11_spill] sm:$0xff] %v13069_v17  ;;  %v4748_v19 = vcombine.high %v13059_v16, %v13059_v16  ;;  %vm4882_vm8 = vcmp.le.s32.totalorder %v13015_v13, %v13069_v17  ;;  %v13082_v60 = vrot.slane %v4756_v63, %v13032_v62 }
 0x733   :  { %2056 = vadd.xlane.f32.xlu1 %v2055_v1  ;;  %v5026_v26 = vsel %vm4882_vm8, 1, %v15877_v56  ;;  %v4764_v44 = vcombine.high %v4756_v63, %v4756_v63  ;;  %v4696_v17 = vcombine.high %v4686_v41, %v4686_v41  ;;  %v4763_v41 = vrot.slane %v4749_v61, %v13032_v62 }
 0x734   :  { %v4794_v16 = vcombine.high %v13082_v60, %v13082_v60 }
 0x735   :  { %v2522_v20 = vpop.xlane.xlu0 %2521  ;;  %v13093_v4 = vrot.slane %v4764_v44, %v13032_v62  ;;  %v13126_v21 = vrot.slane %v4763_v41, %v13032_v62 }
 0x736   :  { %v2668_v61 = vadd.f32 1e-12, %v2522_v20 }
 0x737   :  { %2062 = vadd.xlane.f32.xlu1 %v2061_v53  ;;  %9508 = vmatmul.mubr.msk.f32.vlgmr.msra.gmra.mrb[56].mxu1 %vm391_vm3, %v2196_v59  ;;  %v4694_v53 = vcombine.high %v13072_v30, %v13072_v30  ;;  %v4796_v63 = vcombine.high %v13093_v4, %v13093_v4  ;;  %15883 = vst [vmem:[#allocation54_spill] sm:$0xff] %v13126_v21 }
 0x738   :  { %9510 = vmatprep.mubr.msk.f32.mxu1 %vm10821_vm7, %v15767_v28 }
 0x739   :  { %v13063_v1 = vpop.xlane.xlu0 %2533  ;;  %v13086_v27 = vrot.slane %v4694_v53, %v13055_v6  ;;  %v13097_v53 = vrot.slane %v4696_v17, %v13055_v6 }
 0x73b   :  { %15878 = vst [vmem:[#allocation49_spill] sm:$0xff] %v13086_v27  ;;  %vm4883_vm9 = vcmp.le.s32.totalorder %v13015_v13, %v13086_v27  ;;  %15879 = vst [vmem:[#allocation50_spill] sm:$0xff] %v13097_v53  ;;  %vm4884_vm10 = vcmp.le.s32.totalorder %v13015_v13, %v13097_v53 }
 0x73c   :  { %v5027_v45 = vsel %vm4883_vm9, 1, %v15877_v56 }
 0x73d   :  { %v2024_v59 = vpop.xlane.xlu0 %2023 }
 0x740   :  { %4939 = vperm.xlu0 %10139, %v4748_v19   ;;  %v4649_v19 = vcombine.high %v4599_v46, %v4599_v46  ;;  %v2670_v46 = vadd.f32 1e-12, %v12983_v33  ;;  %v13123_v33 = vld [vmem:[%s15613_s0] sm:$0xff]  ;;  %s10825_s0 = smov 16  }
 0x741   :  { %v2546_v7 = vpop.xlane.xlu0 %2545 }
 0x742   :  { %10353 = vrsqrt.f32 %v2670_v46 }
 0x744   :  { %5061 = vperm.xlu0 %10139, %v5026_v26   ;;  %v4663_v26 = vrot.slane %v4649_v19, %v13032_v62 }
 0x745   :  { %v2549_v0 = vpop.xlane.xlu0 %2548 }
 0x746   :  { %v13107_v44 = vrot.slane %v4663_v26, %v13032_v62  ;;  %v4665_v17 = vcombine.high %v4663_v26, %v4663_v26  ;;  %v2677_v51 = vadd.f32 1e-12, %v2549_v0 }
 0x748   :  { %4960 = vperm.xlu0 %10139, %v4794_v16   ;;  %15880 = vst [vmem:[#allocation51_spill] sm:$0xff] %v13107_v44  ;;  %v13118_v49 = vrot.slane %v13107_v44, %v13055_v6 }
 0x749   :  { %v2027_v58 = vpop.xlane.xlu0 %2026 }
 0x74a   :  { %15882 = vst [vmem:[#allocation53_spill] sm:$0xff] %v13118_v49  ;;  %vm4885_vm11 = vcmp.le.s32.totalorder %v13015_v13, %v13118_v49  ;;  %v2102_v49 = vadd.f32 1e-12, %v2024_v59  ;;  %v2103_v0 = vadd.f32 1e-12, %v2027_v58 }
 0x74c   :  { %5064 = vperm.xlu0 %10139, %v5027_v45   ;;  %v5028_v45 = vsel %vm4884_vm10, 1, %v15877_v56 }
 0x74d   :  { %v13102_v27 = vpop.xlane.xlu0 %2539 }
 0x750   :  { %4967 = vperm.xlu0 %10139, %v4796_v63  }
 0x751   :  { %v13111_v16 = vpop.xlane.xlu0 %2542 }
 0x752   :  { %v13114_v19 = vpop.f32.mrb[50].mxu1 }
 0x753   :  { %15881 = vst [vmem:[#allocation52_spill] sm:$0xff] %v13114_v19  ;;  %v2531_v53 = vpop.xlane.xlu1 %2530  ;;  %v9467_v57 = vpop.f32.mrb[51].mxu1  ;;  %v13129_v19 = vrot.slane %v4665_v17, %v13032_v62  ;;  %v5029_v17 = vsel %vm4885_vm11, 1, %v15877_v56 }
 0x754   :  { %v2671_v63 = vadd.f32 1e-12, %v2531_v53  ;;  %5067 = vperm.xlu0 %10139, %v5028_v45   ;;  %v4600_v57 = vcombine.high %v13123_v33, %v13123_v33  ;;  %v4765_v45 = vcombine.high %v4763_v41, %v4763_v41  ;;  %v10354_v41 = vpop.eup %10353 }
 0x755   :  { %v2030_v26 = vpop.xlane.xlu0 %2029  ;;  %15884 = vst [vmem:[#allocation55_spill] sm:$0xff] %v13129_v19 }
 0x756   :  { %10355 = vrsqrt.f32 %v2671_v63  ;;  %v13131_v44 = vpop.f32.mrb[52].mxu1  ;;  %v13141_v63 = vrot.slane %v13129_v19, %v13055_v6 }
 0x757   :  { %15885 = vst [vmem:[#allocation56_spill] sm:$0xff] %v13131_v44  ;;  %v2525_v46 = vpop.xlane.xlu1 %2524  ;;  %v9470_v20 = vpop.f32.mrb[53].mxu1  ;;  %10357 = vrsqrt.f32 %v2668_v61  ;;  %v13144_v44 = vrot.slane %v4600_v57, %v13032_v62 }
 0x758   :  { %v2669_v53 = vadd.f32 1e-12, %v2525_v46  ;;  %4974 = vperm.xlu0 %10139, %v13126_v21   ;;  %15886 = vst [vmem:[#allocation57_spill] sm:$0xff] %v13141_v63  ;;  %v2676_v20 = vadd.f32 1e-12, %v2546_v7  ;;  %v13147_v46 = vrot.slane %v4765_v45, %v13032_v62  ;;  %vm4886_vm12 = vcmp.le.s32.totalorder %v13015_v13, %v13141_v63 }
 0x759   :  { %v2552_v54 = vpop.xlane.xlu0 %2551  ;;  %v5030_v58 = vsel %vm4886_vm12, 1, %v15877_v56 }
 0x75a   :  { %10359 = vrsqrt.f32 %v2669_v53  ;;  %15887 = vst [vmem:[#allocation58_spill] sm:$0xff] %v13147_v46  ;;  %v4616_v53 = vcombine.high %v13144_v44, %v13144_v44  ;;  %v2678_v14 = vadd.f32 1e-12, %v2552_v54 }
 0x75b   :  { %v2021_v18 = vpop.xlane.xlu1 %2020  ;;  %10361 = vrsqrt.f32 %v2677_v51  ;;  %v15889_v51 = vld [vmem:[#allocation41_spill] sm:$0xff] }
 0x75c   :  { %v2101_v61 = vadd.f32 1e-12, %v2021_v18  ;;  %5070 = vperm.xlu0 %10139, %v5029_v17   ;;  %v2862_v45 = vmul.f32 %v10354_v41, %v15889_v51  ;;  %v13163_v21 = vrot.slane %v4616_v53, %v13032_v62 }
 0x75d   :  { %v2555_v57 = vpop.xlane.xlu0 %2554 }
 0x75e   :  { %10363 = vrsqrt.f32 %v2101_v61  ;;  %v2104_v61 = vadd.f32 1e-12, %v2030_v26 }
 0x75f   :  { %10365 = vrsqrt.f32 %v2102_v49  ;;  %v13153_v59 = vpop.permute.xlu1 %707  ;;  %v2679_v49 = vadd.f32 1e-12, %v2555_v57 }
 0x760   :  { %15888 = vst [vmem:[#allocation59_spill] sm:$0xff] %v13153_v59  ;;  %v10356_v7 = vpop.eup %10355  ;;  %10367 = vrsqrt.f32 %v2676_v20  ;;  %v1925_v18 = vmul.f32 %v13153_v59, %v13153_v59  ;;  %4981 = vperm.xlu0 %10139, %v13147_v46  }
 0x761   :  { %10369 = vrsqrt.f32 %v2103_v0  ;;  %v2863_v17 = vmul.f32 %v10356_v7, %v12374_v42  ;;  %v10358_v63 = vpop.eup %10357  ;;  %v4648_v42 = vcombine.high %v13163_v21, %v13163_v21 }
 0x762   :  { %v2067_v19 = vsel %vm391_vm3, %v1925_v18, 0.0  ;;  %v2860_v46 = vmul.f32 %v10358_v63, %v12506_v37  ;;  %10371 = vrsqrt.f32 %v2104_v61 }
 0x763   :  { %2068 = vadd.xlane.f32.xlu1 %v2067_v19  ;;  %v9766_v20 = vpack.c.bf16 %v2863_v17, %v2862_v45  ;;  %10373 = vrsqrt.f32 %v2679_v49  ;;  %v13177_v63 = vrot.slane %v4648_v42, %v13055_v6  ;;  %v4707_v49 = vrot.slane %v13021_v24, %v13032_v62 }
 0x764   :  { %v10360_v59 = vpop.eup %10359  ;;  %5073 = vperm.xlu0 %10139, %v5030_v58   ;;  %10375 = vrsqrt.f32 %v2678_v14  ;;  %v15891_v58 = vlaneseq }
 0x765   :  { %v2861_v0 = vmul.f32 %v10360_v59, %v12466_v40  ;;  %9768 = vmatpush3.bf16.xpose.msk.msra.mxu1 %vm11884_vm6, %v9766_v20  ;;  %v10362_v26 = vpop.eup %10361  ;;  %15890 = vst [vmem:[#allocation41_spill] sm:$0xff] %v13177_v63  ;;  %vm4880_vm13 = vcmp.le.s32.totalorder %v13015_v13, %v13177_v63  ;;  %v4715_v24 = vcombine.high %v4707_v49, %v4707_v49 }
 0x766   :  { %9769 = vmatprep.subr.bf16.mxu1 %v15753_v3  ;;  %v2869_v57 = vmul.f32 %v10362_v26, %v12513_v34  ;;  %v13202_v51 = vand.u32 127, %v15891_v58 }
 0x767   :  { %v9762_v19 = vpack.c.bf16 %v2861_v0, %v2860_v46  ;;  %v4723_v0 = vrot.slane %v4707_v49, %v13032_v62 }
 0x768   :  { %v10364_v41 = vpop.eup %10363  ;;  %15892 = vst [vmem:[#allocation60_spill] sm:$0xff] %v13202_v51 }
 0x769   :  { %v10366_v54 = vpop.eup %10365  ;;  %9764 = vmatpush3.bf16.xpose.msk.msra.mxu0 %vm11884_vm6, %v9762_v19  ;;  %v2197_v37 = vmul.f32 %v10364_v41, %v12515_v5  ;;  %v2672_v41 = vadd.f32 1e-12, %v13063_v1 }
 0x76a   :  { %v10368_v40 = vpop.eup %10367  ;;  %9777 = vmatprep.subr.bf16.mxu0 %v15753_v3  ;;  %v2198_v46 = vmul.f32 %v10366_v54, %v12550_v35 }
 0x76b   :  { %v10370_v53 = vpop.eup %10369  ;;  %9511 = vmatmul.mubr.msk.f32.gmra.mrb[58].mxu1 %vm391_vm3, %v2197_v37  ;;  %v2868_v14 = vmul.f32 %v10368_v40, %v12474_v8  ;;  %10377 = vrsqrt.f32 %v2672_v41 }
 0x76c   :  { %9513 = vmatprep.mubr.msk.f32.mxu1 %vm10821_vm7, %v15767_v28  ;;  %v2199_v5 = vmul.f32 %v10370_v53, %v12468_v43  ;;  %v10372_v59 = vpop.eup %10371  ;;  %v5024_v43 = vsel %vm4880_vm13, 1, %v15877_v56 }
 0x76d   :  { %v9778_v7 = vpack.c.bf16 %v2869_v57, %v2868_v14  ;;  %v10374_v18 = vpop.eup %10373  ;;  %v2200_v34 = vmul.f32 %v10372_v59, %v12616_v11  ;;  %v2564_v11 = vpop.xlane.xlu0 %2563  ;;  %v4737_v14 = vrot.slane %v4715_v24, %v13032_v62 }
 0x76e   :  { %v10376_v8 = vpop.eup %10375  ;;  %v2871_v35 = vmul.f32 %v10374_v18, %v12653_v52  ;;  %v13213_v52 = vrot.slane %v13072_v30, %v13055_v6  ;;  %v2682_v24 = vadd.f32 1e-12, %v2564_v11 }
 0x76f   :  { %9514 = vmatmul.mubr.msk.f32.gmra.mrb[60].mxu1 %vm391_vm3, %v2198_v46  ;;  %v2870_v45 = vmul.f32 %v10376_v8, %v12612_v31  ;;  %v4607_v31 = vrot.slane %v13123_v33, %v13032_v62 }
 0x770   :  { %9529 = vmatmul.mubr.msk.f32.vlgmr.msra.gmra.mrb[52].mxu0 %vm391_vm3, %v2199_v5  ;;  %9549 = vmatprep.mubr.msk.f32.mxu1 %vm10821_vm7, %v15767_v28  ;;  %15893 = vst [vmem:[#allocation61_spill] sm:$0xff] %v13213_v52  ;;  %vm4881_vm14 = vcmp.le.s32.totalorder %v13015_v13, %v13213_v52 }
 0x771   :  { %9780 = vmatpush3.bf16.xpose.msk.msra.mxu0 %vm11884_vm6, %v9778_v7  ;;  %9531 = vmatprep.mubr.msk.f32.mxu0 %vm10821_vm7, %v15767_v28  ;;  %v9782_v17 = vpack.c.bf16 %v2871_v35, %v2870_v45  ;;  %v2036_v61 = vpop.xlane.xlu0 %2035  ;;  %v5025_v30 = vsel %vm4881_vm14, 1, %v15877_v56  ;;  %v4623_v20 = vrot.slane %v4607_v31, %v13032_v62  ;;  %v4615_v19 = vcombine.high %v4607_v31, %v4607_v31 }
 0x772   :  { %9781 = vmatprep.subr.bf16.mxu0 %v15753_v3  ;;  %v2674_v7 = vadd.f32 1e-12, %v13102_v27  ;;  %v4745_v45 = vcombine.high %v4723_v0, %v4723_v0 }
 0x773   :  { %v13229_v26 = vrot.slane %v4623_v20, %v13055_v6  ;;  %v4645_v5 = vcombine.high %v4623_v20, %v4623_v20 }
 0x774   :  { %5055 = vperm.xlu1 %10140, %v5024_v43   ;;  %9532 = vmatmul.mubr.msk.f32.gmra.mrb[54].mxu0 %vm391_vm3, %v2200_v34 }
 0x775   :  { %9534 = vmatprep.mubr.msk.f32.mxu0 %vm10821_vm7, %v15767_v28  ;;  %v2561_v42 = vpop.xlane.xlu0 %2560  ;;  %15894 = vst [vmem:[#allocation62_spill] sm:$0xff] %v13229_v26  ;;  %vm4873_vm15 = vcmp.le.s32.totalorder %v13015_v13, %v13229_v26  ;;  %v13251_v8 = vrot.slane %v4645_v5, %v13055_v6  ;;  %v10378_v49 = vpop.eup %10377 }
 0x776   :  { %v5017_v54 = vsel %vm4873_vm15, 1, %v15877_v56 }
 0x777   :  { %15896 = vst [vmem:[#allocation64_spill] sm:$0xff] %v13251_v8  ;;  %vm4875_vm2 = vcmp.le.s32.totalorder %v13015_v13, %v13251_v8 }
 0x778   :  { %4802 = vrot.lane.b32.xlu1 %v13202_v51, %s10825_s0  ;;  %v5019_v20 = vsel %vm4875_vm2, 1, %v15877_v56 }
 0x779   :  { %9784 = vmatpush3.bf16.xpose.msk.msra.mxu0 %vm11884_vm6, %v9782_v17  ;;  %v13234_v33 = vpop.xlane.xlu0 %2569  ;;  %v2681_v17 = vadd.f32 1e-12, %v2561_v42  ;;  %v2106_v42 = vadd.f32 1e-12, %v2036_v61 }
 0x77a   :  { %9785 = vmatprep.subr.bf16.mxu0 %v15753_v3 }
 0x77c   :  { %4804 = vrot.lane.b32.xlu1 %v13202_v51, %s10818_s11 }
 0x77d   :  { %v2042_v59 = vpop.xlane.xlu0 %2041 }
 0x780   :  { %4946 = vperm.xlu1 %10140, %v13082_v60   ;;  %v4637_v60 = vrot.slane %v4615_v19, %v13032_v62 }
 0x781   :  { %v2585_v35 = vpop.xlane.xlu0 %2584 }
 0x782   :  { %v13242_v40 = vrot.slane %v4637_v60, %v13055_v6  ;;  %v4647_v27 = vcombine.high %v4637_v60, %v4637_v60 }
 0x784   :  { %5058 = vperm.xlu1 %10140, %v5025_v30   ;;  %15895 = vst [vmem:[#allocation63_spill] sm:$0xff] %v13242_v40  ;;  %vm4874_vm1 = vcmp.le.s32.totalorder %v13015_v13, %v13242_v40 }
 0x785   :  { %v5018_v43 = vsel %vm4874_vm1, 1, %v15877_v56 }
 0x788   :  { %4890 = vperm.xlu1 %10140, %v4723_v0   ;;  %v2864_v0 = vmul.f32 %v10378_v49, %v12545_v10  ;;  %v13286_v49 = vrot.slane %v13043_v9, %v13032_v62 }
 0x78c   :  { %4953 = vperm.xlu1 %10140, %v13093_v4   ;;  %v2675_v4 = vadd.f32 1e-12, %v13111_v16 }
 0x78e   :  { %v13239_v37 = vpop.f32.mrb[54].mxu1 }
 0x78f   :  { %v9473_v53 = vpop.f32.mrb[55].mxu1 }
 0x790   :  { %v2537_v57 = vpop.xlane.xlu1 %2536  ;;  %5034 = vperm.xlu1 %10140, %v5017_v54   ;;  %v13259_v54 = vrot.slane %v4647_v27, %v13055_v6  ;;  %v2576_v53 = vpop.xlane.xlu0 %2575  ;;  %v2689_v27 = vadd.f32 1e-12, %v2585_v35 }
 0x791   :  { %v2673_v46 = vadd.f32 1e-12, %v2537_v57  ;;  %v2686_v9 = vadd.f32 1e-12, %v2576_v53 }
 0x792   :  { %15897 = vst [vmem:[#allocation65_spill] sm:$0xff] %v13259_v54  ;;  %vm4876_vm8 = vcmp.le.s32.totalorder %v13015_v13, %v13259_v54 }
 0x793   :  { %10379 = vrsqrt.f32 %v2673_v46 }
 0x794   :  { %v2033_v1 = vpop.xlane.xlu1 %2032  ;;  %4897 = vperm.xlu1 %10140, %v4737_v14   ;;  %10381 = vrsqrt.f32 %v2675_v4  ;;  %v4747_v4 = vcombine.high %v4737_v14, %v4737_v14 }
 0x795   :  { %v2105_v18 = vadd.f32 1e-12, %v2033_v1 }
 0x796   :  { %v13253_v34 = vpop.f32.mrb[46].mxu0 }
 0x797   :  { %10383 = vrsqrt.f32 %v2105_v18  ;;  %v9488_v16 = vpop.f32.mrb[47].mxu0 }
 0x798   :  { %v2567_v58 = vpop.xlane.xlu1 %2566  ;;  %5037 = vperm.xlu1 %10140, %v5018_v43   ;;  %10385 = vrsqrt.f32 %v2674_v7  ;;  %v2048_v7 = vpop.xlane.xlu0 %2047  ;;  %v2684_v43 = vadd.f32 1e-12, %v13234_v33 }
 0x799   :  { %v2683_v31 = vadd.f32 1e-12, %v2567_v58  ;;  %10387 = vrsqrt.f32 %v2681_v17  ;;  %v5020_v58 = vsel %vm4876_vm8, 1, %v15877_v56 }
 0x79b   :  { %10389 = vrsqrt.f32 %v2683_v31 }
 0x79c   :  { %v2558_v30 = vpop.xlane.xlu1 %2557  ;;  %4904 = vperm.xlu1 %10140, %v4745_v45  }
 0x79d   :  { %v10380_v19 = vpop.eup %10379  ;;  %v2680_v41 = vadd.f32 1e-12, %v2558_v30 }
 0x79e   :  { %v2865_v57 = vmul.f32 %v10380_v19, %v15861_v50  ;;  %v10382_v60 = vpop.eup %10381  ;;  %v13270_v50 = vrot.slane %v13144_v44, %v13032_v62  ;;  %v2108_v44 = vadd.f32 1e-12, %v2042_v59 }
 0x79f   :  { %10391 = vrsqrt.f32 %v2680_v41  ;;  %v2867_v14 = vmul.f32 %v10382_v60, %v12605_v47 }
 0x7a0   :  { %v2039_v46 = vpop.xlane.xlu1 %2038  ;;  %5040 = vperm.xlu1 %10140, %v5019_v20   ;;  %v9770_v5 = vpack.c.bf16 %v2865_v57, %v2864_v0  ;;  %10393 = vrsqrt.f32 %v2682_v24  ;;  %v13282_v47 = vrot.slane %v13270_v50, %v13055_v6  ;;  %v2591_v20 = vpop.xlane.xlu0 %2590 }
 0x7a1   :  { %v10384_v1 = vpop.eup %10383  ;;  %10395 = vrsqrt.f32 %v2106_v42  ;;  %v2107_v11 = vadd.f32 1e-12, %v2039_v46 }
 0x7a2   :  { %9772 = vmatpush3.bf16.xpose.msk.msra.mxu1 %vm11884_vm6, %v9770_v5  ;;  %v2201_v10 = vmul.f32 %v10384_v1, %v12656_v29  ;;  %v10386_v61 = vpop.eup %10385  ;;  %15898 = vst [vmem:[#allocation66_spill] sm:$0xff] %v13282_v47  ;;  %vm4877_vm9 = vcmp.le.s32.totalorder %v13015_v13, %v13282_v47  ;;  %v2691_v1 = vadd.f32 1e-12, %v2591_v20 }
 0x7a3   :  { %9773 = vmatprep.subr.bf16.mxu1 %v15753_v3  ;;  %v2866_v29 = vmul.f32 %v10386_v61, %v12558_v32  ;;  %10397 = vrsqrt.f32 %v2107_v11  ;;  %v10388_v45 = vpop.eup %10387  ;;  %v5021_v42 = vsel %vm4877_vm9, 1, %v15877_v56 }
 0x7a4   :  { %v2573_v18 = vpop.xlane.xlu1 %2572  ;;  %4911 = vperm.xlu1 %10140, %v4747_v4   ;;  %9535 = vmatmul.mubr.msk.f32.gmra.mrb[56].mxu0 %vm391_vm3, %v2201_v10  ;;  %v2873_v59 = vmul.f32 %v10388_v45, %v12660_v38 }
 0x7a5   :  { %v2685_v16 = vadd.f32 1e-12, %v2573_v18  ;;  %9570 = vmatprep.mubr.msk.f32.mxu0 %vm10821_vm7, %v15767_v28  ;;  %v10390_v17 = vpop.eup %10389  ;;  %v9774_v33 = vpack.c.bf16 %v2867_v14, %v2866_v29 }
 0x7a6   :  { %v2875_v24 = vmul.f32 %v10390_v17, %v12614_v12  ;;  %v2054_v12 = vpop.xlane.xlu0 %2053 }
 0x7a7   :  { %10399 = vrsqrt.f32 %v2685_v16 }
 0x7a8   :  { %v2582_v31 = vpop.xlane.xlu1 %2581  ;;  %5043 = vperm.xlu1 %10140, %v5020_v58   ;;  %10401 = vrsqrt.f32 %v2684_v43  ;;  %v2112_v58 = vadd.f32 1e-12, %v2054_v12 }
 0x7a9   :  { %v10392_v30 = vpop.eup %10391  ;;  %v2688_v32 = vadd.f32 1e-12, %v2582_v31  ;;  %10403 = vrsqrt.f32 %v2108_v44 }
 0x7aa   :  { %v2872_v19 = vmul.f32 %v10392_v30, %v15862_v2  ;;  %9776 = vmatpush3.bf16.xpose.msk.msra.mxu1 %vm11884_vm6, %v9774_v33  ;;  %v10394_v35 = vpop.eup %10393  ;;  %v2110_v2 = vadd.f32 1e-12, %v2048_v7  ;;  %v2597_v29 = vpop.xlane.xlu0 %2596 }
 0x7ab   :  { %10405 = vrsqrt.f32 %v2688_v32  ;;  %9789 = vmatprep.subr.bf16.mxu1 %v15753_v3  ;;  %v10396_v62 = vpop.eup %10395  ;;  %v2874_v57 = vmul.f32 %v10394_v35, %v12566_v39  ;;  %v2693_v33 = vadd.f32 1e-12, %v2597_v29  ;;  %v15900_v32 = vld [vmem:[#allocation12_spill] sm:$0xff]  ;;  %v15907_v29 = vld [vmem:[#allocation31_spill] sm:$0xff] }
 0x7ac   :  { %10407 = vrsqrt.f32 %v2689_v27  ;;  %v2045_v38 = vpop.xlane.xlu1 %2044  ;;  %4918 = vperm.xlu1 %10140, %v13286_v49   ;;  %v9786_v41 = vpack.c.bf16 %v2873_v59, %v2872_v19  ;;  %v2202_v60 = vmul.f32 %v10396_v62, %v12560_v15  ;;  %v15899_v27 = vld [vmem:[#allocation14_spill] sm:$0xff] }
 0x7ad   :  { %v2109_v0 = vadd.f32 1e-12, %v2045_v38  ;;  %v10398_v53 = vpop.eup %10397  ;;  %v9790_v5 = vpack.c.bf16 %v2875_v24, %v2874_v57  ;;  %v15902_v38 = vld [vmem:[#allocation30_spill] sm:$0xff] }
 0x7ae   :  { %9788 = vmatpush3.bf16.xpose.msk.msra.mxu0 %vm11884_vm6, %v9786_v41  ;;  %v2203_v39 = vmul.f32 %v10398_v53, %v15863_v55 }
 0x7af   :  { %10409 = vrsqrt.f32 %v2109_v0  ;;  %9801 = vmatprep.subr.bf16.mxu0 %v15753_v3 }
 0x7b0   :  { %10411 = vrsqrt.f32 %v2686_v9  ;;  %v2579_v46 = vpop.xlane.xlu1 %2578  ;;  %5046 = vperm.xlu1 %10140, %v5021_v42   ;;  %v15901_v9 = vld [vmem:[#allocation27_spill] sm:$0xff] }
 0x7b1   :  { %v10400_v4 = vpop.eup %10399  ;;  %10413 = vrsqrt.f32 %v2110_v2  ;;  %v2687_v11 = vadd.f32 1e-12, %v2579_v46  ;;  %9550 = vmatmul.mubr.msk.f32.vlgmr.msra.gmra.mrb[62].mxu1 %vm391_vm3, %v2202_v60  ;;  %v15903_v2 = vld [vmem:[#allocation9_spill] sm:$0xff] }
 0x7b2   :  { %9792 = vmatpush3.bf16.xpose.msk.msra.mxu1 %vm11884_vm6, %v9790_v5  ;;  %9552 = vmatprep.mubr.msk.f32.mxu1 %vm10821_vm7, %v15767_v28  ;;  %v10402_v15 = vpop.eup %10401  ;;  %v2877_v61 = vmul.f32 %v10400_v4, %v12756_v22  ;;  %v15904_v5 = vld [vmem:[#allocation39_spill] sm:$0xff] }
 0x7b3   :  { %10415 = vrsqrt.f32 %v2687_v11  ;;  %9793 = vmatprep.subr.bf16.mxu1 %v15753_v3  ;;  %v10404_v10 = vpop.eup %10403  ;;  %v2876_v16 = vmul.f32 %v10402_v15, %v12718_v23  ;;  %v2060_v35 = vpop.xlane.xlu0 %2059 }
 0x7b4   :  { %v2588_v14 = vpop.xlane.xlu1 %2587  ;;  %10417 = vrsqrt.f32 %v2691_v1  ;;  %v2204_v44 = vmul.f32 %v10404_v10, %v12768_v36  ;;  %v2114_v12 = vadd.f32 1e-12, %v2060_v35  ;;  %v15905_v1 = vld [vmem:[#allocation7_spill] sm:$0xff] }
 0x7b5   :  { %v10406_v7 = vpop.eup %10405  ;;  %v2690_v18 = vadd.f32 1e-12, %v2588_v14  ;;  %9553 = vmatmul.mubr.msk.f32.gmra.mrb[64].mxu1 %vm391_vm3, %v2203_v39  ;;  %v9794_v45 = vpack.c.bf16 %v2877_v61, %v2876_v16  ;;  %v15912_v35 = vld [vmem:[#allocation47_spill] sm:$0xff] }
 0x7b6   :  { %v10408_v43 = vpop.eup %10407  ;;  %9555 = vmatprep.mubr.msk.f32.mxu1 %vm10821_vm7, %v15767_v28  ;;  %v2880_v55 = vmul.f32 %v10406_v7, %v12677_v48 }
 0x7b7   :  { %10419 = vrsqrt.f32 %v2690_v18  ;;  %v2881_v31 = vmul.f32 %v10408_v43, %v15899_v27  ;;  %v2066_v15 = vpop.xlane.xlu0 %2065  ;;  %v15906_v43 = vld [vmem:[#allocation17_spill] sm:$0xff] }
 0x7b8   :  { %v2051_v22 = vpop.xlane.xlu1 %2050  ;;  %10421 = vrsqrt.f32 %v2112_v58  ;;  %v2116_v18 = vadd.f32 1e-12, %v2066_v15 }
 0x7b9   :  { %v10410_v17 = vpop.eup %10409  ;;  %v2111_v30 = vadd.f32 1e-12, %v2051_v22  ;;  %9556 = vmatmul.mubr.msk.f32.gmra.mrb[66].mxu1 %vm391_vm3, %v2204_v44  ;;  %v9802_v36 = vpack.c.bf16 %v2881_v31, %v2880_v55  ;;  %v15908_v22 = vld [vmem:[#allocation8_spill] sm:$0xff] }
 0x7ba   :  { %v10412_v23 = vpop.eup %10411  ;;  %v2205_v59 = vmul.f32 %v10410_v17, %v15900_v32  ;;  %9796 = vmatpush3.bf16.xpose.msk.msra.mxu1 %vm11884_vm6, %v9794_v45  ;;  %9591 = vmatprep.mubr.msk.f32.mxu1 %vm10821_vm7, %v15767_v28  ;;  %v15909_v17 = vld [vmem:[#allocation28_spill] sm:$0xff] }
 0x7bb   :  { %v10414_v48 = vpop.eup %10413  ;;  %10423 = vrsqrt.f32 %v2111_v30  ;;  %9797 = vmatprep.subr.bf16.mxu1 %v15753_v3  ;;  %v2878_v24 = vmul.f32 %v10412_v23, %v15901_v9  ;;  %v15910_v30 = vld [vmem:[#allocation24_spill] sm:$0xff]  ;;  %v15913_v9 = vld [vmem:[#allocation21_spill] sm:$0xff] }
 0x7bc   :  { %v2594_v20 = vpop.xlane.xlu1 %2593  ;;  %9571 = vmatmul.mubr.msk.f32.vlgmr.msra.gmra.mrb[58].mxu0 %vm391_vm3, %v2205_v59  ;;  %10425 = vrsqrt.f32 %v2693_v33  ;;  %v2206_v0 = vmul.f32 %v10414_v48, %v15903_v2  ;;  %v6688_v2 = vld [vmem:[%s15620_s7] sm:$0xff] }
 0x7bd   :  { %v10416_v19 = vpop.eup %10415  ;;  %v2692_v62 = vadd.f32 1e-12, %v2594_v20  ;;  %9804 = vmatpush3.bf16.xpose.msk.msra.mxu0 %vm11884_vm6, %v9802_v36  ;;  %9573 = vmatprep.mubr.msk.f32.mxu0 %vm10821_vm7, %v15767_v28  ;;  %v15911_v20 = vld [vmem:[#allocation33_spill] sm:$0xff] }
 0x7be   :  { %v2879_v41 = vmul.f32 %v10416_v19, %v15902_v38  ;;  %9805 = vmatprep.subr.bf16.mxu0 %v15753_v3  ;;  %v10418_v42 = vpop.eup %10417 }
 0x7bf   :  { %10427 = vrsqrt.f32 %v2692_v62  ;;  %v2883_v4 = vmul.f32 %v10418_v42, %v15904_v5 }
 0x7c0   :  { %v2057_v57 = vpop.xlane.xlu1 %2056  ;;  %9574 = vmatmul.mubr.msk.f32.gmra.mrb[60].mxu0 %vm391_vm3, %v2206_v0  ;;  %v9798_v60 = vpack.c.bf16 %v2879_v41, %v2878_v24  ;;  %v6689_v0 = vld [vmem:[%s15620_s7 + $0x8] sm:$0xff] }
 0x7c1   :  { %v10420_v53 = vpop.eup %10419  ;;  %v2113_v46 = vadd.f32 1e-12, %v2057_v57  ;;  %9576 = vmatprep.mubr.msk.f32.mxu0 %vm10821_vm7, %v15767_v28  ;;  %v9814_v42 = vpack.c.bf16 %v6689_v0, %v6688_v2  ;;  %v6691_v57 = vld [vmem:[%s15620_s7 + $0x18] sm:$0xff]  ;;  %v15920_v2 = vld [vmem:[#allocation15_spill] sm:$0xff]  ;;  %v6704_v0 = vld [vmem:[%s15620_s7 + $0x80] sm:$0xff] }
 0x7c2   :  { %v2882_v11 = vmul.f32 %v10420_v53, %v15905_v1  ;;  %9800 = vmatpush3.bf16.xpose.msk.msra.mxu1 %vm11884_vm6, %v9798_v60  ;;  %v10422_v39 = vpop.eup %10421  ;;  %v6692_v53 = vld [vmem:[%s15620_s7 + $0x20] sm:$0xff]  ;;  %v6694_v1 = vld [vmem:[%s15620_s7 + $0x30] sm:$0xff] }
 0x7c3   :  { %10429 = vrsqrt.f32 %v2113_v46  ;;  %9858 = vmatprep.subr.bf16.mxu1 %v15753_v3  ;;  %v2208_v55 = vmul.f32 %v10422_v39, %v15907_v29  ;;  %v6698_v29 = vld [vmem:[%s15620_s7 + $0x50] sm:$0xff] }
 0x7c4   :  { %v2063_v10 = vpop.xlane.xlu1 %2062  ;;  %v9806_v61 = vpack.c.bf16 %v2883_v4, %v2882_v11  ;;  %10431 = vrsqrt.f32 %v2114_v12  ;;  %v6693_v12 = vld [vmem:[%s15620_s7 + $0x28] sm:$0xff]  ;;  %v6695_v11 = vld [vmem:[%s15620_s7 + $0x38] sm:$0xff] }
 0x7c5   :  { %v10424_v14 = vpop.eup %10423  ;;  %v2115_v7 = vadd.f32 1e-12, %v2063_v10  ;;  %v9820_v46 = vpack.c.bf16 %v6693_v12, %v6692_v53  ;;  %v9823_v15 = vpack.c.bf16 %v6695_v11, %v6694_v1  ;;  %v15921_v12 = vld [vmem:[#allocation35_spill] sm:$0xff] }
 0x7c6   :  { %9808 = vmatpush3.bf16.xpose.msk.msra.mxu0 %vm11884_vm6, %v9806_v61  ;;  %v2207_v16 = vmul.f32 %v10424_v14, %v15906_v43  ;;  %v10426_v58 = vpop.eup %10425  ;;  %v6696_v61 = vld [vmem:[%s15620_s7 + $0x40] sm:$0xff]  ;;  %v6697_v14 = vld [vmem:[%s15620_s7 + $0x48] sm:$0xff] }
 0x7c7   :  { %10433 = vrsqrt.f32 %v2115_v7  ;;  %9809 = vmatprep.subr.bf16.mxu0 %v15753_v3  ;;  %v2885_v45 = vmul.f32 %v10426_v58, %v15908_v22  ;;  %v4940_v7 = vpop.permute.xlu0 %4939 }
 0x7c8   :  { %9577 = vmatmul.mubr.msk.f32.gmra.mrb[62].mxu0 %vm391_vm3, %v2207_v16  ;;  %10435 = vrsqrt.f32 %v2116_v18  ;;  %v9826_v18 = vpack.c.bf16 %v6697_v14, %v6696_v61  ;;  %v4944_v43 = vrot.slane %v4940_v7, %v13055_v6  ;;  %v6709_v14 = vld [vmem:[%s15620_s7 + $0xa8] sm:$0xff] }
 0x7c9   :  { %v10428_v44 = vpop.eup %10427  ;;  %9592 = vmatmul.mubr.msk.f32.vlgmr.msra.gmra.mrb[68].mxu1 %vm391_vm3, %v2208_v55  ;;  %9612 = vmatprep.mubr.msk.f32.mxu0 %vm10821_vm7, %v15767_v28  ;;  %v6699_v55 = vld [vmem:[%s15620_s7 + $0x58] sm:$0xff]  ;;  %v15924_v7 = vld [vmem:[#allocation51_spill] sm:$0xff] }
 0x7ca   :  { %v2884_v27 = vmul.f32 %v10428_v44, %v15909_v17  ;;  %9594 = vmatprep.mubr.msk.f32.mxu1 %vm10821_vm7, %v15767_v28  ;;  %9873 = vmatpush1.bf16.msra.mxu1 %v9814_v42  ;;  %v15914_v17 = vld [vmem:[#allocation59_spill] sm:$0xff] }
 0x7cb   :  { %9859 = vmatprep.subr.bf16.mxu1 %v15753_v3 }
 0x7cc   :  { %v9810_v31 = vpack.c.bf16 %v2885_v45, %v2884_v27  ;;  %v9829_v45 = vpack.c.bf16 %v6699_v55, %v6698_v29  ;;  %v6710_v29 = vld [vmem:[%s15620_s7 + $0xb0] sm:$0xff]  ;;  %v6711_v55 = vld [vmem:[%s15620_s7 + $0xb8] sm:$0xff] }
 0x7cd   :  { %v10430_v33 = vpop.eup %10429 }
 0x7ce   :  { %9812 = vmatpush3.bf16.xpose.msk.msra.mxu0 %vm11884_vm6, %v9810_v31  ;;  %v2209_v23 = vmul.f32 %v10430_v33, %v15910_v30  ;;  %v10432_v32 = vpop.eup %10431  ;;  %vm4806_vm6 = vcmask 130048   ;;  %v6700_v30 = vld [vmem:[%s15620_s7 + $0x60] sm:$0xff] }
 0x7cf   :  { %v13358_v59 = vpop.f32.mrb[48].mxu0  ;;  %9813 = vmatprep.subr.bf16.mxu0 %v15753_v3  ;;  %v2210_v62 = vmul.f32 %v10432_v32, %v15912_v35 }
 0x7d0   :  { %v9491_v48 = vpop.f32.mrb[49].mxu0  ;;  %9595 = vmatmul.mubr.msk.f32.gmra.mrb[70].mxu1 %vm391_vm3, %v2209_v23  ;;  %v6701_v23 = vld [vmem:[%s15620_s7 + $0x68] sm:$0xff] }
 0x7d1   :  { %v10434_v36 = vpop.eup %10433  ;;  %9597 = vmatprep.mubr.msk.f32.mxu1 %vm10821_vm7, %v15767_v28  ;;  %v9832_v48 = vpack.c.bf16 %v6701_v23, %v6700_v30  ;;  %v6712_v30 = vld [vmem:[%s15620_s7 + $0xc0] sm:$0xff]  ;;  %v6713_v23 = vld [vmem:[%s15620_s7 + $0xc8] sm:$0xff] }
 0x7d2   :  { %v2211_v19 = vmul.f32 %v10434_v36, %v15911_v20  ;;  %v10436_v25 = vpop.eup %10435 }
 0x7d3   :  { %v2212_v24 = vmul.f32 %v10436_v25, %v15913_v9  ;;  %v6702_v9 = vld [vmem:[%s15620_s7 + $0x70] sm:$0xff] }
 0x7d4   :  { %9598 = vmatmul.mubr.msk.f32.gmra.mrb[72].mxu1 %vm391_vm3, %v2210_v62  ;;  %v15918_v62 = vld [vmem:[#allocation36_spill] sm:$0xff] }
 0x7d5   :  { %9613 = vmatmul.mubr.msk.f32.vlgmr.msra.gmra.mrb[64].mxu0 %vm391_vm3, %v2211_v19  ;;  %v15917_v19 = vld [vmem:[#allocation26_spill] sm:$0xff] }
 0x7d6   :  { %9615 = vmatprep.mubr.msk.f32.mxu0 %vm10821_vm7, %v15767_v28  ;;  %9815 = vmatpush1.bf16.msra.mxu0 %v9814_v42  ;;  %v6705_v42 = vld [vmem:[%s15620_s7 + $0x88] sm:$0xff] }
 0x7d7   :  { %9816 = vmatprep.subr.bf16.mxu0 %v15753_v3 }
 0x7d9   :  { %9616 = vmatmul.mubr.msk.f32.gmra.mrb[66].mxu0 %vm391_vm3, %v2212_v24  ;;  %v6703_v24 = vld [vmem:[%s15620_s7 + $0x78] sm:$0xff] }
 0x7da   :  { %9618 = vmatprep.mubr.msk.f32.mxu0 %vm10821_vm7, %v15767_v28  ;;  %v6690_v28 = vld [vmem:[%s15620_s7 + $0x10] sm:$0xff] }
 0x7db   :  { %v13374_v38 = vpop.f32.mrb[50].mxu0  ;;  %v9817_v60 = vpack.c.bf16 %v6691_v57, %v6690_v28  ;;  %v9838_v57 = vpack.c.bf16 %v6705_v42, %v6704_v0  ;;  %v15929_v42 = vld [vmem:[#allocation56_spill] sm:$0xff] }
 0x7dc   :  { %v9494_v41 = vpop.f32.mrb[51].mxu0 }
 0x7dd   :  { %9874 = vmatpush1.bf16.msra.mxu1 %v9817_v60  ;;  %9818 = vmatpush1.bf16.msra.mxu0 %v9817_v60  ;;  %v9835_v41 = vpack.c.bf16 %v6703_v24, %v6702_v9  ;;  %v6716_v24 = vld [vmem:[%s15620_s7 + $0xe0] sm:$0xff] }
 0x7de   :  { %9860 = vmatprep.subr.bf16.mxu1 %v15753_v3  ;;  %9819 = vmatprep.subr.bf16.mxu0 %v15753_v3 }
 0x7e1   :  { %9875 = vmatpush1.bf16.msra.mxu1 %v9820_v46  ;;  %9821 = vmatpush1.bf16.msra.mxu0 %v9820_v46 }
 0x7e2   :  { %9861 = vmatprep.subr.bf16.mxu1 %v15753_v3  ;;  %9822 = vmatprep.subr.bf16.mxu0 %v15753_v3 }
 0x7e5   :  { %9876 = vmatpush1.bf16.msra.mxu1 %v9823_v15  ;;  %9824 = vmatpush1.bf16.msra.mxu0 %v9823_v15  ;;  %v13503_v15 = vrot.slane %v13163_v21, %v13055_v6  ;;  %v6708_v21 = vld [vmem:[%s15620_s7 + $0xa0] sm:$0xff] }
 0x7e6   :  { %9862 = vmatprep.subr.bf16.mxu1 %v15753_v3  ;;  %9825 = vmatprep.subr.bf16.mxu0 %v15753_v3 }
 0x7e7   :  { %15922 = vst [vmem:[#allocation12_spill] sm:$0xff] %v13503_v15  ;;  %vm4878_vm14 = vcmp.le.s32.totalorder %v13015_v13, %v13503_v15 }
 0x7e9   :  { %9877 = vmatpush1.bf16.msra.mxu1 %v9826_v18  ;;  %9827 = vmatpush1.bf16.msra.mxu0 %v9826_v18  ;;  %v4695_v18 = vcombine.high %v15924_v7, %v15924_v7  ;;  %v15935_v7 = vld [vmem:[#allocation13_spill] sm:$0xff] }
 0x7ea   :  { %9863 = vmatprep.subr.bf16.mxu1 %v15753_v3  ;;  %9828 = vmatprep.subr.bf16.mxu0 %v15753_v3 }
 0x7ed   :  { %9878 = vmatpush1.bf16.msra.mxu1 %v9829_v45  ;;  %9830 = vmatpush1.bf16.msra.mxu0 %v9829_v45  ;;  %v13537_v45 = vrot.slane %v4695_v18, %v13055_v6 }
 0x7ee   :  { %9864 = vmatprep.subr.bf16.mxu1 %v15753_v3  ;;  %9831 = vmatprep.subr.bf16.mxu0 %v15753_v3 }
 0x7ef   :  { %15927 = vst [vmem:[#allocation27_spill] sm:$0xff] %v13537_v45  ;;  %vm4887_vm2 = vcmp.le.s32.totalorder %v13015_v13, %v13537_v45 }
 0x7f0   :  { %v2069_v5 = vpop.xlane.xlu1 %2068  ;;  %v5031_v36 = vsel %vm4887_vm2, 1, %v15877_v56 }
 0x7f1   :  { %v2117_v4 = vadd.f32 1e-12, %v2069_v5  ;;  %9879 = vmatpush1.bf16.msra.mxu1 %v9832_v48  ;;  %9833 = vmatpush1.bf16.msra.mxu0 %v9832_v48  ;;  %v6706_v5 = vld [vmem:[%s15620_s7 + $0x90] sm:$0xff] }
 0x7f2   :  { %9865 = vmatprep.subr.bf16.mxu1 %v15753_v3  ;;  %9834 = vmatprep.subr.bf16.mxu0 %v15753_v3 }
 0x7f3   :  { %10437 = vrsqrt.f32 %v2117_v4  ;;  %v6707_v4 = vld [vmem:[%s15620_s7 + $0x98] sm:$0xff] }
 0x7f4   :  { %v5056_v39 = vpop.permute.xlu1 %5055  ;;  %v9841_v11 = vpack.c.bf16 %v6707_v4, %v6706_v5 }
 0x7f5   :  { %vm5088_vm10 = vcmp.eq.s32.totalorder %v5056_v39, 1  ;;  %9880 = vmatpush1.bf16.msra.mxu1 %v9835_v41  ;;  %9836 = vmatpush1.bf16.msra.mxu0 %v9835_v41  ;;  %v6717_v41 = vld [vmem:[%s15620_s7 + $0xe8] sm:$0xff] }
 0x7f6   :  { %9866 = vmatprep.subr.bf16.mxu1 %v15753_v3  ;;  %9837 = vmatprep.subr.bf16.mxu0 %v15753_v3  ;;  %v9856_v0 = vpack.c.bf16 %v6717_v41, %v6716_v24 }
 0x7f8   :  { %v4803_v10 = vpop.permute.xlu1 %4802 }
 0x7f9   :  { %v4807_v16 = vsel %vm4806_vm6, %v13202_v51, %v4803_v10  ;;  %9881 = vmatpush1.bf16.msra.mxu1 %v9838_v57  ;;  %9839 = vmatpush1.bf16.msra.mxu0 %v9838_v57  ;;  %v15923_v10 = vld [vmem:[#allocation54_spill] sm:$0xff] }
 0x7fa   :  { %9867 = vmatprep.subr.bf16.mxu1 %v15753_v3  ;;  %9840 = vmatprep.subr.bf16.mxu0 %v15753_v3  ;;  %v4795_v61 = vcombine.high %v15923_v10, %v15923_v10 }
 0x7fc   :  { %v4805_v58 = vpop.permute.xlu1 %4804 }
 0x7fd   :  { %v10438_v44 = vpop.eup %10437  ;;  %v13426_v22 = vsel %vm391_vm3, %v4807_v16, %v4805_v58  ;;  %9882 = vmatpush1.bf16.msra.mxu1 %v9841_v11  ;;  %9842 = vmatpush1.bf16.msra.mxu0 %v9841_v11  ;;  %v5022_v58 = vsel %vm4878_vm14, 1, %v15877_v56 }
 0x7fe   :  { %v2213_v27 = vmul.f32 %v10438_v44, %v15914_v17  ;;  %vm5008_vm7 = vcmp.le.s32.totalorder %v13426_v22, %v4944_v43  ;;  %9868 = vmatprep.subr.bf16.mxu1 %v15753_v3  ;;  %9843 = vmatprep.subr.bf16.mxu0 %v15753_v3  ;;  %v9844_v43 = vpack.c.bf16 %v6709_v14, %v6708_v21 }
 0x7ff   :  { %v5104_v31 = vsel %vm5008_vm7, 1, %v15877_v56  ;;  %v9847_v17 = vpack.c.bf16 %v6711_v55, %v6710_v29 }
 0x800   :  { %9619 = vmatmul.mubr.msk.f32.gmra.mrb[68].mxu0 %vm391_vm3, %v2213_v27  ;;  %v5144_v33 = vrot.slane %v5104_v31, %v13055_v6  ;;  %v4947_v32 = vpop.permute.xlu1 %4946  ;;  %v15928_v27 = vld [vmem:[#allocation52_spill] sm:$0xff] }
 0x801   :  { %v4951_v20 = vrot.slane %v4947_v32, %v13055_v6  ;;  %9883 = vmatpush1.bf16.msra.mxu1 %v9844_v43  ;;  %9845 = vmatpush1.bf16.msra.mxu0 %v9844_v43  ;;  %v9850_v32 = vpack.c.bf16 %v6713_v23, %v6712_v30  ;;  %v5062_v43 = vpop.permute.xlu0 %5061 }
 0x802   :  { %vm5184_vm11 = vcmp.eq.s32.totalorder %v5144_v33, 1  ;;  %9869 = vmatprep.subr.bf16.mxu1 %v15753_v3  ;;  %9846 = vmatprep.subr.bf16.mxu0 %v15753_v3 }
 0x803   :  { %vm13441_vm12 = vmand %vm5088_vm10, %vm5184_vm11  ;;  %vm5009_vm3 = vcmp.le.s32.totalorder %v13426_v22, %v4951_v20  ;;  %v6714_v20 = vld [vmem:[%s15620_s7 + $0xd0] sm:$0xff] }
 0x804   :  { %v13449_v35 = vsel %vm13441_vm12, %v15917_v19, 0.0  ;;  %v13456_v25 = vsel %vm13441_vm12, %v15918_v62, 0.0  ;;  %v5105_v60 = vsel %vm5009_vm3, 1, %v15877_v56  ;;  %v13486_v46 = vsel %vm13441_vm12, %v15921_v12, 0.0  ;;  %v5059_v39 = vpop.permute.xlu1 %5058  ;;  %v6715_v19 = vld [vmem:[%s15620_s7 + $0xd8] sm:$0xff]  ;;  %v15932_v12 = vld [vmem:[#allocation10_spill] sm:$0xff] }
 0x805   :  { %15919 = vst [vmem:[#allocation14_spill] sm:$0xff] %v13456_v25  ;;  %5637 = vrot.lane.b32.xlu0 %v13449_v35, %s10825_s0  ;;  %5493 = vrot.lane.b32.xlu1 %v13449_v35, %s10819_s16  ;;  %v5148_v1 = vrot.slane %v5105_v60, %v13055_v6  ;;  %vm5089_vm15 = vcmp.eq.s32.totalorder %v5059_v39, 1  ;;  %v9853_v62 = vpack.c.bf16 %v6715_v19, %v6714_v20  ;;  %v15940_v20 = vld [vmem:[#allocation19_spill] sm:$0xff] }
 0x806   :  { %9884 = vmatpush1.bf16.msra.mxu1 %v9847_v17  ;;  %9848 = vmatpush1.bf16.msra.mxu0 %v9847_v17 }
 0x807   :  { %vm5185_vm13 = vcmp.eq.s32.totalorder %v5148_v1, 1  ;;  %9870 = vmatprep.subr.bf16.mxu1 %v15753_v3  ;;  %9849 = vmatprep.subr.bf16.mxu0 %v15753_v3 }
 0x808   :  { %vm13523_vm1 = vmand %vm5089_vm15, %vm5185_vm13  ;;  %v4891_v44 = vpop.permute.xlu1 %4890  ;;  %vm5090_vm13 = vcmp.eq.s32.totalorder %v5062_v43, 1 }
 0x809   :  { %5349 = vrot.lane.b32.xlu0 %v13449_v35, %s10826_s13  ;;  %4925 = vperm.xlu1 %10140, %v15920_v2   ;;  %v13544_v31 = vsel %vm13523_vm1, %v15928_v27, 0.0  ;;  %v4895_v33 = vrot.slane %v4891_v44, %v13055_v6  ;;  %v13587_v57 = vsel %vm13523_vm1, %v15929_v42, 0.0  ;;  %v13620_v4 = vsel %vm13523_vm1, %v13239_v37, 0.0  ;;  %v15934_v37 = vld [vmem:[#allocation58_spill] sm:$0xff]  ;;  %v15938_v27 = vld [vmem:[#allocation55_spill] sm:$0xff] }
 0x80a   :  { %v13478_v28 = vpop.f32.mrb[56].mxu1  ;;  %9885 = vmatpush1.bf16.msra.mxu1 %v9850_v32  ;;  %9851 = vmatpush1.bf16.msra.mxu0 %v9850_v32  ;;  %v4961_v32 = vpop.permute.xlu0 %4960 }
 0x80b   :  { %v9509_v53 = vpop.f32.mrb[57].mxu1  ;;  %vm5001_vm8 = vcmp.le.s32.totalorder %v13426_v22, %v4895_v33  ;;  %9871 = vmatprep.subr.bf16.mxu1 %v15753_v3  ;;  %9852 = vmatprep.subr.bf16.mxu0 %v15753_v3  ;;  %v4697_v33 = vcombine.high %v15938_v27, %v15938_v27 }
 0x80c   :  { %v4954_v48 = vpop.permute.xlu1 %4953  ;;  %v5097_v9 = vsel %vm5001_vm8, 1, %v15877_v56  ;;  %v4746_v53 = vcombine.high %v13286_v49, %v13286_v49  ;;  %v4646_v49 = vcombine.high %v13270_v50, %v13270_v50  ;;  %v4797_v50 = vcombine.high %v15934_v37, %v15934_v37 }
 0x80d   :  { %5495 = vrot.lane.b32.xlu0 %v13486_v46, %s10819_s16  ;;  %5781 = vrot.lane.b32.xlu1 %v13449_v35, %s10817_s30  ;;  %v5116_v60 = vrot.slane %v5097_v9, %v13055_v6  ;;  %v4958_v1 = vrot.slane %v4954_v48, %v13055_v6  ;;  %v13679_v48 = vrot.slane %v4697_v33, %v13055_v6 }
 0x80e   :  { %9886 = vmatpush1.bf16.msra.mxu1 %v9853_v62  ;;  %9854 = vmatpush1.bf16.msra.mxu0 %v9853_v62  ;;  %v13628_v11 = vrot.slane %v4646_v49, %v13055_v6  ;;  %v4965_v37 = vrot.slane %v4961_v32, %v13055_v6 }
 0x80f   :  { %9872 = vmatprep.subr.bf16.mxu1 %v15753_v3  ;;  %9855 = vmatprep.subr.bf16.mxu0 %v15753_v3  ;;  %vm5177_vm7 = vcmp.eq.s32.totalorder %v5116_v60, 1  ;;  %vm5010_vm11 = vcmp.le.s32.totalorder %v13426_v22, %v4958_v1  ;;  %15939 = vst [vmem:[#allocation9_spill] sm:$0xff] %v13679_v48  ;;  %vm4888_vm15 = vcmp.le.s32.totalorder %v13015_v13, %v13679_v48 }
 0x810   :  { %v5035_v2 = vpop.permute.xlu1 %5034  ;;  %15933 = vst [vmem:[#allocation30_spill] sm:$0xff] %v13628_v11  ;;  %v5106_v39 = vsel %vm5010_vm11, 1, %v15877_v56  ;;  %vm4879_vm12 = vcmp.le.s32.totalorder %v13015_v13, %v13628_v11  ;;  %v5032_v9 = vsel %vm4888_vm15, 1, %v15877_v56 }
 0x811   :  { %5351 = vrot.lane.b32.xlu0 %v13486_v46, %s10826_s13  ;;  %5639 = vrot.lane.b32.xlu1 %v13486_v46, %s10825_s0  ;;  %vm5081_vm9 = vcmp.eq.s32.totalorder %v5035_v2, 1  ;;  %v5152_v10 = vrot.slane %v5106_v39, %v13055_v6  ;;  %v5023_v21 = vsel %vm4879_vm12, 1, %v15877_v56 }
 0x812   :  { %9887 = vmatpush1.bf16.msra.mxu1 %v9856_v0  ;;  %9857 = vmatpush1.bf16.msra.mxu0 %v9856_v0  ;;  %vm13596_vm10 = vmand %vm5081_vm9, %vm5177_vm7  ;;  %vm5011_vm7 = vcmp.le.s32.totalorder %v13426_v22, %v4965_v37 }
 0x813   :  { %v13605_v5 = vsel %vm13596_vm10, %v15932_v12, 0.0  ;;  %v13649_v18 = vsel %vm13596_vm10, %v15935_v7, 0.0  ;;  %vm5186_vm3 = vcmp.eq.s32.totalorder %v5152_v10, 1  ;;  %v13690_v19 = vsel %vm13596_vm10, %v15940_v20, 0.0  ;;  %v15943_v12 = vld [vmem:[#allocation43_spill] sm:$0xff] }
 0x814   :  { %vm13657_vm14 = vmand %vm5090_vm13, %vm5186_vm3  ;;  %vm5881_vm3 = vcmask 392192  }
 0x815   :  { %4988 = vperm.xlu0 %10139, %v4795_v61   ;;  %5783 = vrot.lane.b32.xlu1 %v13486_v46, %s10817_s30  ;;  %v13672_v23 = vsel %vm13657_vm14, %v13253_v34, 0.0  ;;  %v5065_v34 = vpop.permute.xlu0 %5064  ;;  %v13707_v2 = vsel %vm13657_vm14, %v13358_v59, 0.0  ;;  %v13747_v39 = vsel %vm13657_vm14, %v13374_v38, 0.0 }
 0x816   :  { %vm5091_vm11 = vcmp.eq.s32.totalorder %v5065_v34, 1  ;;  %v6074_v34 = vld [vmem:[%s15619_s6] sm:$0xf] }
 0x819   :  { %5497 = vrot.lane.b32.xlu0 %v13544_v31, %s10819_s16  ;;  %5049 = vperm.xlu1 %10140, %v5022_v58   ;;  %v13701_v24 = vpop.permute.xlu0 %4967 }
 0x81d   :  { %5353 = vrot.lane.b32.xlu0 %v13544_v31, %s10826_s13  ;;  %5641 = vrot.lane.b32.xlu1 %v13544_v31, %s10825_s0  ;;  %v13714_v60 = vpop.permute.xlu0 %5067 }
 0x821   :  { %5076 = vperm.xlu0 %10139, %v5031_v36   ;;  %5785 = vrot.lane.b32.xlu1 %v13544_v31, %s10817_s30  ;;  %v4898_v36 = vpop.permute.xlu1 %4897  ;;  %v13728_v3 = vpop.permute.xlu0 %4974 }
 0x822   :  { %v4902_v62 = vrot.slane %v4898_v36, %v13055_v6 }
 0x824   :  { %vm5002_vm1 = vcmp.le.s32.totalorder %v13426_v22, %v4902_v62 }
 0x825   :  { %5643 = vrot.lane.b32.xlu0 %v13587_v57, %s10825_s0  ;;  %5499 = vrot.lane.b32.xlu1 %v13587_v57, %s10819_s16  ;;  %v5098_v41 = vsel %vm5002_vm1, 1, %v15877_v56  ;;  %v5038_v0 = vpop.permute.xlu1 %5037 }
 0x826   :  { %v5120_v42 = vrot.slane %v5098_v41, %v13055_v6  ;;  %vm5082_vm8 = vcmp.eq.s32.totalorder %v5038_v0, 1 }
 0x828   :  { %vm5178_vm2 = vcmp.eq.s32.totalorder %v5120_v42, 1 }
 0x829   :  { %5355 = vrot.lane.b32.xlu0 %v13587_v57, %s10826_s13  ;;  %4932 = vperm.xlu1 %10140, %v4746_v53   ;;  %v4905_v59 = vpop.permute.xlu1 %4904  ;;  %vm13720_vm9 = vmand %vm5082_vm8, %vm5178_vm2  ;;  %vm6718_vm8 = vcmask 916480  }
 0x82a   :  { %v13733_v49 = vsel %vm13720_vm9, %v15943_v12, 0.0  ;;  %v4909_v41 = vrot.slane %v4905_v59, %v13055_v6 }
 0x82c   :  { %vm5003_vm13 = vcmp.le.s32.totalorder %v13426_v22, %v4909_v41 }
 0x82d   :  { %5449 = vrot.lane.b32.xlu0 %v13605_v5, %s10819_s16  ;;  %5787 = vrot.lane.b32.xlu1 %v13587_v57, %s10817_s30  ;;  %v13735_v1 = vpop.permute.xlu1 %5040  ;;  %v5099_v53 = vsel %vm5003_vm13, 1, %v15877_v56 }
 0x82e   :  { %vm5083_vm15 = vcmp.eq.s32.totalorder %v13735_v1, 1 }
 0x831   :  { %5305 = vrot.lane.b32.xlu0 %v13605_v5, %s10826_s13  ;;  %5593 = vrot.lane.b32.xlu1 %v13605_v5, %s10825_s0  ;;  %v13754_v10 = vpop.permute.xlu1 %4911 }
 0x835   :  { %5645 = vrot.lane.b32.xlu0 %v13620_v4, %s10825_s0  ;;  %5501 = vrot.lane.b32.xlu1 %v13620_v4, %s10819_s16  ;;  %v13764_v7 = vpop.permute.xlu1 %5043 }
 0x836   :  { %vm5084_vm13 = vcmp.eq.s32.totalorder %v13764_v7, 1 }
 0x839   :  { %5357 = vrot.lane.b32.xlu0 %v13620_v4, %s10826_s13  ;;  %5737 = vrot.lane.b32.xlu1 %v13605_v5, %s10817_s30  ;;  %v13785_v27 = vpop.permute.xlu1 %4918 }
 0x83d   :  { %4995 = vperm.xlu0 %10139, %v4797_v50   ;;  %5789 = vrot.lane.b32.xlu1 %v13620_v4, %s10817_s30  ;;  %v13742_v50 = vpop.permute.xlu0 %5070  ;;  %v13801_v62 = vpop.permute.xlu1 %5046 }
 0x83e   :  { %v13643_v61 = vpop.f32.mrb[58].mxu1 }
 0x83f   :  { %v9512_v14 = vpop.f32.mrb[59].mxu1 }
 0x841   :  { %5451 = vrot.lane.b32.xlu0 %v13649_v18, %s10819_s16  ;;  %5052 = vperm.xlu1 %10140, %v5023_v21   ;;  %v5107_v21 = vsel %vm5011_vm7, 1, %v15877_v56  ;;  %v13761_v38 = vpop.permute.xlu0 %4981  ;;  %vm5092_vm7 = vcmp.eq.s32.totalorder %v13714_v60, 1 }
 0x842   :  { %v13653_v16 = vpop.f32.mrb[60].mxu1  ;;  %v5156_v14 = vrot.slane %v5107_v21, %v13055_v6  ;;  %v6082_v21 = vsub.s32 2, %v13015_v13 }
 0x843   :  { %v9515_v58 = vpop.f32.mrb[61].mxu1  ;;  %v13655_v29 = vpop.f32.mrb[52].mxu0 }
 0x844   :  { %v9530_v55 = vpop.f32.mrb[53].mxu0  ;;  %vm5187_vm10 = vcmp.eq.s32.totalorder %v5156_v14, 1  ;;  %v15944_v58 = vld [vmem:[#allocation38_spill] sm:$0xff]  ;;  %v15947_v14 = vld [vmem:[#allocation16_spill] sm:$0xff] }
 0x845   :  { %5307 = vrot.lane.b32.xlu0 %v13649_v18, %s10826_s13  ;;  %5595 = vrot.lane.b32.xlu1 %v13649_v18, %s10825_s0  ;;  %v13770_v43 = vpop.permute.xlu0 %5073  ;;  %v13775_v55 = vsel %vm13720_vm9, %v15944_v58, 0.0  ;;  %vm13781_vm12 = vmand %vm5091_vm11, %vm5187_vm10 }
 0x847   :  { %v13665_v17 = vpop.f32.mrb[54].mxu0 }
 0x848   :  { %v9533_v30 = vpop.f32.mrb[55].mxu0 }
 0x849   :  { %5647 = vrot.lane.b32.xlu0 %v13672_v23, %s10825_s0  ;;  %5503 = vrot.lane.b32.xlu1 %v13672_v23, %s10819_s16  ;;  %v13792_v30 = vsel %vm13781_vm12, %v13478_v28, 0.0 }
 0x84d   :  { %5359 = vrot.lane.b32.xlu0 %v13672_v23, %s10826_s13  ;;  %5739 = vrot.lane.b32.xlu1 %v13649_v18, %s10817_s30 }
 0x851   :  { %5453 = vrot.lane.b32.xlu0 %v13690_v19, %s10819_s16  ;;  %5791 = vrot.lane.b32.xlu1 %v13672_v23, %s10817_s30 }
 0x855   :  { %5079 = vperm.xlu0 %10139, %v5032_v9   ;;  %5597 = vrot.lane.b32.xlu1 %v13690_v19, %s10825_s0  ;;  %v6079_v9 = vrot.slane %v6074_v34, %v13055_v6 }
 0x857   :  { %v13812_v12 = vrot.slane %v6079_v9, %v13055_v6 }
 0x859   :  { %5505 = vrot.lane.b32.xlu0 %v13707_v2, %s10819_s16  ;;  %5309 = vrot.lane.b32.xlu1 %v13690_v19, %s10826_s13 }
 0x85d   :  { %5741 = vrot.lane.b32.xlu0 %v13690_v19, %s10817_s30  ;;  %5649 = vrot.lane.b32.xlu1 %v13707_v2, %s10825_s0 }
 0x861   :  { %5793 = vrot.lane.b32.xlu0 %v13707_v2, %s10817_s30  ;;  %5361 = vrot.lane.b32.xlu1 %v13707_v2, %s10826_s13 }
 0x865   :  { %5599 = vrot.lane.b32.xlu0 %v13733_v49, %s10825_s0  ;;  %5455 = vrot.lane.b32.xlu1 %v13733_v49, %s10819_s16 }
 0x869   :  { %5507 = vrot.lane.b32.xlu0 %v13747_v39, %s10819_s16  ;;  %5311 = vrot.lane.b32.xlu1 %v13733_v49, %s10826_s13 }
 0x86d   :  { %5743 = vrot.lane.b32.xlu0 %v13733_v49, %s10817_s30  ;;  %5651 = vrot.lane.b32.xlu1 %v13747_v39, %s10825_s0 }
 0x871   :  { %5795 = vrot.lane.b32.xlu0 %v13747_v39, %s10817_s30  ;;  %5363 = vrot.lane.b32.xlu1 %v13747_v39, %s10826_s13 }
 0x875   :  { %5601 = vrot.lane.b32.xlu0 %v13775_v55, %s10825_s0  ;;  %5457 = vrot.lane.b32.xlu1 %v13775_v55, %s10819_s16 }
 0x877   :  { %v13787_v33 = vpop.f32.mrb[56].mxu0  ;;  %v5638_v32 = vpop.permute.xlu0 %5637 }
 0x878   :  { %v9536_v36 = vpop.f32.mrb[57].mxu0  ;;  %v5494_v42 = vpop.permute.xlu1 %5493 }
 0x879   :  { %5313 = vrot.lane.b32.xlu1 %v13775_v55, %s10826_s13  ;;  %5509 = vrot.lane.b32.xlu0 %v13792_v30, %s10819_s16  ;;  %v6384_v36 = vsub.s32 1, %v13015_v13 }
 0x87b   :  { %v5350_v20 = vpop.permute.xlu0 %5349  ;;  %v6385_v48 = vrot.slane %v6074_v34, %v6384_v36 }
 0x87c   :  { %v5904_v28 = vsel %vm5881_vm3, %v13449_v35, %v5350_v20  ;;  %v13823_v35 = vsel %vm13720_vm9, %v15947_v14, 0.0  ;;  %v13840_v14 = vsel %vm13781_vm12, %v13643_v61, 0.0 }
 0x87d   :  { %5653 = vrot.lane.b32.xlu1 %v13792_v30, %s10825_s0  ;;  %5745 = vrot.lane.b32.xlu0 %v13775_v55, %s10817_s30  ;;  %v5952_v37 = vsel %vm475_vm5, %v5904_v28, %v5494_v42  ;;  %v6083_v28 = vrot.slane %v6074_v34, %v6082_v21 }
 0x87e   :  { %v6138_v20 = vsub.f32 %v5952_v37, %v13812_v12 }
 0x87f   :  { %v5496_v0 = vpop.permute.xlu0 %5495  ;;  %v13854_v21 = vrot.slane %v6083_v28, %v13055_v6 }
 0x880   :  { %v6234_v63 = vmul.f32 %v6138_v20, %v6138_v20 }
 0x881   :  { %5365 = vrot.lane.b32.xlu1 %v13792_v30, %s10826_s13  ;;  %5797 = vrot.lane.b32.xlu0 %v13792_v30, %s10817_s30 }
 0x882   :  { %v6330_v47 = vsub.f32 0.0, %v6234_v63 }
 0x883   :  { %v5352_v59 = vpop.permute.xlu0 %5351 }
 0x884   :  { %v13826_v58 = vpop.f32.mrb[62].mxu1  ;;  %v5905_v41 = vsel %vm5881_vm3, %v13486_v46, %v5352_v59  ;;  %v5124_v46 = vrot.slane %v5099_v53, %v13055_v6  ;;  %v6000_v59 = vsel %vm4806_vm6, %v5494_v42, %v5638_v32 }
 0x885   :  { %v9551_v9 = vpop.f32.mrb[63].mxu1  ;;  %5459 = vrot.lane.b32.xlu1 %v13823_v35, %s10819_s16  ;;  %5603 = vrot.lane.b32.xlu0 %v13823_v35, %s10825_s0  ;;  %v5953_v61 = vsel %vm475_vm5, %v5905_v41, %v5496_v0 }
 0x886   :  { %v6388_v9 = vsub.s32 3, %v13015_v13  ;;  %v6140_v54 = vsub.f32 %v5953_v61, %v13812_v12  ;;  %vm5179_vm14 = vcmp.eq.s32.totalorder %v5124_v46, 1 }
 0x887   :  { %vm13873_vm1 = vmand %vm5083_vm15, %vm5179_vm14 }
 0x888   :  { %v13842_v51 = vpop.f32.mrb[64].mxu1  ;;  %v13844_v37 = vpop.permute.xlu1 %4925  ;;  %v6389_v15 = vrot.slane %v6074_v34, %v6388_v9  ;;  %v6236_v41 = vmul.f32 %v6140_v54, %v6140_v54 }
 0x889   :  { %v9554_v45 = vpop.f32.mrb[65].mxu1  ;;  %5315 = vrot.lane.b32.xlu1 %v13823_v35, %s10826_s13  ;;  %5511 = vrot.lane.b32.xlu0 %v13840_v14, %s10819_s16 }
 0x88a   :  { %v13859_v45 = vrot.slane %v6385_v48, %v6384_v36  ;;  %v13871_v48 = vrot.slane %v6389_v15, %v6384_v36  ;;  %v15950_v15 = vld [vmem:[#allocation40_spill] sm:$0xff] }
 0x88b   :  { %v13887_v36 = vsel %vm13873_vm1, %v15950_v15, 0.0 }
 0x88c   :  { %v13857_v11 = vpop.f32.mrb[66].mxu1  ;;  %v5782_v20 = vpop.permute.xlu1 %5781  ;;  %v6444_v53 = vmul.f32 %v13859_v45, %v6330_v47 }
 0x88d   :  { %v6048_v8 = vsel %vm408_vm4, %v6000_v59, %v5782_v20  ;;  %v9557_v52 = vpop.f32.mrb[67].mxu1  ;;  %5655 = vrot.lane.b32.xlu1 %v13840_v14, %s10825_s0  ;;  %5747 = vrot.lane.b32.xlu0 %v13823_v35, %s10817_s30  ;;  %v6332_v59 = vsub.f32 0.0, %v6236_v41 }
 0x88e   :  { %v6139_v32 = vsub.f32 %v6048_v8, %v13854_v21  ;;  %v6584_v61 = vmul.f32 1.442695, %v6444_v53 }
 0x88f   :  { %v13868_v42 = vpop.f32.mrb[58].mxu0 }
 0x890   :  { %v6235_v63 = vmul.f32 %v6139_v32, %v6139_v32  ;;  %v9572_v34 = vpop.f32.mrb[59].mxu0  ;;  %v5640_v28 = vpop.permute.xlu1 %5639 }
 0x891   :  { %5367 = vrot.lane.b32.xlu1 %v13840_v14, %s10826_s13  ;;  %5799 = vrot.lane.b32.xlu0 %v13840_v14, %s10817_s30  ;;  %v6001_v46 = vsel %vm4806_vm6, %v5496_v0, %v5640_v28  ;;  %v13904_v28 = vsel %vm13781_vm12, %v13653_v16, 0.0 }
 0x892   :  { %v6331_v8 = vsub.f32 0.0, %v6235_v63  ;;  %v4972_v63 = vrot.slane %v13701_v24, %v13055_v6 }
 0x893   :  { %v13882_v1 = vpop.f32.mrb[60].mxu0 }
 0x894   :  { %v6445_v9 = vmul.f32 %v13871_v48, %v6331_v8  ;;  %v9575_v47 = vpop.f32.mrb[61].mxu0  ;;  %v5784_v54 = vpop.permute.xlu1 %5783  ;;  %v6446_v8 = vmul.f32 %v13859_v45, %v6332_v59  ;;  %vm5012_vm2 = vcmp.le.s32.totalorder %v13426_v22, %v4972_v63 }
 0x895   :  { %v6049_v20 = vsel %vm408_vm4, %v6001_v46, %v5784_v54  ;;  %v13892_v32 = vpop.permute.xlu0 %4988  ;;  %5461 = vrot.lane.b32.xlu1 %v13887_v36, %s10819_s16  ;;  %5605 = vrot.lane.b32.xlu0 %v13887_v36, %s10825_s0  ;;  %v5108_v47 = vsel %vm5012_vm2, 1, %v15877_v56  ;;  %vm5093_vm2 = vcmp.eq.s32.totalorder %v13742_v50, 1 }
 0x896   :  { %v6586_v34 = vmul.f32 1.442695, %v6445_v9  ;;  %v6141_v0 = vsub.f32 %v6049_v20, %v13854_v21  ;;  %v6588_v54 = vmul.f32 1.442695, %v6446_v8 }
 0x898   :  { %10439 = vpow2.f32 %v6586_v34  ;;  %v6237_v53 = vmul.f32 %v6141_v0, %v6141_v0  ;;  %v13906_v41 = vpop.permute.xlu1 %5049 }
 0x899   :  { %10441 = vpow2.f32 %v6584_v61  ;;  %v5498_v15 = vpop.permute.xlu0 %5497  ;;  %5317 = vrot.lane.b32.xlu1 %v13887_v36, %s10826_s13  ;;  %5513 = vrot.lane.b32.xlu0 %v13904_v28, %s10819_s16 }
 0x89a   :  { %v6333_v24 = vsub.f32 0.0, %v6237_v53  ;;  %v5160_v53 = vrot.slane %v5108_v47, %v13055_v6 }
 0x89b   :  { %v13914_v44 = vpop.f32.mrb[62].mxu0 }
 0x89c   :  { %v6447_v16 = vmul.f32 %v13871_v48, %v6333_v24  ;;  %v9578_v9 = vpop.f32.mrb[63].mxu0  ;;  %v13917_v46 = vpop.f32.mrb[68].mxu1  ;;  %vm5188_vm9 = vcmp.eq.s32.totalorder %v5160_v53, 1 }
 0x89d   :  { %v5642_v61 = vpop.permute.xlu1 %5641  ;;  %v5354_v59 = vpop.permute.xlu0 %5353  ;;  %5657 = vrot.lane.b32.xlu1 %v13904_v28, %s10825_s0  ;;  %5749 = vrot.lane.b32.xlu0 %v13887_v36, %s10817_s30  ;;  %vm13952_vm10 = vmand %vm5092_vm7, %vm5188_vm9 }
 0x89e   :  { %v6590_v20 = vmul.f32 1.442695, %v6447_v16  ;;  %v5906_v63 = vsel %vm5881_vm3, %v13544_v31, %v5354_v59  ;;  %v9593_v34 = vpop.f32.mrb[69].mxu1  ;;  %v6002_v24 = vsel %vm4806_vm6, %v5498_v15, %v5642_v61 }
 0x89f   :  { %v5954_v0 = vsel %vm475_vm5, %v5906_v63, %v5498_v15  ;;  %v15952_v15 = vld [vmem:[#allocation22_spill] sm:$0xff] }
 0x8a0   :  { %10443 = vpow2.f32 %v6590_v20  ;;  %v6142_v8 = vsub.f32 %v5954_v0, %v13812_v12 }
 0x8a1   :  { %10445 = vpow2.f32 %v6588_v54  ;;  %v5786_v9 = vpop.permute.xlu1 %5785  ;;  %v13930_v40 = vpop.permute.xlu0 %5076  ;;  %5369 = vrot.lane.b32.xlu1 %v13904_v28, %s10826_s13  ;;  %5801 = vrot.lane.b32.xlu0 %v13904_v28, %s10817_s30  ;;  %v13944_v54 = vsel %vm13873_vm1, %v15952_v15, 0.0 }
 0x8a2   :  { %v10440_v31 = vpop.eup %10439  ;;  %v6238_v16 = vmul.f32 %v6142_v8, %v6142_v8  ;;  %v6050_v47 = vsel %vm408_vm4, %v6002_v24, %v5786_v9 }
 0x8a3   :  { %v10442_v59 = vpop.eup %10441  ;;  %v6143_v20 = vsub.f32 %v6050_v47, %v13854_v21  ;;  %v13938_v63 = vpop.f32.mrb[70].mxu1  ;;  %8887 = vmatprep.mubr.msk.f32.mxu1 %vm6718_vm8, %v10440_v31 }
 0x8a4   :  { %15951 = vst [vmem:[#allocation39_spill] sm:$0xff] %v13938_v63  ;;  %v6334_v61 = vsub.f32 0.0, %v6238_v16  ;;  %v9596_v34 = vpop.f32.mrb[71].mxu1  ;;  %7038 = vmatmul.mubr.f32.vlgmr.msra.gmra.mrb[74].mxu1 %v10442_v59  ;;  %v13961_v16 = vsel %vm13952_vm10, %v13655_v29, 0.0 }
 0x8a5   :  { %v6239_v0 = vmul.f32 %v6143_v20, %v6143_v20  ;;  %v5500_v8 = vpop.permute.xlu1 %5499  ;;  %v5644_v13 = vpop.permute.xlu0 %5643  ;;  %5463 = vrot.lane.b32.xlu1 %v13944_v54, %s10819_s16  ;;  %5607 = vrot.lane.b32.xlu0 %v13944_v54, %s10825_s0 }
 0x8a6   :  { %v6448_v24 = vmul.f32 %v13859_v45, %v6334_v61 }
 0x8a7   :  { %v6335_v53 = vsub.f32 0.0, %v6239_v0  ;;  %v13956_v31 = vpop.f32.mrb[72].mxu1 }
 0x8a8   :  { %15955 = vst [vmem:[#allocation7_spill] sm:$0xff] %v13956_v31  ;;  %v9599_v47 = vpop.f32.mrb[73].mxu1  ;;  %v13963_v59 = vpop.f32.mrb[64].mxu0  ;;  %v6592_v34 = vmul.f32 1.442695, %v6448_v24  ;;  %v6003_v31 = vsel %vm4806_vm6, %v5500_v8, %v5644_v13 }
 0x8a9   :  { %15956 = vst [vmem:[#allocation17_spill] sm:$0xff] %v13963_v59  ;;  %v6449_v20 = vmul.f32 %v13871_v48, %v6335_v53  ;;  %v13966_v60 = vpop.permute.xlu1 %4932  ;;  %v5356_v15 = vpop.permute.xlu0 %5355  ;;  %5319 = vrot.lane.b32.xlu1 %v13944_v54, %s10826_s13  ;;  %5515 = vrot.lane.b32.xlu0 %v13961_v16, %s10819_s16 }
 0x8aa   :  { %v10444_v61 = vpop.eup %10443  ;;  %v5907_v29 = vsel %vm5881_vm3, %v13587_v57, %v5356_v15  ;;  %v9614_v0 = vpop.f32.mrb[65].mxu0 }
 0x8ab   :  { %v10446_v47 = vpop.eup %10445  ;;  %v6594_v26 = vmul.f32 1.442695, %v6449_v20  ;;  %v5955_v25 = vsel %vm475_vm5, %v5907_v29, %v5500_v8  ;;  %8888 = vmatprep.mubr.msk.f32.mxu1 %vm6718_vm8, %v10444_v61  ;;  %v15957_v0 = vld [vmem:[#allocation34_spill] sm:$0xff] }
 0x8ac   :  { %v6144_v53 = vsub.f32 %v5955_v25, %v13812_v12  ;;  %v13977_v59 = vpop.f32.mrb[66].mxu0  ;;  %7043 = vmatmul.mubr.f32.gmra.mrb[76].mxu1 %v10446_v47  ;;  %v4916_v25 = vrot.slane %v13754_v10, %v13055_v6  ;;  %v14000_v47 = vsel %vm13873_vm1, %v15957_v0, 0.0 }
 0x8ad   :  { %10447 = vpow2.f32 %v6594_v26  ;;  %v5788_v63 = vpop.permute.xlu1 %5787  ;;  %v5450_v24 = vpop.permute.xlu0 %5449  ;;  %5659 = vrot.lane.b32.xlu1 %v13961_v16, %s10825_s0  ;;  %5751 = vrot.lane.b32.xlu0 %v13944_v54, %s10817_s30 }
 0x8ae   :  { %10449 = vpow2.f32 %v6592_v34  ;;  %v6240_v57 = vmul.f32 %v6144_v53, %v6144_v53  ;;  %v6051_v20 = vsel %vm408_vm4, %v6003_v31, %v5788_v63  ;;  %v9617_v15 = vpop.f32.mrb[67].mxu0  ;;  %vm5004_vm11 = vcmp.le.s32.totalorder %v13426_v22, %v4916_v25 }
 0x8af   :  { %v6145_v26 = vsub.f32 %v6051_v20, %v13854_v21 }
 0x8b0   :  { %v6336_v61 = vsub.f32 0.0, %v6240_v57 }
 0x8b1   :  { %v6241_v13 = vmul.f32 %v6145_v26, %v6145_v26  ;;  %v5594_v8 = vpop.permute.xlu1 %5593  ;;  %v5306_v29 = vpop.permute.xlu0 %5305  ;;  %5371 = vrot.lane.b32.xlu1 %v13961_v16, %s10826_s13  ;;  %5803 = vrot.lane.b32.xlu0 %v13961_v16, %s10817_s30 }
 0x8b2   :  { %v6450_v34 = vmul.f32 %v13859_v45, %v6336_v61  ;;  %v5882_v63 = vsel %vm5881_vm3, %v13605_v5, %v5306_v29  ;;  %v5100_v5 = vsel %vm5004_vm11, 1, %v15877_v56  ;;  %vm5085_vm11 = vcmp.eq.s32.totalorder %v13801_v62, 1 }
 0x8b3   :  { %v6337_v10 = vsub.f32 0.0, %v6241_v13  ;;  %v5930_v31 = vsel %vm475_vm5, %v5882_v63, %v5450_v24  ;;  %v5128_v29 = vrot.slane %v5100_v5, %v13055_v6  ;;  %v14014_v63 = vsel %vm13952_vm10, %v13665_v17, 0.0 }
 0x8b4   :  { %v6094_v53 = vsub.f32 %v5930_v31, %v13812_v12  ;;  %v6596_v25 = vmul.f32 1.442695, %v6450_v34 }
 0x8b5   :  { %v6451_v57 = vmul.f32 %v13871_v48, %v6337_v10  ;;  %v5502_v20 = vpop.permute.xlu1 %5501  ;;  %v5646_v15 = vpop.permute.xlu0 %5645  ;;  %5465 = vrot.lane.b32.xlu1 %v14000_v47, %s10819_s16  ;;  %5609 = vrot.lane.b32.xlu0 %v14000_v47, %s10825_s0  ;;  %v5978_v10 = vsel %vm4806_vm6, %v5450_v24, %v5594_v8  ;;  %vm5180_vm12 = vcmp.eq.s32.totalorder %v5128_v29, 1 }
 0x8b6   :  { %v6190_v26 = vmul.f32 %v6094_v53, %v6094_v53  ;;  %v6004_v5 = vsel %vm4806_vm6, %v5502_v20, %v5646_v15  ;;  %vm14038_vm14 = vmand %vm5084_vm13, %vm5180_vm12 }
 0x8b7   :  { %v10448_v61 = vpop.eup %10447  ;;  %v6598_v52 = vmul.f32 1.442695, %v6451_v57 }
 0x8b8   :  { %v10450_v13 = vpop.eup %10449  ;;  %8889 = vmatprep.mubr.msk.f32.mxu1 %vm6718_vm8, %v10448_v61  ;;  %v6286_v34 = vsub.f32 0.0, %v6190_v26 }
 0x8b9   :  { %10451 = vpow2.f32 %v6598_v52  ;;  %v5738_v31 = vpop.permute.xlu1 %5737  ;;  %7048 = vmatmul.mubr.f32.gmra.mrb[78].mxu1 %v10450_v13  ;;  %v5358_v0 = vpop.permute.xlu0 %5357  ;;  %5321 = vrot.lane.b32.xlu1 %v14000_v47, %s10826_s13 }
 0x8ba   :  { %10453 = vpow2.f32 %v6596_v25  ;;  %v6026_v53 = vsel %vm408_vm4, %v5978_v10, %v5738_v31  ;;  %v5908_v57 = vsel %vm5881_vm3, %v13620_v4, %v5358_v0  ;;  %5517 = vrot.lane.b32.xlu0 %v14014_v63, %s10819_s16  ;;  %v6400_v4 = vmul.f32 %v13859_v45, %v6286_v34 }
 0x8bb   :  { %v6095_v17 = vsub.f32 %v6026_v53, %v13854_v21  ;;  %v5956_v24 = vsel %vm475_vm5, %v5908_v57, %v5502_v20 }
 0x8bc   :  { %v6146_v8 = vsub.f32 %v5956_v24, %v13812_v12  ;;  %v6496_v57 = vmul.f32 1.442695, %v6400_v4 }
 0x8bd   :  { %v6191_v61 = vmul.f32 %v6095_v17, %v6095_v17  ;;  %v5790_v52 = vpop.permute.xlu1 %5789  ;;  %v14028_v25 = vpop.permute.xlu0 %4995  ;;  %5661 = vrot.lane.b32.xlu1 %v14014_v63, %s10825_s0 }
 0x8be   :  { %v6242_v26 = vmul.f32 %v6146_v8, %v6146_v8  ;;  %v6052_v13 = vsel %vm408_vm4, %v6004_v5, %v5790_v52  ;;  %5753 = vrot.lane.b32.xlu0 %v14000_v47, %s10817_s30 }
 0x8bf   :  { %v6287_v10 = vsub.f32 0.0, %v6191_v61  ;;  %v6147_v31 = vsub.f32 %v6052_v13, %v13854_v21  ;;  %v15960_v61 = vld [vmem:[#allocation44_spill] sm:$0xff] }
 0x8c0   :  { %v6338_v20 = vsub.f32 0.0, %v6242_v26  ;;  %v14053_v52 = vsel %vm14038_vm14, %v15960_v61, 0.0 }
 0x8c1   :  { %v6401_v29 = vmul.f32 %v13871_v48, %v6287_v10  ;;  %v6243_v0 = vmul.f32 %v6147_v31, %v6147_v31  ;;  %v14043_v34 = vpop.permute.xlu1 %5052  ;;  %v5452_v53 = vpop.permute.xlu0 %5451  ;;  %5373 = vrot.lane.b32.xlu1 %v14014_v63, %s10826_s13 }
 0x8c2   :  { %v6452_v17 = vmul.f32 %v13859_v45, %v6338_v20  ;;  %5805 = vrot.lane.b32.xlu0 %v14014_v63, %s10817_s30  ;;  %v4979_v20 = vrot.slane %v13728_v3, %v13055_v6 }
 0x8c3   :  { %v10452_v7 = vpop.eup %10451  ;;  %v6498_v24 = vmul.f32 1.442695, %v6401_v29  ;;  %v6339_v8 = vsub.f32 0.0, %v6243_v0 }
 0x8c4   :  { %v10454_v5 = vpop.eup %10453  ;;  %8890 = vmatprep.mubr.msk.f32.mxu1 %vm6718_vm8, %v10452_v7  ;;  %v6600_v10 = vmul.f32 1.442695, %v6452_v17  ;;  %vm5013_vm15 = vcmp.le.s32.totalorder %v13426_v22, %v4979_v20 }
 0x8c5   :  { %10455 = vpow2.f32 %v6498_v24  ;;  %v6453_v26 = vmul.f32 %v13871_v48, %v6339_v8  ;;  %v5596_v4 = vpop.permute.xlu1 %5595  ;;  %7053 = vmatmul.mubr.f32.gmra.mrb[80].mxu1 %v10454_v5  ;;  %v5308_v13 = vpop.permute.xlu0 %5307  ;;  %5467 = vrot.lane.b32.xlu1 %v14053_v52, %s10819_s16  ;;  %v14070_v24 = vsel %vm13952_vm10, %v13787_v33, 0.0  ;;  %v5109_v33 = vsel %vm5013_vm15, 1, %v15877_v56 }
 0x8c6   :  { %10457 = vpow2.f32 %v6496_v57  ;;  %v5883_v31 = vsel %vm5881_vm3, %v13649_v18, %v5308_v13  ;;  %5611 = vrot.lane.b32.xlu0 %v14053_v52, %s10825_s0  ;;  %v5979_v3 = vsel %vm4806_vm6, %v5452_v53, %v5596_v4  ;;  %v5164_v20 = vrot.slane %v5109_v33, %v13055_v6 }
 0x8c7   :  { %v6602_v29 = vmul.f32 1.442695, %v6453_v26  ;;  %v5931_v0 = vsel %vm475_vm5, %v5883_v31, %v5452_v53  ;;  %vm5094_vm15 = vcmp.eq.s32.totalorder %v13770_v43, 1 }
 0x8c8   :  { %v6096_v7 = vsub.f32 %v5931_v0, %v13812_v12  ;;  %vm5189_vm1 = vcmp.eq.s32.totalorder %v5164_v20, 1 }
 0x8c9   :  { %10459 = vpow2.f32 %v6602_v29  ;;  %v5504_v57 = vpop.permute.xlu1 %5503  ;;  %v5648_v17 = vpop.permute.xlu0 %5647  ;;  %5323 = vrot.lane.b32.xlu1 %v14053_v52, %s10826_s13  ;;  %vm14116_vm9 = vmand %vm5093_vm2, %vm5189_vm1 }
 0x8ca   :  { %10461 = vpow2.f32 %v6600_v10  ;;  %v6192_v18 = vmul.f32 %v6096_v7, %v6096_v7  ;;  %5519 = vrot.lane.b32.xlu0 %v14070_v24, %s10819_s16  ;;  %v6005_v29 = vsel %vm4806_vm6, %v5504_v57, %v5648_v17 }
 0x8cc   :  { %v6288_v9 = vsub.f32 0.0, %v6192_v18 }
 0x8cd   :  { %v5740_v8 = vpop.permute.xlu1 %5739  ;;  %v5360_v5 = vpop.permute.xlu0 %5359  ;;  %5663 = vrot.lane.b32.xlu1 %v14070_v24, %s10825_s0 }
 0x8ce   :  { %v6027_v61 = vsel %vm408_vm4, %v5979_v3, %v5740_v8  ;;  %v5909_v26 = vsel %vm5881_vm3, %v13672_v23, %v5360_v5  ;;  %5755 = vrot.lane.b32.xlu0 %v14053_v52, %s10817_s30  ;;  %v6402_v18 = vmul.f32 %v13859_v45, %v6288_v9 }
 0x8cf   :  { %v10456_v13 = vpop.eup %10455  ;;  %v6097_v10 = vsub.f32 %v6027_v61, %v13854_v21  ;;  %v5957_v53 = vsel %vm475_vm5, %v5909_v26, %v5504_v57  ;;  %v15961_v26 = vld [vmem:[#allocation46_spill] sm:$0xff] }
 0x8d0   :  { %v10458_v4 = vpop.eup %10457  ;;  %v6148_v31 = vsub.f32 %v5957_v53, %v13812_v12  ;;  %8865 = vmatprep.mubr.msk.f32.mxu0 %vm6718_vm8, %v10456_v13  ;;  %v14104_v13 = vsel %vm14038_vm14, %v15961_v26, 0.0 }
 0x8d1   :  { %v6193_v0 = vmul.f32 %v6097_v10, %v6097_v10  ;;  %v5792_v7 = vpop.permute.xlu1 %5791  ;;  %6928 = vmatmul.mubr.f32.vlgmr.msra.gmra.mrb[70].mxu0 %v10458_v4  ;;  %v5454_v23 = vpop.permute.xlu0 %5453  ;;  %5375 = vrot.lane.b32.xlu1 %v14070_v24, %s10826_s13 }
 0x8d2   :  { %v6244_v3 = vmul.f32 %v6148_v31, %v6148_v31  ;;  %v6053_v8 = vsel %vm408_vm4, %v6005_v29, %v5792_v7  ;;  %5807 = vrot.lane.b32.xlu0 %v14070_v24, %s10817_s30 }
 0x8d3   :  { %v10460_v5 = vpop.eup %10459  ;;  %v6289_v61 = vsub.f32 0.0, %v6193_v0  ;;  %v6149_v33 = vsub.f32 %v6053_v8, %v13854_v21  ;;  %v14099_v57 = vpop.f32.mrb[68].mxu0  ;;  %v6500_v0 = vmul.f32 1.442695, %v6402_v18 }
 0x8d4   :  { %v10462_v17 = vpop.eup %10461  ;;  %v6340_v10 = vsub.f32 0.0, %v6244_v3  ;;  %8891 = vmatprep.mubr.msk.f32.mxu1 %vm6718_vm8, %v10460_v5  ;;  %v9620_v9 = vpop.f32.mrb[69].mxu0  ;;  %v14123_v5 = vsel %vm14116_vm9, %v13826_v58, 0.0 }
 0x8d5   :  { %v6403_v53 = vmul.f32 %v13871_v48, %v6289_v61  ;;  %v6245_v4 = vmul.f32 %v6149_v33, %v6149_v33  ;;  %v5598_v31 = vpop.permute.xlu1 %5597  ;;  %7058 = vmatmul.mubr.f32.gmra.mrb[82].mxu1 %v10462_v17  ;;  %v14108_v29 = vpop.permute.xlu0 %5079  ;;  %5469 = vrot.lane.b32.xlu1 %v14104_v13, %s10819_s16 }
 0x8d6   :  { %v6454_v7 = vmul.f32 %v13859_v45, %v6340_v10  ;;  %5613 = vrot.lane.b32.xlu0 %v14104_v13, %s10825_s0  ;;  %v5980_v9 = vsel %vm4806_vm6, %v5454_v23, %v5598_v31 }
 0x8d7   :  { %v6502_v3 = vmul.f32 1.442695, %v6403_v53  ;;  %v6341_v20 = vsub.f32 0.0, %v6245_v4 }
 0x8d8   :  { %v6604_v50 = vmul.f32 1.442695, %v6454_v7 }
 0x8d9   :  { %10463 = vpow2.f32 %v6502_v3  ;;  %v6455_v18 = vmul.f32 %v13871_v48, %v6341_v20  ;;  %v5310_v61 = vpop.permute.xlu1 %5309  ;;  %v5506_v33 = vpop.permute.xlu0 %5505  ;;  %5325 = vrot.lane.b32.xlu1 %v14104_v13, %s10826_s13  ;;  %v4923_v3 = vrot.slane %v13785_v27, %v13055_v6 }
 0x8da   :  { %10465 = vpow2.f32 %v6500_v0  ;;  %v5884_v17 = vsel %vm5881_vm3, %v13690_v19, %v5310_v61  ;;  %5521 = vrot.lane.b32.xlu0 %v14123_v5, %s10819_s16 }
 0x8db   :  { %v6606_v26 = vmul.f32 1.442695, %v6455_v18  ;;  %v5932_v58 = vsel %vm475_vm5, %v5884_v17, %v5454_v23  ;;  %vm5005_vm7 = vcmp.le.s32.totalorder %v13426_v22, %v4923_v3 }
 0x8dc   :  { %v6098_v10 = vsub.f32 %v5932_v58, %v13812_v12  ;;  %v5101_v3 = vsel %vm5005_vm7, 1, %v15877_v56 }
 0x8dd   :  { %10467 = vpow2.f32 %v6606_v26  ;;  %v5650_v53 = vpop.permute.xlu1 %5649  ;;  %v5742_v4 = vpop.permute.xlu0 %5741  ;;  %5665 = vrot.lane.b32.xlu1 %v14123_v5, %s10825_s0 }
 0x8de   :  { %10469 = vpow2.f32 %v6604_v50  ;;  %v6194_v0 = vmul.f32 %v6098_v10, %v6098_v10  ;;  %v6028_v19 = vsel %vm408_vm4, %v5980_v9, %v5742_v4  ;;  %5757 = vrot.lane.b32.xlu0 %v14104_v13, %s10817_s30  ;;  %v6006_v23 = vsel %vm4806_vm6, %v5506_v33, %v5650_v53  ;;  %v15964_v4 = vld [vmem:[#allocation25_spill] sm:$0xff] }
 0x8df   :  { %v6099_v7 = vsub.f32 %v6028_v19, %v13854_v21 }
 0x8e0   :  { %v6290_v20 = vsub.f32 0.0, %v6194_v0  ;;  %v14157_v0 = vsel %vm14038_vm14, %v15964_v4, 0.0 }
 0x8e1   :  { %v6195_v31 = vmul.f32 %v6099_v7, %v6099_v7  ;;  %v5362_v18 = vpop.permute.xlu1 %5361  ;;  %v5794_v61 = vpop.permute.xlu0 %5793  ;;  %5377 = vrot.lane.b32.xlu1 %v14123_v5, %s10826_s13 }
 0x8e2   :  { %v6404_v50 = vmul.f32 %v13859_v45, %v6290_v20  ;;  %v5910_v17 = vsel %vm5881_vm3, %v13707_v2, %v5362_v18  ;;  %v6054_v26 = vsel %vm408_vm4, %v6006_v23, %v5794_v61  ;;  %5809 = vrot.lane.b32.xlu0 %v14123_v5, %s10817_s30 }
 0x8e3   :  { %v10464_v27 = vpop.eup %10463  ;;  %v6291_v58 = vsub.f32 0.0, %v6195_v31  ;;  %v5958_v10 = vsel %vm475_vm5, %v5910_v17, %v5506_v33  ;;  %v6151_v9 = vsub.f32 %v6054_v26, %v13854_v21 }
 0x8e4   :  { %v10466_v53 = vpop.eup %10465  ;;  %v6150_v2 = vsub.f32 %v5958_v10, %v13812_v12  ;;  %8866 = vmatprep.mubr.msk.f32.mxu0 %vm6718_vm8, %v10464_v27  ;;  %v6504_v23 = vmul.f32 1.442695, %v6404_v50  ;;  %v14172_v27 = vsel %vm14116_vm9, %v13842_v51, 0.0 }
 0x8e5   :  { %v6405_v19 = vmul.f32 %v13871_v48, %v6291_v58  ;;  %v6247_v7 = vmul.f32 %v6151_v9, %v6151_v9  ;;  %v5456_v20 = vpop.permute.xlu1 %5455  ;;  %6933 = vmatmul.mubr.f32.gmra.mrb[72].mxu0 %v10466_v53  ;;  %v5600_v33 = vpop.permute.xlu0 %5599  ;;  %5471 = vrot.lane.b32.xlu1 %v14157_v0, %s10819_s16  ;;  %v5132_v9 = vrot.slane %v5101_v3, %v13055_v6 }
 0x8e6   :  { %v6246_v31 = vmul.f32 %v6150_v2, %v6150_v2  ;;  %5615 = vrot.lane.b32.xlu0 %v14157_v0, %s10825_s0 }
 0x8e7   :  { %v10468_v15 = vpop.eup %10467  ;;  %v6506_v18 = vmul.f32 1.442695, %v6405_v19  ;;  %v6343_v61 = vsub.f32 0.0, %v6247_v7  ;;  %vm5181_vm10 = vcmp.eq.s32.totalorder %v5132_v9, 1 }
 0x8e8   :  { %v10470_v17 = vpop.eup %10469  ;;  %v6342_v26 = vsub.f32 0.0, %v6246_v31  ;;  %8892 = vmatprep.mubr.msk.f32.mxu1 %vm6718_vm8, %v10468_v15  ;;  %v5981_v31 = vsel %vm4806_vm6, %v5456_v20, %v5600_v33  ;;  %vm14193_vm12 = vmand %vm5085_vm11, %vm5181_vm10 }
 0x8e9   :  { %10471 = vpow2.f32 %v6506_v18  ;;  %v6457_v50 = vmul.f32 %v13871_v48, %v6343_v61  ;;  %v5312_v58 = vpop.permute.xlu1 %5311  ;;  %7063 = vmatmul.mubr.f32.gmra.mrb[84].mxu1 %v10470_v17  ;;  %v5508_v10 = vpop.permute.xlu0 %5507  ;;  %5327 = vrot.lane.b32.xlu1 %v14157_v0, %s10826_s13 }
 0x8ea   :  { %10473 = vpow2.f32 %v6504_v23  ;;  %v6456_v53 = vmul.f32 %v13859_v45, %v6342_v26  ;;  %v5885_v4 = vsel %vm5881_vm3, %v13733_v49, %v5312_v58  ;;  %5523 = vrot.lane.b32.xlu0 %v14172_v27, %s10819_s16 }
 0x8eb   :  { %v6610_v51 = vmul.f32 1.442695, %v6457_v50  ;;  %v5933_v2 = vsel %vm475_vm5, %v5885_v4, %v5456_v20 }
 0x8ec   :  { %v6608_v19 = vmul.f32 1.442695, %v6456_v53  ;;  %v6100_v7 = vsub.f32 %v5933_v2, %v13812_v12 }
 0x8ed   :  { %10475 = vpow2.f32 %v6610_v51  ;;  %v5652_v15 = vpop.permute.xlu1 %5651  ;;  %v5744_v3 = vpop.permute.xlu0 %5743  ;;  %5667 = vrot.lane.b32.xlu1 %v14172_v27, %s10825_s0 }
 0x8ee   :  { %10477 = vpow2.f32 %v6608_v19  ;;  %v6196_v49 = vmul.f32 %v6100_v7, %v6100_v7  ;;  %v6029_v23 = vsel %vm408_vm4, %v5981_v31, %v5744_v3  ;;  %5759 = vrot.lane.b32.xlu0 %v14157_v0, %s10817_s30  ;;  %v6007_v33 = vsel %vm4806_vm6, %v5508_v10, %v5652_v15  ;;  %v15967_v7 = vld [vmem:[#allocation18_spill] sm:$0xff] }
 0x8ef   :  { %v6101_v18 = vsub.f32 %v6029_v23, %v13854_v21  ;;  %v14211_v31 = vsel %vm14193_vm12, %v15967_v7, 0.0 }
 0x8f0   :  { %v6292_v61 = vsub.f32 0.0, %v6196_v49 }
 0x8f1   :  { %v6197_v17 = vmul.f32 %v6101_v18, %v6101_v18  ;;  %v5364_v26 = vpop.permute.xlu1 %5363  ;;  %v5796_v50 = vpop.permute.xlu0 %5795  ;;  %5379 = vrot.lane.b32.xlu1 %v14172_v27, %s10826_s13 }
 0x8f2   :  { %v6406_v58 = vmul.f32 %v13859_v45, %v6292_v61  ;;  %v5911_v9 = vsel %vm5881_vm3, %v13747_v39, %v5364_v26  ;;  %v6055_v62 = vsel %vm408_vm4, %v6007_v33, %v5796_v50  ;;  %5811 = vrot.lane.b32.xlu0 %v14172_v27, %s10817_s30  ;;  %v4986_v33 = vrot.slane %v13761_v38, %v13055_v6 }
 0x8f3   :  { %v10472_v53 = vpop.eup %10471  ;;  %v6293_v4 = vsub.f32 0.0, %v6197_v17  ;;  %v5959_v51 = vsel %vm475_vm5, %v5911_v9, %v5508_v10  ;;  %v6153_v2 = vsub.f32 %v6055_v62, %v13854_v21  ;;  %v14226_v62 = vsel %vm14116_vm9, %v13857_v11, 0.0 }
 0x8f4   :  { %v10474_v19 = vpop.eup %10473  ;;  %v6152_v15 = vsub.f32 %v5959_v51, %v13812_v12  ;;  %8867 = vmatprep.mubr.msk.f32.mxu0 %vm6718_vm8, %v10472_v53  ;;  %v6508_v10 = vmul.f32 1.442695, %v6406_v58  ;;  %vm5014_vm13 = vcmp.le.s32.totalorder %v13426_v22, %v4986_v33  ;;  %vm5086_vm9 = vcmp.eq.s32.totalorder %v13906_v41, 1 }
 0x8f5   :  { %v6407_v39 = vmul.f32 %v13871_v48, %v6293_v4  ;;  %v6249_v3 = vmul.f32 %v6153_v2, %v6153_v2  ;;  %v5458_v49 = vpop.permute.xlu1 %5457  ;;  %6938 = vmatmul.mubr.f32.gmra.mrb[74].mxu0 %v10474_v19  ;;  %v5602_v23 = vpop.permute.xlu0 %5601  ;;  %5473 = vrot.lane.b32.xlu1 %v14211_v31, %s10819_s16 }
 0x8f6   :  { %v6248_v18 = vmul.f32 %v6152_v15, %v6152_v15  ;;  %5617 = vrot.lane.b32.xlu0 %v14211_v31, %s10825_s0  ;;  %v5982_v7 = vsel %vm4806_vm6, %v5458_v49, %v5602_v23 }
 0x8f7   :  { %v10476_v61 = vpop.eup %10475  ;;  %v6510_v17 = vmul.f32 1.442695, %v6407_v39  ;;  %v6345_v26 = vsub.f32 0.0, %v6249_v3 }
 0x8f8   :  { %v10478_v50 = vpop.eup %10477  ;;  %v6344_v9 = vsub.f32 0.0, %v6248_v18  ;;  %8893 = vmatprep.mubr.msk.f32.mxu1 %vm6718_vm8, %v10476_v61 }
 0x8f9   :  { %10479 = vpow2.f32 %v6510_v17  ;;  %v6459_v58 = vmul.f32 %v13871_v48, %v6345_v26  ;;  %v5314_v53 = vpop.permute.xlu1 %5313  ;;  %7068 = vmatmul.mubr.f32.gmra.mrb[86].mxu1 %v10478_v50  ;;  %v5510_v4 = vpop.permute.xlu0 %5509  ;;  %5329 = vrot.lane.b32.xlu1 %v14211_v31, %s10826_s13 }
 0x8fa   :  { %10481 = vpow2.f32 %v6508_v10  ;;  %v6458_v38 = vmul.f32 %v13859_v45, %v6344_v9  ;;  %v5886_v51 = vsel %vm5881_vm3, %v13775_v55, %v5314_v53  ;;  %5525 = vrot.lane.b32.xlu0 %v14226_v62, %s10819_s16  ;;  %v5110_v55 = vsel %vm5014_vm13, 1, %v15877_v56 }
 0x8fb   :  { %v6614_v11 = vmul.f32 1.442695, %v6459_v58  ;;  %v5934_v8 = vsel %vm475_vm5, %v5886_v51, %v5458_v49  ;;  %v5168_v33 = vrot.slane %v5110_v55, %v13055_v6 }
 0x8fc   :  { %v6612_v2 = vmul.f32 1.442695, %v6458_v38  ;;  %v6102_v19 = vsub.f32 %v5934_v8, %v13812_v12 }
 0x8fd   :  { %10483 = vpow2.f32 %v6614_v11  ;;  %v5654_v15 = vpop.permute.xlu1 %5653  ;;  %v5746_v39 = vpop.permute.xlu0 %5745  ;;  %5669 = vrot.lane.b32.xlu1 %v14226_v62, %s10825_s0  ;;  %vm14266_vm14 = vcmp.eq.s32.totalorder %v5168_v33, 1 }
 0x8fe   :  { %10485 = vpow2.f32 %v6612_v2  ;;  %v6198_v3 = vmul.f32 %v6102_v19, %v6102_v19  ;;  %v6030_v10 = vsel %vm408_vm4, %v5982_v7, %v5746_v39  ;;  %5761 = vrot.lane.b32.xlu0 %v14211_v31, %s10817_s30  ;;  %v6008_v49 = vsel %vm4806_vm6, %v5510_v4, %v5654_v15  ;;  %v15968_v2 = vld [vmem:[#allocation37_spill] sm:$0xff]  ;;  %vm14278_vm1 = vmand %vm5094_vm15, %vm14266_vm14 }
 0x8ff   :  { %v6103_v18 = vsub.f32 %v6030_v10, %v13854_v21  ;;  %v14262_v19 = vsel %vm14193_vm12, %v15968_v2, 0.0 }
 0x900   :  { %v6294_v61 = vsub.f32 0.0, %v6198_v3 }
 0x901   :  { %v6199_v23 = vmul.f32 %v6103_v18, %v6103_v18  ;;  %v5366_v17 = vpop.permute.xlu1 %5365  ;;  %v5798_v26 = vpop.permute.xlu0 %5797  ;;  %5381 = vrot.lane.b32.xlu1 %v14226_v62, %s10826_s13 }
 0x902   :  { %v6408_v50 = vmul.f32 %v13859_v45, %v6294_v61  ;;  %v5912_v9 = vsel %vm5881_vm3, %v13792_v30, %v5366_v17  ;;  %v6056_v58 = vsel %vm408_vm4, %v6008_v49, %v5798_v26  ;;  %5813 = vrot.lane.b32.xlu0 %v14226_v62, %s10817_s30  ;;  %v14286_v26 = vsel %vm14278_vm1, %v13868_v42, 0.0 }
 0x903   :  { %v10480_v53 = vpop.eup %10479  ;;  %v6295_v38 = vsub.f32 0.0, %v6199_v23  ;;  %v5960_v51 = vsel %vm475_vm5, %v5912_v9, %v5510_v4  ;;  %v6155_v11 = vsub.f32 %v6056_v58, %v13854_v21 }
 0x904   :  { %v10482_v8 = vpop.eup %10481  ;;  %v6154_v7 = vsub.f32 %v5960_v51, %v13812_v12  ;;  %8868 = vmatprep.mubr.msk.f32.mxu0 %vm6718_vm8, %v10480_v53  ;;  %v6512_v3 = vmul.f32 1.442695, %v6408_v50 }
 0x905   :  { %v6409_v15 = vmul.f32 %v13871_v48, %v6295_v38  ;;  %v6251_v39 = vmul.f32 %v6155_v11, %v6155_v11  ;;  %v5460_v4 = vpop.permute.xlu1 %5459  ;;  %6943 = vmatmul.mubr.f32.gmra.mrb[76].mxu0 %v10482_v8  ;;  %v5604_v55 = vpop.permute.xlu0 %5603  ;;  %5475 = vrot.lane.b32.xlu1 %v14262_v19, %s10819_s16 }
 0x906   :  { %v6250_v10 = vmul.f32 %v6154_v7, %v6154_v7  ;;  %5619 = vrot.lane.b32.xlu0 %v14262_v19, %s10825_s0  ;;  %v5983_v8 = vsel %vm4806_vm6, %v5460_v4, %v5604_v55  ;;  %v4930_v55 = vrot.slane %v13844_v37, %v13055_v6 }
 0x907   :  { %v10484_v18 = vpop.eup %10483  ;;  %v6514_v61 = vmul.f32 1.442695, %v6409_v15  ;;  %v6347_v33 = vsub.f32 0.0, %v6251_v39 }
 0x908   :  { %v10486_v49 = vpop.eup %10485  ;;  %v6346_v17 = vsub.f32 0.0, %v6250_v10  ;;  %8894 = vmatprep.mubr.msk.f32.mxu1 %vm6718_vm8, %v10484_v18  ;;  %vm5006_vm2 = vcmp.le.s32.totalorder %v13426_v22, %v4930_v55 }
 0x909   :  { %10487 = vpow2.f32 %v6514_v61  ;;  %v6461_v43 = vmul.f32 %v13871_v48, %v6347_v33  ;;  %v5316_v50 = vpop.permute.xlu1 %5315  ;;  %7073 = vmatmul.mubr.f32.gmra.mrb[88].mxu1 %v10486_v49  ;;  %v5512_v9 = vpop.permute.xlu0 %5511  ;;  %5331 = vrot.lane.b32.xlu1 %v14262_v19, %s10826_s13 }
 0x90a   :  { %10489 = vpow2.f32 %v6512_v3  ;;  %v6460_v58 = vmul.f32 %v13859_v45, %v6346_v17  ;;  %v5887_v53 = vsel %vm5881_vm3, %v13823_v35, %v5316_v50  ;;  %5527 = vrot.lane.b32.xlu0 %v14286_v26, %s10819_s16 }
 0x90b   :  { %v6618_v42 = vmul.f32 1.442695, %v6461_v43  ;;  %v5935_v38 = vsel %vm475_vm5, %v5887_v53, %v5460_v4 }
 0x90c   :  { %v6616_v51 = vmul.f32 1.442695, %v6460_v58  ;;  %v6104_v11 = vsub.f32 %v5935_v38, %v13812_v12 }
 0x90d   :  { %10491 = vpow2.f32 %v6618_v42  ;;  %v5656_v2 = vpop.permute.xlu1 %5655  ;;  %v5748_v7 = vpop.permute.xlu0 %5747  ;;  %5671 = vrot.lane.b32.xlu1 %v14286_v26, %s10825_s0  ;;  %v15973_v42 = vld [vmem:[#allocation45_spill] sm:$0xff] }
 0x90e   :  { %10493 = vpow2.f32 %v6616_v51  ;;  %v6200_v30 = vmul.f32 %v6104_v11, %v6104_v11  ;;  %v6031_v35 = vsel %vm408_vm4, %v5983_v8, %v5748_v7  ;;  %5763 = vrot.lane.b32.xlu0 %v14262_v19, %s10817_s30  ;;  %v6009_v3 = vsel %vm4806_vm6, %v5512_v9, %v5656_v2 }
 0x90f   :  { %v6105_v15 = vsub.f32 %v6031_v35, %v13854_v21  ;;  %v14321_v37 = vsel %vm14193_vm12, %v15973_v42, 0.0  ;;  %vm5095_vm12 = vcmp.eq.s32.totalorder %v13930_v40, 1 }
 0x910   :  { %v6296_v39 = vsub.f32 0.0, %v6200_v30 }
 0x911   :  { %v6201_v10 = vmul.f32 %v6105_v15, %v6105_v15  ;;  %v5368_v18 = vpop.permute.xlu1 %5367  ;;  %v5800_v4 = vpop.permute.xlu0 %5799  ;;  %5383 = vrot.lane.b32.xlu1 %v14286_v26, %s10826_s13 }
 0x912   :  { %v6410_v61 = vmul.f32 %v13859_v45, %v6296_v39  ;;  %v5913_v33 = vsel %vm5881_vm3, %v13840_v14, %v5368_v18  ;;  %v6057_v49 = vsel %vm408_vm4, %v6009_v3, %v5800_v4  ;;  %5815 = vrot.lane.b32.xlu0 %v14286_v26, %s10817_s30  ;;  %v5102_v39 = vsel %vm5006_vm2, 1, %v15877_v56 }
 0x913   :  { %v10488_v17 = vpop.eup %10487  ;;  %v6297_v43 = vsub.f32 0.0, %v6201_v10  ;;  %v5961_v50 = vsel %vm475_vm5, %v5913_v33, %v5512_v9  ;;  %v6157_v58 = vsub.f32 %v6057_v49, %v13854_v21  ;;  %v14336_v3 = vsel %vm14278_vm1, %v13882_v1, 0.0 }
 0x914   :  { %v10490_v53 = vpop.eup %10489  ;;  %v6156_v38 = vsub.f32 %v5961_v50, %v13812_v12  ;;  %8869 = vmatprep.mubr.msk.f32.mxu0 %vm6718_vm8, %v10488_v17  ;;  %v6516_v9 = vmul.f32 1.442695, %v6410_v61  ;;  %v5136_v49 = vrot.slane %v5102_v39, %v13055_v6 }
 0x915   :  { %v6411_v14 = vmul.f32 %v13871_v48, %v6297_v43  ;;  %v6253_v51 = vmul.f32 %v6157_v58, %v6157_v58  ;;  %v5462_v11 = vpop.permute.xlu1 %5461  ;;  %6948 = vmatmul.mubr.f32.gmra.mrb[78].mxu0 %v10490_v53  ;;  %v5606_v8 = vpop.permute.xlu0 %5605  ;;  %5477 = vrot.lane.b32.xlu1 %v14321_v37, %s10819_s16 }
 0x916   :  { %v6252_v2 = vmul.f32 %v6156_v38, %v6156_v38  ;;  %5621 = vrot.lane.b32.xlu0 %v14321_v37, %s10825_s0  ;;  %v5984_v50 = vsel %vm4806_vm6, %v5462_v11, %v5606_v8  ;;  %vm5182_vm7 = vcmp.eq.s32.totalorder %v5136_v49, 1 }
 0x917   :  { %v10492_v20 = vpop.eup %10491  ;;  %v6518_v7 = vmul.f32 1.442695, %v6411_v14  ;;  %v6349_v30 = vsub.f32 0.0, %v6253_v51  ;;  %vm14357_vm10 = vmand %vm5086_vm9, %vm5182_vm7 }
 0x918   :  { %v10494_v35 = vpop.eup %10493  ;;  %v6348_v15 = vsub.f32 0.0, %v6252_v2  ;;  %8895 = vmatprep.mubr.msk.f32.mxu1 %vm6718_vm8, %v10492_v20 }
 0x919   :  { %10495 = vpow2.f32 %v6518_v7  ;;  %v6463_v10 = vmul.f32 %v13871_v48, %v6349_v30  ;;  %v5318_v18 = vpop.permute.xlu1 %5317  ;;  %7078 = vmatmul.mubr.f32.gmra.mrb[90].mxu1 %v10494_v35  ;;  %v5514_v4 = vpop.permute.xlu0 %5513  ;;  %5333 = vrot.lane.b32.xlu1 %v14321_v37, %s10826_s13 }
 0x91a   :  { %10497 = vpow2.f32 %v6516_v9  ;;  %v6462_v55 = vmul.f32 %v13859_v45, %v6348_v15  ;;  %v5888_v61 = vsel %vm5881_vm3, %v13887_v36, %v5318_v18  ;;  %5529 = vrot.lane.b32.xlu0 %v14336_v3, %s10819_s16  ;;  %v15976_v18 = vld [vmem:[#allocation42_spill] sm:$0xff] }
 0x91b   :  { %v6622_v1 = vmul.f32 1.442695, %v6463_v10  ;;  %v5936_v33 = vsel %vm475_vm5, %v5888_v61, %v5462_v11 }
 0x91c   :  { %v6620_v17 = vmul.f32 1.442695, %v6462_v55  ;;  %v6106_v43 = vsub.f32 %v5936_v33, %v13812_v12  ;;  %v14375_v55 = vsel %vm14357_vm10, %v15976_v18, 0.0 }
 0x91d   :  { %10499 = vpow2.f32 %v6622_v1  ;;  %v5658_v58 = vpop.permute.xlu1 %5657  ;;  %v5750_v53 = vpop.permute.xlu0 %5749  ;;  %5673 = vrot.lane.b32.xlu1 %v14336_v3, %s10825_s0 }
 0x91e   :  { %10501 = vpow2.f32 %v6620_v17  ;;  %v6202_v36 = vmul.f32 %v6106_v43, %v6106_v43  ;;  %v6032_v42 = vsel %vm408_vm4, %v5984_v50, %v5750_v53  ;;  %5765 = vrot.lane.b32.xlu0 %v14321_v37, %s10817_s30  ;;  %v6010_v11 = vsel %vm4806_vm6, %v5514_v4, %v5658_v58 }
 0x91f   :  { %v6107_v38 = vsub.f32 %v6032_v42, %v13854_v21  ;;  %v4993_v50 = vrot.slane %v13892_v32, %v13055_v6 }
 0x920   :  { %v6298_v14 = vsub.f32 0.0, %v6202_v36 }
 0x921   :  { %v6203_v8 = vmul.f32 %v6107_v38, %v6107_v38  ;;  %v5370_v9 = vpop.permute.xlu1 %5369  ;;  %v5802_v41 = vpop.permute.xlu0 %5801  ;;  %5385 = vrot.lane.b32.xlu1 %v14336_v3, %s10826_s13  ;;  %v14390_v38 = vsel %vm14278_vm1, %v13914_v44, 0.0  ;;  %vm5015_vm11 = vcmp.le.s32.totalorder %v13426_v22, %v4993_v50  ;;  %vm5087_vm1 = vcmp.eq.s32.totalorder %v14043_v34, 1 }
 0x922   :  { %v6412_v2 = vmul.f32 %v13859_v45, %v6298_v14  ;;  %v5914_v20 = vsel %vm5881_vm3, %v13904_v28, %v5370_v9  ;;  %v6058_v7 = vsel %vm408_vm4, %v6010_v11, %v5802_v41  ;;  %5817 = vrot.lane.b32.xlu0 %v14336_v3, %s10817_s30 }
 0x923   :  { %v10496_v30 = vpop.eup %10495  ;;  %v6299_v35 = vsub.f32 0.0, %v6203_v8  ;;  %v5962_v15 = vsel %vm475_vm5, %v5914_v20, %v5514_v4  ;;  %v6159_v39 = vsub.f32 %v6058_v7, %v13854_v21 }
 0x924   :  { %v10498_v10 = vpop.eup %10497  ;;  %v6158_v61 = vsub.f32 %v5962_v15, %v13812_v12  ;;  %8870 = vmatprep.mubr.msk.f32.mxu0 %vm6718_vm8, %v10496_v30  ;;  %v6520_v4 = vmul.f32 1.442695, %v6412_v2 }
 0x925   :  { %v6413_v28 = vmul.f32 %v13871_v48, %v6299_v35  ;;  %v6255_v1 = vmul.f32 %v6159_v39, %v6159_v39  ;;  %v5464_v33 = vpop.permute.xlu1 %5463  ;;  %6953 = vmatmul.mubr.f32.gmra.mrb[80].mxu0 %v10498_v10  ;;  %v5608_v49 = vpop.permute.xlu0 %5607  ;;  %5479 = vrot.lane.b32.xlu1 %v14375_v55, %s10819_s16 }
 0x926   :  { %v6254_v17 = vmul.f32 %v6158_v61, %v6158_v61  ;;  %5623 = vrot.lane.b32.xlu0 %v14375_v55, %s10825_s0  ;;  %v5985_v20 = vsel %vm4806_vm6, %v5464_v33, %v5608_v49 }
 0x927   :  { %v10500_v43 = vpop.eup %10499  ;;  %v6522_v58 = vmul.f32 1.442695, %v6413_v28  ;;  %v6351_v53 = vsub.f32 0.0, %v6255_v1 }
 0x928   :  { %v10502_v36 = vpop.eup %10501  ;;  %v6350_v42 = vsub.f32 0.0, %v6254_v17  ;;  %8896 = vmatprep.mubr.msk.f32.mxu1 %vm6718_vm8, %v10500_v43 }
 0x929   :  { %10503 = vpow2.f32 %v6522_v58  ;;  %v6465_v14 = vmul.f32 %v13871_v48, %v6351_v53  ;;  %v5320_v11 = vpop.permute.xlu1 %5319  ;;  %7083 = vmatmul.mubr.f32.gmra.mrb[92].mxu1 %v10502_v36  ;;  %v5516_v8 = vpop.permute.xlu0 %5515  ;;  %5335 = vrot.lane.b32.xlu1 %v14375_v55, %s10826_s13 }
 0x92a   :  { %10505 = vpow2.f32 %v6520_v4  ;;  %v6464_v32 = vmul.f32 %v13859_v45, %v6350_v42  ;;  %v5889_v9 = vsel %vm5881_vm3, %v13944_v54, %v5320_v11  ;;  %5531 = vrot.lane.b32.xlu0 %v14390_v38, %s10819_s16  ;;  %v5111_v54 = vsel %vm5015_vm11, 1, %v15877_v56  ;;  %v15977_v42 = vld [vmem:[#allocation23_spill] sm:$0xff] }
 0x92b   :  { %v6626_v44 = vmul.f32 1.442695, %v6465_v14  ;;  %v5937_v23 = vsel %vm475_vm5, %v5889_v9, %v5464_v33  ;;  %v5172_v18 = vrot.slane %v5111_v54, %v13055_v6  ;;  %v14427_v14 = vsel %vm14357_vm10, %v15977_v42, 0.0 }
 0x92c   :  { %v6624_v41 = vmul.f32 1.442695, %v6464_v32  ;;  %v6108_v2 = vsub.f32 %v5937_v23, %v13812_v12 }
 0x92d   :  { %10507 = vpow2.f32 %v6626_v44  ;;  %v5660_v7 = vpop.permute.xlu1 %5659  ;;  %v5752_v30 = vpop.permute.xlu0 %5751  ;;  %5675 = vrot.lane.b32.xlu1 %v14390_v38, %s10825_s0  ;;  %vm5191_vm13 = vcmp.eq.s32.totalorder %v5172_v18, 1 }
 0x92e   :  { %10509 = vpow2.f32 %v6624_v41  ;;  %v6204_v35 = vmul.f32 %v6108_v2, %v6108_v2  ;;  %v6033_v15 = vsel %vm408_vm4, %v5985_v20, %v5752_v30  ;;  %5767 = vrot.lane.b32.xlu0 %v14375_v55, %s10817_s30  ;;  %v6011_v61 = vsel %vm4806_vm6, %v5516_v8, %v5660_v7  ;;  %vm14436_vm14 = vmand %vm5095_vm12, %vm5191_vm13 }
 0x92f   :  { %v6109_v39 = vsub.f32 %v6033_v15, %v13854_v21  ;;  %v14446_v40 = vsel %vm14436_vm14, %v13917_v46, 0.0 }
 0x930   :  { %v6300_v10 = vsub.f32 0.0, %v6204_v35 }
 0x931   :  { %v6205_v28 = vmul.f32 %v6109_v39, %v6109_v39  ;;  %v5372_v1 = vpop.permute.xlu1 %5371  ;;  %v5804_v33 = vpop.permute.xlu0 %5803  ;;  %5387 = vrot.lane.b32.xlu1 %v14390_v38, %s10826_s13 }
 0x932   :  { %v6414_v49 = vmul.f32 %v13859_v45, %v6300_v10  ;;  %v5915_v4 = vsel %vm5881_vm3, %v13961_v16, %v5372_v1  ;;  %v6059_v17 = vsel %vm408_vm4, %v6011_v61, %v5804_v33  ;;  %5819 = vrot.lane.b32.xlu0 %v14390_v38, %s10817_s30 }
 0x933   :  { %v10504_v43 = vpop.eup %10503  ;;  %v6301_v50 = vsub.f32 0.0, %v6205_v28  ;;  %v5963_v58 = vsel %vm475_vm5, %v5915_v4, %v5516_v8  ;;  %v6161_v53 = vsub.f32 %v6059_v17, %v13854_v21 }
 0x934   :  { %v10506_v36 = vpop.eup %10505  ;;  %v6160_v16 = vsub.f32 %v5963_v58, %v13812_v12  ;;  %8871 = vmatprep.mubr.msk.f32.mxu0 %vm6718_vm8, %v10504_v43  ;;  %v6524_v23 = vmul.f32 1.442695, %v6414_v49 }
 0x935   :  { %v6415_v11 = vmul.f32 %v13871_v48, %v6301_v50  ;;  %v6257_v32 = vmul.f32 %v6161_v53, %v6161_v53  ;;  %v5466_v9 = vpop.permute.xlu1 %5465  ;;  %6958 = vmatmul.mubr.f32.gmra.mrb[82].mxu0 %v10506_v36  ;;  %v5610_v44 = vpop.permute.xlu0 %5609  ;;  %5481 = vrot.lane.b32.xlu1 %v14427_v14, %s10819_s16 }
 0x936   :  { %v6256_v41 = vmul.f32 %v6160_v16, %v6160_v16  ;;  %5625 = vrot.lane.b32.xlu0 %v14427_v14, %s10825_s0  ;;  %v5986_v33 = vsel %vm4806_vm6, %v5466_v9, %v5610_v44  ;;  %v4937_v16 = vrot.slane %v13966_v60, %v13055_v6 }
 0x937   :  { %v10508_v2 = vpop.eup %10507  ;;  %v6526_v20 = vmul.f32 1.442695, %v6415_v11  ;;  %v6353_v7 = vsub.f32 0.0, %v6257_v32 }
 0x938   :  { %v10510_v30 = vpop.eup %10509  ;;  %v6352_v54 = vsub.f32 0.0, %v6256_v41  ;;  %8897 = vmatprep.mubr.msk.f32.mxu1 %vm6718_vm8, %v10508_v2  ;;  %vm5007_vm15 = vcmp.le.s32.totalorder %v13426_v22, %v4937_v16 }
 0x939   :  { %10511 = vpow2.f32 %v6526_v20  ;;  %v6467_v35 = vmul.f32 %v13871_v48, %v6353_v7  ;;  %v5322_v15 = vpop.permute.xlu1 %5321  ;;  %7088 = vmatmul.mubr.f32.gmra.mrb[94].mxu1 %v10510_v30  ;;  %v5518_v39 = vpop.permute.xlu0 %5517  ;;  %5337 = vrot.lane.b32.xlu1 %v14427_v14, %s10826_s13  ;;  %v15980_v7 = vld [vmem:[#allocation29_spill] sm:$0xff] }
 0x93a   :  { %10513 = vpow2.f32 %v6524_v23  ;;  %v6466_v10 = vmul.f32 %v13859_v45, %v6352_v54  ;;  %v5890_v18 = vsel %vm5881_vm3, %v14000_v47, %v5322_v15  ;;  %5533 = vrot.lane.b32.xlu0 %v14446_v40, %s10819_s16  ;;  %v14481_v60 = vsel %vm14357_vm10, %v15980_v7, 0.0 }
 0x93b   :  { %v6630_v46 = vmul.f32 1.442695, %v6467_v35  ;;  %v5938_v61 = vsel %vm475_vm5, %v5890_v18, %v5466_v9  ;;  %vm5096_vm10 = vcmp.eq.s32.totalorder %v14108_v29, 1 }
 0x93c   :  { %v6628_v28 = vmul.f32 1.442695, %v6466_v10  ;;  %v6110_v1 = vsub.f32 %v5938_v61, %v13812_v12 }
 0x93d   :  { %10515 = vpow2.f32 %v6630_v46  ;;  %v5662_v49 = vpop.permute.xlu1 %5661  ;;  %v5754_v4 = vpop.permute.xlu0 %5753  ;;  %5677 = vrot.lane.b32.xlu1 %v14446_v40, %s10825_s0 }
 0x93e   :  { %10517 = vpow2.f32 %v6628_v28  ;;  %v6206_v17 = vmul.f32 %v6110_v1, %v6110_v1  ;;  %v6034_v47 = vsel %vm408_vm4, %v5986_v33, %v5754_v4  ;;  %5769 = vrot.lane.b32.xlu0 %v14427_v14, %s10817_s30  ;;  %v6012_v58 = vsel %vm4806_vm6, %v5518_v39, %v5662_v49  ;;  %v15981_v1 = vld [vmem:[#allocation39_spill] sm:$0xff] }
 0x93f   :  { %v6111_v43 = vsub.f32 %v6034_v47, %v13854_v21  ;;  %v14495_v33 = vsel %vm14436_vm14, %v15981_v1, 0.0  ;;  %v5103_v49 = vsel %vm5007_vm15, 1, %v15877_v56 }
 0x940   :  { %v6302_v50 = vsub.f32 0.0, %v6206_v17 }
 0x941   :  { %v6207_v53 = vmul.f32 %v6111_v43, %v6111_v43  ;;  %v5374_v36 = vpop.permute.xlu1 %5373  ;;  %v5806_v42 = vpop.permute.xlu0 %5805  ;;  %5389 = vrot.lane.b32.xlu1 %v14446_v40, %s10826_s13 }
 0x942   :  { %v6416_v11 = vmul.f32 %v13859_v45, %v6302_v50  ;;  %v5916_v32 = vsel %vm5881_vm3, %v14014_v63, %v5374_v36  ;;  %v6060_v9 = vsel %vm408_vm4, %v6012_v58, %v5806_v42  ;;  %5821 = vrot.lane.b32.xlu0 %v14446_v40, %s10817_s30  ;;  %v5140_v36 = vrot.slane %v5103_v49, %v13055_v6 }
 0x943   :  { %v10512_v44 = vpop.eup %10511  ;;  %v6303_v23 = vsub.f32 0.0, %v6207_v53  ;;  %v5964_v41 = vsel %vm475_vm5, %v5916_v32, %v5518_v39  ;;  %v6163_v2 = vsub.f32 %v6060_v9, %v13854_v21 }
 0x944   :  { %v10514_v20 = vpop.eup %10513  ;;  %v6162_v30 = vsub.f32 %v5964_v41, %v13812_v12  ;;  %8872 = vmatprep.mubr.msk.f32.mxu0 %vm6718_vm8, %v10512_v44  ;;  %v6528_v39 = vmul.f32 1.442695, %v6416_v11  ;;  %vm5183_vm2 = vcmp.eq.s32.totalorder %v5140_v36, 1 }
 0x945   :  { %v6417_v63 = vmul.f32 %v13871_v48, %v6303_v23  ;;  %v6259_v54 = vmul.f32 %v6163_v2, %v6163_v2  ;;  %v5468_v35 = vpop.permute.xlu1 %5467  ;;  %6963 = vmatmul.mubr.f32.gmra.mrb[84].mxu0 %v10514_v20  ;;  %v5612_v15 = vpop.permute.xlu0 %5611  ;;  %5483 = vrot.lane.b32.xlu1 %v14481_v60, %s10819_s16  ;;  %vm14517_vm9 = vmand %vm5087_vm1, %vm5183_vm2 }
 0x946   :  { %v6258_v10 = vmul.f32 %v6162_v30, %v6162_v30  ;;  %5627 = vrot.lane.b32.xlu0 %v14481_v60, %s10825_s0  ;;  %v5987_v11 = vsel %vm4806_vm6, %v5468_v35, %v5612_v15 }
 0x947   :  { %v10516_v51 = vpop.eup %10515  ;;  %v6530_v18 = vmul.f32 1.442695, %v6417_v63  ;;  %v6355_v46 = vsub.f32 0.0, %v6259_v54 }
 0x948   :  { %v10518_v61 = vpop.eup %10517  ;;  %v6354_v28 = vsub.f32 0.0, %v6258_v10  ;;  %8898 = vmatprep.mubr.msk.f32.mxu1 %vm6718_vm8, %v10516_v51 }
 0x949   :  { %10519 = vpow2.f32 %v6530_v18  ;;  %v6469_v4 = vmul.f32 %v13871_v48, %v6355_v46  ;;  %v5324_v17 = vpop.permute.xlu1 %5323  ;;  %7093 = vmatmul.mubr.f32.gmra.mrb[96].mxu1 %v10518_v61  ;;  %v5520_v47 = vpop.permute.xlu0 %5519  ;;  %5339 = vrot.lane.b32.xlu1 %v14481_v60, %s10826_s13  ;;  %v15984_v46 = vld [vmem:[#allocation20_spill] sm:$0xff] }
 0x94a   :  { %10521 = vpow2.f32 %v6528_v39  ;;  %v6468_v43 = vmul.f32 %v13859_v45, %v6354_v28  ;;  %v5891_v50 = vsel %vm5881_vm3, %v14053_v52, %v5324_v17  ;;  %5535 = vrot.lane.b32.xlu0 %v14495_v33, %s10819_s16  ;;  %v14535_v61 = vsel %vm14517_vm9, %v15984_v46, 0.0 }
 0x94b   :  { %v6634_v58 = vmul.f32 1.442695, %v6469_v4  ;;  %v5939_v53 = vsel %vm475_vm5, %v5891_v50, %v5468_v35  ;;  %v5000_v50 = vrot.slane %v14028_v25, %v13055_v6 }
 0x94c   :  { %v6632_v42 = vmul.f32 1.442695, %v6468_v43  ;;  %v6112_v16 = vsub.f32 %v5939_v53, %v13812_v12 }
 0x94d   :  { %10523 = vpow2.f32 %v6634_v58  ;;  %v5664_v32 = vpop.permute.xlu1 %5663  ;;  %v5756_v9 = vpop.permute.xlu0 %5755  ;;  %5679 = vrot.lane.b32.xlu1 %v14495_v33, %s10825_s0  ;;  %vm5016_vm7 = vcmp.le.s32.totalorder %v13426_v22, %v5000_v50 }
 0x94e   :  { %10525 = vpow2.f32 %v6632_v42  ;;  %v6208_v52 = vmul.f32 %v6112_v16, %v6112_v16  ;;  %v6035_v44 = vsel %vm408_vm4, %v5987_v11, %v5756_v9  ;;  %5771 = vrot.lane.b32.xlu0 %v14481_v60, %s10817_s30  ;;  %v6013_v20 = vsel %vm4806_vm6, %v5520_v47, %v5664_v32  ;;  %v15985_v16 = vld [vmem:[#allocation7_spill] sm:$0xff] }
 0x94f   :  { %v6113_v23 = vsub.f32 %v6035_v44, %v13854_v21  ;;  %v14550_v11 = vsel %vm14436_vm14, %v15985_v16, 0.0 }
 0x950   :  { %v6304_v41 = vsub.f32 0.0, %v6208_v52 }
 0x951   :  { %v6209_v7 = vmul.f32 %v6113_v23, %v6113_v23  ;;  %v5376_v30 = vpop.permute.xlu1 %5375  ;;  %v5808_v34 = vpop.permute.xlu0 %5807  ;;  %5391 = vrot.lane.b32.xlu1 %v14495_v33, %s10826_s13 }
 0x952   :  { %v6418_v63 = vmul.f32 %v13859_v45, %v6304_v41  ;;  %v5917_v54 = vsel %vm5881_vm3, %v14070_v24, %v5376_v30  ;;  %v6061_v35 = vsel %vm408_vm4, %v6013_v20, %v5808_v34  ;;  %5823 = vrot.lane.b32.xlu0 %v14495_v33, %s10817_s30 }
 0x953   :  { %v10520_v15 = vpop.eup %10519  ;;  %v6305_v39 = vsub.f32 0.0, %v6209_v7  ;;  %v5965_v10 = vsel %vm475_vm5, %v5917_v54, %v5520_v47  ;;  %v6165_v51 = vsub.f32 %v6061_v35, %v13854_v21 }
 0x954   :  { %v10522_v18 = vpop.eup %10521  ;;  %v6164_v28 = vsub.f32 %v5965_v10, %v13812_v12  ;;  %8873 = vmatprep.mubr.msk.f32.mxu0 %vm6718_vm8, %v10520_v15  ;;  %v6532_v17 = vmul.f32 1.442695, %v6418_v63 }
 0x955   :  { %v6419_v24 = vmul.f32 %v13871_v48, %v6305_v39  ;;  %v6261_v1 = vmul.f32 %v6165_v51, %v6165_v51  ;;  %v5470_v49 = vpop.permute.xlu1 %5469  ;;  %6968 = vmatmul.mubr.f32.gmra.mrb[86].mxu0 %v10522_v18  ;;  %v5614_v4 = vpop.permute.xlu0 %5613  ;;  %5485 = vrot.lane.b32.xlu1 %v14535_v61, %s10819_s16 }
 0x956   :  { %v6260_v47 = vmul.f32 %v6164_v28, %v6164_v28  ;;  %5629 = vrot.lane.b32.xlu0 %v14535_v61, %s10825_s0  ;;  %v5988_v7 = vsel %vm4806_vm6, %v5470_v49, %v5614_v4 }
 0x957   :  { %v10524_v43 = vpop.eup %10523  ;;  %v6534_v58 = vmul.f32 1.442695, %v6419_v24  ;;  %v6357_v53 = vsub.f32 0.0, %v6261_v1 }
 0x958   :  { %v10526_v36 = vpop.eup %10525  ;;  %v6356_v42 = vsub.f32 0.0, %v6260_v47  ;;  %8899 = vmatprep.mubr.msk.f32.mxu1 %vm6718_vm8, %v10524_v43  ;;  %v15986_v43 = vld [vmem:[#allocation32_spill] sm:$0xff] }
 0x959   :  { %10527 = vpow2.f32 %v6534_v58  ;;  %v6471_v32 = vmul.f32 %v13871_v48, %v6357_v53  ;;  %v5326_v9 = vpop.permute.xlu1 %5325  ;;  %7098 = vmatmul.mubr.f32.gmra.mrb[98].mxu1 %v10526_v36  ;;  %v5522_v52 = vpop.permute.xlu0 %5521  ;;  %5341 = vrot.lane.b32.xlu1 %v14535_v61, %s10826_s13  ;;  %v14587_v50 = vsel %vm14517_vm9, %v15986_v43, 0.0 }
 0x95a   :  { %10529 = vpow2.f32 %v6532_v17  ;;  %v6470_v25 = vmul.f32 %v13859_v45, %v6356_v42  ;;  %v5892_v44 = vsel %vm5881_vm3, %v14104_v13, %v5326_v9  ;;  %5537 = vrot.lane.b32.xlu0 %v14550_v11, %s10819_s16  ;;  %v5112_v13 = vsel %vm5016_vm7, 1, %v15877_v56 }
 0x95b   :  { %v6638_v8 = vmul.f32 1.442695, %v6471_v32  ;;  %v5940_v23 = vsel %vm475_vm5, %v5892_v44, %v5470_v49  ;;  %v5176_v15 = vrot.slane %v5112_v13, %v13055_v6 }
 0x95c   :  { %v6636_v41 = vmul.f32 1.442695, %v6470_v25  ;;  %v6114_v20 = vsub.f32 %v5940_v23, %v13812_v12 }
 0x95d   :  { %10531 = vpow2.f32 %v6638_v8  ;;  %v5666_v30 = vpop.permute.xlu1 %5665  ;;  %v5758_v34 = vpop.permute.xlu0 %5757  ;;  %5681 = vrot.lane.b32.xlu1 %v14550_v11, %s10825_s0  ;;  %vm5192_vm11 = vcmp.eq.s32.totalorder %v5176_v15, 1 }
 0x95e   :  { %10533 = vpow2.f32 %v6636_v41  ;;  %v6210_v63 = vmul.f32 %v6114_v20, %v6114_v20  ;;  %v6036_v22 = vsel %vm408_vm4, %v5988_v7, %v5758_v34  ;;  %5773 = vrot.lane.b32.xlu0 %v14535_v61, %s10817_s30  ;;  %v6014_v39 = vsel %vm4806_vm6, %v5522_v52, %v5666_v30  ;;  %vm14596_vm12 = vmand %vm5096_vm10, %vm5192_vm11  ;;  %v15989_v41 = vld [vmem:[#allocation17_spill] sm:$0xff] }
 0x95f   :  { %v6115_v54 = vsub.f32 %v6036_v22, %v13854_v21  ;;  %v14606_v29 = vsel %vm14596_vm12, %v15989_v41, 0.0 }
 0x960   :  { %v6306_v35 = vsub.f32 0.0, %v6210_v63 }
 0x961   :  { %v6211_v10 = vmul.f32 %v6115_v54, %v6115_v54  ;;  %v5378_v51 = vpop.permute.xlu1 %5377  ;;  %v5810_v18 = vpop.permute.xlu0 %5809  ;;  %5393 = vrot.lane.b32.xlu1 %v14550_v11, %s10826_s13 }
 0x962   :  { %v6420_v46 = vmul.f32 %v13859_v45, %v6306_v35  ;;  %v5918_v28 = vsel %vm5881_vm3, %v14123_v5, %v5378_v51  ;;  %v6062_v24 = vsel %vm408_vm4, %v6014_v39, %v5810_v18  ;;  %5825 = vrot.lane.b32.xlu0 %v14550_v11, %s10817_s30 }
 0x963   :  { %v10528_v1 = vpop.eup %10527  ;;  %v6307_v49 = vsub.f32 0.0, %v6211_v10  ;;  %v5966_v4 = vsel %vm475_vm5, %v5918_v28, %v5522_v52  ;;  %v6167_v17 = vsub.f32 %v6062_v24, %v13854_v21 }
 0x964   :  { %v10530_v47 = vpop.eup %10529  ;;  %v6166_v5 = vsub.f32 %v5966_v4, %v13812_v12  ;;  %8874 = vmatprep.mubr.msk.f32.mxu0 %vm6718_vm8, %v10528_v1  ;;  %v6536_v32 = vmul.f32 1.442695, %v6420_v46 }
 0x965   :  { %v6421_v58 = vmul.f32 %v13871_v48, %v6307_v49  ;;  %v6263_v53 = vmul.f32 %v6167_v17, %v6167_v17  ;;  %v5472_v36 = vpop.permute.xlu1 %5471  ;;  %6973 = vmatmul.mubr.f32.gmra.mrb[88].mxu0 %v10530_v47  ;;  %v5616_v42 = vpop.permute.xlu0 %5615  ;;  %5487 = vrot.lane.b32.xlu1 %v14587_v50, %s10819_s16 }
 0x966   :  { %v6262_v9 = vmul.f32 %v6166_v5, %v6166_v5  ;;  %5631 = vrot.lane.b32.xlu0 %v14587_v50, %s10825_s0  ;;  %v5989_v15 = vsel %vm4806_vm6, %v5472_v36, %v5616_v42  ;;  %v15990_v42 = vld [vmem:[#allocation6_spill] sm:$0xff] }
 0x967   :  { %v10532_v52 = vpop.eup %10531  ;;  %v6538_v25 = vmul.f32 1.442695, %v6421_v58  ;;  %v6359_v44 = vsub.f32 0.0, %v6263_v53 }
 0x968   :  { %v10534_v8 = vpop.eup %10533  ;;  %v6358_v23 = vsub.f32 0.0, %v6262_v9  ;;  %8900 = vmatprep.mubr.msk.f32.mxu1 %vm6718_vm8, %v10532_v52 }
 0x969   :  { %10535 = vpow2.f32 %v6538_v25  ;;  %v6473_v20 = vmul.f32 %v13871_v48, %v6359_v44  ;;  %v5328_v7 = vpop.permute.xlu1 %5327  ;;  %7103 = vmatmul.mubr.f32.gmra.mrb[100].mxu1 %v10534_v8  ;;  %v5524_v30 = vpop.permute.xlu0 %5523  ;;  %5343 = vrot.lane.b32.xlu1 %v14587_v50, %s10826_s13 }
 0x96a   :  { %10537 = vpow2.f32 %v6536_v32  ;;  %v6472_v34 = vmul.f32 %v13859_v45, %v6358_v23  ;;  %v5893_v13 = vsel %vm5881_vm3, %v14157_v0, %v5328_v7  ;;  %5539 = vrot.lane.b32.xlu0 %v14606_v29, %s10819_s16  ;;  %v14639_v32 = vsel %vm14517_vm9, %v15990_v42, 0.0 }
 0x96b   :  { %v6642_v63 = vmul.f32 1.442695, %v6473_v20  ;;  %v5941_v22 = vsel %vm475_vm5, %v5893_v13, %v5472_v36 }
 0x96c   :  { %v6640_v54 = vmul.f32 1.442695, %v6472_v34  ;;  %v6116_v35 = vsub.f32 %v5941_v22, %v13812_v12 }
 0x96d   :  { %10539 = vpow2.f32 %v6642_v63  ;;  %v5668_v39 = vpop.permute.xlu1 %5667  ;;  %v5760_v10 = vpop.permute.xlu0 %5759  ;;  %5683 = vrot.lane.b32.xlu1 %v14606_v29, %s10825_s0  ;;  %v14654_v63 = vsel %vm14596_vm12, %v13977_v59, 0.0 }
 0x96e   :  { %10541 = vpow2.f32 %v6640_v54  ;;  %v6212_v51 = vmul.f32 %v6116_v35, %v6116_v35  ;;  %v6037_v0 = vsel %vm408_vm4, %v5989_v15, %v5760_v10  ;;  %5775 = vrot.lane.b32.xlu0 %v14587_v50, %s10817_s30  ;;  %v6015_v28 = vsel %vm4806_vm6, %v5524_v30, %v5668_v39 }
 0x96f   :  { %v6117_v18 = vsub.f32 %v6037_v0, %v13854_v21 }
 0x970   :  { %v6308_v46 = vsub.f32 0.0, %v6212_v51 }
 0x971   :  { %v6213_v24 = vmul.f32 %v6117_v18, %v6117_v18  ;;  %v5380_v1 = vpop.permute.xlu1 %5379  ;;  %v5812_v49 = vpop.permute.xlu0 %5811  ;;  %5395 = vrot.lane.b32.xlu1 %v14606_v29, %s10826_s13 }
 0x972   :  { %v6422_v4 = vmul.f32 %v13859_v45, %v6308_v46  ;;  %v5919_v17 = vsel %vm5881_vm3, %v14172_v27, %v5380_v1  ;;  %v6063_v47 = vsel %vm408_vm4, %v6015_v28, %v5812_v49  ;;  %5827 = vrot.lane.b32.xlu0 %v14606_v29, %s10817_s30 }
 0x973   :  { %v10536_v43 = vpop.eup %10535  ;;  %v6309_v5 = vsub.f32 0.0, %v6213_v24  ;;  %v5967_v58 = vsel %vm475_vm5, %v5919_v17, %v5524_v30  ;;  %v6169_v53 = vsub.f32 %v6063_v47, %v13854_v21 }
 0x974   :  { %v10538_v36 = vpop.eup %10537  ;;  %v6168_v9 = vsub.f32 %v5967_v58, %v13812_v12  ;;  %8875 = vmatprep.mubr.msk.f32.mxu0 %vm6718_vm8, %v10536_v43  ;;  %v6540_v8 = vmul.f32 1.442695, %v6422_v4 }
 0x975   :  { %v6423_v27 = vmul.f32 %v13871_v48, %v6309_v5  ;;  %v6265_v52 = vmul.f32 %v6169_v53, %v6169_v53  ;;  %v5474_v25 = vpop.permute.xlu1 %5473  ;;  %6978 = vmatmul.mubr.f32.gmra.mrb[90].mxu0 %v10538_v36  ;;  %v5618_v44 = vpop.permute.xlu0 %5617  ;;  %5489 = vrot.lane.b32.xlu1 %v14639_v32, %s10819_s16 }
 0x976   :  { %v6264_v23 = vmul.f32 %v6168_v9, %v6168_v9  ;;  %5633 = vrot.lane.b32.xlu0 %v14639_v32, %s10825_s0  ;;  %v5990_v18 = vsel %vm4806_vm6, %v5474_v25, %v5618_v44 }
 0x977   :  { %v10540_v2 = vpop.eup %10539  ;;  %v6542_v41 = vmul.f32 1.442695, %v6423_v27  ;;  %v6361_v20 = vsub.f32 0.0, %v6265_v52  ;;  %v14648_v7 = vpop.f32.mrb[74].mxu1 }
 0x978   :  { %v10542_v30 = vpop.eup %10541  ;;  %v6360_v34 = vsub.f32 0.0, %v6264_v23  ;;  %8901 = vmatprep.mubr.msk.f32.mxu1 %vm6718_vm8, %v10540_v2  ;;  %v7041_v13 = vpop.f32.mrb[75].mxu1 }
 0x979   :  { %10543 = vpow2.f32 %v6542_v41  ;;  %v6475_v22 = vmul.f32 %v13871_v48, %v6361_v20  ;;  %v5330_v54 = vpop.permute.xlu1 %5329  ;;  %7108 = vmatmul.mubr.f32.gmra.mrb[102].mxu1 %v10542_v30  ;;  %v5526_v35 = vpop.permute.xlu0 %5525  ;;  %5345 = vrot.lane.b32.xlu1 %v14639_v32, %s10826_s13  ;;  %v15991_v20 = vld [vmem:[#allocation14_spill] sm:$0xff] }
 0x97a   :  { %10545 = vpow2.f32 %v6540_v8  ;;  %v6474_v15 = vmul.f32 %v13859_v45, %v6360_v34  ;;  %v5894_v39 = vsel %vm5881_vm3, %v14211_v31, %v5330_v54  ;;  %5541 = vrot.lane.b32.xlu0 %v14654_v63, %s10819_s16 }
 0x97b   :  { %v6646_v59 = vmul.f32 1.442695, %v6475_v22  ;;  %v5942_v10 = vsel %vm475_vm5, %v5894_v39, %v5474_v25  ;;  %v14697_v39 = vsel %vm14596_vm12, %v14099_v57, 0.0 }
 0x97c   :  { %v6644_v51 = vmul.f32 1.442695, %v6474_v15  ;;  %v6118_v0 = vsub.f32 %v5942_v10, %v13812_v12 }
 0x97d   :  { %10547 = vpow2.f32 %v6646_v59  ;;  %v5670_v46 = vpop.permute.xlu1 %5669  ;;  %v5762_v28 = vpop.permute.xlu0 %5761  ;;  %5685 = vrot.lane.b32.xlu1 %v14654_v63, %s10825_s0 }
 0x97e   :  { %10549 = vpow2.f32 %v6644_v51  ;;  %v6214_v24 = vmul.f32 %v6118_v0, %v6118_v0  ;;  %v6038_v31 = vsel %vm408_vm4, %v5990_v18, %v5762_v28  ;;  %5777 = vrot.lane.b32.xlu0 %v14639_v32, %s10817_s30  ;;  %v6016_v47 = vsel %vm4806_vm6, %v5526_v35, %v5670_v46 }
 0x97f   :  { %v6119_v1 = vsub.f32 %v6038_v31, %v13854_v21  ;;  %v14673_v49 = vpop.f32.mrb[76].mxu1 }
 0x980   :  { %v6310_v4 = vsub.f32 0.0, %v6214_v24  ;;  %v7046_v17 = vpop.f32.mrb[77].mxu1 }
 0x981   :  { %v6215_v43 = vmul.f32 %v6119_v1, %v6119_v1  ;;  %v5382_v5 = vpop.permute.xlu1 %5381  ;;  %v5814_v58 = vpop.permute.xlu0 %5813  ;;  %5397 = vrot.lane.b32.xlu1 %v14654_v63, %s10826_s13 }
 0x982   :  { %v6424_v53 = vmul.f32 %v13859_v45, %v6310_v4  ;;  %v5920_v36 = vsel %vm5881_vm3, %v14226_v62, %v5382_v5  ;;  %v6064_v42 = vsel %vm408_vm4, %v6016_v47, %v5814_v58  ;;  %5829 = vrot.lane.b32.xlu0 %v14654_v63, %s10817_s30  ;;  %v15992_v47 = vld [vmem:[#allocation62_spill] sm:$0xff] }
 0x983   :  { %v10544_v9 = vpop.eup %10543  ;;  %v6311_v27 = vsub.f32 0.0, %v6215_v43  ;;  %v5968_v52 = vsel %vm475_vm5, %v5920_v36, %v5526_v35  ;;  %v6171_v25 = vsub.f32 %v6064_v42, %v13854_v21  ;;  %v15993_v43 = vld [vmem:[#allocation48_spill] sm:$0xff]  ;;  %v15994_v36 = vld [vmem:[#allocation63_spill] sm:$0xff] }
 0x984   :  { %v10546_v44 = vpop.eup %10545  ;;  %v6170_v8 = vsub.f32 %v5968_v52, %v13812_v12  ;;  %8876 = vmatprep.mubr.msk.f32.mxu0 %vm6718_vm8, %v10544_v9  ;;  %v6544_v30 = vmul.f32 1.442695, %v6424_v53  ;;  %vm7360_vm13 = vcmp.ge.s32.totalorder %v15993_v43, %v15992_v47  ;;  %vm7361_vm14 = vcmp.ge.s32.totalorder %v15993_v43, %v15994_v36 }
 0x985   :  { %v6425_v23 = vmul.f32 %v13871_v48, %v6311_v27  ;;  %v6267_v2 = vmul.f32 %v6171_v25, %v6171_v25  ;;  %v5476_v62 = vpop.permute.xlu1 %5475  ;;  %6983 = vmatmul.mubr.f32.gmra.mrb[92].mxu0 %v10546_v44  ;;  %v5620_v41 = vpop.permute.xlu0 %5619  ;;  %5491 = vrot.lane.b32.xlu1 %v15991_v20, %s10819_s16  ;;  %v7376_v9 = vsel %vm7360_vm13, 1, %v15877_v56 }
 0x986   :  { %v6266_v34 = vmul.f32 %v6170_v8, %v6170_v8  ;;  %5635 = vrot.lane.b32.xlu0 %v15991_v20, %s10825_s0  ;;  %v15995_v8 = vld [vmem:[#allocation61_spill] sm:$0xff] }
 0x987   :  { %v10548_v13 = vpop.eup %10547  ;;  %v6546_v22 = vmul.f32 1.442695, %v6425_v23  ;;  %v6363_v54 = vsub.f32 0.0, %v6267_v2  ;;  %vm7368_vm15 = vcmp.ge.s32.totalorder %v15993_v43, %v15995_v8 }
 0x988   :  { %v10550_v35 = vpop.eup %10549  ;;  %v6362_v15 = vsub.f32 0.0, %v6266_v34  ;;  %8902 = vmatprep.mubr.msk.f32.mxu1 %vm6718_vm8, %v10548_v13 }
 0x989   :  { %10551 = vpow2.f32 %v6546_v22  ;;  %v6477_v59 = vmul.f32 %v13871_v48, %v6363_v54  ;;  %v5332_v10 = vpop.permute.xlu1 %5331  ;;  %7113 = vmatmul.mubr.f32.gmra.mrb[104].mxu1 %v10550_v35  ;;  %v5528_v51 = vpop.permute.xlu0 %5527  ;;  %5347 = vrot.lane.b32.xlu1 %v15991_v20, %s10826_s13  ;;  %v15996_v54 = vld [vmem:[#allocation11_spill] sm:$0xff] }
 0x98a   :  { %10553 = vpow2.f32 %v6544_v30  ;;  %v6476_v0 = vmul.f32 %v13859_v45, %v6362_v15  ;;  %v5895_v18 = vsel %vm5881_vm3, %v14262_v19, %v5332_v10  ;;  %5543 = vrot.lane.b32.xlu0 %v14697_v39, %s10819_s16  ;;  %v5991_v19 = vsel %vm4806_vm6, %v5476_v62, %v5620_v41 }
 0x98b   :  { %v6650_v57 = vmul.f32 1.442695, %v6477_v59  ;;  %v5943_v16 = vsel %vm475_vm5, %v5895_v18, %v5476_v62  ;;  %v7377_v30 = vsel %vm7361_vm14, 1, %v15877_v56  ;;  %vm7369_vm1 = vcmp.ge.s32.totalorder %v15993_v43, %v15996_v54  ;;  %v15997_v18 = vld [vmem:[#allocation64_spill] sm:$0xff]  ;;  %v16002_v54 = vld [vmem:[#allocation53_spill] sm:$0xff] }
 0x98c   :  { %v6648_v46 = vmul.f32 1.442695, %v6476_v0  ;;  %v6120_v28 = vsub.f32 %v5943_v16, %v13812_v12  ;;  %v14709_v24 = vpop.f32.mrb[78].mxu1  ;;  %v7384_v15 = vsel %vm7368_vm15, 1, %v15877_v56  ;;  %vm7362_vm2 = vcmp.ge.s32.totalorder %v15993_v43, %v15997_v18 }
 0x98d   :  { %10555 = vpow2.f32 %v6650_v57  ;;  %v5672_v31 = vpop.permute.xlu1 %5671  ;;  %v7051_v1 = vpop.f32.mrb[79].mxu1  ;;  %5687 = vrot.lane.b32.xlu1 %v14697_v39, %s10825_s0  ;;  %vm7372_vm12 = vcmp.ge.s32.totalorder %v15993_v43, %v16002_v54 }
 0x98e   :  { %10557 = vpow2.f32 %v6648_v46  ;;  %v6216_v4 = vmul.f32 %v6120_v28, %v6120_v28  ;;  %v5764_v17 = vpop.permute.xlu0 %5763  ;;  %5779 = vrot.lane.b32.xlu0 %v15991_v20, %s10817_s30  ;;  %v6017_v27 = vsel %vm4806_vm6, %v5528_v51, %v5672_v31  ;;  %v7385_v46 = vsel %vm7369_vm1, 1, %v15877_v56 }
 0x98f   :  { %v6039_v5 = vsel %vm408_vm4, %v5991_v19, %v5764_v17  ;;  %v15998_v17 = vld [vmem:[#allocation49_spill] sm:$0xff] }
 0x990   :  { %v6312_v58 = vsub.f32 0.0, %v6216_v4  ;;  %v6121_v53 = vsub.f32 %v6039_v5, %v13854_v21  ;;  %vm7370_vm9 = vcmp.ge.s32.totalorder %v15993_v43, %v15998_v17 }
 0x991   :  { %v5384_v42 = vpop.permute.xlu1 %5383  ;;  %5399 = vrot.lane.b32.xlu1 %v14697_v39, %s10826_s13 }
 0x992   :  { %v6217_v52 = vmul.f32 %v6121_v53, %v6121_v53  ;;  %v5921_v25 = vsel %vm5881_vm3, %v14286_v26, %v5384_v42  ;;  %v5816_v44 = vpop.permute.xlu0 %5815  ;;  %5831 = vrot.lane.b32.xlu0 %v14697_v39, %s10817_s30  ;;  %v6426_v2 = vmul.f32 %v13859_v45, %v6312_v58  ;;  %v7378_v58 = vsel %vm7362_vm2, 1, %v15877_v56 }
 0x993   :  { %v10552_v23 = vpop.eup %10551  ;;  %v5969_v62 = vsel %vm475_vm5, %v5921_v25, %v5528_v51  ;;  %v6065_v41 = vsel %vm408_vm4, %v6017_v27, %v5816_v44  ;;  %v16000_v25 = vld [vmem:[#allocation50_spill] sm:$0xff] }
 0x994   :  { %v10554_v34 = vpop.eup %10553  ;;  %v6313_v13 = vsub.f32 0.0, %v6217_v52  ;;  %v6172_v26 = vsub.f32 %v5969_v62, %v13812_v12  ;;  %v6173_v22 = vsub.f32 %v6065_v41, %v13854_v21  ;;  %8877 = vmatprep.mubr.msk.f32.mxu0 %vm6718_vm8, %v10552_v23  ;;  %v6548_v16 = vmul.f32 1.442695, %v6426_v2 }
 0x995   :  { %v5478_v35 = vpop.permute.xlu1 %5477  ;;  %6988 = vmatmul.mubr.f32.gmra.mrb[94].mxu0 %v10554_v34  ;;  %7393 = vperm.xlu1 %10140, %v7376_v9   ;;  %v15999_v9 = vld [vmem:[#allocation65_spill] sm:$0xff]  ;;  %v7386_v52 = vsel %vm7370_vm9, 1, %v15877_v56  ;;  %vm7371_vm10 = vcmp.ge.s32.totalorder %v15993_v43, %v16000_v25 }
 0x996   :  { %v6427_v59 = vmul.f32 %v13871_v48, %v6313_v13  ;;  %v6268_v10 = vmul.f32 %v6172_v26, %v6172_v26  ;;  %v6269_v51 = vmul.f32 %v6173_v22, %v6173_v22  ;;  %v5622_v0 = vpop.permute.xlu0 %5621  ;;  %7396 = vperm.xlu0 %10139, %v7377_v30   ;;  %vm7363_vm7 = vcmp.ge.s32.totalorder %v15993_v43, %v15999_v9  ;;  %v16001_v13 = vld [vmem:[#allocation66_spill] sm:$0xff] }
 0x997   :  { %v10556_v57 = vpop.eup %10555  ;;  %v7379_v41 = vsel %vm7363_vm7, 1, %v15877_v56  ;;  %v5992_v30 = vsel %vm4806_vm6, %v5478_v35, %v5622_v0  ;;  %vm7364_vm11 = vcmp.ge.s32.totalorder %v15993_v43, %v16001_v13  ;;  %vm7504_vm7 = vcmask 121856  }
 0x998   :  { %v10558_v28 = vpop.eup %10557  ;;  %v6550_v31 = vmul.f32 1.442695, %v6427_v59  ;;  %v6364_v1 = vsub.f32 0.0, %v6268_v10  ;;  %v6365_v19 = vsub.f32 0.0, %v6269_v51  ;;  %v14746_v4 = vpop.f32.mrb[80].mxu1  ;;  %8903 = vmatprep.mubr.msk.f32.mxu1 %vm6718_vm8, %v10556_v57 }
 0x999   :  { %v5334_v47 = vpop.permute.xlu1 %5333  ;;  %v7056_v5 = vpop.f32.mrb[81].mxu1  ;;  %7118 = vmatmul.mubr.f32.gmra.mrb[106].mxu1 %v10558_v28  ;;  %7417 = vperm.xlu1 %10140, %v7384_v15  }
 0x99a   :  { %10559 = vpow2.f32 %v6550_v31  ;;  %v6478_v53 = vmul.f32 %v13859_v45, %v6364_v1  ;;  %v6479_v36 = vmul.f32 %v13871_v48, %v6365_v19  ;;  %v5530_v42 = vpop.permute.xlu0 %5529  ;;  %7420 = vperm.xlu0 %10139, %v7385_v46   ;;  %v5896_v27 = vsel %vm5881_vm3, %v14321_v37, %v5334_v47  ;;  %v16003_v1 = vld [vmem:[#allocation12_spill] sm:$0xff] }
 0x99b   :  { %10561 = vpow2.f32 %v6548_v16  ;;  %v5944_v23 = vsel %vm475_vm5, %v5896_v27, %v5478_v35  ;;  %v7387_v37 = vsel %vm7371_vm10, 1, %v15877_v56  ;;  %v7380_v35 = vsel %vm7364_vm11, 1, %v15877_v56 }
 0x99c   :  { %v6652_v44 = vmul.f32 1.442695, %v6478_v53  ;;  %v6654_v8 = vmul.f32 1.442695, %v6479_v36  ;;  %v6122_v2 = vsub.f32 %v5944_v23, %v13812_v12  ;;  %v7388_v16 = vsel %vm7372_vm12, 1, %v15877_v56 }
 0x99d   :  { %v5674_v62 = vpop.permute.xlu1 %5673  ;;  %7399 = vperm.xlu1 %10140, %v7378_v58   ;;  %vm7365_vm13 = vcmp.ge.s32.totalorder %v15993_v43, %v16003_v1  ;;  %v16004_v58 = vld [vmem:[#allocation57_spill] sm:$0xff]  ;;  %vm7857_vm11 = vcmask 1041408   ;;  %vm7874_vm12 = vcmask 116736  }
 0x99e   :  { %10563 = vpow2.f32 %v6652_v44  ;;  %v5766_v34 = vpop.permute.xlu0 %5765  ;;  %7423 = vperm.xlu0 %10139, %v7386_v52   ;;  %v6218_v26 = vmul.f32 %v6122_v2, %v6122_v2  ;;  %v6018_v51 = vsel %vm4806_vm6, %v5530_v42, %v5674_v62  ;;  %vm7373_vm14 = vcmp.ge.s32.totalorder %v15993_v43, %v16004_v58  ;;  %v16005_v2 = vld [vmem:[#allocation30_spill] sm:$0xff] }
 0x99f   :  { %10565 = vpow2.f32 %v6654_v8  ;;  %v6040_v22 = vsel %vm408_vm4, %v5992_v30, %v5766_v34  ;;  %v7381_v44 = vsel %vm7365_vm13, 1, %v15877_v56  ;;  %v7389_v23 = vsel %vm7373_vm14, 1, %v15877_v56 }
 0x9a0   :  { %v6123_v15 = vsub.f32 %v6040_v22, %v13854_v21  ;;  %v6314_v59 = vsub.f32 0.0, %v6218_v26  ;;  %vm7366_vm15 = vcmp.ge.s32.totalorder %v15993_v43, %v16005_v2 }
 0x9a1   :  { %v5386_v10 = vpop.permute.xlu1 %5385  ;;  %7402 = vperm.xlu1 %10140, %v7379_v41  }
 0x9a2   :  { %v6219_v0 = vmul.f32 %v6123_v15, %v6123_v15  ;;  %v5922_v18 = vsel %vm5881_vm3, %v14336_v3, %v5386_v10  ;;  %v5818_v57 = vpop.permute.xlu0 %5817  ;;  %7426 = vperm.xlu0 %10139, %v7387_v37   ;;  %v6428_v46 = vmul.f32 %v13859_v45, %v6314_v59  ;;  %v16006_v37 = vld [vmem:[#allocation27_spill] sm:$0xff] }
 0x9a3   :  { %v5970_v28 = vsel %vm475_vm5, %v5922_v18, %v5530_v42  ;;  %v6066_v31 = vsel %vm408_vm4, %v6018_v51, %v5818_v57  ;;  %vm7374_vm1 = vcmp.ge.s32.totalorder %v15993_v43, %v16006_v37  ;;  %v16007_v18 = vld [vmem:[#allocation41_spill] sm:$0xff] }
 0x9a4   :  { %v10560_v19 = vpop.eup %10559  ;;  %v6315_v17 = vsub.f32 0.0, %v6219_v0  ;;  %v6174_v47 = vsub.f32 %v5970_v28, %v13812_v12  ;;  %v6175_v5 = vsub.f32 %v6066_v31, %v13854_v21  ;;  %v14784_v3 = vpop.f32.mrb[70].mxu0  ;;  %v6552_v8 = vmul.f32 1.442695, %v6428_v46  ;;  %v16008_v28 = vld [vmem:[#allocation9_spill] sm:$0xff] }
 0x9a5   :  { %v10562_v53 = vpop.eup %10561  ;;  %8878 = vmatprep.mubr.msk.f32.mxu0 %vm6718_vm8, %v10560_v19  ;;  %v5480_v36 = vpop.permute.xlu1 %5479  ;;  %7405 = vperm.xlu1 %10140, %v7380_v35   ;;  %v7382_v35 = vsel %vm7366_vm15, 1, %v15877_v56  ;;  %v7390_v0 = vsel %vm7374_vm1, 1, %v15877_v56  ;;  %vm7367_vm2 = vcmp.ge.s32.totalorder %v15993_v43, %v16007_v18  ;;  %vm7375_vm9 = vcmp.ge.s32.totalorder %v15993_v43, %v16008_v28 }
 0x9a6   :  { %v6931_v42 = vpop.f32.mrb[71].mxu0  ;;  %v6429_v9 = vmul.f32 %v13871_v48, %v6315_v17  ;;  %v6270_v27 = vmul.f32 %v6174_v47, %v6174_v47  ;;  %v6271_v52 = vmul.f32 %v6175_v5, %v6175_v5  ;;  %6993 = vmatmul.mubr.f32.gmra.mrb[96].mxu0 %v10562_v53  ;;  %v5624_v25 = vpop.permute.xlu0 %5623  ;;  %7429 = vperm.xlu0 %10139, %v7388_v16   ;;  %v7383_v17 = vsel %vm7367_vm2, 1, %v15877_v56 }
 0x9a7   :  { %v7391_v58 = vsel %vm7375_vm9, 1, %v15877_v56 }
 0x9a8   :  { %v10564_v62 = vpop.eup %10563  ;;  %v6554_v41 = vmul.f32 1.442695, %v6429_v9  ;;  %v6366_v30 = vsub.f32 0.0, %v6270_v27  ;;  %v6367_v34 = vsub.f32 0.0, %v6271_v52  ;;  %v14799_v26 = vpop.f32.mrb[82].mxu1 }
 0x9a9   :  { %v10566_v13 = vpop.eup %10565  ;;  %v5336_v22 = vpop.permute.xlu1 %5335  ;;  %7408 = vperm.xlu1 %10140, %v7381_v44  }
 0x9aa   :  { %10567 = vpow2.f32 %v6554_v41  ;;  %v6480_v54 = vmul.f32 %v13859_v45, %v6366_v30  ;;  %v6481_v15 = vmul.f32 %v13871_v48, %v6367_v34  ;;  %8904 = vmatprep.mubr.msk.f32.mxu1 %vm6718_vm8, %v10566_v13  ;;  %v7061_v59 = vpop.f32.mrb[83].mxu1  ;;  %v5532_v10 = vpop.permute.xlu0 %5531  ;;  %7432 = vperm.xlu0 %10139, %v7389_v23   ;;  %v5897_v51 = vsel %vm5881_vm3, %v14375_v55, %v5336_v22 }
 0x9ab   :  { %10569 = vpow2.f32 %v6552_v8  ;;  %7123 = vmatmul.mubr.f32.gmra.mrb[108].mxu1 %v10564_v62  ;;  %v5945_v46 = vsel %vm475_vm5, %v5897_v51, %v5480_v36  ;;  %v5993_v55 = vsel %vm4806_vm6, %v5480_v36, %v5624_v25 }
 0x9ac   :  { %v6656_v57 = vmul.f32 1.442695, %v6480_v54  ;;  %v6658_v16 = vmul.f32 1.442695, %v6481_v15  ;;  %v6124_v31 = vsub.f32 %v5945_v46, %v13812_v12 }
 0x9ad   :  { %v5676_v1 = vpop.permute.xlu1 %5675  ;;  %7411 = vperm.xlu1 %10140, %v7382_v35  }
 0x9ae   :  { %10571 = vpow2.f32 %v6656_v57  ;;  %v5768_v19 = vpop.permute.xlu0 %5767  ;;  %7435 = vperm.xlu0 %10139, %v7390_v0   ;;  %v6220_v47 = vmul.f32 %v6124_v31, %v6124_v31  ;;  %v6019_v27 = vsel %vm4806_vm6, %v5532_v10, %v5676_v1 }
 0x9af   :  { %10573 = vpow2.f32 %v6658_v16  ;;  %v6041_v5 = vsel %vm408_vm4, %v5993_v55, %v5768_v19 }
 0x9b0   :  { %v6125_v53 = vsub.f32 %v6041_v5, %v13854_v21  ;;  %v6316_v42 = vsub.f32 0.0, %v6220_v47 }
 0x9b1   :  { %v5388_v9 = vpop.permute.xlu1 %5387  ;;  %7414 = vperm.xlu1 %10140, %v7383_v17  }
 0x9b2   :  { %v6221_v52 = vmul.f32 %v6125_v53, %v6125_v53  ;;  %v5923_v36 = vsel %vm5881_vm3, %v14390_v38, %v5388_v9  ;;  %v5820_v25 = vpop.permute.xlu0 %5819  ;;  %7438 = vperm.xlu0 %10139, %v7391_v58   ;;  %v6430_v44 = vmul.f32 %v13859_v45, %v6316_v42 }
 0x9b3   :  { %v5971_v8 = vsel %vm475_vm5, %v5923_v36, %v5532_v10  ;;  %v6067_v23 = vsel %vm408_vm4, %v6019_v27, %v5820_v25 }
 0x9b4   :  { %v10568_v56 = vpop.eup %10567  ;;  %v6317_v2 = vsub.f32 0.0, %v6221_v52  ;;  %v6176_v62 = vsub.f32 %v5971_v8, %v13812_v12  ;;  %v6177_v41 = vsub.f32 %v6067_v23, %v13854_v21  ;;  %v6556_v54 = vmul.f32 1.442695, %v6430_v44 }
 0x9b5   :  { %v10570_v30 = vpop.eup %10569  ;;  %8879 = vmatprep.mubr.msk.f32.mxu0 %vm6718_vm8, %v10568_v56  ;;  %v5482_v34 = vpop.permute.xlu1 %5481 }
 0x9b6   :  { %v6431_v38 = vmul.f32 %v13871_v48, %v6317_v2  ;;  %v6272_v37 = vmul.f32 %v6176_v62, %v6176_v62  ;;  %v6273_v13 = vmul.f32 %v6177_v41, %v6177_v41  ;;  %6998 = vmatmul.mubr.f32.gmra.mrb[98].mxu0 %v10570_v30  ;;  %v5626_v22 = vpop.permute.xlu0 %5625 }
 0x9b7   :  { %v5994_v53 = vsel %vm4806_vm6, %v5482_v34, %v5626_v22 }
 0x9b8   :  { %v10572_v15 = vpop.eup %10571  ;;  %v6558_v59 = vmul.f32 1.442695, %v6431_v38  ;;  %v6368_v10 = vsub.f32 0.0, %v6272_v37  ;;  %v6369_v35 = vsub.f32 0.0, %v6273_v13  ;;  %v14835_v51 = vpop.f32.mrb[72].mxu0 }
 0x9b9   :  { %v10574_v0 = vpop.eup %10573  ;;  %v5338_v18 = vpop.permute.xlu1 %5337 }
 0x9ba   :  { %v6936_v57 = vpop.f32.mrb[73].mxu0  ;;  %10575 = vpow2.f32 %v6558_v59  ;;  %v6482_v16 = vmul.f32 %v13859_v45, %v6368_v10  ;;  %v6483_v46 = vmul.f32 %v13871_v48, %v6369_v35  ;;  %8905 = vmatprep.mubr.msk.f32.mxu1 %vm6718_vm8, %v10574_v0  ;;  %v5898_v28 = vsel %vm5881_vm3, %v14427_v14, %v5338_v18  ;;  %v5534_v31 = vpop.permute.xlu0 %5533 }
 0x9bb   :  { %10577 = vpow2.f32 %v6556_v54  ;;  %v5946_v1 = vsel %vm475_vm5, %v5898_v28, %v5482_v34  ;;  %7128 = vmatmul.mubr.f32.gmra.mrb[110].mxu1 %v10572_v15 }
 0x9bc   :  { %v6660_v55 = vmul.f32 1.442695, %v6482_v16  ;;  %v6662_v19 = vmul.f32 1.442695, %v6483_v46  ;;  %v6126_v17 = vsub.f32 %v5946_v1, %v13812_v12  ;;  %v14844_v47 = vpop.f32.mrb[84].mxu1 }
 0x9bd   :  { %v5678_v5 = vpop.permute.xlu1 %5677  ;;  %v7066_v58 = vpop.f32.mrb[85].mxu1 }
 0x9be   :  { %10579 = vpow2.f32 %v6660_v55  ;;  %v6222_v42 = vmul.f32 %v6126_v17, %v6126_v17  ;;  %v5770_v9 = vpop.permute.xlu0 %5769  ;;  %v6020_v25 = vsel %vm4806_vm6, %v5534_v31, %v5678_v5 }
 0x9bf   :  { %10581 = vpow2.f32 %v6662_v19  ;;  %v6042_v14 = vsel %vm408_vm4, %v5994_v53, %v5770_v9 }
 0x9c0   :  { %v6318_v27 = vsub.f32 0.0, %v6222_v42  ;;  %v6127_v52 = vsub.f32 %v6042_v14, %v13854_v21 }
 0x9c1   :  { %v5390_v36 = vpop.permute.xlu1 %5389 }
 0x9c2   :  { %v6223_v44 = vmul.f32 %v6127_v52, %v6127_v52  ;;  %v5924_v8 = vsel %vm5881_vm3, %v14446_v40, %v5390_v36  ;;  %v5822_v23 = vpop.permute.xlu0 %5821  ;;  %v6432_v56 = vmul.f32 %v13859_v45, %v6318_v27 }
 0x9c3   :  { %v5972_v2 = vsel %vm475_vm5, %v5924_v8, %v5534_v31  ;;  %v6068_v62 = vsel %vm408_vm4, %v6020_v25, %v5822_v23 }
 0x9c4   :  { %v10576_v41 = vpop.eup %10575  ;;  %v6319_v30 = vsub.f32 0.0, %v6223_v44  ;;  %v6178_v34 = vsub.f32 %v5972_v2, %v13812_v12  ;;  %v6179_v38 = vsub.f32 %v6068_v62, %v13854_v21  ;;  %v6560_v15 = vmul.f32 1.442695, %v6432_v56 }
 0x9c5   :  { %v10578_v37 = vpop.eup %10577  ;;  %8880 = vmatprep.mubr.msk.f32.mxu0 %vm6718_vm8, %v10576_v41  ;;  %v5484_v13 = vpop.permute.xlu1 %5483 }
 0x9c6   :  { %v6433_v22 = vmul.f32 %v13871_v48, %v6319_v30  ;;  %v6274_v40 = vmul.f32 %v6178_v34, %v6178_v34  ;;  %7003 = vmatmul.mubr.f32.gmra.mrb[100].mxu0 %v10578_v37  ;;  %v5628_v54 = vpop.permute.xlu0 %5627  ;;  %v6275_v59 = vmul.f32 %v6179_v38, %v6179_v38 }
 0x9c7   :  { %v5995_v14 = vsel %vm4806_vm6, %v5484_v13, %v5628_v54 }
 0x9c8   :  { %v10580_v10 = vpop.eup %10579  ;;  %v6562_v35 = vmul.f32 1.442695, %v6433_v22  ;;  %v6370_v0 = vsub.f32 0.0, %v6274_v40  ;;  %v14859_v18 = vpop.f32.mrb[74].mxu0  ;;  %v6371_v16 = vsub.f32 0.0, %v6275_v59 }
 0x9c9   :  { %v10582_v57 = vpop.eup %10581  ;;  %v5340_v46 = vpop.permute.xlu1 %5339 }
 0x9ca   :  { %v6941_v28 = vpop.f32.mrb[75].mxu0  ;;  %10583 = vpow2.f32 %v6562_v35  ;;  %v6484_v31 = vmul.f32 %v13859_v45, %v6370_v0  ;;  %8906 = vmatprep.mubr.msk.f32.mxu1 %vm6718_vm8, %v10582_v57  ;;  %v5899_v1 = vsel %vm5881_vm3, %v14481_v60, %v5340_v46  ;;  %v5536_v55 = vpop.permute.xlu0 %5535  ;;  %v6485_v19 = vmul.f32 %v13871_v48, %v6371_v16 }
 0x9cb   :  { %10585 = vpow2.f32 %v6560_v15  ;;  %v5947_v17 = vsel %vm475_vm5, %v5899_v1, %v5484_v13  ;;  %7133 = vmatmul.mubr.f32.gmra.mrb[112].mxu1 %v10580_v10 }
 0x9cc   :  { %v6664_v5 = vmul.f32 1.442695, %v6484_v31  ;;  %v6128_v58 = vsub.f32 %v5947_v17, %v13812_v12  ;;  %v14868_v53 = vpop.f32.mrb[86].mxu1  ;;  %v6666_v42 = vmul.f32 1.442695, %v6485_v19 }
 0x9cd   :  { %v5680_v9 = vpop.permute.xlu1 %5679  ;;  %v7071_v52 = vpop.f32.mrb[87].mxu1 }
 0x9ce   :  { %10587 = vpow2.f32 %v6664_v5  ;;  %v6224_v27 = vmul.f32 %v6128_v58, %v6128_v58  ;;  %v5772_v60 = vpop.permute.xlu0 %5771  ;;  %v6021_v23 = vsel %vm4806_vm6, %v5536_v55, %v5680_v9 }
 0x9cf   :  { %10589 = vpow2.f32 %v6666_v42  ;;  %v6043_v36 = vsel %vm408_vm4, %v5995_v14, %v5772_v60 }
 0x9d0   :  { %v6320_v25 = vsub.f32 0.0, %v6224_v27  ;;  %v6129_v44 = vsub.f32 %v6043_v36, %v13854_v21 }
 0x9d1   :  { %v5392_v8 = vpop.permute.xlu1 %5391 }
 0x9d2   :  { %v6225_v56 = vmul.f32 %v6129_v44, %v6129_v44  ;;  %v5925_v2 = vsel %vm5881_vm3, %v14495_v33, %v5392_v8  ;;  %v5824_v62 = vpop.permute.xlu0 %5823  ;;  %v6434_v41 = vmul.f32 %v13859_v45, %v6320_v25 }
 0x9d3   :  { %v5973_v30 = vsel %vm475_vm5, %v5925_v2, %v5536_v55  ;;  %v6069_v34 = vsel %vm408_vm4, %v6021_v23, %v5824_v62 }
 0x9d4   :  { %v10584_v38 = vpop.eup %10583  ;;  %v6321_v37 = vsub.f32 0.0, %v6225_v56  ;;  %v6180_v13 = vsub.f32 %v5973_v30, %v13812_v12  ;;  %v6181_v22 = vsub.f32 %v6069_v34, %v13854_v21  ;;  %v6564_v10 = vmul.f32 1.442695, %v6434_v41 }
 0x9d5   :  { %v10586_v40 = vpop.eup %10585  ;;  %8881 = vmatprep.mubr.msk.f32.mxu0 %vm6718_vm8, %v10584_v38  ;;  %v5486_v54 = vpop.permute.xlu1 %5485 }
 0x9d6   :  { %v6435_v15 = vmul.f32 %v13871_v48, %v6321_v37  ;;  %v6276_v33 = vmul.f32 %v6180_v13, %v6180_v13  ;;  %7008 = vmatmul.mubr.f32.gmra.mrb[102].mxu0 %v10586_v40  ;;  %v5630_v59 = vpop.permute.xlu0 %5629  ;;  %v6277_v35 = vmul.f32 %v6181_v22, %v6181_v22 }
 0x9d7   :  { %v5996_v36 = vsel %vm4806_vm6, %v5486_v54, %v5630_v59 }
 0x9d8   :  { %v10588_v0 = vpop.eup %10587  ;;  %v6566_v57 = vmul.f32 1.442695, %v6435_v15  ;;  %v6372_v16 = vsub.f32 0.0, %v6276_v33  ;;  %v14883_v46 = vpop.f32.mrb[76].mxu0  ;;  %v6373_v31 = vsub.f32 0.0, %v6277_v35 }
 0x9d9   :  { %v10590_v28 = vpop.eup %10589  ;;  %v5342_v1 = vpop.permute.xlu1 %5341 }
 0x9da   :  { %v6946_v55 = vpop.f32.mrb[77].mxu0  ;;  %10591 = vpow2.f32 %v6566_v57  ;;  %v6486_v19 = vmul.f32 %v13859_v45, %v6372_v16  ;;  %8907 = vmatprep.mubr.msk.f32.mxu1 %vm6718_vm8, %v10590_v28  ;;  %v5900_v17 = vsel %vm5881_vm3, %v14535_v61, %v5342_v1  ;;  %v5538_v5 = vpop.permute.xlu0 %5537  ;;  %v6487_v58 = vmul.f32 %v13871_v48, %v6373_v31 }
 0x9db   :  { %10593 = vpow2.f32 %v6564_v10  ;;  %v5948_v42 = vsel %vm475_vm5, %v5900_v17, %v5486_v54  ;;  %7138 = vmatmul.mubr.f32.gmra.mrb[114].mxu1 %v10588_v0 }
 0x9dc   :  { %v6668_v9 = vmul.f32 1.442695, %v6486_v19  ;;  %v6130_v14 = vsub.f32 %v5948_v42, %v13812_v12  ;;  %v14892_v27 = vpop.f32.mrb[88].mxu1  ;;  %v6670_v52 = vmul.f32 1.442695, %v6487_v58 }
 0x9dd   :  { %v5682_v60 = vpop.permute.xlu1 %5681  ;;  %v7076_v44 = vpop.f32.mrb[89].mxu1 }
 0x9de   :  { %10595 = vpow2.f32 %v6668_v9  ;;  %v6226_v25 = vmul.f32 %v6130_v14, %v6130_v14  ;;  %v5774_v61 = vpop.permute.xlu0 %5773  ;;  %v6022_v62 = vsel %vm4806_vm6, %v5538_v5, %v5682_v60 }
 0x9df   :  { %10597 = vpow2.f32 %v6670_v52  ;;  %v6044_v8 = vsel %vm408_vm4, %v5996_v36, %v5774_v61 }
 0x9e0   :  { %v6322_v23 = vsub.f32 0.0, %v6226_v25  ;;  %v6131_v56 = vsub.f32 %v6044_v8, %v13854_v21 }
 0x9e1   :  { %v5394_v2 = vpop.permute.xlu1 %5393 }
 0x9e2   :  { %v6227_v41 = vmul.f32 %v6131_v56, %v6131_v56  ;;  %v5926_v30 = vsel %vm5881_vm3, %v14550_v11, %v5394_v2  ;;  %v5826_v34 = vpop.permute.xlu0 %5825  ;;  %v6436_v38 = vmul.f32 %v13859_v45, %v6322_v23  ;;  %v7192_v2 = vmax.f32 %v14709_v24, 1e-10 }
 0x9e3   :  { %v5974_v37 = vsel %vm475_vm5, %v5926_v30, %v5538_v5  ;;  %v6070_v13 = vsel %vm408_vm4, %v6022_v62, %v5826_v34 }
 0x9e4   :  { %v10592_v22 = vpop.eup %10591  ;;  %v6323_v40 = vsub.f32 0.0, %v6227_v41  ;;  %v6182_v54 = vsub.f32 %v5974_v37, %v13812_v12  ;;  %v6183_v15 = vsub.f32 %v6070_v13, %v13854_v21  ;;  %v6568_v0 = vmul.f32 1.442695, %v6436_v38 }
 0x9e5   :  { %v10594_v33 = vpop.eup %10593  ;;  %8882 = vmatprep.mubr.msk.f32.mxu0 %vm6718_vm8, %v10592_v22  ;;  %v5488_v59 = vpop.permute.xlu1 %5487  ;;  %v7193_v41 = vmax.f32 %v14746_v4, 1e-10 }
 0x9e6   :  { %v6437_v10 = vmul.f32 %v13871_v48, %v6323_v40  ;;  %v6278_v11 = vmul.f32 %v6182_v54, %v6182_v54  ;;  %7013 = vmatmul.mubr.f32.gmra.mrb[104].mxu0 %v10594_v33  ;;  %v5632_v35 = vpop.permute.xlu0 %5631  ;;  %v6279_v57 = vmul.f32 %v6183_v15, %v6183_v15 }
 0x9e7   :  { %v5997_v8 = vsel %vm4806_vm6, %v5488_v59, %v5632_v35  ;;  %v7168_v35 = vmax.f32 %v14784_v3, 1e-10  ;;  %v7169_v3 = vmax.f32 %v14835_v51, 1e-10  ;;  %v7195_v51 = vmax.f32 %v14844_v47, 1e-10 }
 0x9e8   :  { %v10596_v16 = vpop.eup %10595  ;;  %v6570_v28 = vmul.f32 1.442695, %v6437_v10  ;;  %v6374_v31 = vsub.f32 0.0, %v6278_v11  ;;  %v14907_v1 = vpop.f32.mrb[78].mxu0  ;;  %v6375_v19 = vsub.f32 0.0, %v6279_v57 }
 0x9e9   :  { %v10598_v55 = vpop.eup %10597  ;;  %v5344_v17 = vpop.permute.xlu1 %5343  ;;  %v7171_v47 = vmax.f32 %v14883_v46, 1e-10 }
 0x9ea   :  { %v6951_v5 = vpop.f32.mrb[79].mxu0  ;;  %10599 = vpow2.f32 %v6570_v28  ;;  %v6488_v58 = vmul.f32 %v13859_v45, %v6374_v31  ;;  %8908 = vmatprep.mubr.msk.f32.mxu1 %vm6718_vm8, %v10598_v55  ;;  %v5901_v42 = vsel %vm5881_vm3, %v14587_v50, %v5344_v17  ;;  %v5540_v9 = vpop.permute.xlu0 %5539  ;;  %v6489_v14 = vmul.f32 %v13871_v48, %v6375_v19 }
 0x9eb   :  { %10601 = vpow2.f32 %v6568_v0  ;;  %v5949_v52 = vsel %vm475_vm5, %v5901_v42, %v5488_v59  ;;  %7143 = vmatmul.mubr.f32.gmra.mrb[116].mxu1 %v10596_v16  ;;  %v7194_v19 = vmax.f32 %v14799_v26, 1e-10 }
 0x9ec   :  { %v6672_v60 = vmul.f32 1.442695, %v6488_v58  ;;  %v6132_v36 = vsub.f32 %v5949_v52, %v13812_v12  ;;  %v14916_v25 = vpop.f32.mrb[90].mxu1  ;;  %v6674_v44 = vmul.f32 1.442695, %v6489_v14 }
 0x9ed   :  { %v5684_v61 = vpop.permute.xlu1 %5683  ;;  %v7081_v56 = vpop.f32.mrb[91].mxu1 }
 0x9ee   :  { %10603 = vpow2.f32 %v6672_v60  ;;  %v6228_v23 = vmul.f32 %v6132_v36, %v6132_v36  ;;  %v5776_v50 = vpop.permute.xlu0 %5775  ;;  %v6023_v37 = vsel %vm4806_vm6, %v5540_v9, %v5684_v61 }
 0x9ef   :  { %10605 = vpow2.f32 %v6674_v44  ;;  %v6045_v62 = vsel %vm408_vm4, %v5997_v8, %v5776_v50 }
 0x9f0   :  { %v6324_v30 = vsub.f32 0.0, %v6228_v23  ;;  %v6133_v34 = vsub.f32 %v6045_v62, %v13854_v21  ;;  %10607 = vlog2.f32 %v7192_v2  ;;  %v7170_v2 = vmax.f32 %v14859_v18, 1e-10 }
 0x9f1   :  { %v5396_v38 = vpop.permute.xlu1 %5395  ;;  %10609 = vlog2.f32 %v7193_v41 }
 0x9f2   :  { %v6229_v13 = vmul.f32 %v6133_v34, %v6133_v34  ;;  %v5927_v22 = vsel %vm5881_vm3, %v14606_v29, %v5396_v38  ;;  %v5828_v40 = vpop.permute.xlu0 %5827  ;;  %v6438_v54 = vmul.f32 %v13859_v45, %v6324_v30  ;;  %10611 = vlog2.f32 %v7168_v35 }
 0x9f3   :  { %v5975_v24 = vsel %vm475_vm5, %v5927_v22, %v5540_v9  ;;  %v6071_v15 = vsel %vm408_vm4, %v6023_v37, %v5828_v40  ;;  %v7172_v22 = vmax.f32 %v14907_v1, 1e-10 }
 0x9f4   :  { %v10600_v33 = vpop.eup %10599  ;;  %v6325_v4 = vsub.f32 0.0, %v6229_v13  ;;  %v6184_v59 = vsub.f32 %v5975_v24, %v13812_v12  ;;  %v6185_v10 = vsub.f32 %v6071_v15, %v13854_v21  ;;  %v6572_v28 = vmul.f32 1.442695, %v6438_v54 }
 0x9f5   :  { %v10602_v11 = vpop.eup %10601  ;;  %8883 = vmatprep.mubr.msk.f32.mxu0 %vm6718_vm8, %v10600_v33  ;;  %v5490_v29 = vpop.permute.xlu1 %5489  ;;  %v7196_v33 = vmax.f32 %v14868_v53, 1e-10 }
 0x9f6   :  { %v6439_v0 = vmul.f32 %v13871_v48, %v6325_v4  ;;  %v6280_v57 = vmul.f32 %v6184_v59, %v6184_v59  ;;  %7018 = vmatmul.mubr.f32.gmra.mrb[106].mxu0 %v10602_v11  ;;  %v5634_v16 = vpop.permute.xlu0 %5633  ;;  %v6281_v31 = vmul.f32 %v6185_v10, %v6185_v10 }
 0x9f7   :  { %v5998_v30 = vsel %vm4806_vm6, %v5490_v29, %v5634_v16 }
 0x9f8   :  { %v10604_v55 = vpop.eup %10603  ;;  %v6574_v17 = vmul.f32 1.442695, %v6439_v0  ;;  %v6376_v5 = vsub.f32 0.0, %v6280_v57  ;;  %v14935_v58 = vpop.f32.mrb[80].mxu0  ;;  %v6377_v9 = vsub.f32 0.0, %v6281_v31 }
 0x9f9   :  { %v10606_v42 = vpop.eup %10605  ;;  %v5346_v14 = vpop.permute.xlu1 %5345  ;;  %v7173_v31 = vmax.f32 %v14935_v58, 1e-10 }
 0x9fa   :  { %v6956_v52 = vpop.f32.mrb[81].mxu0  ;;  %10613 = vpow2.f32 %v6574_v17  ;;  %v6490_v60 = vmul.f32 %v13859_v45, %v6376_v5  ;;  %8909 = vmatprep.mubr.msk.f32.mxu1 %vm6718_vm8, %v10606_v42  ;;  %v5902_v36 = vsel %vm5881_vm3, %v14639_v32, %v5346_v14  ;;  %v5542_v26 = vpop.permute.xlu0 %5541  ;;  %v6491_v44 = vmul.f32 %v13871_v48, %v6377_v9 }
 0x9fb   :  { %10615 = vpow2.f32 %v6572_v28  ;;  %v5950_v61 = vsel %vm475_vm5, %v5902_v36, %v5490_v29  ;;  %7148 = vmatmul.mubr.f32.gmra.mrb[118].mxu1 %v10604_v55  ;;  %v10608_v50 = vpop.eup %10607 }
 0x9fc   :  { %10617 = vlog2.f32 %v7194_v19  ;;  %v6676_v8 = vmul.f32 1.442695, %v6490_v60  ;;  %v6134_v23 = vsub.f32 %v5950_v61, %v13812_v12  ;;  %v14946_v56 = vpop.f32.mrb[92].mxu1  ;;  %v6678_v32 = vmul.f32 1.442695, %v6491_v44  ;;  %v10610_v41 = vpop.eup %10609 }
 0x9fd   :  { %10619 = vlog2.f32 %v7169_v3  ;;  %v5686_v62 = vpop.permute.xlu1 %5685  ;;  %v7086_v38 = vpop.f32.mrb[93].mxu1  ;;  %v7265_v54 = vmul.f32 0.6931472, %v10608_v50  ;;  %v7267_v24 = vmul.f32 0.6931472, %v10610_v41 }
 0x9fe   :  { %10621 = vpow2.f32 %v6676_v8  ;;  %v6230_v34 = vmul.f32 %v6134_v23, %v6134_v23  ;;  %v5778_v37 = vpop.permute.xlu0 %5777  ;;  %v6024_v4 = vsel %vm4806_vm6, %v5542_v26, %v5686_v62  ;;  %v10612_v11 = vpop.eup %10611 }
 0x9ff   :  { %10623 = vpow2.f32 %v6678_v32  ;;  %v6046_v13 = vsel %vm408_vm4, %v5998_v30, %v5778_v37  ;;  %v14966_v3 = vmul.f32 0.01, %v7265_v54  ;;  %v14968_v60 = vmul.f32 0.01, %v7267_v24 }
 0xa00   :  { %10625 = vlog2.f32 %v7195_v51  ;;  %v6326_v40 = vsub.f32 0.0, %v6230_v34  ;;  %v6135_v18 = vsub.f32 %v6046_v13, %v13854_v21  ;;  %v7217_v61 = vmul.f32 0.6931472, %v10612_v11 }
 0xa01   :  { %10627 = vlog2.f32 %v7170_v2  ;;  %v5398_v15 = vpop.permute.xlu1 %5397  ;;  %v7197_v51 = vmax.f32 %v14892_v27, 1e-10 }
 0xa02   :  { %v6231_v59 = vmul.f32 %v6135_v18, %v6135_v18  ;;  %v5928_v46 = vsel %vm5881_vm3, %v14654_v63, %v5398_v15  ;;  %v5830_v10 = vpop.permute.xlu0 %5829  ;;  %10629 = vlog2.f32 %v7171_v47  ;;  %v6440_v1 = vmul.f32 %v13859_v45, %v6326_v40 }
 0xa03   :  { %v5976_v35 = vsel %vm475_vm5, %v5928_v46, %v5542_v26  ;;  %v6072_v29 = vsel %vm408_vm4, %v6024_v4, %v5830_v10  ;;  %10631 = vlog2.f32 %v7172_v22  ;;  %v7198_v47 = vmax.f32 %v14916_v25, 1e-10 }
 0xa04   :  { %v10614_v0 = vpop.eup %10613  ;;  %v6327_v57 = vsub.f32 0.0, %v6231_v59  ;;  %v6186_v53 = vsub.f32 %v5976_v35, %v13812_v12  ;;  %v6187_v16 = vsub.f32 %v6072_v29, %v13854_v21  ;;  %v6576_v9 = vmul.f32 1.442695, %v6440_v1 }
 0xa05   :  { %v10616_v28 = vpop.eup %10615  ;;  %8884 = vmatprep.mubr.msk.f32.mxu0 %vm6718_vm8, %v10614_v0  ;;  %v5492_v63 = vpop.permute.xlu1 %5491  ;;  %10633 = vlog2.f32 %v7196_v33  ;;  %v7312_v4 = vmul.f32 0.01, %v7217_v61 }
 0xa06   :  { %v10618_v55 = vpop.eup %10617  ;;  %v6441_v19 = vmul.f32 %v13871_v48, %v6327_v57  ;;  %v6282_v17 = vmul.f32 %v6186_v53, %v6186_v53  ;;  %7023 = vmatmul.mubr.f32.gmra.mrb[108].mxu0 %v10616_v28  ;;  %v5636_v5 = vpop.permute.xlu0 %5635  ;;  %v6283_v14 = vmul.f32 %v6187_v16, %v6187_v16  ;;  %10635 = vlog2.f32 %v7173_v31 }
 0xa07   :  { %v10620_v42 = vpop.eup %10619  ;;  %v7269_v32 = vmul.f32 0.6931472, %v10618_v55  ;;  %v5999_v59 = vsel %vm4806_vm6, %v5492_v63, %v5636_v5 }
 0xa08   :  { %v10622_v52 = vpop.eup %10621  ;;  %v6578_v36 = vmul.f32 1.442695, %v6441_v19  ;;  %v6378_v58 = vsub.f32 0.0, %v6282_v17  ;;  %v14970_v26 = vpop.f32.mrb[82].mxu0  ;;  %v6379_v8 = vsub.f32 0.0, %v6283_v14 }
 0xa09   :  { %v10624_v44 = vpop.eup %10623  ;;  %v5348_v23 = vpop.permute.xlu1 %5347  ;;  %v7219_v38 = vmul.f32 0.6931472, %v10620_v42  ;;  %v14983_v25 = vmul.f32 0.01, %v7269_v32 }
 0xa0a   :  { %v6961_v50 = vpop.f32.mrb[83].mxu0  ;;  %v10626_v2 = vpop.eup %10625  ;;  %10637 = vpow2.f32 %v6578_v36  ;;  %v6492_v62 = vmul.f32 %v13859_v45, %v6378_v58  ;;  %8910 = vmatprep.mubr.msk.f32.mxu1 %vm6718_vm8, %v10624_v44  ;;  %v5903_v41 = vsel %vm5881_vm3, %v15991_v20, %v5348_v23  ;;  %v6493_v27 = vmul.f32 %v13871_v48, %v6379_v8 }
 0xa0b   :  { %v5544_v30 = vpop.permute.xlu0 %5543  ;;  %v10628_v34 = vpop.eup %10627  ;;  %10639 = vpow2.f32 %v6576_v9  ;;  %v5951_v37 = vsel %vm475_vm5, %v5903_v41, %v5492_v63  ;;  %7153 = vmatmul.mubr.f32.gmra.mrb[120].mxu1 %v10622_v52  ;;  %v7271_v54 = vmul.f32 0.6931472, %v10626_v2  ;;  %v7199_v20 = vmax.f32 %v14946_v56, 1e-10 }
 0xa0c   :  { %v6680_v13 = vmul.f32 1.442695, %v6492_v62  ;;  %v6136_v22 = vsub.f32 %v5951_v37, %v13812_v12  ;;  %v7089_v40 = vpop.f32.mrb[94].mxu1  ;;  %v10630_v18 = vpop.eup %10629  ;;  %10641 = vlog2.f32 %v7197_v51  ;;  %v6682_v24 = vmul.f32 1.442695, %v6493_v27 }
 0xa0d   :  { %v5688_v15 = vpop.permute.xlu1 %5687  ;;  %v10632_v33 = vpop.eup %10631  ;;  %v7313_v1 = vmul.f32 0.01, %v7219_v38  ;;  %v7221_v29 = vmul.f32 0.6931472, %v10628_v34  ;;  %v14987_v57 = vmul.f32 0.01, %v7271_v54 }
 0xa0e   :  { %10643 = vpow2.f32 %v6680_v13  ;;  %v6232_v46 = vmul.f32 %v6136_v22, %v6136_v22  ;;  %v7091_v10 = vpop.f32.mrb[95].mxu1  ;;  %v7223_v53 = vmul.f32 0.6931472, %v10630_v18  ;;  %v7225_v16 = vmul.f32 0.6931472, %v10632_v33 }
 0xa0f   :  { %v5780_v11 = vpop.permute.xlu0 %5779  ;;  %10645 = vpow2.f32 %v6682_v24  ;;  %v10634_v31 = vpop.eup %10633  ;;  %v7174_v63 = vmax.f32 %v14970_v26, 1e-10  ;;  %v6025_v55 = vsel %vm4806_vm6, %v5544_v30, %v5688_v15  ;;  %v7200_v14 = vmax.f32 %v7089_v40, 1e-10 }
 0xa10   :  { %v6047_v35 = vsel %vm408_vm4, %v5999_v59, %v5780_v11  ;;  %10647 = vlog2.f32 %v7198_v47  ;;  %v6328_v56 = vsub.f32 0.0, %v6232_v46  ;;  %v10636_v42 = vpop.eup %10635  ;;  %v7314_v44 = vmul.f32 0.01, %v7221_v29 }
 0xa11   :  { %v6137_v0 = vsub.f32 %v6047_v35, %v13854_v21  ;;  %10649 = vlog2.f32 %v7199_v20  ;;  %v5400_v28 = vpop.permute.xlu1 %5399  ;;  %v7273_v23 = vmul.f32 0.6931472, %v10634_v31  ;;  %v7315_v50 = vmul.f32 0.01, %v7223_v53 }
 0xa12   :  { %v5929_v17 = vsel %vm5881_vm3, %v14697_v39, %v5400_v28  ;;  %v6442_v9 = vmul.f32 %v13859_v45, %v6328_v56  ;;  %v7316_v39 = vmul.f32 0.01, %v7225_v16  ;;  %v7227_v32 = vmul.f32 0.6931472, %v10636_v42 }
 0xa13   :  { %v6233_v19 = vmul.f32 %v6137_v0, %v6137_v0  ;;  %v5832_v5 = vpop.permute.xlu0 %5831  ;;  %v5977_v52 = vsel %vm475_vm5, %v5929_v17, %v5544_v30  ;;  %10651 = vlog2.f32 %v7174_v63 }
 0xa14   :  { %v6073_v36 = vsel %vm408_vm4, %v6025_v55, %v5832_v5  ;;  %v10638_v58 = vpop.eup %10637  ;;  %v6188_v26 = vsub.f32 %v5977_v52, %v13812_v12  ;;  %v6580_v38 = vmul.f32 1.442695, %v6442_v9  ;;  %10653 = vlog2.f32 %v7200_v14 }
 0xa15   :  { %v6329_v61 = vsub.f32 0.0, %v6233_v19  ;;  %v6189_v51 = vsub.f32 %v6073_v36, %v13854_v21  ;;  %v10640_v8 = vpop.eup %10639  ;;  %8885 = vmatprep.mubr.msk.f32.mxu0 %vm6718_vm8, %v10638_v58  ;;  %v7394_v2 = vpop.permute.xlu1 %7393  ;;  %v7340_v14 = vmul.f32 0.01, %v7273_v23 }
 0xa16   :  { %v6284_v41 = vmul.f32 %v6188_v26, %v6188_v26  ;;  %7028 = vmatmul.mubr.f32.gmra.mrb[110].mxu0 %v10640_v8  ;;  %v10642_v34 = vpop.eup %10641  ;;  %vm7440_vm4 = vcmp.eq.s32.totalorder %v7394_v2, 1 }
 0xa17   :  { %v6443_v62 = vmul.f32 %v13871_v48, %v6329_v61  ;;  %v7397_v30 = vpop.permute.xlu0 %7396  ;;  %v6285_v12 = vmul.f32 %v6189_v51, %v6189_v51  ;;  %v7456_v47 = vsel %vm7440_vm4, 0.0, %v7312_v4  ;;  %v7457_v40 = vsel %vm7440_vm4, 0.0, %v7313_v1 }
 0xa18   :  { %v10644_v21 = vpop.eup %10643  ;;  %v6380_v37 = vsub.f32 0.0, %v6284_v41  ;;  %vm7441_vm5 = vcmp.eq.s32.totalorder %v7397_v30, 1  ;;  %v7458_v18 = vsel %vm7440_vm4, 0.0, %v7314_v44  ;;  %v7505_v54 = vsel %vm7504_vm7, %v7456_v47, 0.0  ;;  %v6964_v20 = vpop.f32.mrb[84].mxu0 }
 0xa19   :  { %v6582_v27 = vmul.f32 1.442695, %v6443_v62  ;;  %v10646_v13 = vpop.eup %10645  ;;  %v6381_v22 = vsub.f32 0.0, %v6285_v12  ;;  %v7506_v33 = vrot.slane %v7505_v54, 4  ;;  %v7617_v59 = vsel %vm7504_vm7, %v7457_v40, 0.0  ;;  %v6966_v46 = vpop.f32.mrb[85].mxu0 }
 0xa1a   :  { %v10648_v24 = vpop.eup %10647  ;;  %v6494_v15 = vmul.f32 %v13859_v45, %v6380_v37  ;;  %8911 = vmatprep.mubr.msk.f32.mxu1 %vm6718_vm8, %v10646_v13  ;;  %v7618_v11 = vrot.slane %v7617_v59, 4  ;;  %v7729_v1 = vsel %vm7504_vm7, %v7458_v18, 0.0  ;;  %v7275_v35 = vmul.f32 0.6931472, %v10642_v34  ;;  %v7418_v19 = vpop.permute.xlu1 %7417 }
 0xa1b   :  { %10655 = vpow2.f32 %v6582_v27  ;;  %v10650_v10 = vpop.eup %10649  ;;  %v6495_v4 = vmul.f32 %v13871_v48, %v6381_v22  ;;  %7158 = vmatmul.mubr.f32.gmra.mrb[122].mxu1 %v10644_v21  ;;  %v7459_v56 = vsel %vm7441_vm5, 0.0, %v7315_v50  ;;  %v7317_v45 = vmul.f32 0.01, %v7227_v32  ;;  %v7421_v13 = vpop.permute.xlu0 %7420 }
 0xa1c   :  { %10657 = vpow2.f32 %v6580_v38  ;;  %v6684_v29 = vmul.f32 1.442695, %v6494_v15  ;;  %v15007_v0 = vpop.f32.mrb[96].mxu1  ;;  %v7507_v16 = vadd.f32 %v7506_v33, %v7505_v54  ;;  %v7460_v28 = vsel %vm7441_vm5, 0.0, %v7316_v39 }
 0xa1d   :  { %v6686_v53 = vmul.f32 1.442695, %v6495_v4  ;;  %v7096_v31 = vpop.f32.mrb[97].mxu1  ;;  %v7277_v63 = vmul.f32 0.6931472, %v10648_v24  ;;  %v7619_v55 = vadd.f32 %v7618_v11, %v7617_v59  ;;  %v7730_v48 = vrot.slane %v7729_v1, 4  ;;  %v10652_v9 = vpop.eup %10651 }
 0xa1e   :  { %10659 = vpow2.f32 %v6684_v29  ;;  %v7461_v17 = vsel %vm7441_vm5, 0.0, %v7317_v45  ;;  %v7512_v5 = vsel %vm7504_vm7, %v7459_v56, 0.0  ;;  %v7624_v42 = vsel %vm7504_vm7, %v7460_v28, 0.0  ;;  %v10654_v44 = vpop.eup %10653 }
 0xa1f   :  { %10661 = vpow2.f32 %v6686_v53  ;;  %v7279_v52 = vmul.f32 0.6931472, %v10650_v10  ;;  %v7513_v36 = vrot.slane %v7512_v5, 4  ;;  %v7625_v58 = vrot.slane %v7624_v42, 4 }
 0xa20   :  { %v7341_v61 = vmul.f32 0.01, %v7275_v35  ;;  %v7508_v26 = vrot.slane %v7507_v16, 2  ;;  %v7175_v51 = vmax.f32 %v6964_v20, 1e-10  ;;  %vm7448_vm6 = vcmp.eq.s32.totalorder %v7418_v19, 1 }
 0xa21   :  { %v15013_v8 = vmul.f32 0.01, %v7277_v63  ;;  %v7731_v50 = vadd.f32 %v7730_v48, %v7729_v1  ;;  %v7514_v39 = vadd.f32 %v7513_v36, %v7512_v5  ;;  %v7736_v2 = vsel %vm7504_vm7, %v7461_v17, 0.0 }
 0xa22   :  { %v7620_v32 = vrot.slane %v7619_v55, 2  ;;  %v7626_v62 = vadd.f32 %v7625_v58, %v7624_v42  ;;  %10663 = vlog2.f32 %v7175_v51  ;;  %v7480_v23 = vsel %vm7448_vm6, 0.0, %v14966_v3 }
 0xa23   :  { %v15018_v30 = vmul.f32 0.01, %v7279_v52  ;;  %v7229_v34 = vmul.f32 0.6931472, %v10652_v9  ;;  %v7281_v38 = vmul.f32 0.6931472, %v10654_v44  ;;  %v7509_v21 = vadd.f32 %v7508_v26, %v7507_v16 }
 0xa24   :  { %v7737_v27 = vrot.slane %v7736_v2, 4  ;;  %v7481_v37 = vsel %vm7448_vm6, 0.0, %v14968_v60  ;;  %v7482_v47 = vsel %vm7448_vm6, 0.0, %v14983_v25  ;;  %v7732_v22 = vrot.slane %v7731_v50, 2 }
 0xa25   :  { %v10656_v41 = vpop.eup %10655  ;;  %v7515_v40 = vrot.slane %v7514_v39, 2  ;;  %v7561_v3 = vsel %vm7504_vm7, %v7480_v23, 0.0  ;;  %v7673_v18 = vsel %vm7504_vm7, %v7481_v37, 0.0  ;;  %v7621_v54 = vadd.f32 %v7620_v32, %v7619_v55  ;;  %v15046_v32 = vpop.permute.xlu1 %7399 }
 0xa26   :  { %v10658_v12 = vpop.eup %10657  ;;  %8886 = vmatprep.mubr.msk.f32.mxu0 %vm6718_vm8, %v10656_v41  ;;  %v7627_v20 = vrot.slane %v7626_v62, 2  ;;  %v7562_v24 = vrot.slane %v7561_v3, 4  ;;  %v7785_v15 = vsel %vm7504_vm7, %v7482_v47, 0.0  ;;  %v7318_v60 = vmul.f32 0.01, %v7229_v34 }
 0xa27   :  { %7033 = vmatmul.mubr.f32.gmra.mrb[112].mxu0 %v10658_v12  ;;  %v7674_v59 = vrot.slane %v7673_v18, 4  ;;  %vm7449_vm3 = vcmp.eq.s32.totalorder %v7421_v13, 1  ;;  %v15030_v10 = vmul.f32 0.01, %v7281_v38  ;;  %v7738_v4 = vadd.f32 %v7737_v27, %v7736_v2 }
 0xa28   :  { %v10660_v33 = vpop.eup %10659  ;;  %v15028_v25 = vpop.f32.mrb[86].mxu0  ;;  %v7786_v11 = vrot.slane %v7785_v15, 4  ;;  %v7483_v1 = vsel %vm7449_vm3, 0.0, %v14987_v57  ;;  %v7510_v29 = vrot.slane %v7509_v21, 1  ;;  %v15034_v56 = vadd.f32 %v7732_v22, %v7731_v50 }
 0xa29   :  { %v10662_v46 = vpop.eup %10661  ;;  %v6971_v35 = vpop.f32.mrb[87].mxu0  ;;  %v7516_v45 = vadd.f32 %v7515_v40, %v7514_v39  ;;  %v7484_v53 = vsel %vm7449_vm3, 0.0, %v7340_v14  ;;  %v7622_v16 = vrot.slane %v7621_v54, 1  ;;  %v7628_v28 = vadd.f32 %v7627_v20, %v7626_v62 }
 0xa2a   :  { %8912 = vmatprep.mubr.msk.f32.mxu1 %vm6718_vm8, %v10662_v46  ;;  %v7563_v31 = vadd.f32 %v7562_v24, %v7561_v3  ;;  %v7485_v63 = vsel %vm7449_vm3, 0.0, %v7341_v61  ;;  %v7675_v55 = vadd.f32 %v7674_v59, %v7673_v18  ;;  %v7568_v48 = vsel %vm7504_vm7, %v7483_v1, 0.0  ;;  %v7424_v62 = vpop.permute.xlu0 %7423 }
 0xa2b   :  { %7163 = vmatmul.mubr.f32.gmra.mrb[124].mxu1 %v10660_v33  ;;  %v7680_v57 = vsel %vm7504_vm7, %v7484_v53, 0.0  ;;  %v7792_v19 = vsel %vm7504_vm7, %v7485_v63, 0.0  ;;  %v7739_v42 = vrot.slane %v7738_v4, 2  ;;  %v7787_v9 = vadd.f32 %v7786_v11, %v7785_v15 }
 0xa2c   :  { %v15042_v17 = vpop.f32.mrb[98].mxu1  ;;  %v10664_v5 = vpop.eup %10663  ;;  %v7569_v14 = vrot.slane %v7568_v48, 4  ;;  %v7681_v52 = vrot.slane %v7680_v57, 4  ;;  %v7517_v58 = vrot.slane %v7516_v45, 1  ;;  %v7793_v26 = vrot.slane %v7792_v19, 4 }
 0xa2d   :  { %v7101_v36 = vpop.f32.mrb[99].mxu1  ;;  %v7231_v44 = vmul.f32 0.6931472, %v10664_v5  ;;  %v7201_v61 = vmax.f32 %v15007_v0, 1e-10  ;;  %v7511_v51 = vadd.f32 %v7510_v29, %v7509_v21  ;;  %v7734_v50 = vrot.slane %v15034_v56, 1 }
 0xa2e   :  { %v7564_v39 = vrot.slane %v7563_v31, 2  ;;  %v7570_v2 = vadd.f32 %v7569_v14, %v7568_v48  ;;  %v7623_v23 = vadd.f32 %v7622_v16, %v7621_v54  ;;  %v7676_v34 = vrot.slane %v7675_v55, 2 }
 0xa2f   :  { %v7319_v41 = vmul.f32 0.01, %v7231_v44  ;;  %10665 = vlog2.f32 %v7201_v61  ;;  %v7629_v38 = vrot.slane %v7628_v28, 1  ;;  %v15048_v12 = vadd.f32 %v7739_v42, %v7738_v4 }
 0xa30   :  { %v7788_v27 = vrot.slane %v7787_v9, 2  ;;  %v7682_v37 = vadd.f32 %v7681_v52, %v7680_v57  ;;  %v15050_v47 = vadd.f32 %v7517_v58, %v7516_v45  ;;  %v7794_v0 = vadd.f32 %v7793_v26, %v7792_v19 }
 0xa31   :  { %vm7442_vm8 = vcmp.eq.s32.totalorder %v15046_v32, 1  ;;  %vm7450_vm10 = vcmp.eq.s32.totalorder %v7424_v62, 1  ;;  %v7565_v21 = vadd.f32 %v7564_v39, %v7563_v31  ;;  %v7571_v13 = vrot.slane %v7570_v2, 2 }
 0xa32   :  { %v7462_v22 = vsel %vm7442_vm8, 0.0, %v7318_v60  ;;  %v7463_v40 = vsel %vm7442_vm8, 0.0, %v7319_v41  ;;  %v7677_v3 = vadd.f32 %v7676_v34, %v7675_v55  ;;  %v7486_v20 = vsel %vm7450_vm10, 0.0, %v15013_v8 }
 0xa33   :  { %v7519_v18 = vsel %vm7504_vm7, %v7462_v22, 0.0  ;;  %v7631_v54 = vsel %vm7504_vm7, %v7463_v40, 0.0  ;;  %v7630_v24 = vadd.f32 %v7629_v38, %v7628_v28  ;;  %v15061_v15 = vadd.f32 %v7788_v27, %v7787_v9 }
 0xa34   :  { %v7683_v33 = vrot.slane %v7682_v37, 2  ;;  %v7632_v59 = vrot.slane %v7631_v54, 4  ;;  %v7795_v46 = vrot.slane %v7794_v0, 2  ;;  %v7487_v60 = vsel %vm7450_vm10, 0.0, %v15018_v30 }
 0xa35   :  { %v7488_v4 = vsel %vm7450_vm10, 0.0, %v15030_v10  ;;  %v7575_v11 = vsel %vm7504_vm7, %v7486_v20, 0.0  ;;  %v7741_v1 = vrot.slane %v15048_v12, 1  ;;  %v7566_v35 = vrot.slane %v7565_v21, 1 }
 0xa36   :  { %v7572_v29 = vadd.f32 %v7571_v13, %v7570_v2  ;;  %v7520_v8 = vrot.slane %v7519_v18, 4  ;;  %v7678_v45 = vrot.slane %v7677_v3, 1  ;;  %v7576_v53 = vrot.slane %v7575_v11, 4 }
 0xa37   :  { %v7687_v16 = vsel %vm7504_vm7, %v7487_v60, 0.0  ;;  %v7799_v28 = vsel %vm7504_vm7, %v7488_v4, 0.0  ;;  %v7684_v63 = vadd.f32 %v7683_v33, %v7682_v37  ;;  %v7633_v30 = vadd.f32 %v7632_v59, %v7631_v54 }
 0xa38   :  { %v15071_v31 = vpop.f32.mrb[88].mxu0  ;;  %v7688_v55 = vrot.slane %v7687_v16, 4  ;;  %v7800_v48 = vrot.slane %v7799_v28, 4  ;;  %v7790_v19 = vrot.slane %v15061_v15, 1  ;;  %v7796_v5 = vadd.f32 %v7795_v46, %v7794_v0 }
 0xa39   :  { %v6976_v10 = vpop.f32.mrb[89].mxu0  ;;  %v10666_v57 = vpop.eup %10665  ;;  %v7577_v42 = vadd.f32 %v7576_v53, %v7575_v11  ;;  %v7735_v9 = vadd.f32 %v7734_v50, %v15034_v56  ;;  %v7573_v14 = vrot.slane %v7572_v29, 1  ;;  %v7521_v36 = vadd.f32 %v7520_v8, %v7519_v18 }
 0xa3a   :  { %v7283_v52 = vmul.f32 0.6931472, %v10666_v57  ;;  %v7689_v58 = vadd.f32 %v7688_v55, %v7687_v16  ;;  %v7801_v26 = vadd.f32 %v7800_v48, %v7799_v28  ;;  %v7841_v61 = vsel %vm132_vm0, %v7511_v51, %v7623_v23  ;;  %v15079_v56 = vpop.permute.xlu0 %7426 }
 0xa3b   :  { %v7578_v44 = vrot.slane %v7577_v42, 2  ;;  %v7176_v39 = vmax.f32 %v15028_v25, 1e-10  ;;  %v7685_v62 = vrot.slane %v7684_v63, 1  ;;  %v7634_v34 = vrot.slane %v7633_v30, 2 }
 0xa3c   :  { %v15077_v2 = vpop.f32.mrb[100].mxu1  ;;  %v7345_v41 = vmul.f32 0.01, %v7283_v52  ;;  %v7690_v38 = vrot.slane %v7689_v58, 2  ;;  %v7802_v0 = vrot.slane %v7801_v26, 2  ;;  %v15082_v50 = vsel %vm7857_vm11, %v7841_v61, %v7735_v9 }
 0xa3d   :  { %v7106_v27 = vpop.f32.mrb[101].mxu1  ;;  %v7579_v37 = vadd.f32 %v7578_v44, %v7577_v42  ;;  %10667 = vlog2.f32 %v7176_v39  ;;  %v7567_v13 = vadd.f32 %v7566_v35, %v7565_v21  ;;  %v7679_v22 = vadd.f32 %v7678_v45, %v7677_v3 }
 0xa3e   :  { %v7522_v51 = vrot.slane %v7521_v36, 2  ;;  %v7691_v23 = vadd.f32 %v7690_v38, %v7689_v58  ;;  %v7574_v25 = vadd.f32 %v7573_v14, %v7572_v29  ;;  %v7797_v40 = vrot.slane %v7796_v5, 1 }
 0xa3f   :  { %v7803_v18 = vadd.f32 %v7802_v0, %v7801_v26  ;;  %v7875_v54 = vsel %vm7874_vm12, %v15082_v50, 0.0  ;;  %v7635_v20 = vadd.f32 %v7634_v34, %v7633_v30  ;;  %vm7451_vm13 = vcmp.eq.s32.totalorder %v15079_v56, 1 }
 0xa40   :  { %7876 = vadd.xlane.f32.xlu1 %v7875_v54  ;;  %v7742_v33 = vadd.f32 %v7741_v1, %v15048_v12  ;;  %v7842_v59 = vsel %vm132_vm0, %v15050_v47, %v7630_v24  ;;  %v7686_v46 = vadd.f32 %v7685_v62, %v7684_v63  ;;  %v7580_v21 = vrot.slane %v7579_v37, 1 }
 0xa41   :  { %v7692_v3 = vrot.slane %v7691_v23, 1  ;;  %v7489_v60 = vsel %vm7451_vm13, 0.0, %v7345_v41  ;;  %v7523_v4 = vadd.f32 %v7522_v51, %v7521_v36  ;;  %v7202_v35 = vmax.f32 %v15042_v17, 1e-10 }
 0xa42   :  { %v15093_v11 = vsel %vm7857_vm11, %v7842_v59, %v7742_v33  ;;  %v7804_v29 = vrot.slane %v7803_v18, 1  ;;  %v7791_v12 = vadd.f32 %v7790_v19, %v15061_v15  ;;  %v7849_v47 = vsel %vm132_vm0, %v7567_v13, %v7679_v22 }
 0xa43   :  { %v7878_v8 = vsel %vm7874_vm12, %v15093_v11, 0.0  ;;  %v7636_v24 = vrot.slane %v7635_v20, 1  ;;  %v7582_v1 = vsel %vm7504_vm7, %v7489_v60, 0.0  ;;  %10669 = vlog2.f32 %v7202_v35 }
 0xa44   :  { %7879 = vadd.xlane.f32.xlu0 %v7878_v8  ;;  %v7798_v45 = vadd.f32 %v7797_v40, %v7796_v5  ;;  %v7581_v53 = vadd.f32 %v7580_v21, %v7579_v37  ;;  %v7693_v16 = vadd.f32 %v7692_v3, %v7691_v23  ;;  %v15102_v28 = vsel %vm7857_vm11, %v7849_v47, %v7791_v12  ;;  %v15126_v40 = vpop.permute.xlu1 %7402 }
 0xa45   :  { %v7850_v17 = vsel %vm132_vm0, %v7574_v25, %v7686_v46  ;;  %v7524_v63 = vrot.slane %v7523_v4, 1  ;;  %v7899_v30 = vsel %vm7874_vm12, %v15102_v28, 0.0  ;;  %v7805_v48 = vadd.f32 %v7804_v29, %v7803_v18 }
 0xa46   :  { %v15108_v15 = vsel %vm7857_vm11, %v7850_v17, %v7798_v45  ;;  %v7637_v57 = vadd.f32 %v7636_v24, %v7635_v20  ;;  %v7583_v19 = vrot.slane %v7582_v1, 4  ;;  %v7851_v9 = vsel %vm132_vm0, %v7581_v53, %v7693_v16 }
 0xa47   :  { %v10668_v55 = vpop.eup %10667  ;;  %v7177_v14 = vmax.f32 %v15071_v31, 1e-10  ;;  %v7203_v52 = vmax.f32 %v15077_v2, 1e-10  ;;  %v7525_v36 = vadd.f32 %v7524_v63, %v7523_v4  ;;  %v15114_v44 = vsel %vm7857_vm11, %v7851_v9, %v7805_v48 }
 0xa48   :  { %v6979_v10 = vpop.f32.mrb[90].mxu0  ;;  %v7233_v5 = vmul.f32 0.6931472, %v10668_v55  ;;  %7900 = vadd.xlane.f32.xlu0 %v7899_v30  ;;  %v7902_v26 = vsel %vm7874_vm12, %v15108_v15, 0.0  ;;  %v7584_v62 = vadd.f32 %v7583_v19, %v7582_v1  ;;  %v7905_v13 = vsel %vm7874_vm12, %v15114_v44, 0.0 }
 0xa49   :  { %v6981_v42 = vpop.f32.mrb[91].mxu0  ;;  %10671 = vlog2.f32 %v7177_v14  ;;  %v7178_v61 = vmax.f32 %v6979_v10, 1e-10  ;;  %v7843_v31 = vsel %vm132_vm0, %v7525_v36, %v7637_v57  ;;  %vm7443_vm14 = vcmp.eq.s32.totalorder %v15126_v40, 1  ;;  %v15135_v10 = vpop.permute.xlu0 %7429 }
 0xa4a   :  { %v7320_v58 = vmul.f32 0.01, %v7233_v5  ;;  %10673 = vlog2.f32 %v7203_v52  ;;  %v7585_v22 = vrot.slane %v7584_v62, 2  ;;  %vm7452_vm15 = vcmp.eq.s32.totalorder %v15135_v10, 1 }
 0xa4b   :  { %10675 = vlog2.f32 %v7178_v61  ;;  %vm7923_vm6 = vcmask 1042432   ;;  %vm8639_vm10 = vcmask 1043459  }
 0xa4c   :  { %v7109_v39 = vpop.f32.mrb[102].mxu1  ;;  %v7464_v41 = vsel %vm7442_vm8, 0.0, %v7320_v58  ;;  %7903 = vadd.xlane.f32.xlu0 %v7902_v26  ;;  %v7586_v18 = vadd.f32 %v7585_v22, %v7584_v62 }
 0xa4d   :  { %v7111_v2 = vpop.f32.mrb[103].mxu1  ;;  %v7743_v34 = vsel %vm7504_vm7, %v7464_v41, 0.0  ;;  %v7204_v38 = vmax.f32 %v7109_v39, 1e-10  ;;  %v10670_v27 = vpop.eup %10669 }
 0xa4e   :  { %v7744_v37 = vrot.slane %v7743_v34, 4  ;;  %v7285_v0 = vmul.f32 0.6931472, %v10670_v27  ;;  %v7587_v8 = vrot.slane %v7586_v18, 1 }
 0xa4f   :  { %10677 = vlog2.f32 %v7204_v38 }
 0xa50   :  { %v7745_v51 = vadd.f32 %v7744_v37, %v7743_v34  ;;  %7906 = vadd.xlane.f32.xlu0 %v7905_v13  ;;  %v7346_v32 = vmul.f32 0.01, %v7285_v0  ;;  %v7588_v38 = vadd.f32 %v7587_v8, %v7586_v18 }
 0xa52   :  { %v7746_v23 = vrot.slane %v7745_v51, 2  ;;  %v7490_v25 = vsel %vm7451_vm13, 0.0, %v7346_v32 }
 0xa53   :  { %v7694_v54 = vsel %vm7504_vm7, %v7490_v25, 0.0  ;;  %v10672_v33 = vpop.eup %10671 }
 0xa54   :  { %v7747_v20 = vadd.f32 %v7746_v23, %v7745_v51  ;;  %v7695_v59 = vrot.slane %v7694_v54, 4  ;;  %v10674_v46 = vpop.eup %10673  ;;  %v7235_v21 = vmul.f32 0.6931472, %v10672_v33 }
 0xa55   :  { %v10676_v60 = vpop.eup %10675  ;;  %v7287_v35 = vmul.f32 0.6931472, %v10674_v46 }
 0xa56   :  { %v7748_v3 = vrot.slane %v7747_v20, 1  ;;  %v7696_v4 = vadd.f32 %v7695_v59, %v7694_v54  ;;  %v7321_v12 = vmul.f32 0.01, %v7235_v21  ;;  %v7237_v47 = vmul.f32 0.6931472, %v10676_v60 }
 0xa57   :  { %v7347_v53 = vmul.f32 0.01, %v7287_v35 }
 0xa58   :  { %v6984_v29 = vpop.f32.mrb[92].mxu0  ;;  %v7749_v24 = vadd.f32 %v7748_v3, %v7747_v20  ;;  %v7697_v45 = vrot.slane %v7696_v4, 2  ;;  %v7465_v63 = vsel %vm7443_vm14, 0.0, %v7321_v12  ;;  %v7322_v30 = vmul.f32 0.01, %v7237_v47 }
 0xa59   :  { %v10678_v1 = vpop.eup %10677  ;;  %v7179_v16 = vmax.f32 %v6984_v29, 1e-10  ;;  %v6986_v17 = vpop.f32.mrb[93].mxu0  ;;  %v7526_v19 = vsel %vm7504_vm7, %v7465_v63, 0.0  ;;  %v7491_v5 = vsel %vm7451_vm13, 0.0, %v7347_v53  ;;  %vm8647_vm13 = vcmask 1047559  }
 0xa5a   :  { %v15133_v55 = vsel %vm7857_vm11, %v7843_v31, %v7749_v24  ;;  %v7289_v48 = vmul.f32 0.6931472, %v10678_v1  ;;  %v7698_v57 = vadd.f32 %v7697_v45, %v7696_v4  ;;  %v7527_v14 = vrot.slane %v7526_v19, 4 }
 0xa5b   :  { %v7881_v42 = vsel %vm7874_vm12, %v15133_v55, 0.0  ;;  %v7806_v52 = vsel %vm7504_vm7, %v7491_v5, 0.0  ;;  %v7466_v36 = vsel %vm7443_vm14, 0.0, %v7322_v30  ;;  %10679 = vlog2.f32 %v7179_v16 }
 0xa5c   :  { %v7114_v9 = vpop.f32.mrb[104].mxu1  ;;  %7882 = vadd.xlane.f32.xlu1 %v7881_v42  ;;  %v7348_v58 = vmul.f32 0.01, %v7289_v48  ;;  %v7807_v61 = vrot.slane %v7806_v52, 4  ;;  %v7638_v39 = vsel %vm7504_vm7, %v7466_v36, 0.0  ;;  %v7528_v56 = vadd.f32 %v7527_v14, %v7526_v19 }
 0xa5d   :  { %v7116_v26 = vpop.f32.mrb[105].mxu1  ;;  %v7205_v62 = vmax.f32 %v7114_v9, 1e-10  ;;  %v7639_v41 = vrot.slane %v7638_v39, 4  ;;  %v7699_v31 = vrot.slane %v7698_v57, 1 }
 0xa5e   :  { %v7808_v2 = vadd.f32 %v7807_v61, %v7806_v52  ;;  %v7492_v34 = vsel %vm7452_vm15, 0.0, %v7348_v58  ;;  %v7529_v27 = vrot.slane %v7528_v56, 2 }
 0xa5f   :  { %10681 = vlog2.f32 %v7205_v62  ;;  %v7640_v37 = vadd.f32 %v7639_v41, %v7638_v39  ;;  %v7700_v0 = vadd.f32 %v7699_v31, %v7698_v57  ;;  %v7589_v32 = vsel %vm7504_vm7, %v7492_v34, 0.0 }
 0xa60   :  { %v7809_v13 = vrot.slane %v7808_v2, 2  ;;  %v7530_v22 = vadd.f32 %v7529_v27, %v7528_v56  ;;  %v7590_v20 = vrot.slane %v7589_v32, 4 }
 0xa61   :  { %v7641_v51 = vrot.slane %v7640_v37, 2  ;;  %v7852_v23 = vsel %vm132_vm0, %v7588_v38, %v7700_v0  ;;  %v15163_v38 = vpop.permute.xlu1 %7405 }
 0xa62   :  { %v7810_v25 = vadd.f32 %v7809_v13, %v7808_v2  ;;  %v7531_v59 = vrot.slane %v7530_v22, 1  ;;  %v7591_v12 = vadd.f32 %v7590_v20, %v7589_v32  ;;  %vm7444_vm1 = vcmp.eq.s32.totalorder %v15163_v38, 1 }
 0xa63   :  { %v7642_v54 = vadd.f32 %v7641_v51, %v7640_v37 }
 0xa64   :  { %v7811_v33 = vrot.slane %v7810_v25, 1  ;;  %v7532_v24 = vadd.f32 %v7531_v59, %v7530_v22  ;;  %v7592_v5 = vrot.slane %v7591_v12, 2 }
 0xa65   :  { %v7643_v46 = vrot.slane %v7642_v54, 1  ;;  %v10680_v21 = vpop.eup %10679 }
 0xa66   :  { %v7812_v3 = vadd.f32 %v7811_v33, %v7810_v25  ;;  %v7239_v18 = vmul.f32 0.6931472, %v10680_v21  ;;  %v7593_v58 = vadd.f32 %v7592_v5, %v7591_v12 }
 0xa67   :  { %v7644_v29 = vadd.f32 %v7643_v46, %v7642_v54 }
 0xa68   :  { %v6989_v60 = vpop.f32.mrb[94].mxu0  ;;  %v15152_v47 = vsel %vm7857_vm11, %v7852_v23, %v7812_v3  ;;  %v7323_v1 = vmul.f32 0.01, %v7239_v18  ;;  %v7594_v2 = vrot.slane %v7593_v58, 1 }
 0xa69   :  { %v7180_v4 = vmax.f32 %v6989_v60, 1e-10  ;;  %v6991_v35 = vpop.f32.mrb[95].mxu0  ;;  %v10682_v8 = vpop.eup %10681  ;;  %v7908_v53 = vsel %vm7874_vm12, %v15152_v47, 0.0  ;;  %v7844_v17 = vsel %vm132_vm0, %v7532_v24, %v7644_v29 }
 0xa6a   :  { %v7291_v45 = vmul.f32 0.6931472, %v10682_v8  ;;  %7909 = vadd.xlane.f32.xlu0 %v7908_v53  ;;  %v7467_v63 = vsel %vm7443_vm14, 0.0, %v7323_v1  ;;  %v7595_v25 = vadd.f32 %v7594_v2, %v7593_v58  ;;  %vm8645_vm14 = vcmask 1046534  }
 0xa6b   :  { %10683 = vlog2.f32 %v7180_v4  ;;  %v7750_v19 = vsel %vm7504_vm7, %v7467_v63, 0.0 }
 0xa6c   :  { %v7119_v16 = vpop.f32.mrb[106].mxu1  ;;  %v7349_v30 = vmul.f32 0.01, %v7291_v45  ;;  %v7751_v42 = vrot.slane %v7750_v19, 4 }
 0xa6d   :  { %v7206_v48 = vmax.f32 %v7119_v16, 1e-10  ;;  %v7121_v57 = vpop.f32.mrb[107].mxu1 }
 0xa6e   :  { %v7493_v9 = vsel %vm7452_vm15, 0.0, %v7349_v30  ;;  %v7752_v52 = vadd.f32 %v7751_v42, %v7750_v19 }
 0xa6f   :  { %10685 = vlog2.f32 %v7206_v48  ;;  %v7701_v14 = vsel %vm7504_vm7, %v7493_v9, 0.0 }
 0xa70   :  { %v7702_v36 = vrot.slane %v7701_v14, 4  ;;  %v7753_v26 = vrot.slane %v7752_v52, 2 }
 0xa72   :  { %v7703_v61 = vadd.f32 %v7702_v36, %v7701_v14  ;;  %v7754_v62 = vadd.f32 %v7753_v26, %v7752_v52  ;;  %v15184_v36 = vpop.permute.xlu0 %7432 }
 0xa73   :  { %vm7453_vm2 = vcmp.eq.s32.totalorder %v15184_v36, 1 }
 0xa74   :  { %v7704_v39 = vrot.slane %v7703_v61, 2  ;;  %v7755_v31 = vrot.slane %v7754_v62, 1 }
 0xa75   :  { %v10684_v40 = vpop.eup %10683 }
 0xa76   :  { %v7241_v56 = vmul.f32 0.6931472, %v10684_v40  ;;  %v7705_v41 = vadd.f32 %v7704_v39, %v7703_v61  ;;  %v7756_v0 = vadd.f32 %v7755_v31, %v7754_v62 }
 0xa78   :  { %v7324_v27 = vmul.f32 0.01, %v7241_v56  ;;  %v7706_v13 = vrot.slane %v7705_v41, 1  ;;  %v15166_v23 = vsel %vm7857_vm11, %v7844_v17, %v7756_v0 }
 0xa79   :  { %v10686_v34 = vpop.eup %10685  ;;  %v6994_v37 = vpop.f32.mrb[96].mxu0  ;;  %v7884_v33 = vsel %vm7874_vm12, %v15166_v23, 0.0 }
 0xa7a   :  { %v7293_v22 = vmul.f32 0.6931472, %v10686_v34  ;;  %v7181_v51 = vmax.f32 %v6994_v37, 1e-10  ;;  %v6996_v32 = vpop.f32.mrb[97].mxu0  ;;  %v7707_v54 = vadd.f32 %v7706_v13, %v7705_v41  ;;  %v7468_v59 = vsel %vm7444_vm1, 0.0, %v7324_v27  ;;  %7885 = vadd.xlane.f32.xlu1 %v7884_v33 }
 0xa7b   :  { %v7533_v35 = vsel %vm7504_vm7, %v7468_v59, 0.0 }
 0xa7c   :  { %v7350_v20 = vmul.f32 0.01, %v7293_v22  ;;  %10687 = vlog2.f32 %v7181_v51  ;;  %v7853_v46 = vsel %vm132_vm0, %v7595_v25, %v7707_v54  ;;  %v7534_v12 = vrot.slane %v7533_v35, 4 }
 0xa7e   :  { %v7494_v21 = vsel %vm7452_vm15, 0.0, %v7350_v20  ;;  %v7124_v3 = vpop.f32.mrb[108].mxu1  ;;  %v7535_v53 = vadd.f32 %v7534_v12, %v7533_v35  ;;  %vm8671_vm15 = vcmask 130112  }
 0xa7f   :  { %v7813_v60 = vsel %vm7504_vm7, %v7494_v21, 0.0  ;;  %v7207_v18 = vmax.f32 %v7124_v3, 1e-10  ;;  %v7126_v4 = vpop.f32.mrb[109].mxu1 }
 0xa80   :  { %v7814_v29 = vrot.slane %v7813_v60, 4  ;;  %v7536_v5 = vrot.slane %v7535_v53, 2 }
 0xa81   :  { %10689 = vlog2.f32 %v7207_v18 }
 0xa82   :  { %v7815_v8 = vadd.f32 %v7814_v29, %v7813_v60  ;;  %v7537_v39 = vadd.f32 %v7536_v5, %v7535_v53 }
 0xa84   :  { %v7816_v24 = vrot.slane %v7815_v8, 2  ;;  %v7538_v27 = vrot.slane %v7537_v39, 1 }
 0xa86   :  { %v10688_v1 = vpop.eup %10687  ;;  %v7817_v45 = vadd.f32 %v7816_v24, %v7815_v8  ;;  %v7539_v32 = vadd.f32 %v7538_v27, %v7537_v39 }
 0xa87   :  { %v7243_v16 = vmul.f32 0.6931472, %v10688_v1 }
 0xa88   :  { %v7818_v17 = vrot.slane %v7817_v45, 1 }
 0xa89   :  { %v7325_v63 = vmul.f32 0.01, %v7243_v16  ;;  %v6999_v10 = vpop.f32.mrb[98].mxu0 }
 0xa8a   :  { %v7182_v30 = vmax.f32 %v6999_v10, 1e-10  ;;  %v7001_v48 = vpop.f32.mrb[99].mxu0  ;;  %v7819_v57 = vadd.f32 %v7818_v17, %v7817_v45 }
 0xa8b   :  { %v10690_v19 = vpop.eup %10689  ;;  %v7469_v42 = vsel %vm7444_vm1, 0.0, %v7325_v63 }
 0xa8c   :  { %v7645_v9 = vsel %vm7504_vm7, %v7469_v42, 0.0  ;;  %v7295_v14 = vmul.f32 0.6931472, %v10690_v19  ;;  %10691 = vlog2.f32 %v7182_v30  ;;  %v15182_v52 = vsel %vm7857_vm11, %v7853_v46, %v7819_v57 }
 0xa8d   :  { %v7646_v58 = vrot.slane %v7645_v9, 4  ;;  %v7911_v26 = vsel %vm7874_vm12, %v15182_v52, 0.0 }
 0xa8e   :  { %v7351_v61 = vmul.f32 0.01, %v7295_v14  ;;  %v7129_v40 = vpop.f32.mrb[110].mxu1  ;;  %7912 = vadd.xlane.f32.xlu0 %v7911_v26  ;;  %v15199_v14 = vpop.permute.xlu1 %7408 }
 0xa8f   :  { %v7647_v62 = vadd.f32 %v7646_v58, %v7645_v9  ;;  %v7208_v56 = vmax.f32 %v7129_v40, 1e-10  ;;  %v7131_v41 = vpop.f32.mrb[111].mxu1  ;;  %vm7445_vm9 = vcmp.eq.s32.totalorder %v15199_v14, 1 }
 0xa90   :  { %v7495_v2 = vsel %vm7453_vm2, 0.0, %v7351_v61 }
 0xa91   :  { %v7648_v31 = vrot.slane %v7647_v62, 2  ;;  %10693 = vlog2.f32 %v7208_v56  ;;  %v7596_v37 = vsel %vm7504_vm7, %v7495_v2, 0.0 }
 0xa92   :  { %v7597_v22 = vrot.slane %v7596_v37, 4 }
 0xa93   :  { %v7649_v34 = vadd.f32 %v7648_v31, %v7647_v62 }
 0xa94   :  { %v7598_v3 = vadd.f32 %v7597_v22, %v7596_v37 }
 0xa95   :  { %v7650_v0 = vrot.slane %v7649_v34, 1 }
 0xa96   :  { %v10692_v13 = vpop.eup %10691  ;;  %v7599_v12 = vrot.slane %v7598_v3, 2 }
 0xa97   :  { %v7245_v51 = vmul.f32 0.6931472, %v10692_v13  ;;  %v7651_v25 = vadd.f32 %v7650_v0, %v7649_v34 }
 0xa98   :  { %v7600_v63 = vadd.f32 %v7599_v12, %v7598_v3 }
 0xa99   :  { %v7326_v54 = vmul.f32 0.01, %v7245_v51  ;;  %v7004_v20 = vpop.f32.mrb[100].mxu0  ;;  %v7845_v33 = vsel %vm132_vm0, %v7539_v32, %v7651_v25 }
 0xa9a   :  { %v7183_v59 = vmax.f32 %v7004_v20, 1e-10  ;;  %v7006_v46 = vpop.f32.mrb[101].mxu0  ;;  %v7601_v9 = vrot.slane %v7600_v63, 1 }
 0xa9b   :  { %v10694_v21 = vpop.eup %10693  ;;  %v7470_v60 = vsel %vm7444_vm1, 0.0, %v7326_v54  ;;  %vm8674_vm1 = vcmask 122880  }
 0xa9c   :  { %v7757_v18 = vsel %vm7504_vm7, %v7470_v60, 0.0  ;;  %v7297_v4 = vmul.f32 0.6931472, %v10694_v21  ;;  %10695 = vlog2.f32 %v7183_v59  ;;  %v7602_v2 = vadd.f32 %v7601_v9, %v7600_v63 }
 0xa9d   :  { %v7758_v35 = vrot.slane %v7757_v18, 4 }
 0xa9e   :  { %v7352_v29 = vmul.f32 0.01, %v7297_v4  ;;  %v7134_v8 = vpop.f32.mrb[112].mxu1 }
 0xa9f   :  { %v7759_v24 = vadd.f32 %v7758_v35, %v7757_v18  ;;  %v7209_v1 = vmax.f32 %v7134_v8, 1e-10  ;;  %v7136_v45 = vpop.f32.mrb[113].mxu1 }
 0xaa0   :  { %v7496_v53 = vsel %vm7453_vm2, 0.0, %v7352_v29 }
 0xaa1   :  { %v7760_v16 = vrot.slane %v7759_v24, 2  ;;  %v7708_v17 = vsel %vm7504_vm7, %v7496_v53, 0.0  ;;  %10697 = vlog2.f32 %v7209_v1 }
 0xaa2   :  { %v7709_v38 = vrot.slane %v7708_v17, 4 }
 0xaa3   :  { %v7761_v10 = vadd.f32 %v7760_v16, %v7759_v24 }
 0xaa4   :  { %v7710_v30 = vadd.f32 %v7709_v38, %v7708_v17 }
 0xaa5   :  { %v7762_v48 = vrot.slane %v7761_v10, 1 }
 0xaa6   :  { %v10696_v57 = vpop.eup %10695  ;;  %v7711_v19 = vrot.slane %v7710_v30, 2 }
 0xaa7   :  { %v7247_v5 = vmul.f32 0.6931472, %v10696_v57  ;;  %v7763_v42 = vadd.f32 %v7762_v48, %v7761_v10  ;;  %v15220_v48 = vpop.permute.xlu0 %7435 }
 0xaa8   :  { %v7712_v58 = vadd.f32 %v7711_v19, %v7710_v30  ;;  %vm7454_vm4 = vcmp.eq.s32.totalorder %v15220_v48, 1 }
 0xaa9   :  { %v7327_v26 = vmul.f32 0.01, %v7247_v5  ;;  %v7009_v61 = vpop.f32.mrb[102].mxu0  ;;  %v15202_v40 = vsel %vm7857_vm11, %v7845_v33, %v7763_v42 }
 0xaaa   :  { %v7184_v39 = vmax.f32 %v7009_v61, 1e-10  ;;  %v7011_v62 = vpop.f32.mrb[103].mxu0  ;;  %v7887_v56 = vsel %vm7874_vm12, %v15202_v40, 0.0  ;;  %v7713_v41 = vrot.slane %v7712_v58, 1 }
 0xaab   :  { %v10698_v31 = vpop.eup %10697  ;;  %7888 = vadd.xlane.f32.xlu1 %v7887_v56  ;;  %v7471_v34 = vsel %vm7445_vm9, 0.0, %v7327_v26 }
 0xaac   :  { %v7299_v27 = vmul.f32 0.6931472, %v10698_v31  ;;  %10699 = vlog2.f32 %v7184_v39  ;;  %v7714_v37 = vadd.f32 %v7713_v41, %v7712_v58  ;;  %v7540_v51 = vsel %vm7504_vm7, %v7471_v34, 0.0 }
 0xaad   :  { %v7541_v33 = vrot.slane %v7540_v51, 4 }
 0xaae   :  { %v7353_v0 = vmul.f32 0.01, %v7299_v27  ;;  %v7139_v13 = vpop.f32.mrb[114].mxu1  ;;  %v7854_v22 = vsel %vm132_vm0, %v7602_v2, %v7714_v37 }
 0xaaf   :  { %v7210_v32 = vmax.f32 %v7139_v13, 1e-10  ;;  %v7141_v25 = vpop.f32.mrb[115].mxu1  ;;  %v7542_v3 = vadd.f32 %v7541_v33, %v7540_v51 }
 0xab0   :  { %v7497_v54 = vsel %vm7453_vm2, 0.0, %v7353_v0 }
 0xab1   :  { %v7820_v20 = vsel %vm7504_vm7, %v7497_v54, 0.0  ;;  %10701 = vlog2.f32 %v7210_v32  ;;  %v7543_v8 = vrot.slane %v7542_v3, 2 }
 0xab2   :  { %v7821_v59 = vrot.slane %v7820_v20, 4 }
 0xab3   :  { %v7544_v63 = vadd.f32 %v7543_v8, %v7542_v3 }
 0xab4   :  { %v7822_v46 = vadd.f32 %v7821_v59, %v7820_v20 }
 0xab5   :  { %v7545_v39 = vrot.slane %v7544_v63, 1 }
 0xab6   :  { %v10700_v21 = vpop.eup %10699  ;;  %v7823_v60 = vrot.slane %v7822_v46, 2 }
 0xab7   :  { %v7249_v18 = vmul.f32 0.6931472, %v10700_v21  ;;  %v7546_v2 = vadd.f32 %v7545_v39, %v7544_v63  ;;  %v15235_v63 = vpop.permute.xlu1 %7411  ;;  %v7190_v39 = vmax.f32 %v14648_v7, 1e-10 }
 0xab8   :  { %v7824_v4 = vadd.f32 %v7823_v60, %v7822_v46  ;;  %vm7446_vm5 = vcmp.eq.s32.totalorder %v15235_v63, 1 }
 0xab9   :  { %v7328_v35 = vmul.f32 0.01, %v7249_v18  ;;  %v7014_v29 = vpop.f32.mrb[104].mxu0 }
 0xaba   :  { %v7185_v12 = vmax.f32 %v7014_v29, 1e-10  ;;  %v7016_v24 = vpop.f32.mrb[105].mxu0  ;;  %v7825_v1 = vrot.slane %v7824_v4, 1 }
 0xabb   :  { %v10702_v45 = vpop.eup %10701  ;;  %v7472_v36 = vsel %vm7445_vm9, 0.0, %v7328_v35 }
 0xabc   :  { %v7652_v53 = vsel %vm7504_vm7, %v7472_v36, 0.0  ;;  %v7301_v16 = vmul.f32 0.6931472, %v10702_v45  ;;  %10703 = vlog2.f32 %v7185_v12  ;;  %v7826_v17 = vadd.f32 %v7825_v1, %v7824_v4 }
 0xabd   :  { %v7653_v38 = vrot.slane %v7652_v53, 4 }
 0xabe   :  { %v7144_v10 = vpop.f32.mrb[116].mxu1  ;;  %v15218_v30 = vsel %vm7857_vm11, %v7854_v22, %v7826_v17  ;;  %v7354_v19 = vmul.f32 0.01, %v7301_v16 }
 0xabf   :  { %v7654_v57 = vadd.f32 %v7653_v38, %v7652_v53  ;;  %v7211_v5 = vmax.f32 %v7144_v10, 1e-10  ;;  %v7146_v42 = vpop.f32.mrb[117].mxu1  ;;  %v7914_v9 = vsel %vm7874_vm12, %v15218_v30, 0.0 }
 0xac0   :  { %7915 = vadd.xlane.f32.xlu0 %v7914_v9  ;;  %v7498_v61 = vsel %vm7454_vm4, 0.0, %v7354_v19 }
 0xac1   :  { %v7655_v58 = vrot.slane %v7654_v57, 2  ;;  %10705 = vlog2.f32 %v7211_v5  ;;  %v7603_v41 = vsel %vm7504_vm7, %v7498_v61, 0.0 }
 0xac2   :  { %v7604_v27 = vrot.slane %v7603_v41, 4 }
 0xac3   :  { %v7656_v26 = vadd.f32 %v7655_v58, %v7654_v57 }
 0xac4   :  { %v7605_v33 = vadd.f32 %v7604_v27, %v7603_v41 }
 0xac5   :  { %v7657_v62 = vrot.slane %v7656_v26, 1 }
 0xac6   :  { %v10704_v56 = vpop.eup %10703  ;;  %v7606_v35 = vrot.slane %v7605_v33, 2 }
 0xac7   :  { %v7251_v31 = vmul.f32 0.6931472, %v10704_v56  ;;  %v7658_v34 = vadd.f32 %v7657_v62, %v7656_v26 }
 0xac8   :  { %v7607_v1 = vadd.f32 %v7606_v35, %v7605_v33 }
 0xac9   :  { %v7329_v37 = vmul.f32 0.01, %v7251_v31  ;;  %v7019_v0 = vpop.f32.mrb[106].mxu0  ;;  %v7846_v13 = vsel %vm132_vm0, %v7546_v2, %v7658_v34 }
 0xaca   :  { %v7186_v22 = vmax.f32 %v7019_v0, 1e-10  ;;  %v7021_v51 = vpop.f32.mrb[107].mxu0  ;;  %v7608_v19 = vrot.slane %v7607_v1, 1 }
 0xacb   :  { %v10706_v32 = vpop.eup %10705  ;;  %v7473_v25 = vsel %vm7445_vm9, 0.0, %v7329_v37 }
 0xacc   :  { %v7764_v54 = vsel %vm7504_vm7, %v7473_v25, 0.0  ;;  %v7303_v20 = vmul.f32 0.6931472, %v10706_v32  ;;  %10707 = vlog2.f32 %v7186_v22  ;;  %v7609_v56 = vadd.f32 %v7608_v19, %v7607_v1 }
 0xacd   :  { %v7765_v59 = vrot.slane %v7764_v54, 4 }
 0xace   :  { %v7355_v46 = vmul.f32 0.01, %v7303_v20  ;;  %v7149_v21 = vpop.f32.mrb[118].mxu1 }
 0xacf   :  { %v7766_v3 = vadd.f32 %v7765_v59, %v7764_v54  ;;  %v7212_v60 = vmax.f32 %v7149_v21, 1e-10  ;;  %v7151_v18 = vpop.f32.mrb[119].mxu1  ;;  %v15252_v59 = vpop.permute.xlu1 %7414 }
 0xad0   :  { %v7499_v4 = vsel %vm7454_vm4, 0.0, %v7355_v46  ;;  %vm7447_vm8 = vcmp.eq.s32.totalorder %v15252_v59, 1 }
 0xad1   :  { %v7767_v29 = vrot.slane %v7766_v3, 2  ;;  %v7715_v8 = vsel %vm7504_vm7, %v7499_v4, 0.0  ;;  %10709 = vlog2.f32 %v7212_v60 }
 0xad2   :  { %v7716_v14 = vrot.slane %v7715_v8, 4 }
 0xad3   :  { %v7768_v12 = vadd.f32 %v7767_v29, %v7766_v3  ;;  %v15254_v3 = vpop.permute.xlu0 %7438  ;;  %v7877_v1 = vpop.xlane.xlu1 %7876 }
 0xad4   :  { %v7717_v24 = vadd.f32 %v7716_v14, %v7715_v8  ;;  %vm7455_vm3 = vcmp.eq.s32.totalorder %v15254_v3, 1 }
 0xad5   :  { %v7769_v45 = vrot.slane %v7768_v12, 1 }
 0xad6   :  { %v10708_v36 = vpop.eup %10707  ;;  %v7718_v53 = vrot.slane %v7717_v24, 2 }
 0xad7   :  { %v7253_v16 = vmul.f32 0.6931472, %v10708_v36  ;;  %v7770_v17 = vadd.f32 %v7769_v45, %v7768_v12  ;;  %v7880_v45 = vpop.xlane.xlu0 %7879 }
 0xad8   :  { %v7719_v38 = vadd.f32 %v7718_v53, %v7717_v24 }
 0xad9   :  { %v7024_v10 = vpop.f32.mrb[108].mxu0  ;;  %v15238_v57 = vsel %vm7857_vm11, %v7846_v13, %v7770_v17  ;;  %v7330_v5 = vmul.f32 0.01, %v7253_v16  ;;  %v7191_v13 = vmax.f32 %v14673_v49, 1e-10 }
 0xada   :  { %v7187_v42 = vmax.f32 %v7024_v10, 1e-10  ;;  %v7026_v9 = vpop.f32.mrb[109].mxu0  ;;  %v7890_v26 = vsel %vm7874_vm12, %v15238_v57, 0.0  ;;  %v7720_v61 = vrot.slane %v7719_v38, 1 }
 0xadb   :  { %v10710_v58 = vpop.eup %10709  ;;  %7891 = vadd.xlane.f32.xlu1 %v7890_v26  ;;  %v7474_v31 = vsel %vm7446_vm5, 0.0, %v7330_v5 }
 0xadc   :  { %v7305_v62 = vmul.f32 0.6931472, %v10710_v58  ;;  %10711 = vlog2.f32 %v7187_v42  ;;  %v7721_v41 = vadd.f32 %v7720_v61, %v7719_v38  ;;  %v7547_v7 = vsel %vm7504_vm7, %v7474_v31, 0.0 }
 0xadd   :  { %10713 = vlog2.f32 %v7190_v39  ;;  %v7548_v25 = vrot.slane %v7547_v7, 4  ;;  %v7924_v58 = vsel %vm7923_vm6, %v7877_v1, 0.0 }
 0xade   :  { %v7154_v2 = vpop.f32.mrb[120].mxu1  ;;  %v7356_v34 = vmul.f32 0.01, %v7305_v62  ;;  %v7855_v0 = vsel %vm132_vm0, %v7609_v56, %v7721_v41 }
 0xadf   :  { %v7213_v27 = vmax.f32 %v7154_v2, 1e-10  ;;  %v7156_v37 = vpop.f32.mrb[121].mxu1  ;;  %v7549_v46 = vadd.f32 %v7548_v25, %v7547_v7  ;;  %v7925_v2 = vrot.slane %v7924_v58, 4 }
 0xae0   :  { %v7500_v22 = vsel %vm7454_vm4, 0.0, %v7356_v34  ;;  %v7901_v34 = vpop.xlane.xlu0 %7900 }
 0xae1   :  { %10715 = vlog2.f32 %v7213_v27  ;;  %v7827_v51 = vsel %vm7504_vm7, %v7500_v22, 0.0  ;;  %v7550_v14 = vrot.slane %v7549_v46, 2  ;;  %v7931_v22 = vsel %vm7923_vm6, %v7880_v45, 0.0 }
 0xae2   :  { %v7828_v32 = vrot.slane %v7827_v51, 4  ;;  %10717 = vlog2.f32 %v7191_v13 }
 0xae3   :  { %v7551_v26 = vadd.f32 %v7550_v14, %v7549_v46  ;;  %v7932_v46 = vrot.slane %v7931_v22, 4 }
 0xae4   :  { %v7829_v54 = vadd.f32 %v7828_v32, %v7827_v51 }
 0xae5   :  { %v7552_v13 = vrot.slane %v7551_v26, 1 }
 0xae6   :  { %v10712_v20 = vpop.eup %10711  ;;  %v7830_v33 = vrot.slane %v7829_v54, 2 }
 0xae7   :  { %v7255_v21 = vmul.f32 0.6931472, %v10712_v20  ;;  %v10714_v18 = vpop.eup %10713  ;;  %v7926_v20 = vadd.f32 %v7925_v2, %v7924_v58 }
 0xae8   :  { %v7831_v60 = vadd.f32 %v7830_v33, %v7829_v54  ;;  %v7261_v17 = vmul.f32 0.6931472, %v10714_v18  ;;  %v7904_v18 = vpop.xlane.xlu0 %7903 }
 0xae9   :  { %v7029_v49 = vpop.f32.mrb[110].mxu0  ;;  %v7331_v48 = vmul.f32 0.01, %v7255_v21  ;;  %v7927_v45 = vrot.slane %v7926_v20, 2 }
 0xaea   :  { %v7188_v4 = vmax.f32 %v7029_v49, 1e-10  ;;  %v7031_v35 = vpop.f32.mrb[111].mxu0  ;;  %v7832_v8 = vrot.slane %v7831_v60, 1  ;;  %v7334_v41 = vmul.f32 0.01, %v7261_v17  ;;  %v7553_v49 = vadd.f32 %v7552_v13, %v7551_v26 }
 0xaeb   :  { %v10716_v29 = vpop.eup %10715  ;;  %v7475_v12 = vsel %vm7446_vm5, 0.0, %v7331_v48  ;;  %v7928_v2 = vadd.f32 %v7927_v45, %v7926_v20 }
 0xaec   :  { %v7307_v24 = vmul.f32 0.6931472, %v10716_v29  ;;  %v7659_v36 = vsel %vm7504_vm7, %v7475_v12, 0.0  ;;  %10719 = vlog2.f32 %v7188_v4  ;;  %v7833_v53 = vadd.f32 %v7832_v8, %v7831_v60  ;;  %v10718_v16 = vpop.eup %10717 }
 0xaed   :  { %v7660_v38 = vrot.slane %v7659_v36, 4  ;;  %v7263_v62 = vmul.f32 0.6931472, %v10718_v16  ;;  %v7478_v27 = vsel %vm7447_vm8, 0.0, %v7334_v41  ;;  %v7980_v4 = vsel %vm7923_vm6, %v7901_v34, 0.0  ;;  %v7883_v16 = vpop.xlane.xlu1 %7882 }
 0xaee   :  { %v7357_v10 = vmul.f32 0.01, %v7307_v24  ;;  %v7159_v19 = vpop.f32.mrb[122].mxu1  ;;  %v15261_v9 = vsel %vm7857_vm11, %v7855_v0, %v7833_v53  ;;  %v7666_v54 = vsel %vm7504_vm7, %v7478_v27, 0.0  ;;  %v7933_v53 = vadd.f32 %v7932_v46, %v7931_v22 }
 0xaef   :  { %v7214_v5 = vmax.f32 %v7159_v19, 1e-10  ;;  %v7161_v42 = vpop.f32.mrb[123].mxu1  ;;  %v7661_v61 = vadd.f32 %v7660_v38, %v7659_v36  ;;  %v7917_v39 = vsel %vm7874_vm12, %v15261_v9, 0.0  ;;  %v7335_v7 = vmul.f32 0.01, %v7263_v62  ;;  %v7907_v62 = vpop.xlane.xlu0 %7906 }
 0xaf0   :  { %v7501_v56 = vsel %vm7455_vm3, 0.0, %v7357_v10  ;;  %7918 = vadd.xlane.f32.xlu0 %v7917_v39  ;;  %v7667_v24 = vrot.slane %v7666_v54, 4  ;;  %v7981_v10 = vrot.slane %v7980_v4, 4  ;;  %v7987_v42 = vsel %vm7923_vm6, %v7904_v18, 0.0 }
 0xaf1   :  { %10721 = vlog2.f32 %v7214_v5  ;;  %v7662_v31 = vrot.slane %v7661_v61, 2  ;;  %v7610_v0 = vsel %vm7504_vm7, %v7501_v56, 0.0  ;;  %v7479_v25 = vsel %vm7447_vm8, 0.0, %v7335_v7 }
 0xaf2   :  { %v7611_v33 = vrot.slane %v7610_v0, 4  ;;  %v7778_v1 = vsel %vm7504_vm7, %v7479_v25, 0.0  ;;  %v15285_v39 = vadd.f32 %v7667_v24, %v7666_v54  ;;  %v7938_v56 = vsel %vm7923_vm6, %v7883_v16, 0.0 }
 0xaf3   :  { %v7663_v37 = vadd.f32 %v7662_v31, %v7661_v61  ;;  %v7779_v5 = vrot.slane %v7778_v1, 4  ;;  %v7934_v34 = vrot.slane %v7933_v53, 2  ;;  %v7988_v13 = vrot.slane %v7987_v42, 4 }
 0xaf4   :  { %v7612_v36 = vadd.f32 %v7611_v33, %v7610_v0  ;;  %v7982_v0 = vadd.f32 %v7981_v10, %v7980_v4  ;;  %v7994_v22 = vsel %vm7923_vm6, %v7907_v62, 0.0  ;;  %v7929_v46 = vrot.slane %v7928_v2, 1 }
 0xaf5   :  { %v7664_v51 = vrot.slane %v7663_v37, 1  ;;  %v7780_v54 = vadd.f32 %v7779_v5, %v7778_v1 }
 0xaf6   :  { %v10720_v32 = vpop.eup %10719  ;;  %v7613_v41 = vrot.slane %v7612_v36, 2  ;;  %v7983_v18 = vrot.slane %v7982_v0, 2 }
 0xaf7   :  { %v7257_v21 = vmul.f32 0.6931472, %v10720_v32  ;;  %v7665_v60 = vadd.f32 %v7664_v51, %v7663_v37  ;;  %v7939_v51 = vrot.slane %v7938_v56, 4  ;;  %v7910_v20 = vpop.xlane.xlu0 %7909  ;;  %v7781_v45 = vrot.slane %v7780_v54, 2 }
 0xaf8   :  { %v7614_v33 = vadd.f32 %v7613_v41, %v7612_v36  ;;  %v8001_v16 = vsel %vm7923_vm6, %v7910_v20, 0.0  ;;  %v7930_v36 = vadd.f32 %v7929_v46, %v7928_v2 }
 0xaf9   :  { %v7332_v35 = vmul.f32 0.01, %v7257_v21  ;;  %v15278_v14 = vsel %vm132_vm0, %v7553_v49, %v7665_v60  ;;  %v7935_v21 = vadd.f32 %v7934_v34, %v7933_v53 }
 0xafa   :  { %v7034_v48 = vpop.f32.mrb[112].mxu0  ;;  %v7615_v1 = vrot.slane %v7614_v33, 1 }
 0xafb   :  { %v7189_v29 = vmax.f32 %v7034_v48, 1e-10  ;;  %v7036_v8 = vpop.f32.mrb[113].mxu0  ;;  %v10722_v12 = vpop.eup %10721  ;;  %v7476_v17 = vsel %vm7446_vm5, 0.0, %v7332_v35  ;;  %v7989_v48 = vadd.f32 %v7988_v13, %v7987_v42  ;;  %v7995_v35 = vrot.slane %v7994_v22, 4 }
 0xafc   :  { %v7309_v38 = vmul.f32 0.6931472, %v10722_v12  ;;  %v7771_v19 = vsel %vm7504_vm7, %v7476_v17, 0.0  ;;  %v7940_v8 = vadd.f32 %v7939_v51, %v7938_v56 }
 0xafd   :  { %10723 = vlog2.f32 %v7189_v29  ;;  %v7772_v58 = vrot.slane %v7771_v19, 4  ;;  %v7669_v29 = vrot.slane %v15285_v39, 2  ;;  %v7990_v5 = vrot.slane %v7989_v48, 2 }
 0xafe   :  { %v7358_v26 = vmul.f32 0.01, %v7309_v38  ;;  %v7164_v61 = vpop.f32.mrb[124].mxu1  ;;  %v7936_v38 = vrot.slane %v7935_v21, 1 }
 0xaff   :  { %v7215_v31 = vmax.f32 %v7164_v61, 1e-10  ;;  %v7166_v63 = vpop.f32.mrb[125].mxu1  ;;  %v7773_v27 = vadd.f32 %v7772_v58, %v7771_v19  ;;  %v7984_v19 = vadd.f32 %v7983_v18, %v7982_v0  ;;  %v7996_v58 = vadd.f32 %v7995_v35, %v7994_v22 }
 0xb00   :  { %v7502_v37 = vsel %vm7455_vm3, 0.0, %v7358_v26  ;;  %v7941_v26 = vrot.slane %v7940_v8, 2  ;;  %v8002_v61 = vrot.slane %v8001_v16, 4  ;;  %v8037_v35 = vmul.f32 0.022222223, %v7930_v36 }
 0xb01   :  { %v7722_v7 = vsel %vm7504_vm7, %v7502_v37, 0.0  ;;  %10725 = vlog2.f32 %v7215_v31  ;;  %v7774_v32 = vrot.slane %v7773_v27, 2  ;;  %v7985_v22 = vrot.slane %v7984_v19, 1 }
 0xb02   :  { %v7723_v25 = vrot.slane %v7722_v7, 4  ;;  %v7997_v51 = vrot.slane %v7996_v58, 2  ;;  %v8003_v18 = vadd.f32 %v8002_v61, %v8001_v16 }
 0xb03   :  { %v7775_v60 = vadd.f32 %v7774_v32, %v7773_v27  ;;  %v7616_v27 = vadd.f32 %v7615_v1, %v7614_v33 }
 0xb04   :  { %v7724_v49 = vadd.f32 %v7723_v25, %v7722_v7  ;;  %v7942_v25 = vadd.f32 %v7941_v26, %v7940_v8  ;;  %v8004_v26 = vrot.slane %v8003_v18, 2 }
 0xb05   :  { %v7776_v24 = vrot.slane %v7775_v60, 1 }
 0xb06   :  { %v7725_v12 = vrot.slane %v7724_v49, 2 }
 0xb07   :  { %v10724_v4 = vpop.eup %10723  ;;  %v7777_v10 = vadd.f32 %v7776_v24, %v7775_v60  ;;  %v7886_v62 = vpop.xlane.xlu1 %7885  ;;  %v7782_v60 = vadd.f32 %v7781_v45, %v7780_v54 }
 0xb08   :  { %v7259_v17 = vmul.f32 0.6931472, %v10724_v4  ;;  %v7726_v53 = vadd.f32 %v7725_v12, %v7724_v49  ;;  %v7945_v2 = vsel %vm7923_vm6, %v7886_v62, 0.0  ;;  %v7670_v49 = vadd.f32 %v7669_v29, %v15285_v39 }
 0xb09   :  { %v15296_v56 = vsel %vm7857_vm11, %v15278_v14, %v7777_v10  ;;  %v7946_v13 = vrot.slane %v7945_v2, 4  ;;  %v7991_v14 = vadd.f32 %v7990_v5, %v7989_v48  ;;  %v7937_v4 = vadd.f32 %v7936_v38, %v7935_v21 }
 0xb0a   :  { %v7333_v42 = vmul.f32 0.01, %v7259_v17  ;;  %v7727_v41 = vrot.slane %v7726_v53, 1  ;;  %v7893_v34 = vsel %vm7874_vm12, %v15296_v56, 0.0  ;;  %v7986_v17 = vadd.f32 %v7985_v22, %v7984_v19 }
 0xb0b   :  { %v10726_v31 = vpop.eup %10725  ;;  %7894 = vadd.xlane.f32.xlu1 %v7893_v34  ;;  %v7947_v59 = vadd.f32 %v7946_v13, %v7945_v2  ;;  %v7992_v48 = vrot.slane %v7991_v14, 1  ;;  %v7943_v10 = vrot.slane %v7942_v25, 1  ;;  %v7783_v29 = vrot.slane %v7782_v60, 1 }
 0xb0c   :  { %v7477_v63 = vsel %vm7447_vm8, 0.0, %v7333_v42  ;;  %v7311_v0 = vmul.f32 0.6931472, %v10726_v31  ;;  %v7728_v7 = vadd.f32 %v7727_v41, %v7726_v53  ;;  %v7998_v53 = vadd.f32 %v7997_v51, %v7996_v58 }
 0xb0d   :  { %v7554_v37 = vsel %vm7504_vm7, %v7477_v63, 0.0  ;;  %v7948_v24 = vrot.slane %v7947_v59, 2  ;;  %v7671_v42 = vrot.slane %v7670_v49, 1  ;;  %v15310_v21 = vsub.f32 %v15082_v50, %v8037_v35 }
 0xb0e   :  { %v7555_v32 = vrot.slane %v7554_v37, 4  ;;  %v7359_v46 = vmul.f32 0.01, %v7311_v0  ;;  %v7856_v20 = vsel %vm132_vm0, %v7616_v27, %v7728_v7  ;;  %v8038_v3 = vmul.f32 0.022222223, %v7937_v4 }
 0xb0f   :  { %v7949_v54 = vadd.f32 %v7948_v24, %v7947_v59  ;;  %v8045_v16 = vmul.f32 0.022222223, %v7986_v17  ;;  %v7993_v36 = vadd.f32 %v7992_v48, %v7991_v14  ;;  %v7999_v19 = vrot.slane %v7998_v53, 1 }
 0xb10   :  { %v7556_v33 = vadd.f32 %v7555_v32, %v7554_v37  ;;  %v7503_v12 = vsel %vm7455_vm3, 0.0, %v7359_v46  ;;  %v7944_v61 = vadd.f32 %v7943_v10, %v7942_v25  ;;  %v7672_v41 = vadd.f32 %v7671_v42, %v7670_v49 }
 0xb11   :  { %v7834_v8 = vsel %vm7504_vm7, %v7503_v12, 0.0  ;;  %v8005_v58 = vadd.f32 %v8004_v26, %v8003_v18  ;;  %v7950_v31 = vrot.slane %v7949_v54, 1  ;;  %v7784_v2 = vadd.f32 %v7783_v29, %v7782_v60 }
 0xb12   :  { %v7557_v1 = vrot.slane %v7556_v33, 2  ;;  %v7835_v5 = vrot.slane %v7834_v8, 4  ;;  %v8069_v27 = vmul.f32 %v15310_v21, %v15310_v21  ;;  %v8046_v37 = vmul.f32 0.022222223, %v7993_v36 }
 0xb13   :  { %v15316_v0 = vsub.f32 %v15093_v11, %v8038_v3  ;;  %v15319_v13 = vsub.f32 %v15102_v28, %v8045_v16  ;;  %v8000_v7 = vadd.f32 %v7999_v19, %v7998_v53  ;;  %v8039_v22 = vmul.f32 0.022222223, %v7944_v61 }
 0xb14   :  { %v7558_v39 = vadd.f32 %v7557_v1, %v7556_v33  ;;  %v7836_v45 = vadd.f32 %v7835_v5, %v7834_v8  ;;  %v8006_v32 = vrot.slane %v8005_v58, 1  ;;  %v7951_v25 = vadd.f32 %v7950_v31, %v7949_v54 }
 0xb15   :  { %v8085_v28 = vsel %vm7874_vm12, %v8069_v27, 0.0  ;;  %v8070_v18 = vmul.f32 %v15316_v0, %v15316_v0  ;;  %v8077_v33 = vmul.f32 %v15319_v13, %v15319_v13  ;;  %v8047_v35 = vmul.f32 0.022222223, %v8000_v7 }
 0xb16   :  { %v7559_v38 = vrot.slane %v7558_v39, 1  ;;  %v7837_v62 = vrot.slane %v7836_v45, 2  ;;  %v15336_v12 = vsub.f32 %v15108_v15, %v8046_v37  ;;  %v15339_v24 = vsub.f32 %v15133_v55, %v8039_v22 }
 0xb17   :  { %v8007_v17 = vadd.f32 %v8006_v32, %v8005_v58  ;;  %v8040_v48 = vmul.f32 0.022222223, %v7951_v25  ;;  %v8088_v10 = vsel %vm7874_vm12, %v8070_v18, 0.0  ;;  %v15348_v5 = vsub.f32 %v15114_v44, %v8047_v35 }
 0xb18   :  { %v7560_v63 = vadd.f32 %v7559_v38, %v7558_v39  ;;  %v7838_v34 = vadd.f32 %v7837_v62, %v7836_v45  ;;  %v8078_v15 = vmul.f32 %v15336_v12, %v15336_v12  ;;  %v8071_v26 = vmul.f32 %v15339_v24, %v15339_v24 }
 0xb19   :  { %v8048_v55 = vmul.f32 0.022222223, %v8007_v17  ;;  %v15353_v39 = vsub.f32 %v15166_v23, %v8040_v48  ;;  %v8079_v45 = vmul.f32 %v15348_v5, %v15348_v5  ;;  %vm8637_vm7 = vcmask 1042434  }
 0xb1a   :  { %v7848_v50 = vsel %vm132_vm0, %v7560_v63, %v7672_v41  ;;  %v7839_v51 = vrot.slane %v7838_v34, 1  ;;  %v8112_v29 = vsel %vm7874_vm12, %v8078_v15, 0.0  ;;  %v8091_v44 = vsel %vm7874_vm12, %v8071_v26, 0.0 }
 0xb1b   :  { %v15322_v14 = vsel %vm7857_vm11, %v7848_v50, %v7784_v2  ;;  %v7913_v59 = vpop.xlane.xlu0 %7912  ;;  %v8072_v16 = vmul.f32 %v15353_v39, %v15353_v39  ;;  %v15362_v36 = vsub.f32 %v15152_v47, %v8048_v55  ;;  %v8115_v38 = vsel %vm7874_vm12, %v8079_v45, 0.0 }
 0xb1c   :  { %v7896_v46 = vsel %vm7874_vm12, %v15322_v14, 0.0  ;;  %v8008_v49 = vsel %vm7923_vm6, %v7913_v59, 0.0  ;;  %v7840_v11 = vadd.f32 %v7839_v51, %v7838_v34  ;;  %vm8635_vm0 = vcmask 1041409  }
 0xb1d   :  { %7897 = vadd.xlane.f32.xlu1 %v7896_v46  ;;  %v8009_v60 = vrot.slane %v8008_v49, 4  ;;  %v8094_v19 = vsel %vm7874_vm12, %v8072_v16, 0.0  ;;  %v8080_v61 = vmul.f32 %v15362_v36, %v15362_v36 }
 0xb1e   :  { %v15333_v4 = vsel %vm7857_vm11, %v7856_v20, %v7840_v11  ;;  %v8109_v20 = vsel %vm7874_vm12, %v8077_v33, 0.0  ;;  %vm8641_vm11 = vcmask 1044484  }
 0xb1f   :  { %v8010_v1 = vadd.f32 %v8009_v60, %v8008_v49  ;;  %v7920_v8 = vsel %vm7874_vm12, %v15333_v4, 0.0  ;;  %v8118_v41 = vsel %vm7874_vm12, %v8080_v61, 0.0 }
 0xb20   :  { %7921 = vadd.xlane.f32.xlu0 %v7920_v8 }
 0xb21   :  { %8086 = vadd.xlane.f32.xlu1 %v8085_v28  ;;  %v8011_v53 = vrot.slane %v8010_v1, 2 }
 0xb23   :  { %v8012_v42 = vadd.f32 %v8011_v53, %v8010_v1 }
 0xb24   :  { %8089 = vadd.xlane.f32.xlu0 %v8088_v10 }
 0xb25   :  { %8110 = vadd.xlane.f32.xlu1 %v8109_v20  ;;  %v8013_v54 = vrot.slane %v8012_v42, 1 }
 0xb27   :  { %v8014_v3 = vadd.f32 %v8013_v54, %v8012_v42 }
 0xb28   :  { %8113 = vadd.xlane.f32.xlu0 %v8112_v29 }
 0xb29   :  { %8092 = vadd.xlane.f32.xlu1 %v8091_v44  ;;  %v8049_v23 = vmul.f32 0.022222223, %v8014_v3 }
 0xb2b   :  { %v15369_v62 = vsub.f32 %v15182_v52, %v8049_v23 }
 0xb2c   :  { %8116 = vadd.xlane.f32.xlu0 %v8115_v38 }
 0xb2d   :  { %8095 = vadd.xlane.f32.xlu1 %v8094_v19  ;;  %v8081_v47 = vmul.f32 %v15369_v62, %v15369_v62 }
 0xb2f   :  { %v8121_v58 = vsel %vm7874_vm12, %v8081_v47, 0.0 }
 0xb30   :  { %8119 = vadd.xlane.f32.xlu0 %v8118_v41 }
 0xb34   :  { %8122 = vadd.xlane.f32.xlu0 %v8121_v58 }
 0xb38   :  { %v7889_v31 = vpop.xlane.xlu1 %7888 }
 0xb39   :  { %v7952_v63 = vsel %vm7923_vm6, %v7889_v31, 0.0 }
 0xb3a   :  { %v7953_v2 = vrot.slane %v7952_v63, 4 }
 0xb3c   :  { %v7954_v34 = vadd.f32 %v7953_v2, %v7952_v63 }
 0xb3e   :  { %v7955_v27 = vrot.slane %v7954_v34, 2 }
 0xb40   :  { %v7956_v37 = vadd.f32 %v7955_v27, %v7954_v34 }
 0xb42   :  { %v7957_v52 = vrot.slane %v7956_v37, 1 }
 0xb44   :  { %v7958_v50 = vadd.f32 %v7957_v52, %v7956_v37 }
 0xb46   :  { %v8041_v7 = vmul.f32 0.022222223, %v7958_v50 }
 0xb48   :  { %v15377_v22 = vsub.f32 %v15202_v40, %v8041_v7 }
 0xb4a   :  { %v8073_v51 = vmul.f32 %v15377_v22, %v15377_v22 }
 0xb4c   :  { %v8097_v32 = vsel %vm7874_vm12, %v8073_v51, 0.0 }
 0xb4d   :  { %v7916_v25 = vpop.xlane.xlu0 %7915  ;;  %8098 = vadd.xlane.f32.xlu1 %v8097_v32 }
 0xb4e   :  { %v8015_v46 = vsel %vm7923_vm6, %v7916_v25, 0.0 }
 0xb4f   :  { %v8016_v59 = vrot.slane %v8015_v46, 4 }
 0xb51   :  { %v8017_v49 = vadd.f32 %v8016_v59, %v8015_v46 }
 0xb53   :  { %v8018_v11 = vrot.slane %v8017_v49, 2 }
 0xb55   :  { %v8019_v60 = vadd.f32 %v8018_v11, %v8017_v49 }
 0xb57   :  { %v8020_v28 = vrot.slane %v8019_v60, 1 }
 0xb59   :  { %v8021_v18 = vadd.f32 %v8020_v28, %v8019_v60 }
 0xb5b   :  { %v8050_v33 = vmul.f32 0.022222223, %v8021_v18 }
 0xb5d   :  { %v15384_v35 = vsub.f32 %v15218_v30, %v8050_v33 }
 0xb5f   :  { %v8082_v40 = vmul.f32 %v15384_v35, %v15384_v35 }
 0xb61   :  { %v8124_v17 = vsel %vm7874_vm12, %v8082_v40, 0.0 }
 0xb62   :  { %8125 = vadd.xlane.f32.xlu0 %v8124_v17 }
 0xb68   :  { %v7892_v48 = vpop.xlane.xlu1 %7891 }
 0xb69   :  { %v7959_v1 = vsel %vm7923_vm6, %v7892_v48, 0.0 }
 0xb6a   :  { %v7960_v8 = vrot.slane %v7959_v1, 4 }
 0xb6c   :  { %v7961_v53 = vadd.f32 %v7960_v8, %v7959_v1 }
 0xb6e   :  { %v7962_v10 = vrot.slane %v7961_v53, 2 }
 0xb70   :  { %v7963_v20 = vadd.f32 %v7962_v10, %v7961_v53 }
 0xb72   :  { %v7964_v15 = vrot.slane %v7963_v20, 1 }
 0xb74   :  { %v7965_v55 = vadd.f32 %v7964_v15, %v7963_v20 }
 0xb76   :  { %v8042_v42 = vmul.f32 0.022222223, %v7965_v55 }
 0xb78   :  { %v15391_v26 = vsub.f32 %v15238_v57, %v8042_v42 }
 0xb7a   :  { %v8074_v30 = vmul.f32 %v15391_v26, %v15391_v26 }
 0xb7c   :  { %v8100_v54 = vsel %vm7874_vm12, %v8074_v30, 0.0 }
 0xb7d   :  { %v7919_v29 = vpop.xlane.xlu0 %7918  ;;  %8101 = vadd.xlane.f32.xlu1 %v8100_v54 }
 0xb7e   :  { %v8022_v45 = vsel %vm7923_vm6, %v7919_v29, 0.0 }
 0xb7f   :  { %v8023_v3 = vrot.slane %v8022_v45, 4 }
 0xb81   :  { %v8024_v44 = vadd.f32 %v8023_v3, %v8022_v45 }
 0xb83   :  { %v8025_v16 = vrot.slane %v8024_v44, 2 }
 0xb85   :  { %v8026_v23 = vadd.f32 %v8025_v16, %v8024_v44 }
 0xb87   :  { %v8027_v38 = vrot.slane %v8026_v23, 1 }
 0xb89   :  { %v8028_v19 = vadd.f32 %v8027_v38, %v8026_v23 }
 0xb8b   :  { %v8051_v61 = vmul.f32 0.022222223, %v8028_v19 }
 0xb8d   :  { %v15398_v41 = vsub.f32 %v15261_v9, %v8051_v61 }
 0xb8f   :  { %v8083_v57 = vmul.f32 %v15398_v41, %v15398_v41 }
 0xb91   :  { %v8127_v47 = vsel %vm7874_vm12, %v8083_v57, 0.0 }
 0xb92   :  { %8128 = vadd.xlane.f32.xlu0 %v8127_v47 }
 0xb98   :  { %v7895_v58 = vpop.xlane.xlu1 %7894 }
 0xb99   :  { %v7966_v31 = vsel %vm7923_vm6, %v7895_v58, 0.0 }
 0xb9a   :  { %v7967_v63 = vrot.slane %v7966_v31, 4 }
 0xb9c   :  { %v7968_v2 = vadd.f32 %v7967_v63, %v7966_v31 }
 0xb9e   :  { %v7969_v34 = vrot.slane %v7968_v2, 2 }
 0xba0   :  { %v7970_v27 = vadd.f32 %v7969_v34, %v7968_v2 }
 0xba2   :  { %v7971_v37 = vrot.slane %v7970_v27, 1 }
 0xba4   :  { %v7972_v52 = vadd.f32 %v7971_v37, %v7970_v27 }
 0xba6   :  { %v8043_v50 = vmul.f32 0.022222223, %v7972_v52 }
 0xba8   :  { %v15405_v9 = vsub.f32 %v15296_v56, %v8043_v50 }
 0xbaa   :  { %v7898_v7 = vpop.xlane.xlu1 %7897  ;;  %v8075_v25 = vmul.f32 %v15405_v9, %v15405_v9 }
 0xbab   :  { %v7973_v51 = vsel %vm7923_vm6, %v7898_v7, 0.0 }
 0xbac   :  { %v7974_v32 = vrot.slane %v7973_v51, 4  ;;  %v8103_v11 = vsel %vm7874_vm12, %v8075_v25, 0.0 }
 0xbad   :  { %v7922_v59 = vpop.xlane.xlu0 %7921  ;;  %8104 = vadd.xlane.f32.xlu1 %v8103_v11 }
 0xbae   :  { %v7975_v46 = vadd.f32 %v7974_v32, %v7973_v51  ;;  %v8087_v49 = vpop.xlane.xlu1 %8086  ;;  %v8029_v60 = vsel %vm7923_vm6, %v7922_v59, 0.0 }
 0xbaf   :  { %v8133_v28 = vsel %vm7923_vm6, %v8087_v49, 0.0  ;;  %v8030_v33 = vrot.slane %v8029_v60, 4 }
 0xbb0   :  { %v7976_v18 = vrot.slane %v7975_v46, 2  ;;  %v8134_v56 = vrot.slane %v8133_v28, 4 }
 0xbb1   :  { %v8031_v17 = vadd.f32 %v8030_v33, %v8029_v60  ;;  %v8090_v1 = vpop.xlane.xlu0 %8089 }
 0xbb2   :  { %v7977_v40 = vadd.f32 %v7976_v18, %v7975_v46  ;;  %v8135_v48 = vadd.f32 %v8134_v56, %v8133_v28  ;;  %v8111_v8 = vpop.xlane.xlu1 %8110  ;;  %v8140_v53 = vsel %vm7923_vm6, %v8090_v1, 0.0 }
 0xbb3   :  { %v8189_v10 = vsel %vm7923_vm6, %v8111_v8, 0.0  ;;  %v8032_v15 = vrot.slane %v8031_v17, 2  ;;  %v8141_v42 = vrot.slane %v8140_v53, 4 }
 0xbb4   :  { %v7978_v20 = vrot.slane %v7977_v40, 1  ;;  %v8136_v55 = vrot.slane %v8135_v48, 2  ;;  %v8190_v30 = vrot.slane %v8189_v10, 4 }
 0xbb5   :  { %v8033_v29 = vadd.f32 %v8032_v15, %v8031_v17  ;;  %v8142_v3 = vadd.f32 %v8141_v42, %v8140_v53  ;;  %v8114_v44 = vpop.xlane.xlu0 %8113 }
 0xbb6   :  { %v7979_v54 = vadd.f32 %v7978_v20, %v7977_v40  ;;  %v8137_v45 = vadd.f32 %v8136_v55, %v8135_v48  ;;  %v8093_v16 = vpop.xlane.xlu1 %8092  ;;  %v8191_v23 = vadd.f32 %v8190_v30, %v8189_v10  ;;  %v8196_v38 = vsel %vm7923_vm6, %v8114_v44, 0.0 }
 0xbb7   :  { %v8147_v19 = vsel %vm7923_vm6, %v8093_v16, 0.0  ;;  %v8034_v57 = vrot.slane %v8033_v29, 1  ;;  %v8143_v58 = vrot.slane %v8142_v3, 2  ;;  %v8197_v63 = vrot.slane %v8196_v38, 4 }
 0xbb8   :  { %v8044_v61 = vmul.f32 0.022222223, %v7979_v54  ;;  %v8138_v47 = vrot.slane %v8137_v45, 1  ;;  %v8192_v31 = vrot.slane %v8191_v23, 2  ;;  %v8148_v2 = vrot.slane %v8147_v19, 4 }
 0xbb9   :  { %v8035_v34 = vadd.f32 %v8034_v57, %v8033_v29  ;;  %v8144_v37 = vadd.f32 %v8143_v58, %v8142_v3  ;;  %v8117_v52 = vpop.xlane.xlu0 %8116  ;;  %v8198_v32 = vadd.f32 %v8197_v63, %v8196_v38 }
 0xbba   :  { %v8139_v27 = vadd.f32 %v8138_v47, %v8137_v45  ;;  %v8096_v50 = vpop.xlane.xlu1 %8095  ;;  %v15418_v7 = vsub.f32 %v15322_v14, %v8044_v61  ;;  %v8193_v51 = vadd.f32 %v8192_v31, %v8191_v23  ;;  %v8149_v25 = vadd.f32 %v8148_v2, %v8147_v19 }
 0xbbb   :  { %v8203_v46 = vsel %vm7923_vm6, %v8117_v52, 0.0  ;;  %v8052_v59 = vmul.f32 0.022222223, %v8035_v34  ;;  %v8145_v11 = vrot.slane %v8144_v37, 1  ;;  %v8199_v18 = vrot.slane %v8198_v32, 2 }
 0xbbc   :  { %v8245_v49 = vmul.f32 0.022222223, %v8139_v27  ;;  %v8204_v60 = vrot.slane %v8203_v46, 4  ;;  %v8194_v28 = vrot.slane %v8193_v51, 1  ;;  %v8150_v33 = vrot.slane %v8149_v25, 2 }
 0xbbd   :  { %v8154_v56 = vsel %vm7923_vm6, %v8096_v50, 0.0  ;;  %v8146_v17 = vadd.f32 %v8145_v11, %v8144_v37  ;;  %v8120_v14 = vpop.xlane.xlu0 %8119  ;;  %v8200_v53 = vadd.f32 %v8199_v18, %v8198_v32  ;;  %v8076_v23 = vmul.f32 %v15418_v7, %v15418_v7 }
 0xbbe   :  { %v8261_v40 = vadd.f32 1e-05, %v8245_v49  ;;  %v8205_v48 = vadd.f32 %v8204_v60, %v8203_v46  ;;  %v8155_v1 = vrot.slane %v8154_v56, 4  ;;  %v8195_v8 = vadd.f32 %v8194_v28, %v8193_v51 }
 0xbbf   :  { %v8151_v10 = vadd.f32 %v8150_v33, %v8149_v25  ;;  %v8210_v20 = vsel %vm7923_vm6, %v8120_v14, 0.0  ;;  %v8246_v15 = vmul.f32 0.022222223, %v8146_v17  ;;  %v8201_v54 = vrot.slane %v8200_v53, 1 }
 0xbc0   :  { %10727 = vrsqrt.f32 %v8261_v40  ;;  %v8206_v55 = vrot.slane %v8205_v48, 2  ;;  %v8156_v42 = vadd.f32 %v8155_v1, %v8154_v56  ;;  %v8253_v30 = vmul.f32 0.022222223, %v8195_v8  ;;  %v15435_v56 = vld [vmem:[%s15621_s8] sm:$0x7] }
 0xbc1   :  { %v8152_v29 = vrot.slane %v8151_v10, 1  ;;  %v8211_v45 = vrot.slane %v8210_v20, 4  ;;  %v8262_v3 = vadd.f32 1e-05, %v8246_v15  ;;  %v8202_v19 = vadd.f32 %v8201_v54, %v8200_v53  ;;  %v8123_v47 = vpop.xlane.xlu0 %8122  ;;  %v15442_v53 = vld [vmem:[%s15621_s8 + $0x4] sm:$0x7] }
 0xbc2   :  { %v8207_v44 = vadd.f32 %v8206_v55, %v8205_v48  ;;  %v8157_v16 = vrot.slane %v8156_v42, 2  ;;  %v8269_v38 = vadd.f32 1e-05, %v8253_v30  ;;  %v8106_v63 = vsel %vm7874_vm12, %v8076_v23, 0.0 }
 0xbc3   :  { %v8153_v61 = vadd.f32 %v8152_v29, %v8151_v10  ;;  %v8212_v57 = vadd.f32 %v8211_v45, %v8210_v20  ;;  %10729 = vrsqrt.f32 %v8262_v3  ;;  %v8254_v2 = vmul.f32 0.022222223, %v8202_v19  ;;  %8107 = vadd.xlane.f32.xlu1 %v8106_v63 }
 0xbc4   :  { %v8208_v58 = vrot.slane %v8207_v44, 1  ;;  %v8158_v31 = vadd.f32 %v8157_v16, %v8156_v42  ;;  %10731 = vrsqrt.f32 %v8269_v38  ;;  %v8217_v50 = vsel %vm7923_vm6, %v8123_v47, 0.0  ;;  %v15448_v42 = vld [vmem:[%s15621_s8 + $0x8] sm:$0x7]  ;;  %s10827_s8 = smov [#allocation3]  }
 0xbc5   :  { %v8247_v34 = vmul.f32 0.022222223, %v8153_v61  ;;  %v8213_v27 = vrot.slane %v8212_v57, 2  ;;  %v15428_v51 = vsub.f32 %v15333_v4, %v8052_v59  ;;  %v8270_v32 = vadd.f32 1e-05, %v8254_v2  ;;  %s8682_s5 = sshll.u32 %s10827_s8, 4  ;;  %s8683_s5 = int_to_ptr.vmem [resolvable:$true] %s8682_s5 }
 0xbc6   :  { %v8209_v37 = vadd.f32 %v8208_v58, %v8207_v44  ;;  %v8159_v52 = vrot.slane %v8158_v31, 1  ;;  %v8218_v49 = vrot.slane %v8217_v50, 4  ;;  %s10793_s20 = scalar_lea.vmem %s8683_s5, 16  ;;  %s10797_s21 = scalar_lea.vmem %s8683_s5, 32 }
 0xbc7   :  { %v8263_v25 = vadd.f32 1e-05, %v8247_v34  ;;  %v8214_v46 = vadd.f32 %v8213_v27, %v8212_v57  ;;  %v8084_v28 = vmul.f32 %v15428_v51, %v15428_v51  ;;  %10733 = vrsqrt.f32 %v8270_v32  ;;  %p10794_p0 = scmp.ne.s32.totalorder %s8683_s5, %s10793_s20  ;;  %p10798_p1 = scmp.lt.s32.totalorder %s8683_s5, %s8683_s5 }
 0xbc8   :  { %v8255_v11 = vmul.f32 0.022222223, %v8209_v37  ;;  %v8160_v60 = vadd.f32 %v8159_v52, %v8158_v31  ;;  %v8219_v33 = vadd.f32 %v8218_v49, %v8217_v50  ;;  %p10799_p2 = scmp.lt.s32.totalorder %s10797_s21, %s10793_s20 }
 0xbc9   :  { %v8215_v18 = vrot.slane %v8214_v46, 1  ;;  %10735 = vrsqrt.f32 %v8263_v25  ;;  %v8130_v17 = vsel %vm7874_vm12, %v8084_v28, 0.0 }
 0xbca   :  { %v10728_v40 = vpop.eup %10727  ;;  %v8271_v4 = vadd.f32 1e-05, %v8255_v11  ;;  %v8248_v59 = vmul.f32 0.022222223, %v8160_v60  ;;  %v8220_v1 = vrot.slane %v8219_v33, 2  ;;  %8131 = vadd.xlane.f32.xlu0 %v8130_v17  ;;  %p10800_p3 = por %p10799_p2, %p10798_p1 }
 0xbcb   :  { %v8216_v48 = vadd.f32 %v8215_v18, %v8214_v46  ;;  %v8293_v14 = vmul.f32 %v10728_v40, %v15310_v21 }
 0xbcc   :  { %10737 = vrsqrt.f32 %v8271_v4  ;;  %v8264_v8 = vadd.f32 1e-05, %v8248_v59  ;;  %v8221_v20 = vadd.f32 %v8220_v1, %v8219_v33  ;;  %p10801_p4 = pnand %p10800_p3, %p10794_p0 }
 0xbcd   :  { %v8256_v10 = vmul.f32 0.022222223, %v8216_v48  ;;  %v8310_v15 = vmul.f32 %v15435_v56, %v8293_v14  ;;  %v10730_v55 = vpop.eup %10729 }
 0xbce   :  { %10739 = vrsqrt.f32 %v8264_v8  ;;  %v10732_v30 = vpop.eup %10731  ;;  %v8222_v54 = vrot.slane %v8221_v20, 1  ;;  %v8294_v45 = vmul.f32 %v10730_v55, %v15316_v0 }
 0xbcf   :  { %v8272_v21 = vadd.f32 1e-05, %v8256_v10  ;;  %v8328_v29 = vadd.f32 %v15442_v53, %v8310_v15  ;;  %v8301_v3 = vmul.f32 %v10732_v30, %v15319_v13 }
 0xbd0   :  { %v8223_v44 = vadd.f32 %v8222_v54, %v8221_v20  ;;  %v8311_v23 = vmul.f32 %v15435_v56, %v8294_v45 }
 0xbd1   :  { %10741 = vrsqrt.f32 %v8272_v21  ;;  %v8346_v16 = vmul.f32 %v15448_v42, %v8328_v29  ;;  %v8318_v38 = vmul.f32 %v15435_v56, %v8301_v3  ;;  %v10734_v19 = vpop.eup %10733 }
 0xbd2   :  { %v8257_v61 = vmul.f32 0.022222223, %v8223_v44  ;;  %v8329_v47 = vadd.f32 %v15442_v53, %v8311_v23  ;;  %v8302_v13 = vmul.f32 %v10734_v19, %v15336_v12 }
 0xbd3   :  { %v8362_v57 = vsel %vm7874_vm12, %v8346_v16, 0.0  ;;  %v10736_v58 = vpop.eup %10735  ;;  %v8336_v0 = vadd.f32 %v15442_v53, %v8318_v38 }
 0xbd4   :  { %8363 = vadd.xlane.f32.xlu1 %v8362_v57  ;;  %v8273_v31 = vadd.f32 1e-05, %v8257_v61  ;;  %v8347_v63 = vmul.f32 %v15448_v42, %v8329_v47  ;;  %v8295_v2 = vmul.f32 %v10736_v58, %v15339_v24  ;;  %v8319_v37 = vmul.f32 %v15435_v56, %v8302_v13 }
 0xbd5   :  { %v8354_v27 = vmul.f32 %v15448_v42, %v8336_v0 }
 0xbd6   :  { %v10738_v34 = vpop.eup %10737  ;;  %10743 = vrsqrt.f32 %v8273_v31  ;;  %v8365_v52 = vsel %vm7874_vm12, %v8347_v63, 0.0  ;;  %v8312_v50 = vmul.f32 %v15435_v56, %v8295_v2  ;;  %v8337_v46 = vadd.f32 %v15442_v53, %v8319_v37 }
 0xbd7   :  { %v8303_v32 = vmul.f32 %v10738_v34, %v15348_v5  ;;  %8366 = vadd.xlane.f32.xlu0 %v8365_v52  ;;  %v8386_v12 = vsel %vm7874_vm12, %v8354_v27, 0.0 }
 0xbd8   :  { %v10740_v25 = vpop.eup %10739  ;;  %8387 = vadd.xlane.f32.xlu1 %v8386_v12  ;;  %v8330_v24 = vadd.f32 %v15442_v53, %v8312_v50  ;;  %v8355_v60 = vmul.f32 %v15448_v42, %v8337_v46 }
 0xbd9   :  { %v8320_v49 = vmul.f32 %v15435_v56, %v8303_v32  ;;  %v8296_v11 = vmul.f32 %v10740_v25, %v15353_v39 }
 0xbda   :  { %v8099_v18 = vpop.xlane.xlu1 %8098  ;;  %v8348_v33 = vmul.f32 %v15448_v42, %v8330_v24  ;;  %v8389_v59 = vsel %vm7874_vm12, %v8355_v60, 0.0 }
 0xbdb   :  { %v10742_v28 = vpop.eup %10741  ;;  %v8338_v5 = vadd.f32 %v15442_v53, %v8320_v49  ;;  %v8313_v40 = vmul.f32 %v15435_v56, %v8296_v11  ;;  %v8161_v4 = vsel %vm7923_vm6, %v8099_v18, 0.0  ;;  %8390 = vadd.xlane.f32.xlu0 %v8389_v59 }
 0xbdc   :  { %v8304_v17 = vmul.f32 %v10742_v28, %v15362_v36  ;;  %v8162_v48 = vrot.slane %v8161_v4, 4  ;;  %v8368_v39 = vsel %vm7874_vm12, %v8348_v33, 0.0 }
 0xbdd   :  { %v8356_v1 = vmul.f32 %v15448_v42, %v8338_v5  ;;  %v8331_v14 = vadd.f32 %v15442_v53, %v8313_v40  ;;  %8369 = vadd.xlane.f32.xlu1 %v8368_v39 }
 0xbde   :  { %v8321_v8 = vmul.f32 %v15435_v56, %v8304_v17  ;;  %v8163_v10 = vadd.f32 %v8162_v48, %v8161_v4 }
 0xbdf   :  { %v8392_v20 = vsel %vm7874_vm12, %v8356_v1, 0.0  ;;  %v8349_v15 = vmul.f32 %v15448_v42, %v8331_v14 }
 0xbe0   :  { %v8339_v55 = vadd.f32 %v15442_v53, %v8321_v8  ;;  %v10744_v30 = vpop.eup %10743  ;;  %v8164_v36 = vrot.slane %v8163_v10, 2  ;;  %8393 = vadd.xlane.f32.xlu0 %v8392_v20 }
 0xbe1   :  { %v8371_v21 = vsel %vm7874_vm12, %v8349_v15, 0.0  ;;  %v8305_v29 = vmul.f32 %v10744_v30, %v15369_v62 }
 0xbe2   :  { %8372 = vadd.xlane.f32.xlu1 %v8371_v21  ;;  %v8357_v54 = vmul.f32 %v15448_v42, %v8339_v55  ;;  %v8165_v45 = vadd.f32 %v8164_v36, %v8163_v10 }
 0xbe3   :  { %v8322_v44 = vmul.f32 %v15435_v56, %v8305_v29 }
 0xbe4   :  { %v8395_v3 = vsel %vm7874_vm12, %v8357_v54, 0.0  ;;  %v8166_v16 = vrot.slane %v8165_v45, 1 }
 0xbe5   :  { %8396 = vadd.xlane.f32.xlu0 %v8395_v3  ;;  %v8340_v23 = vadd.f32 %v15442_v53, %v8322_v44 }
 0xbe6   :  { %v8167_v38 = vadd.f32 %v8166_v16, %v8165_v45 }
 0xbe7   :  { %v8358_v19 = vmul.f32 %v15448_v42, %v8340_v23 }
 0xbe8   :  { %v8249_v61 = vmul.f32 0.022222223, %v8167_v38 }
 0xbe9   :  { %v8398_v57 = vsel %vm7874_vm12, %v8358_v19, 0.0 }
 0xbea   :  { %v8265_v47 = vadd.f32 1e-05, %v8249_v61  ;;  %8399 = vadd.xlane.f32.xlu0 %v8398_v57 }
 0xbec   :  { %10745 = vrsqrt.f32 %v8265_v47 }
 0xbef   :  { %v8126_v58 = vpop.xlane.xlu0 %8125 }
 0xbf0   :  { %v8224_v62 = vsel %vm7923_vm6, %v8126_v58, 0.0 }
 0xbf1   :  { %v8225_v0 = vrot.slane %v8224_v62, 4 }
 0xbf3   :  { %v8226_v13 = vadd.f32 %v8225_v0, %v8224_v62 }
 0xbf5   :  { %v8227_v31 = vrot.slane %v8226_v13, 2 }
 0xbf6   :  { %v10746_v63 = vpop.eup %10745 }
 0xbf7   :  { %v8228_v2 = vadd.f32 %v8227_v31, %v8226_v13  ;;  %v8297_v34 = vmul.f32 %v10746_v63, %v15377_v22 }
 0xbf9   :  { %v8229_v27 = vrot.slane %v8228_v2, 1  ;;  %v8314_v37 = vmul.f32 %v15435_v56, %v8297_v34 }
 0xbfb   :  { %v8230_v52 = vadd.f32 %v8229_v27, %v8228_v2  ;;  %v8332_v50 = vadd.f32 %v15442_v53, %v8314_v37 }
 0xbfd   :  { %v8258_v32 = vmul.f32 0.022222223, %v8230_v52  ;;  %v8350_v25 = vmul.f32 %v15448_v42, %v8332_v50 }
 0xbff   :  { %v8274_v12 = vadd.f32 1e-05, %v8258_v32  ;;  %v8374_v46 = vsel %vm7874_vm12, %v8350_v25, 0.0 }
 0xc00   :  { %8375 = vadd.xlane.f32.xlu1 %v8374_v46 }
 0xc01   :  { %10747 = vrsqrt.f32 %v8274_v12 }
 0xc0a   :  { %v8102_v49 = vpop.xlane.xlu1 %8101 }
 0xc0b   :  { %v10748_v24 = vpop.eup %10747  ;;  %v8168_v11 = vsel %vm7923_vm6, %v8102_v49, 0.0 }
 0xc0c   :  { %v8306_v22 = vmul.f32 %v10748_v24, %v15384_v35  ;;  %v8169_v60 = vrot.slane %v8168_v11, 4 }
 0xc0e   :  { %v8323_v28 = vmul.f32 %v15435_v56, %v8306_v22  ;;  %v8170_v18 = vadd.f32 %v8169_v60, %v8168_v11 }
 0xc10   :  { %v8341_v33 = vadd.f32 %v15442_v53, %v8323_v28  ;;  %v8171_v5 = vrot.slane %v8170_v18, 2 }
 0xc12   :  { %v8359_v40 = vmul.f32 %v15448_v42, %v8341_v33  ;;  %v8172_v4 = vadd.f32 %v8171_v5, %v8170_v18 }
 0xc14   :  { %v8401_v59 = vsel %vm7874_vm12, %v8359_v40, 0.0  ;;  %v8173_v17 = vrot.slane %v8172_v4, 1 }
 0xc15   :  { %8402 = vadd.xlane.f32.xlu0 %v8401_v59 }
 0xc16   :  { %v8174_v48 = vadd.f32 %v8173_v17, %v8172_v4 }
 0xc18   :  { %v8250_v39 = vmul.f32 0.022222223, %v8174_v48 }
 0xc1a   :  { %v8266_v1 = vadd.f32 1e-05, %v8250_v39 }
 0xc1c   :  { %10749 = vrsqrt.f32 %v8266_v1 }
 0xc1f   :  { %v8129_v14 = vpop.xlane.xlu0 %8128 }
 0xc20   :  { %v8231_v35 = vsel %vm7923_vm6, %v8129_v14, 0.0 }
 0xc21   :  { %v8232_v8 = vrot.slane %v8231_v35, 4 }
 0xc23   :  { %v8233_v10 = vadd.f32 %v8232_v8, %v8231_v35 }
 0xc25   :  { %v8234_v20 = vrot.slane %v8233_v10, 2 }
 0xc26   :  { %v10750_v15 = vpop.eup %10749 }
 0xc27   :  { %v8235_v55 = vadd.f32 %v8234_v20, %v8233_v10  ;;  %v8298_v30 = vmul.f32 %v10750_v15, %v15391_v26 }
 0xc29   :  { %v8236_v36 = vrot.slane %v8235_v55, 1  ;;  %v8315_v21 = vmul.f32 %v15435_v56, %v8298_v30 }
 0xc2b   :  { %v8237_v54 = vadd.f32 %v8236_v36, %v8235_v55  ;;  %v8333_v29 = vadd.f32 %v15442_v53, %v8315_v21 }
 0xc2d   :  { %v8259_v45 = vmul.f32 0.022222223, %v8237_v54  ;;  %v8351_v3 = vmul.f32 %v15448_v42, %v8333_v29 }
 0xc2f   :  { %v8275_v44 = vadd.f32 1e-05, %v8259_v45  ;;  %v8377_v16 = vsel %vm7874_vm12, %v8351_v3, 0.0 }
 0xc30   :  { %8378 = vadd.xlane.f32.xlu1 %v8377_v16 }
 0xc31   :  { %10751 = vrsqrt.f32 %v8275_v44 }
 0xc3a   :  { %v8105_v23 = vpop.xlane.xlu1 %8104 }
 0xc3b   :  { %v10752_v38 = vpop.eup %10751  ;;  %v8175_v19 = vsel %vm7923_vm6, %v8105_v23, 0.0 }
 0xc3c   :  { %v8176_v61 = vrot.slane %v8175_v19, 4  ;;  %v8307_v26 = vmul.f32 %v10752_v38, %v15398_v41 }
 0xc3e   :  { %v8177_v57 = vadd.f32 %v8176_v61, %v8175_v19  ;;  %v8324_v47 = vmul.f32 %v15435_v56, %v8307_v26 }
 0xc40   :  { %v8178_v58 = vrot.slane %v8177_v57, 2  ;;  %v8342_v62 = vadd.f32 %v15442_v53, %v8324_v47 }
 0xc42   :  { %v8179_v0 = vadd.f32 %v8178_v58, %v8177_v57  ;;  %v8360_v13 = vmul.f32 %v15448_v42, %v8342_v62 }
 0xc44   :  { %v8180_v31 = vrot.slane %v8179_v0, 1  ;;  %v8404_v63 = vsel %vm7874_vm12, %v8360_v13, 0.0 }
 0xc45   :  { %8405 = vadd.xlane.f32.xlu0 %v8404_v63 }
 0xc46   :  { %v8181_v2 = vadd.f32 %v8180_v31, %v8179_v0 }
 0xc48   :  { %v8251_v34 = vmul.f32 0.022222223, %v8181_v2 }
 0xc4a   :  { %v8267_v27 = vadd.f32 1e-05, %v8251_v34 }
 0xc4c   :  { %10753 = vrsqrt.f32 %v8267_v27 }
 0xc50   :  { %v8108_v37 = vpop.xlane.xlu1 %8107 }
 0xc51   :  { %v8182_v41 = vsel %vm7923_vm6, %v8108_v37, 0.0 }
 0xc52   :  { %v8183_v52 = vrot.slane %v8182_v41, 4 }
 0xc54   :  { %v8184_v50 = vadd.f32 %v8183_v52, %v8182_v41 }
 0xc56   :  { %v10754_v32 = vpop.eup %10753  ;;  %v8185_v25 = vrot.slane %v8184_v50, 2 }
 0xc57   :  { %v8132_v12 = vpop.xlane.xlu0 %8131  ;;  %v8299_v24 = vmul.f32 %v10754_v32, %v15405_v9 }
 0xc58   :  { %v8238_v46 = vsel %vm7923_vm6, %v8132_v12, 0.0  ;;  %v8186_v49 = vadd.f32 %v8185_v25, %v8184_v50 }
 0xc59   :  { %v8239_v11 = vrot.slane %v8238_v46, 4  ;;  %v8316_v22 = vmul.f32 %v15435_v56, %v8299_v24 }
 0xc5a   :  { %v8187_v60 = vrot.slane %v8186_v49, 1 }
 0xc5b   :  { %v8240_v28 = vadd.f32 %v8239_v11, %v8238_v46  ;;  %v8334_v18 = vadd.f32 %v15442_v53, %v8316_v22 }
 0xc5c   :  { %v8188_v33 = vadd.f32 %v8187_v60, %v8186_v49 }
 0xc5d   :  { %v8241_v5 = vrot.slane %v8240_v28, 2  ;;  %v8352_v40 = vmul.f32 %v15448_v42, %v8334_v18 }
 0xc5e   :  { %v8252_v4 = vmul.f32 0.022222223, %v8188_v33 }
 0xc5f   :  { %v8242_v59 = vadd.f32 %v8241_v5, %v8240_v28  ;;  %v8380_v17 = vsel %vm7874_vm12, %v8352_v40, 0.0 }
 0xc60   :  { %v8268_v48 = vadd.f32 1e-05, %v8252_v4  ;;  %8381 = vadd.xlane.f32.xlu1 %v8380_v17 }
 0xc61   :  { %v8243_v39 = vrot.slane %v8242_v59, 1  ;;  %v8364_v45 = vpop.xlane.xlu1 %8363 }
 0xc62   :  { %10755 = vrsqrt.f32 %v8268_v48  ;;  %v8410_v26 = vsel %vm7923_vm6, %v8364_v45, 0.0 }
 0xc63   :  { %v8244_v9 = vadd.f32 %v8243_v39, %v8242_v59 }
 0xc64   :  { %v8367_v3 = vpop.xlane.xlu0 %8366 }
 0xc65   :  { %v8260_v1 = vmul.f32 0.022222223, %v8244_v9  ;;  %v8388_v44 = vpop.xlane.xlu1 %8387 }
 0xc67   :  { %v8276_v14 = vadd.f32 1e-05, %v8260_v1 }
 0xc68   :  { %v8391_v16 = vpop.xlane.xlu0 %8390 }
 0xc69   :  { %10757 = vrsqrt.f32 %v8276_v14  ;;  %v8473_v58 = vsel %vm7923_vm6, %v8391_v16, 0.0 }
 0xc6a   :  { %v8370_v23 = vpop.xlane.xlu1 %8369  ;;  %v8474_v34 = vrot.slane %v8473_v58, 4 }
 0xc6b   :  { %v8424_v13 = vsel %vm7923_vm6, %v8370_v23, 0.0 }
 0xc6c   :  { %v10756_v35 = vpop.eup %10755  ;;  %v8425_v41 = vrot.slane %v8424_v13, 4  ;;  %v8475_v11 = vadd.f32 %v8474_v34, %v8473_v58  ;;  %v15549_v34 = vld [vmem:[#allocation2] sm:$0x1] }
 0xc6d   :  { %v8300_v8 = vmul.f32 %v10756_v35, %v15418_v7 }
 0xc6e   :  { %v8426_v18 = vadd.f32 %v8425_v41, %v8424_v13  ;;  %v8476_v1 = vrot.slane %v8475_v11, 2 }
 0xc6f   :  { %v8317_v20 = vmul.f32 %v15435_v56, %v8300_v8  ;;  %v8373_v38 = vpop.xlane.xlu1 %8372 }
 0xc70   :  { %v8431_v31 = vsel %vm7923_vm6, %v8373_v38, 0.0 }
 0xc71   :  { %v8335_v15 = vadd.f32 %v15442_v53, %v8317_v20  ;;  %v8432_v25 = vrot.slane %v8431_v31, 4  ;;  %v8427_v20 = vrot.slane %v8426_v18, 2 }
 0xc73   :  { %v10758_v10 = vpop.eup %10757  ;;  %v8353_v30 = vmul.f32 %v15448_v42, %v8335_v15  ;;  %v8433_v17 = vadd.f32 %v8432_v25, %v8431_v31 }
 0xc74   :  { %v8308_v55 = vmul.f32 %v10758_v10, %v15428_v51  ;;  %v8394_v51 = vpop.xlane.xlu0 %8393 }
 0xc75   :  { %v8383_v36 = vsel %vm7874_vm12, %v8353_v30, 0.0  ;;  %v8480_v46 = vsel %vm7923_vm6, %v8394_v51, 0.0  ;;  %v8428_v51 = vadd.f32 %v8427_v20, %v8426_v18 }
 0xc76   :  { %v8325_v21 = vmul.f32 %v15435_v56, %v8308_v55  ;;  %8384 = vadd.xlane.f32.xlu1 %v8383_v36  ;;  %v8417_v56 = vsel %vm7923_vm6, %v8367_v3, 0.0  ;;  %v8481_v59 = vrot.slane %v8480_v46, 4  ;;  %v8477_v3 = vadd.f32 %v8476_v1, %v8475_v11 }
 0xc77   :  { %v8418_v47 = vrot.slane %v8417_v56, 4  ;;  %v8429_v31 = vrot.slane %v8428_v51, 1 }
 0xc78   :  { %v8343_v54 = vadd.f32 %v15442_v53, %v8325_v21  ;;  %v8397_v19 = vpop.xlane.xlu0 %8396  ;;  %v8466_v53 = vsel %vm7923_vm6, %v8388_v44, 0.0  ;;  %v8482_v21 = vadd.f32 %v8481_v59, %v8480_v46  ;;  %v8478_v58 = vrot.slane %v8477_v3, 1 }
 0xc79   :  { %v8467_v0 = vrot.slane %v8466_v53, 4  ;;  %v8419_v37 = vadd.f32 %v8418_v47, %v8417_v56  ;;  %v8487_v22 = vsel %vm7923_vm6, %v8397_v19, 0.0  ;;  %v8430_v11 = vadd.f32 %v8429_v31, %v8428_v51 }
 0xc7a   :  { %v8361_v29 = vmul.f32 %v15448_v42, %v8343_v54  ;;  %v8411_v42 = vrot.slane %v8410_v26, 4  ;;  %v8488_v39 = vrot.slane %v8487_v22, 4  ;;  %v8434_v54 = vrot.slane %v8433_v17, 2 }
 0xc7b   :  { %v8468_v32 = vadd.f32 %v8467_v0, %v8466_v53  ;;  %v8420_v28 = vrot.slane %v8419_v37, 2  ;;  %v8483_v56 = vrot.slane %v8482_v21, 2 }
 0xc7c   :  { %v8407_v7 = vsel %vm7874_vm12, %v8361_v29, 0.0  ;;  %v8400_v62 = vpop.xlane.xlu0 %8399  ;;  %v8412_v2 = vadd.f32 %v8411_v42, %v8410_v26  ;;  %v8489_v29 = vadd.f32 %v8488_v39, %v8487_v22  ;;  %v8435_v53 = vadd.f32 %v8434_v54, %v8433_v17 }
 0xc7d   :  { %8408 = vadd.xlane.f32.xlu0 %v8407_v7  ;;  %v8494_v33 = vsel %vm7923_vm6, %v8400_v62, 0.0  ;;  %v8469_v4 = vrot.slane %v8468_v32, 2  ;;  %v8421_v30 = vadd.f32 %v8420_v28, %v8419_v37  ;;  %v8484_v41 = vadd.f32 %v8483_v56, %v8482_v21 }
 0xc7e   :  { %v8413_v49 = vrot.slane %v8412_v2, 2  ;;  %v8495_v14 = vrot.slane %v8494_v33, 4  ;;  %vm8643_vm12 = vcmask 1045509  }
 0xc7f   :  { %v8470_v36 = vadd.f32 %v8469_v4, %v8468_v32 }
 0xc80   :  { %v8414_v10 = vadd.f32 %v8413_v49, %v8412_v2  ;;  %v8496_v44 = vadd.f32 %v8495_v14, %v8494_v33  ;;  %v8485_v33 = vrot.slane %v8484_v41, 1 }
 0xc81   :  { %v8471_v26 = vrot.slane %v8470_v36, 1 }
 0xc82   :  { %v8415_v23 = vrot.slane %v8414_v10, 1  ;;  %v8497_v62 = vrot.slane %v8496_v44, 2  ;;  %v8486_v20 = vadd.f32 %v8485_v33, %v8484_v41 }
 0xc83   :  { %v8472_v37 = vadd.f32 %v8471_v26, %v8470_v36 }
 0xc84   :  { %v8416_v13 = vadd.f32 %v8415_v23, %v8414_v10  ;;  %v8498_v46 = vadd.f32 %v8497_v62, %v8496_v44  ;;  %v8533_v23 = vadd.f32 %v15549_v34, %v8486_v20 }
 0xc85   :  { %v8531_v18 = vadd.f32 %v15549_v34, %v8472_v37 }
 0xc86   :  { %v8523_v49 = vadd.f32 %v15549_v34, %v8416_v13 }
 0xc88   :  { %10759 = vtanh.f32 %v8523_v49 }
 0xc8d   :  { %v8376_v61 = vpop.xlane.xlu1 %8375 }
 0xc8e   :  { %v8438_v27 = vsel %vm7923_vm6, %v8376_v61, 0.0  ;;  %v8422_v61 = vrot.slane %v8421_v30, 1 }
 0xc8f   :  { %v8439_v24 = vrot.slane %v8438_v27, 4 }
 0xc91   :  { %v8440_v9 = vadd.f32 %v8439_v24, %v8438_v27  ;;  %v8423_v27 = vadd.f32 %v8422_v61, %v8421_v30 }
 0xc93   :  { %v8441_v7 = vrot.slane %v8440_v9, 2  ;;  %v8524_v28 = vadd.f32 %v15549_v34, %v8423_v27 }
 0xc95   :  { %v8442_v42 = vadd.f32 %v8441_v7, %v8440_v9  ;;  %v8499_v9 = vrot.slane %v8498_v46, 1  ;;  %10761 = vtanh.f32 %v8524_v28 }
 0xc96   :  { %10763 = vtanh.f32 %v8531_v18 }
 0xc97   :  { %v8443_v32 = vrot.slane %v8442_v42, 1  ;;  %v8500_v54 = vadd.f32 %v8499_v9, %v8498_v46 }
 0xc99   :  { %v8444_v59 = vadd.f32 %v8443_v32, %v8442_v42  ;;  %v8535_v26 = vadd.f32 %v15549_v34, %v8500_v54 }
 0xc9b   :  { %v8527_v36 = vadd.f32 %v15549_v34, %v8444_v59 }
 0xca2   :  { %v8403_v52 = vpop.xlane.xlu0 %8402 }
 0xca3   :  { %v8501_v48 = vsel %vm7923_vm6, %v8403_v52, 0.0  ;;  %v8436_v52 = vrot.slane %v8435_v53, 1 }
 0xca4   :  { %v8502_v15 = vrot.slane %v8501_v48, 4 }
 0xca6   :  { %v8503_v38 = vadd.f32 %v8502_v15, %v8501_v48 }
 0xcbd   :  { %v8379_v57 = vpop.xlane.xlu1 %8378 }
 0xcbe   :  { %v8445_v50 = vsel %vm7923_vm6, %v8379_v57, 0.0  ;;  %v8490_v57 = vrot.slane %v8489_v29, 2 }
 0xcbf   :  { %v8446_v60 = vrot.slane %v8445_v50, 4 }
 0xcc1   :  { %v8447_v35 = vadd.f32 %v8446_v60, %v8445_v50  ;;  %v8491_v50 = vadd.f32 %v8490_v57, %v8489_v29 }
 0xcc3   :  { %v8448_v16 = vrot.slane %v8447_v35, 2  ;;  %v8492_v4 = vrot.slane %v8491_v50, 1 }
 0xcc5   :  { %v8449_v0 = vadd.f32 %v8448_v16, %v8447_v35  ;;  %v8525_v35 = vadd.f32 %v15549_v34, %v8430_v11  ;;  %v8493_v30 = vadd.f32 %v8492_v4, %v8491_v50 }
 0xcc7   :  { %v8450_v24 = vrot.slane %v8449_v0, 1 }
 0xcc9   :  { %v8451_v1 = vadd.f32 %v8450_v24, %v8449_v0 }
 0xccb   :  { %v8528_v29 = vadd.f32 %v15549_v34, %v8451_v1 }
 0xcd2   :  { %v8406_v5 = vpop.xlane.xlu0 %8405 }
 0xcd3   :  { %v8508_v8 = vsel %vm7923_vm6, %v8406_v5, 0.0  ;;  %v8437_v5 = vadd.f32 %v8436_v52, %v8435_v53 }
 0xcd4   :  { %v8509_v45 = vrot.slane %v8508_v8, 4 }
 0xcd5   :  { %v8526_v15 = vadd.f32 %v15549_v34, %v8437_v5 }
 0xcd6   :  { %v8510_v47 = vadd.f32 %v8509_v45, %v8508_v8 }
 0xcd8   :  { %v8511_v25 = vrot.slane %v8510_v47, 2 }
 0xcda   :  { %v8512_v17 = vadd.f32 %v8511_v25, %v8510_v47 }
 0xcdc   :  { %v8513_v21 = vrot.slane %v8512_v17, 1 }
 0xcde   :  { %v8514_v61 = vadd.f32 %v8513_v21, %v8512_v17 }
 0xce0   :  { %v8537_v62 = vadd.f32 %v15549_v34, %v8514_v61 }
 0xced   :  { %v8382_v63 = vpop.xlane.xlu1 %8381 }
 0xcee   :  { %v8452_v12 = vsel %vm7923_vm6, %v8382_v63, 0.0  ;;  %v8504_v63 = vrot.slane %v8503_v38, 2 }
 0xcef   :  { %v8453_v40 = vrot.slane %v8452_v12, 4 }
 0xcf0   :  { %v8505_v22 = vadd.f32 %v8504_v63, %v8503_v38 }
 0xcf1   :  { %v8454_v55 = vadd.f32 %v8453_v40, %v8452_v12  ;;  %v8479_v12 = vadd.f32 %v8478_v58, %v8477_v3  ;;  %v10760_v58 = vpop.eup %10759 }
 0xcf2   :  { %v8506_v8 = vrot.slane %v8505_v22, 1  ;;  %v10762_v0 = vpop.eup %10761  ;;  %v8574_v49 = vrot.slane %v10760_v58, %v13055_v6 }
 0xcf3   :  { %v8455_v19 = vrot.slane %v8454_v55, 2  ;;  %v8532_v39 = vadd.f32 %v15549_v34, %v8479_v12  ;;  %v10764_v63 = vpop.eup %10763  ;;  %v8578_v32 = vrot.slane %v10762_v0, %v13055_v6 }
 0xcf4   :  { %v8507_v3 = vadd.f32 %v8506_v8, %v8505_v22 }
 0xcf5   :  { %v8456_v2 = vadd.f32 %v8455_v19, %v8454_v55  ;;  %10765 = vtanh.f32 %v8532_v39  ;;  %v8534_v19 = vadd.f32 %v15549_v34, %v8493_v30  ;;  %v8636_v33 = vsel %vm8635_vm0, %v8578_v32, %v8574_v49 }
 0xcf6   :  { %10767 = vtanh.f32 %v8525_v35  ;;  %v8536_v57 = vadd.f32 %v15549_v34, %v8507_v3  ;;  %v8606_v39 = vrot.slane %v10764_v63, %v13055_v6 }
 0xcf7   :  { %v8457_v60 = vrot.slane %v8456_v2, 1  ;;  %10769 = vtanh.f32 %v8526_v15 }
 0xcf8   :  { %10771 = vtanh.f32 %v8527_v36 }
 0xcf9   :  { %v8458_v10 = vadd.f32 %v8457_v60, %v8456_v2  ;;  %10773 = vtanh.f32 %v8528_v29 }
 0xcfb   :  { %v8529_v44 = vadd.f32 %v15549_v34, %v8458_v10 }
 0xcfd   :  { %10775 = vtanh.f32 %v8529_v44 }
 0xcfe   :  { %10777 = vtanh.f32 %v8533_v23 }
 0xcff   :  { %10779 = vtanh.f32 %v8534_v19  ;;  %v10766_v2 = vpop.eup %10765 }
 0xd00   :  { %10781 = vtanh.f32 %v8535_v26  ;;  %v10768_v37 = vpop.eup %10767  ;;  %v8610_v59 = vrot.slane %v10766_v2, %v13055_v6 }
 0xd01   :  { %10783 = vtanh.f32 %v8536_v57  ;;  %v10770_v41 = vpop.eup %10769  ;;  %v8582_v12 = vrot.slane %v10768_v37, %v13055_v6 }
 0xd02   :  { %v10772_v50 = vpop.eup %10771  ;;  %v8586_v11 = vrot.slane %v10770_v41, %v13055_v6  ;;  %v8649_v36 = vsel %vm8635_vm0, %v8610_v59, %v8606_v39 }
 0xd03   :  { %v8385_v40 = vpop.xlane.xlu1 %8384  ;;  %v10774_v25 = vpop.eup %10773  ;;  %v8590_v60 = vrot.slane %v10772_v50, %v13055_v6 }
 0xd04   :  { %v8459_v48 = vsel %vm7923_vm6, %v8385_v40, 0.0  ;;  %v8594_v18 = vrot.slane %v10774_v25, %v13055_v6  ;;  %v8638_v40 = vsel %vm8637_vm7, %v8582_v12, %v8636_v33 }
 0xd05   :  { %v8460_v14 = vrot.slane %v8459_v48, 4  ;;  %v8640_v17 = vsel %vm8639_vm10, %v8586_v11, %v8638_v40 }
 0xd06   :  { %v8642_v1 = vsel %vm8641_vm11, %v8590_v60, %v8640_v17 }
 0xd07   :  { %v8461_v55 = vadd.f32 %v8460_v14, %v8459_v48  ;;  %v10776_v24 = vpop.eup %10775  ;;  %v8644_v8 = vsel %vm8643_vm12, %v8594_v18, %v8642_v1 }
 0xd08   :  { %v10778_v22 = vpop.eup %10777 }
 0xd09   :  { %v8462_v7 = vrot.slane %v8461_v55, 2  ;;  %v10780_v28 = vpop.eup %10779  ;;  %v8614_v9 = vrot.slane %v10778_v22, %v13055_v6 }
 0xd0a   :  { %v8409_v45 = vpop.xlane.xlu0 %8408  ;;  %v10782_v5 = vpop.eup %10781  ;;  %v8618_v10 = vrot.slane %v10780_v28, %v13055_v6 }
 0xd0b   :  { %v8515_v16 = vsel %vm7923_vm6, %v8409_v45, 0.0  ;;  %v8463_v51 = vadd.f32 %v8462_v7, %v8461_v55  ;;  %v10784_v4 = vpop.eup %10783  ;;  %v8622_v15 = vrot.slane %v10782_v5, %v13055_v6  ;;  %v8650_v54 = vsel %vm8637_vm7, %v8614_v9, %v8649_v36 }
 0xd0c   :  { %v8516_v38 = vrot.slane %v8515_v16, 4  ;;  %v8626_v30 = vrot.slane %v10784_v4, %v13055_v6  ;;  %v8651_v29 = vsel %vm8639_vm10, %v8618_v10, %v8650_v54 }
 0xd0d   :  { %v8464_v56 = vrot.slane %v8463_v51, 1  ;;  %v8652_v45 = vsel %vm8641_vm11, %v8622_v15, %v8651_v29 }
 0xd0e   :  { %v8517_v53 = vadd.f32 %v8516_v38, %v8515_v16  ;;  %v8653_v44 = vsel %vm8643_vm12, %v8626_v30, %v8652_v45 }
 0xd0f   :  { %v8465_v42 = vadd.f32 %v8464_v56, %v8463_v51  ;;  %v16009_v51 = vld [vmem:[#allocation60_spill] sm:$0xff] }
 0xd10   :  { %v8518_v47 = vrot.slane %v8517_v53, 2  ;;  %v8666_v38 = vadd.s32 4294967288, %v16009_v51  ;;  %v8664_v19 = vsub.s32 %v16009_v51, %v15993_v43 }
 0xd11   :  { %v8530_v13 = vadd.f32 %v15549_v34, %v8465_v42 }
 0xd12   :  { %v8519_v31 = vadd.f32 %v8518_v47, %v8517_v53  ;;  %v8669_v61 = vsub.s32 %v8666_v38, %v15993_v43 }
 0xd13   :  { %10785 = vtanh.f32 %v8530_v13 }
 0xd14   :  { %v8520_v27 = vrot.slane %v8519_v31, 1  ;;  %10787 = vtanh.f32 %v8537_v62 }
 0xd16   :  { %v8521_v52 = vadd.f32 %v8520_v27, %v8519_v31 }
 0xd18   :  { %v8538_v46 = vadd.f32 %v15549_v34, %v8521_v52  ;;  %v8598_v34 = vrot.slane %v10776_v24, %v13055_v6 }
 0xd1a   :  { %10789 = vtanh.f32 %v8538_v46  ;;  %v8646_v20 = vsel %vm8645_vm14, %v8598_v34, %v8644_v8 }
 0xd1d   :  { %v10786_v48 = vpop.eup %10785 }
 0xd1e   :  { %v10788_v14 = vpop.eup %10787  ;;  %v8602_v35 = vrot.slane %v10786_v48, %v13055_v6 }
 0xd1f   :  { %v8630_v21 = vrot.slane %v10788_v14, %v13055_v6 }
 0xd20   :  { %v8648_v55 = vsel %vm8647_vm13, %v8602_v35, %v8646_v20 }
 0xd21   :  { %8657 = vperm.xlu1 %10140, %v8648_v55   ;;  %v8654_v16 = vsel %vm8645_vm14, %v8630_v21, %v8653_v44 }
 0xd24   :  { %v10790_v7 = vpop.eup %10789 }
 0xd25   :  { %v8634_v3 = vrot.slane %v10790_v7, %v13055_v6 }
 0xd27   :  { %v8655_v23 = vsel %vm8647_vm13, %v8634_v3, %v8654_v16 }
 0xd28   :  { %8660 = vperm.xlu0 %10139, %v8655_v23  }
 0xda0   :  { %v8658_v26 = vpop.permute.xlu1 %8657 }
 0xda1   :  { %v8665_v53 = vrot.slane %v8658_v26, %v8664_v19 }
 0xda7   :  { %v8661_v56 = vpop.permute.xlu0 %8660 }
 0xda8   :  { %v8670_v6 = vrot.slane %v8661_v56, %v8669_v61 }
 0xdaa   :  { %v8672_v57 = vsel %vm8671_vm15, %v8670_v6, %v8665_v53 }
 0xdab   :  { %8675 = vst.msk [vmem:[#allocation3] sm:$0x1] %vm8674_vm1, %v8672_v57 }
 0xdac   :  { %10804 = shalt.err (!%p10801_p4)
}
 0xdad   :  { %s10805_s23 = scalar_lea.hbm %s15623_s10, 16 }
 0xdae   :  { %p10806_p5 = scmp.ne.s32.totalorder %s15623_s10, %s10805_s23  ;;  %p10809_p6 = scmp.lt.u32.totalorder %s10805_s23, %s15623_s10 }
 0xdb0   :  { %p10811_p7 = pnand %p10809_p6, %p10806_p5 }
 0xdb2   :  { %10814 = shalt.err (!%p10811_p7)
}
 0xdb3   :  { %8685 = dma.vmem_to_hbm [thread:$0]  %s8683_s5, 16, %s15623_s10, [#allocation4]  }
 0xdb4   :  { %10815 = dma.done.wait [#allocation4], 16  }
 0xdb5   :  { %10816 = vsyncadd [#allocation4], 4294967280 }
 0xdb6   :  { %8689 = vsyncpa [#allocation4], 1 }

</bundles_post_ra>
